<compile_context>
chip_gen: v7x
topology: tpu7x:2x2x1
jax: 0.10.0
libtpu: 0.0.40
codegen_flags: <defaults>
</compile_context>

<pallas_src>
import math

import jax
import jax.numpy as jnp
from jax import lax
from jax.experimental import pallas as pl
from jax.experimental.pallas import tpu as pltpu


# ---------------------------------------------------------------------------
# Kernel
# ---------------------------------------------------------------------------
def _pdp_init_embed_kernel(locs_ref, w_ref, out_ref):
    """locs_ref: (Bt, N, 2)   w_ref: (11, D)   out_ref: (Bt, N, D).

    w_ref rows: 0:2 = W_depot, 2:6 = W_pick (pickup x, pickup y, paired-delivery x,
    paired-delivery y), 6:8 = W_delivery, 8 = b_depot, 9 = b_pick, 10 = b_delivery.
    """
    n = locs_ref.shape[1]
    half = (n - 1) // 2
    f32 = jnp.float32

    # ---- per-node effective weight / bias tables (tiny: (N, D), rebuilt per grid step) ----
    node = lax.broadcasted_iota(jnp.int32, (n, 1), 0)            # node index on sublane axis
    m_dep = (node == 0).astype(f32)                              # (N, 1) segment one-hots
    m_pick = jnp.logical_and(node >= 1, node <= half).astype(f32)
    m_del = (node > half).astype(f32)

    wx = m_dep * w_ref[0:1, :] + m_pick * w_ref[2:3, :] + m_del * w_ref[6:7, :]    # (N, D)
    wy = m_dep * w_ref[1:2, :] + m_pick * w_ref[3:4, :] + m_del * w_ref[7:8, :]
    wpx = m_pick * w_ref[4:5, :]                                                   # (N, D)
    wpy = m_pick * w_ref[5:6, :]
    wb = m_dep * w_ref[8:9, :] + m_pick * w_ref[9:10, :] + m_del * w_ref[10:11, :]

    # ---- coordinates ----
    x = locs_ref[:, :, 0:1].astype(f32)                          # (Bt, N, 1) own coords
    y = locs_ref[:, :, 1:2].astype(f32)
    # Paired delivery coords aligned to pickup rows: paired[n] = locs[n + half] for
    # n in [1, half]; all other rows are multiplied by wpx/wpy == 0 so their value is
    # irrelevant.  This small concat over the 2-wide coords is the only node-axis shuffle.
    px = jnp.concatenate(
        [locs_ref[:, half:, 0:1], locs_ref[:, 1:1 + half, 0:1]], axis=1).astype(f32)
    py = jnp.concatenate(
        [locs_ref[:, half:, 1:2], locs_ref[:, 1:1 + half, 1:2]], axis=1).astype(f32)

    # ---- shape-uniform compute + ONE lane/sublane-aligned full-tile store ----
    out = x * wx + y * wy + px * wpx + py * wpy + wb             # (Bt, N, D) f32
    out_ref[...] = out.astype(out_ref.dtype)


# ---------------------------------------------------------------------------
# Tiling / VMEM accounting
# ---------------------------------------------------------------------------
_VMEM_SIZING_BUDGET = 22 << 20   # conservative sizing budget (< 32 MiB v7x scoped VMEM)
_MAX_OUT_TILE_BYTES = 8 << 20    # diminishing returns past ~8 MiB of raw output per step
_MIN_SPLIT_OUT_BYTES = 1 << 20   # only force >=2 grid steps if each still writes >= 1 MiB


def _per_batch_vmem_bytes(N, D):
    """Padded-VMEM footprint per batch element (f32), incl. intermediate headroom."""
    n_pad = ((N + 7) // 8) * 8
    d_pad = ((D + 127) // 128) * 128
    slab = n_pad * d_pad * 4          # padded (., N, D) slab
    thin = n_pad * 128 * 4            # padded (., N, <=2) coord slab (64x raw bytes)
    # double-buffered in + out blocks plus ~8 slab-sized slice/elementwise intermediates
    return 2 * (slab + thin) + 8 * slab


def _choose_batch_tile(B, N, D):
    per_batch = _per_batch_vmem_bytes(N, D)
    bt = max(1, min(B, _VMEM_SIZING_BUDGET // per_batch))
    raw_out = N * D * 4
    bt = min(bt, max(1, _MAX_OUT_TILE_BYTES // raw_out))
    # Keep >= 2 grid steps (keeps both v7x TensorCores busy) only when each step still
    # writes >= ~1 MiB; on single-TC chips an extra step costs only ~0.35 us.
    if bt >= B and B >= 2 and B * raw_out >= 2 * _MIN_SPLIT_OUT_BYTES:
        bt = -(-B // 2)
    return min(bt, B)


def _snap_to_divisor(B, bt):
    """Largest divisor of B in [bt//2, bt], preferring an even grid-step count.
    If none exists, return bt unchanged and let the caller zero-pad the batch."""
    bt = min(bt, B)
    divisors = [d for d in range(bt, max(bt // 2, 1) - 1, -1) if B % d == 0]
    if not divisors:
        return bt
    best = divisors[0]
    if B // best > 1 and (B // best) % 2 == 1:
        for d in divisors:
            if (B // d) % 2 == 0 and 4 * d >= 3 * best:   # don't shrink tile > 25% for evenness
                return d
    return best


# ---------------------------------------------------------------------------
# Wrapper
# ---------------------------------------------------------------------------
def pack_pdp_params(params):
    """Pack weights + biases into one resident (11, D) operand (hoist out of the hot path)."""
    D = params["w_depot"].shape[-1]
    return jnp.concatenate(
        [
            params["w_depot"],                       # rows 0:2
            params["w_pick"],                        # rows 2:6
            params["w_delivery"],                    # rows 6:8
            params["b_depot"].reshape(1, D),         # row 8
            params["b_pick"].reshape(1, D),          # row 9
            params["b_delivery"].reshape(1, D),      # row 10
        ],
        axis=0,
    )


def pdp_init_embedding(locs, params, *, batch_tile=None, out_dtype=None):
    """Pallas implementation of PDPInitEmbedding.forward.

    locs:   [B, N, 2] with node 0 = depot, then `half` pickups, then `half` deliveries.
    params: dict of w_depot (2,D), w_pick (4,D), w_delivery (2,D), b_* (D,), OR a
            pre-packed (11, D) array from pack_pdp_params.
    """
    B, N, coord_dim = locs.shape
    assert coord_dim == 2, "locs must carry (x, y) coordinates"
    assert N >= 3 and (N - 1) % 2 == 0, "PDP needs depot + an even number of pickup/delivery nodes"

    w_stack = pack_pdp_params(params) if isinstance(params, dict) else params
    D = w_stack.shape[-1]
    assert w_stack.shape == (11, D), w_stack.shape
    if out_dtype is None:
        out_dtype = locs.dtype       # keep exact module semantics by default

    if batch_tile is None:
        bt = _snap_to_divisor(B, _choose_batch_tile(B, N, D))
    else:
        bt = max(1, min(int(batch_tile), B))

    grid_b = -(-B // bt)
    b_pad = grid_b * bt
    locs_in = locs
    if b_pad != B:                   # ragged batch: zero-pad, slice the result afterwards
        locs_in = jnp.concatenate(
            [locs, jnp.zeros((b_pad - B, N, coord_dim), locs.dtype)], axis=0)

    vmem_limit = int(min(32 << 20,   # <= 32 MiB so the same tiling is safe on v7x
                         max(16 << 20,
                             2 * bt * _per_batch_vmem_bytes(N, D) + (1 << 20))))

    out = pl.pallas_call(
        _pdp_init_embed_kernel,
        out_shape=jax.ShapeDtypeStruct((b_pad, N, D), out_dtype),
        grid_spec=pl.GridSpec(
            grid=(grid_b,),
            in_specs=[
                pl.BlockSpec((bt, N, coord_dim), lambda i: (i, 0, 0)),   # locs batch tile
                pl.BlockSpec((11, D), lambda i: (0, 0)),                 # resident weight stack
            ],
            out_specs=pl.BlockSpec((bt, N, D), lambda i: (i, 0, 0)),
        ),
        compiler_params=pltpu.CompilerParams(
            dimension_semantics=("parallel",),
            vmem_limit_bytes=vmem_limit,
        ),
    )(locs_in, w_stack)

    return out[:B] if b_pad != B else out


# ---------------------------------------------------------------------------
# Reference + demo
# ---------------------------------------------------------------------------
def _init_linear_params(key, in_features, out_features):
    # deterministic torch-nn.Linear-style init: U(-1/sqrt(in), 1/sqrt(in))
    kw, kb = jax.random.split(key)
    bound = 1.0 / math.sqrt(in_features)
    w = jax.random.uniform(kw, (in_features, out_features), jnp.float32,
                           minval=-bound, maxval=bound)
    b = jax.random.uniform(kb, (out_features,), jnp.float32, minval=-bound, maxval=bound)
    return w, b


def _reference(locs, params):
    # pure-JAX mirror of the torch forward (HIGHEST precision so f32 matmuls are exact-ish)
    hi = lax.Precision.HIGHEST
    depot = locs[:, 0:1, :]
    rest = locs[:, 1:, :]
    half = rest.shape[1] // 2
    pick_feats = jnp.concatenate([rest[:, :half, :], rest[:, half:, :]], axis=-1)
    deliv_feats = rest[:, half:, :]
    dep_e = jnp.matmul(depot, params["w_depot"], precision=hi) + params["b_depot"]
    pick_e = jnp.matmul(pick_feats, params["w_pick"], precision=hi) + params["b_pick"]
    del_e = jnp.matmul(deliv_feats, params["w_delivery"], precision=hi) + params["b_delivery"]
    return jnp.concatenate([dep_e, pick_e, del_e], axis=-2)


if __name__ == "__main__":
    key = jax.random.PRNGKey(0)
    k_locs, k_dep, k_pick, k_del = jax.random.split(key, 4)

    B = 64
    num_pairs = 10
    N = 1 + 2 * num_pairs      # 1 depot + 10 pickups + 10 deliveries = 21 nodes
    embed_dim = 128            # lane-dense output (multiple of 128)

    locs = jax.random.uniform(k_locs, (B, N, 2), jnp.float32)

    w_dep, b_dep = _init_linear_params(k_dep, 2, embed_dim)
    w_pick, b_pick = _init_linear_params(k_pick, 4, embed_dim)
    w_del, b_del = _init_linear_params(k_del, 2, embed_dim)
    params = {
        "w_depot": w_dep, "b_depot": b_dep,
        "w_pick": w_pick, "b_pick": b_pick,
        "w_delivery": w_del, "b_delivery": b_del,
    }

    ref = _reference(locs, params)
    w_stack = pack_pdp_params(params)            # hoisted packing (reused across calls)

    # 1) default tiling (whole batch fits one step at this small demo size)
    out = jax.block_until_ready(pdp_init_embedding(locs, w_stack))
    assert out.shape == (B, N, embed_dim), out.shape
    assert jnp.allclose(out, ref, atol=1e-5, rtol=1e-5), "mismatch vs reference (default tiling)"

    # 2) multi-step grid (exercises the pipelined batch-tile loop)
    out2 = jax.block_until_ready(pdp_init_embedding(locs, w_stack, batch_tile=16))
    assert jnp.allclose(out2, ref, atol=1e-5, rtol=1e-5), "mismatch vs reference (batch_tile=16)"

    # 3) ragged batch tile (exercises the zero-pad + slice remainder path, dict params)
    out3 = jax.block_until_ready(pdp_init_embedding(locs, params, batch_tile=24))
    assert jnp.allclose(out3, ref, atol=1e-5, rtol=1e-5), "mismatch vs reference (batch_tile=24)"

    print("KERNEL_OK")
</pallas_src>

<mosaic_0001>
module attributes {stable_mosaic.version = 11 : i64} {
  func.func @_pdp_init_embed_kernel(%arg0: i32, %arg1: memref<64x21x2xf32, #tpu.memory_space<vmem>>, %arg2: memref<11x128xf32, #tpu.memory_space<vmem>>, %arg3: memref<64x21x128xf32, #tpu.memory_space<vmem>>) attributes {dimension_semantics = [#tpu.dimension_semantics<parallel>], iteration_bounds = array<i64: 1>, scalar_prefetch = 0 : i64, scratch_operands = 0 : i64, tpu.core_type = #tpu.core_type<tc>, window_params = [{transform_indices = @transform_0, window_bounds = array<i64: 64, 21, 2>}, {pipeline_mode = #tpu.pipeline_mode<synchronous>, transform_indices = @transform_1, window_bounds = array<i64: 11, 128>}, {transform_indices = @transform_2, window_bounds = array<i64: 64, 21, 128>}]} {
    %0 = tpu.iota {dimensions = array<i32: 0>} : vector<21x1xi32>
    %c0_i32 = arith.constant 0 : i32
    %1 = vector.broadcast %c0_i32 : i32 to vector<21x1xi32>
    %2 = arith.cmpi eq, %0, %1 : vector<21x1xi32>
    %3 = arith.extui %2 : vector<21x1xi1> to vector<21x1xi32>
    %4 = arith.sitofp %3 : vector<21x1xi32> to vector<21x1xf32>
    %c1_i32 = arith.constant 1 : i32
    %5 = vector.broadcast %c1_i32 : i32 to vector<21x1xi32>
    %6 = arith.cmpi sge, %0, %5 : vector<21x1xi32>
    %c10_i32 = arith.constant 10 : i32
    %7 = vector.broadcast %c10_i32 : i32 to vector<21x1xi32>
    %8 = arith.cmpi sle, %0, %7 : vector<21x1xi32>
    %9 = arith.andi %6, %8 : vector<21x1xi1>
    %10 = arith.extui %9 : vector<21x1xi1> to vector<21x1xi32>
    %11 = arith.sitofp %10 : vector<21x1xi32> to vector<21x1xf32>
    %c10_i32_0 = arith.constant 10 : i32
    %12 = vector.broadcast %c10_i32_0 : i32 to vector<21x1xi32>
    %13 = arith.cmpi sgt, %0, %12 : vector<21x1xi32>
    %14 = arith.extui %13 : vector<21x1xi1> to vector<21x1xi32>
    %15 = arith.sitofp %14 : vector<21x1xi32> to vector<21x1xf32>
    %c0 = arith.constant 0 : index
    %c0_1 = arith.constant 0 : index
    %16 = vector.load %arg2[%c0, %c0_1] : memref<11x128xf32, #tpu.memory_space<vmem>>, vector<1x128xf32>
    %17 = vector.broadcast %4 : vector<21x1xf32> to vector<21x128xf32>
    %18 = vector.broadcast %16 : vector<1x128xf32> to vector<21x128xf32>
    %19 = arith.mulf %17, %18 : vector<21x128xf32>
    %c2 = arith.constant 2 : index
    %c0_2 = arith.constant 0 : index
    %20 = vector.load %arg2[%c2, %c0_2] : memref<11x128xf32, #tpu.memory_space<vmem>>, vector<1x128xf32>
    %21 = vector.broadcast %11 : vector<21x1xf32> to vector<21x128xf32>
    %22 = vector.broadcast %20 : vector<1x128xf32> to vector<21x128xf32>
    %23 = arith.mulf %21, %22 : vector<21x128xf32>
    %24 = arith.addf %19, %23 : vector<21x128xf32>
    %c6 = arith.constant 6 : index
    %c0_3 = arith.constant 0 : index
    %25 = vector.load %arg2[%c6, %c0_3] : memref<11x128xf32, #tpu.memory_space<vmem>>, vector<1x128xf32>
    %26 = vector.broadcast %15 : vector<21x1xf32> to vector<21x128xf32>
    %27 = vector.broadcast %25 : vector<1x128xf32> to vector<21x128xf32>
    %28 = arith.mulf %26, %27 : vector<21x128xf32>
    %29 = arith.addf %24, %28 : vector<21x128xf32>
    %c1 = arith.constant 1 : index
    %c0_4 = arith.constant 0 : index
    %30 = vector.load %arg2[%c1, %c0_4] : memref<11x128xf32, #tpu.memory_space<vmem>>, vector<1x128xf32>
    %31 = vector.broadcast %4 : vector<21x1xf32> to vector<21x128xf32>
    %32 = vector.broadcast %30 : vector<1x128xf32> to vector<21x128xf32>
    %33 = arith.mulf %31, %32 : vector<21x128xf32>
    %c3 = arith.constant 3 : index
    %c0_5 = arith.constant 0 : index
    %34 = vector.load %arg2[%c3, %c0_5] : memref<11x128xf32, #tpu.memory_space<vmem>>, vector<1x128xf32>
    %35 = vector.broadcast %11 : vector<21x1xf32> to vector<21x128xf32>
    %36 = vector.broadcast %34 : vector<1x128xf32> to vector<21x128xf32>
    %37 = arith.mulf %35, %36 : vector<21x128xf32>
    %38 = arith.addf %33, %37 : vector<21x128xf32>
    %c7 = arith.constant 7 : index
    %c0_6 = arith.constant 0 : index
    %39 = vector.load %arg2[%c7, %c0_6] : memref<11x128xf32, #tpu.memory_space<vmem>>, vector<1x128xf32>
    %40 = vector.broadcast %15 : vector<21x1xf32> to vector<21x128xf32>
    %41 = vector.broadcast %39 : vector<1x128xf32> to vector<21x128xf32>
    %42 = arith.mulf %40, %41 : vector<21x128xf32>
    %43 = arith.addf %38, %42 : vector<21x128xf32>
    %c4 = arith.constant 4 : index
    %c0_7 = arith.constant 0 : index
    %44 = vector.load %arg2[%c4, %c0_7] : memref<11x128xf32, #tpu.memory_space<vmem>>, vector<1x128xf32>
    %45 = vector.broadcast %11 : vector<21x1xf32> to vector<21x128xf32>
    %46 = vector.broadcast %44 : vector<1x128xf32> to vector<21x128xf32>
    %47 = arith.mulf %45, %46 : vector<21x128xf32>
    %c5 = arith.constant 5 : index
    %c0_8 = arith.constant 0 : index
    %48 = vector.load %arg2[%c5, %c0_8] : memref<11x128xf32, #tpu.memory_space<vmem>>, vector<1x128xf32>
    %49 = vector.broadcast %11 : vector<21x1xf32> to vector<21x128xf32>
    %50 = vector.broadcast %48 : vector<1x128xf32> to vector<21x128xf32>
    %51 = arith.mulf %49, %50 : vector<21x128xf32>
    %c8 = arith.constant 8 : index
    %c0_9 = arith.constant 0 : index
    %52 = vector.load %arg2[%c8, %c0_9] : memref<11x128xf32, #tpu.memory_space<vmem>>, vector<1x128xf32>
    %53 = vector.broadcast %4 : vector<21x1xf32> to vector<21x128xf32>
    %54 = vector.broadcast %52 : vector<1x128xf32> to vector<21x128xf32>
    %55 = arith.mulf %53, %54 : vector<21x128xf32>
    %c9 = arith.constant 9 : index
    %c0_10 = arith.constant 0 : index
    %56 = vector.load %arg2[%c9, %c0_10] : memref<11x128xf32, #tpu.memory_space<vmem>>, vector<1x128xf32>
    %57 = vector.broadcast %11 : vector<21x1xf32> to vector<21x128xf32>
    %58 = vector.broadcast %56 : vector<1x128xf32> to vector<21x128xf32>
    %59 = arith.mulf %57, %58 : vector<21x128xf32>
    %60 = arith.addf %55, %59 : vector<21x128xf32>
    %c10 = arith.constant 10 : index
    %c0_11 = arith.constant 0 : index
    %61 = vector.load %arg2[%c10, %c0_11] : memref<11x128xf32, #tpu.memory_space<vmem>>, vector<1x128xf32>
    %62 = vector.broadcast %15 : vector<21x1xf32> to vector<21x128xf32>
    %63 = vector.broadcast %61 : vector<1x128xf32> to vector<21x128xf32>
    %64 = arith.mulf %62, %63 : vector<21x128xf32>
    %65 = arith.addf %60, %64 : vector<21x128xf32>
    %c0_12 = arith.constant 0 : index
    %c0_13 = arith.constant 0 : index
    %c0_14 = arith.constant 0 : index
    %66 = vector.load %arg1[%c0_12, %c0_13, %c0_14] : memref<64x21x2xf32, #tpu.memory_space<vmem>>, vector<64x21x1xf32>
    %c0_15 = arith.constant 0 : index
    %c0_16 = arith.constant 0 : index
    %c1_17 = arith.constant 1 : index
    %67 = vector.load %arg1[%c0_15, %c0_16, %c1_17] : memref<64x21x2xf32, #tpu.memory_space<vmem>>, vector<64x21x1xf32>
    %c0_18 = arith.constant 0 : index
    %c10_19 = arith.constant 10 : index
    %c0_20 = arith.constant 0 : index
    %68 = vector.load %arg1[%c0_18, %c10_19, %c0_20] : memref<64x21x2xf32, #tpu.memory_space<vmem>>, vector<64x11x1xf32>
    %c0_21 = arith.constant 0 : index
    %c1_22 = arith.constant 1 : index
    %c0_23 = arith.constant 0 : index
    %69 = vector.load %arg1[%c0_21, %c1_22, %c0_23] : memref<64x21x2xf32, #tpu.memory_space<vmem>>, vector<64x10x1xf32>
    %70 = tpu.concatenate %68, %69 in 1 : vector<64x11x1xf32>, vector<64x10x1xf32> -> vector<64x21x1xf32>
    %c0_24 = arith.constant 0 : index
    %c10_25 = arith.constant 10 : index
    %c1_26 = arith.constant 1 : index
    %71 = vector.load %arg1[%c0_24, %c10_25, %c1_26] : memref<64x21x2xf32, #tpu.memory_space<vmem>>, vector<64x11x1xf32>
    %c0_27 = arith.constant 0 : index
    %c1_28 = arith.constant 1 : index
    %c1_29 = arith.constant 1 : index
    %72 = vector.load %arg1[%c0_27, %c1_28, %c1_29] : memref<64x21x2xf32, #tpu.memory_space<vmem>>, vector<64x10x1xf32>
    %73 = tpu.concatenate %71, %72 in 1 : vector<64x11x1xf32>, vector<64x10x1xf32> -> vector<64x21x1xf32>
    %74 = vector.shape_cast %29 : vector<21x128xf32> to vector<1x21x128xf32>
    %75 = vector.broadcast %66 : vector<64x21x1xf32> to vector<64x21x128xf32>
    %76 = vector.broadcast %74 : vector<1x21x128xf32> to vector<64x21x128xf32>
    %77 = arith.mulf %75, %76 : vector<64x21x128xf32>
    %78 = vector.shape_cast %43 : vector<21x128xf32> to vector<1x21x128xf32>
    %79 = vector.broadcast %67 : vector<64x21x1xf32> to vector<64x21x128xf32>
    %80 = vector.broadcast %78 : vector<1x21x128xf32> to vector<64x21x128xf32>
    %81 = arith.mulf %79, %80 : vector<64x21x128xf32>
    %82 = arith.addf %77, %81 : vector<64x21x128xf32>
    %83 = vector.shape_cast %47 : vector<21x128xf32> to vector<1x21x128xf32>
    %84 = vector.broadcast %70 : vector<64x21x1xf32> to vector<64x21x128xf32>
    %85 = vector.broadcast %83 : vector<1x21x128xf32> to vector<64x21x128xf32>
    %86 = arith.mulf %84, %85 : vector<64x21x128xf32>
    %87 = arith.addf %82, %86 : vector<64x21x128xf32>
    %88 = vector.shape_cast %51 : vector<21x128xf32> to vector<1x21x128xf32>
    %89 = vector.broadcast %73 : vector<64x21x1xf32> to vector<64x21x128xf32>
    %90 = vector.broadcast %88 : vector<1x21x128xf32> to vector<64x21x128xf32>
    %91 = arith.mulf %89, %90 : vector<64x21x128xf32>
    %92 = arith.addf %87, %91 : vector<64x21x128xf32>
    %93 = vector.shape_cast %65 : vector<21x128xf32> to vector<1x21x128xf32>
    %94 = vector.broadcast %93 : vector<1x21x128xf32> to vector<64x21x128xf32>
    %95 = arith.addf %92, %94 : vector<64x21x128xf32>
    %c0_30 = arith.constant 0 : index
    %c0_31 = arith.constant 0 : index
    %c0_32 = arith.constant 0 : index
    %96 = vector.load %arg3[%c0_30, %c0_31, %c0_32] : memref<64x21x128xf32, #tpu.memory_space<vmem>>, vector<64x21x128xf32>
    tpu.vector_store %arg3[%c0_30, %c0_31, %c0_32], %95 {strides = array<i32>} : memref<64x21x128xf32, #tpu.memory_space<vmem>>, vector<64x21x128xf32>,
    return
  }
  func.func @transform_0(%arg0: i32) -> (i32, i32, i32) {
    %c0_i32 = arith.constant 0 : i32
    %c0_i32_0 = arith.constant 0 : i32
    %c0_i32_1 = arith.constant 0 : i32
    return %arg0, %c0_i32, %c0_i32_0 : i32, i32, i32
  }
  func.func @transform_1(%arg0: i32) -> (i32, i32) {
    %c0_i32 = arith.constant 0 : i32
    %c0_i32_0 = arith.constant 0 : i32
    %c0_i32_1 = arith.constant 0 : i32
    return %c0_i32, %c0_i32_0 : i32, i32
  }
  func.func @transform_2(%arg0: i32) -> (i32, i32, i32) {
    %c0_i32 = arith.constant 0 : i32
    %c0_i32_0 = arith.constant 0 : i32
    %c0_i32_1 = arith.constant 0 : i32
    return %arg0, %c0_i32, %c0_i32_0 : i32, i32, i32
  }
}

</mosaic_0001>

<bundles_post_ra>
// kernel: tpu_custom_call.1
= control target key start
LH: loop header
LB: loop body
LE: loop exit
PB: predicated region body
PF: predicated region fallthrough
CT: control target
= control target key end

     0   :  { %v13033_v0 = vmov 0   ;;  %vm730_vm0 = vcmask 1042432   ;;  %s13030_s0 = inlined_call_operand.vmem [shape: f32[64,21,2], index: 0, kind: input, shape index: {}]   ;;  %s13031_s1 = inlined_call_operand.vmem [shape: f32[11,128], index: 1, kind: input, shape index: {}]   ;;  %s13032_s2 = inlined_call_operand.vmem [shape: f32[64,21,128], index: 2, kind: output, shape index: {}]  }
   0x1   :  { %6194 = vset.pattern.permute.xlu1 %v13033_v0  ;;  %6193 = vset.pattern.permute.xlu0 %v13033_v0  ;;  %v156_v1 = vld [vmem:[%s13030_s0 + $0x10] sm:$0x1f]  ;;  %v154_v2 = vld [vmem:[%s13030_s0] sm:$0xff]  ;;  %v157_v3 = vld [vmem:[%s13030_s0 + $0x18] sm:$0xff] }
   0x2   :  { %1063 = vperm.xlu1 %6194, %v156_v1   ;;  %1053 = vperm.xlu0 %6193, %v154_v2   ;;  %v155_v4 = vld [vmem:[%s13030_s0 + $0x8] sm:$0xff]  ;;  %v158_v6 = vld [vmem:[%s13030_s0 + $0x20] sm:$0xff]  ;;  %v161_v7 = vld [vmem:[%s13030_s0 + $0x38] sm:$0xff] }
   0x3   :  { %v159_v5 = vld [vmem:[%s13030_s0 + $0x28] sm:$0x1f]  ;;  %v160_v8 = vld [vmem:[%s13030_s0 + $0x30] sm:$0xff]  ;;  %v162_v10 = vld [vmem:[%s13030_s0 + $0x40] sm:$0x1f] }
   0x4   :  { %v163_v9 = vld [vmem:[%s13030_s0 + $0x48] sm:$0xff]  ;;  %v165_v11 = vld [vmem:[%s13030_s0 + $0x58] sm:$0x1f]  ;;  %v164_v12 = vld [vmem:[%s13030_s0 + $0x50] sm:$0xff] }
   0x5   :  { %v167_v13 = vld [vmem:[%s13030_s0 + $0x68] sm:$0xff]  ;;  %v166_v14 = vld [vmem:[%s13030_s0 + $0x60] sm:$0xff]  ;;  %v169_v15 = vld [vmem:[%s13030_s0 + $0x78] sm:$0xff] }
   0x6   :  { %1068 = vperm.xlu1 %6194, %v157_v3   ;;  %1058 = vperm.xlu0 %6193, %v155_v4   ;;  %v168_v16 = vld [vmem:[%s13030_s0 + $0x70] sm:$0x1f]  ;;  %v171_v17 = vld [vmem:[%s13030_s0 + $0x88] sm:$0x1f]  ;;  %v170_v18 = vld [vmem:[%s13030_s0 + $0x80] sm:$0xff] }
   0x7   :  { %v173_v19 = vld [vmem:[%s13030_s0 + $0x98] sm:$0xff]  ;;  %v172_v20 = vld [vmem:[%s13030_s0 + $0x90] sm:$0xff]  ;;  %v175_v21 = vld [vmem:[%s13030_s0 + $0xa8] sm:$0xff] }
   0x8   :  { %v174_v22 = vld [vmem:[%s13030_s0 + $0xa0] sm:$0x1f]  ;;  %v177_v23 = vld [vmem:[%s13030_s0 + $0xb8] sm:$0x1f]  ;;  %v176_v24 = vld [vmem:[%s13030_s0 + $0xb0] sm:$0xff] }
   0x9   :  { %v179_v25 = vld [vmem:[%s13030_s0 + $0xc8] sm:$0xff]  ;;  %v178_v26 = vld [vmem:[%s13030_s0 + $0xc0] sm:$0xff]  ;;  %v181_v27 = vld [vmem:[%s13030_s0 + $0xd8] sm:$0xff] }
   0xa   :  { %1078 = vperm.xlu1 %6194, %v159_v5   ;;  %1073 = vperm.xlu0 %6193, %v158_v6   ;;  %v180_v28 = vld [vmem:[%s13030_s0 + $0xd0] sm:$0x1f]  ;;  %v183_v29 = vld [vmem:[%s13030_s0 + $0xe8] sm:$0x1f]  ;;  %v182_v30 = vld [vmem:[%s13030_s0 + $0xe0] sm:$0xff] }
   0xb   :  { %v185_v31 = vld [vmem:[%s13030_s0 + $0xf8] sm:$0xff]  ;;  %v184_v32 = vld [vmem:[%s13030_s0 + $0xf0] sm:$0xff]  ;;  %v187_v33 = vld [vmem:[%s13030_s0 + $0x108] sm:$0xff] }
   0xc   :  { %v186_v34 = vld [vmem:[%s13030_s0 + $0x100] sm:$0x1f]  ;;  %v189_v35 = vld [vmem:[%s13030_s0 + $0x118] sm:$0x1f]  ;;  %v188_v36 = vld [vmem:[%s13030_s0 + $0x110] sm:$0xff] }
   0xd   :  { %v191_v37 = vld [vmem:[%s13030_s0 + $0x128] sm:$0xff]  ;;  %v190_v38 = vld [vmem:[%s13030_s0 + $0x120] sm:$0xff]  ;;  %v193_v39 = vld [vmem:[%s13030_s0 + $0x138] sm:$0xff] }
   0xe   :  { %1088 = vperm.xlu1 %6194, %v161_v7   ;;  %1083 = vperm.xlu0 %6193, %v160_v8   ;;  %v192_v40 = vld [vmem:[%s13030_s0 + $0x130] sm:$0x1f]  ;;  %v195_v41 = vld [vmem:[%s13030_s0 + $0x148] sm:$0x1f]  ;;  %v194_v42 = vld [vmem:[%s13030_s0 + $0x140] sm:$0xff] }
   0xf   :  { %v197_v43 = vld [vmem:[%s13030_s0 + $0x158] sm:$0xff]  ;;  %v196_v44 = vld [vmem:[%s13030_s0 + $0x150] sm:$0xff]  ;;  %v199_v45 = vld [vmem:[%s13030_s0 + $0x168] sm:$0xff] }
  0x10   :  { %v198_v46 = vld [vmem:[%s13030_s0 + $0x160] sm:$0x1f]  ;;  %v201_v47 = vld [vmem:[%s13030_s0 + $0x178] sm:$0x1f]  ;;  %v200_v48 = vld [vmem:[%s13030_s0 + $0x170] sm:$0xff] }
  0x11   :  { %v203_v49 = vld [vmem:[%s13030_s0 + $0x188] sm:$0xff]  ;;  %v202_v50 = vld [vmem:[%s13030_s0 + $0x180] sm:$0xff]  ;;  %v205_v51 = vld [vmem:[%s13030_s0 + $0x198] sm:$0xff] }
  0x12   :  { %1098 = vperm.xlu1 %6194, %v163_v9   ;;  %1093 = vperm.xlu0 %6193, %v162_v10   ;;  %v204_v52 = vld [vmem:[%s13030_s0 + $0x190] sm:$0x1f]  ;;  %v207_v53 = vld [vmem:[%s13030_s0 + $0x1a8] sm:$0x1f]  ;;  %v206_v54 = vld [vmem:[%s13030_s0 + $0x1a0] sm:$0xff] }
  0x13   :  { %v209_v55 = vld [vmem:[%s13030_s0 + $0x1b8] sm:$0xff]  ;;  %v208_v56 = vld [vmem:[%s13030_s0 + $0x1b0] sm:$0xff]  ;;  %v211_v57 = vld [vmem:[%s13030_s0 + $0x1c8] sm:$0xff] }
  0x14   :  { %v210_v58 = vld [vmem:[%s13030_s0 + $0x1c0] sm:$0x1f]  ;;  %v213_v59 = vld [vmem:[%s13030_s0 + $0x1d8] sm:$0x1f]  ;;  %v212_v60 = vld [vmem:[%s13030_s0 + $0x1d0] sm:$0xff] }
  0x15   :  { %v215_v61 = vld [vmem:[%s13030_s0 + $0x1e8] sm:$0xff]  ;;  %v214_v62 = vld [vmem:[%s13030_s0 + $0x1e0] sm:$0xff]  ;;  %v217_v63 = vld [vmem:[%s13030_s0 + $0x1f8] sm:$0xff] }
  0x16   :  { %1108 = vperm.xlu1 %6194, %v165_v11   ;;  %1103 = vperm.xlu0 %6193, %v164_v12   ;;  %v216_v1 = vld [vmem:[%s13030_s0 + $0x1f0] sm:$0x1f]  ;;  %v219_v2 = vld [vmem:[%s13030_s0 + $0x208] sm:$0x1f]  ;;  %v218_v3 = vld [vmem:[%s13030_s0 + $0x200] sm:$0xff] }
  0x17   :  { %v221_v6 = vld [vmem:[%s13030_s0 + $0x218] sm:$0xff]  ;;  %v220_v7 = vld [vmem:[%s13030_s0 + $0x210] sm:$0xff]  ;;  %v223_v10 = vld [vmem:[%s13030_s0 + $0x228] sm:$0xff] }
  0x18   :  { %v222_v11 = vld [vmem:[%s13030_s0 + $0x220] sm:$0x1f] }
  0x1a   :  { %1118 = vperm.xlu1 %6194, %v167_v13   ;;  %1113 = vperm.xlu0 %6193, %v166_v14   ;;  %v225_v14 = vld [vmem:[%s13030_s0 + $0x238] sm:$0x1f] }
  0x1e   :  { %1128 = vperm.xlu1 %6194, %v169_v15   ;;  %1123 = vperm.xlu0 %6193, %v168_v16   ;;  %v224_v15 = vld [vmem:[%s13030_s0 + $0x230] sm:$0xff] }
  0x22   :  { %1138 = vperm.xlu1 %6194, %v171_v17   ;;  %1133 = vperm.xlu0 %6193, %v170_v18   ;;  %v227_v18 = vld [vmem:[%s13030_s0 + $0x248] sm:$0xff] }
  0x26   :  { %1148 = vperm.xlu1 %6194, %v173_v19   ;;  %1143 = vperm.xlu0 %6193, %v172_v20   ;;  %v226_v19 = vld [vmem:[%s13030_s0 + $0x240] sm:$0xff] }
  0x2a   :  { %1158 = vperm.xlu1 %6194, %v175_v21   ;;  %1153 = vperm.xlu0 %6193, %v174_v22   ;;  %v229_v22 = vld [vmem:[%s13030_s0 + $0x258] sm:$0xff] }
  0x2e   :  { %1168 = vperm.xlu1 %6194, %v177_v23   ;;  %1163 = vperm.xlu0 %6193, %v176_v24   ;;  %v228_v23 = vld [vmem:[%s13030_s0 + $0x250] sm:$0x1f] }
  0x32   :  { %1178 = vperm.xlu1 %6194, %v179_v25   ;;  %1173 = vperm.xlu0 %6193, %v178_v26   ;;  %v231_v26 = vld [vmem:[%s13030_s0 + $0x268] sm:$0x1f] }
  0x36   :  { %1188 = vperm.xlu1 %6194, %v181_v27   ;;  %1183 = vperm.xlu0 %6193, %v180_v28   ;;  %v230_v27 = vld [vmem:[%s13030_s0 + $0x260] sm:$0xff] }
  0x3a   :  { %1198 = vperm.xlu1 %6194, %v183_v29   ;;  %1193 = vperm.xlu0 %6193, %v182_v30   ;;  %v233_v30 = vld [vmem:[%s13030_s0 + $0x278] sm:$0xff] }
  0x3e   :  { %1208 = vperm.xlu1 %6194, %v185_v31   ;;  %1203 = vperm.xlu0 %6193, %v184_v32   ;;  %v232_v31 = vld [vmem:[%s13030_s0 + $0x270] sm:$0xff] }
  0x42   :  { %1218 = vperm.xlu1 %6194, %v187_v33   ;;  %1213 = vperm.xlu0 %6193, %v186_v34   ;;  %v235_v34 = vld [vmem:[%s13030_s0 + $0x288] sm:$0xff] }
  0x46   :  { %1228 = vperm.xlu1 %6194, %v189_v35   ;;  %1223 = vperm.xlu0 %6193, %v188_v36   ;;  %v234_v35 = vld [vmem:[%s13030_s0 + $0x280] sm:$0x1f] }
  0x4a   :  { %1238 = vperm.xlu1 %6194, %v191_v37   ;;  %1233 = vperm.xlu0 %6193, %v190_v38   ;;  %v237_v38 = vld [vmem:[%s13030_s0 + $0x298] sm:$0x1f] }
  0x4e   :  { %1248 = vperm.xlu1 %6194, %v193_v39   ;;  %1243 = vperm.xlu0 %6193, %v192_v40   ;;  %v236_v39 = vld [vmem:[%s13030_s0 + $0x290] sm:$0xff] }
  0x52   :  { %1258 = vperm.xlu1 %6194, %v195_v41   ;;  %1253 = vperm.xlu0 %6193, %v194_v42   ;;  %v239_v42 = vld [vmem:[%s13030_s0 + $0x2a8] sm:$0xff] }
  0x56   :  { %1268 = vperm.xlu1 %6194, %v197_v43   ;;  %1263 = vperm.xlu0 %6193, %v196_v44   ;;  %v238_v43 = vld [vmem:[%s13030_s0 + $0x2a0] sm:$0xff] }
  0x5a   :  { %1278 = vperm.xlu1 %6194, %v199_v45   ;;  %1273 = vperm.xlu0 %6193, %v198_v46   ;;  %v241_v46 = vld [vmem:[%s13030_s0 + $0x2b8] sm:$0xff] }
  0x5e   :  { %1288 = vperm.xlu1 %6194, %v201_v47   ;;  %1283 = vperm.xlu0 %6193, %v200_v48   ;;  %v240_v47 = vld [vmem:[%s13030_s0 + $0x2b0] sm:$0x1f] }
  0x62   :  { %1298 = vperm.xlu1 %6194, %v203_v49   ;;  %1293 = vperm.xlu0 %6193, %v202_v50   ;;  %v243_v50 = vld [vmem:[%s13030_s0 + $0x2c8] sm:$0x1f] }
  0x66   :  { %1308 = vperm.xlu1 %6194, %v205_v51   ;;  %1303 = vperm.xlu0 %6193, %v204_v52   ;;  %v242_v51 = vld [vmem:[%s13030_s0 + $0x2c0] sm:$0xff] }
  0x6a   :  { %1318 = vperm.xlu1 %6194, %v207_v53   ;;  %1313 = vperm.xlu0 %6193, %v206_v54   ;;  %v245_v54 = vld [vmem:[%s13030_s0 + $0x2d8] sm:$0xff] }
  0x6e   :  { %1328 = vperm.xlu1 %6194, %v209_v55   ;;  %1323 = vperm.xlu0 %6193, %v208_v56   ;;  %v244_v55 = vld [vmem:[%s13030_s0 + $0x2d0] sm:$0xff] }
  0x72   :  { %1338 = vperm.xlu1 %6194, %v211_v57   ;;  %1333 = vperm.xlu0 %6193, %v210_v58   ;;  %v247_v58 = vld [vmem:[%s13030_s0 + $0x2e8] sm:$0xff] }
  0x76   :  { %1348 = vperm.xlu1 %6194, %v213_v59   ;;  %1343 = vperm.xlu0 %6193, %v212_v60   ;;  %v246_v59 = vld [vmem:[%s13030_s0 + $0x2e0] sm:$0x1f] }
  0x7a   :  { %1358 = vperm.xlu1 %6194, %v215_v61   ;;  %1353 = vperm.xlu0 %6193, %v214_v62   ;;  %v249_v62 = vld [vmem:[%s13030_s0 + $0x2f8] sm:$0x1f] }
  0x7e   :  { %1368 = vperm.xlu1 %6194, %v217_v63   ;;  %1363 = vperm.xlu0 %6193, %v216_v1   ;;  %v248_v63 = vld [vmem:[%s13030_s0 + $0x2f0] sm:$0xff] }
  0x81   :  { %v6673_v4 = vpop.permute.xlu1 %1063  ;;  %v6675_v5 = vpop.permute.xlu0 %1053 }
  0x82   :  { %13216 = vst [vmem:[#allocation2_spill] sm:$0xff] %v6673_v4  ;;  %13217 = vst [vmem:[#allocation3_spill] sm:$0xff] %v6675_v5  ;;  %1378 = vperm.xlu1 %6194, %v219_v2   ;;  %1373 = vperm.xlu0 %6193, %v218_v3   ;;  %v251_v3 = vld [vmem:[%s13030_s0 + $0x308] sm:$0xff]  ;;  %v417_v5 = vld [vmem:[%s13030_s0 + $0x35a] sm:$0x7] }
  0x83   :  { %v405_v4 = vld [vmem:[%s13030_s0 + $0x2ca] sm:$0x7] }
  0x85   :  { %v6683_v8 = vpop.permute.xlu1 %1068  ;;  %v6685_v9 = vpop.permute.xlu0 %1058 }
  0x86   :  { %13218 = vst [vmem:[#allocation4_spill] sm:$0xff] %v6683_v8  ;;  %13219 = vst [vmem:[#allocation5_spill] sm:$0xff] %v6685_v9  ;;  %1388 = vperm.xlu1 %6194, %v221_v6   ;;  %1383 = vperm.xlu0 %6193, %v220_v7   ;;  %v250_v6 = vld [vmem:[%s13030_s0 + $0x300] sm:$0xff]  ;;  %v409_v9 = vld [vmem:[%s13030_s0 + $0x2fa] sm:$0x7] }
  0x87   :  { %v413_v8 = vld [vmem:[%s13030_s0 + $0x32a] sm:$0x7] }
  0x89   :  { %v6693_v12 = vpop.permute.xlu1 %1078  ;;  %v6695_v13 = vpop.permute.xlu0 %1073 }
  0x8a   :  { %13220 = vst [vmem:[#allocation6_spill] sm:$0xff] %v6693_v12  ;;  %13221 = vst [vmem:[#allocation7_spill] sm:$0xff] %v6695_v13  ;;  %1398 = vperm.xlu1 %6194, %v223_v10   ;;  %1393 = vperm.xlu0 %6193, %v222_v11   ;;  %v253_v11 = vld [vmem:[%s13030_s0 + $0x318] sm:$0xff] }
  0x8d   :  { %v6703_v16 = vpop.permute.xlu1 %1088  ;;  %v6705_v17 = vpop.permute.xlu0 %1083 }
  0x8e   :  { %13222 = vst [vmem:[#allocation8_spill] sm:$0xff] %v6703_v16  ;;  %13223 = vst [vmem:[#allocation9_spill] sm:$0xff] %v6705_v17  ;;  %1408 = vperm.xlu1 %6194, %v225_v14   ;;  %1403 = vperm.xlu0 %6193, %v224_v15   ;;  %v252_v14 = vld [vmem:[%s13030_s0 + $0x310] sm:$0x1f]  ;;  %v401_v16 = vld [vmem:[%s13030_s0 + $0x29a] sm:$0x7] }
  0x91   :  { %v6713_v20 = vpop.permute.xlu1 %1098  ;;  %v6715_v21 = vpop.permute.xlu0 %1093 }
  0x92   :  { %13224 = vst [vmem:[#allocation10_spill] sm:$0xff] %v6713_v20  ;;  %13225 = vst [vmem:[#allocation11_spill] sm:$0xff] %v6715_v21  ;;  %1418 = vperm.xlu1 %6194, %v227_v18   ;;  %1413 = vperm.xlu0 %6193, %v226_v19   ;;  %v255_v19 = vld [vmem:[%s13030_s0 + $0x328] sm:$0x1f] }
  0x95   :  { %v6723_v24 = vpop.permute.xlu1 %1108  ;;  %v6725_v25 = vpop.permute.xlu0 %1103 }
  0x96   :  { %13226 = vst [vmem:[#allocation12_spill] sm:$0xff] %v6723_v24  ;;  %13227 = vst [vmem:[#allocation13_spill] sm:$0xff] %v6725_v25  ;;  %1428 = vperm.xlu1 %6194, %v229_v22   ;;  %1423 = vperm.xlu0 %6193, %v228_v23   ;;  %v254_v22 = vld [vmem:[%s13030_s0 + $0x320] sm:$0xff]  ;;  %v393_v24 = vld [vmem:[%s13030_s0 + $0x23a] sm:$0x7] }
  0x99   :  { %v6733_v28 = vpop.permute.xlu1 %1118  ;;  %v6735_v29 = vpop.permute.xlu0 %1113 }
  0x9a   :  { %13228 = vst [vmem:[#allocation14_spill] sm:$0xff] %v6733_v28  ;;  %13229 = vst [vmem:[#allocation15_spill] sm:$0xff] %v6735_v29  ;;  %1438 = vperm.xlu1 %6194, %v231_v26   ;;  %1433 = vperm.xlu0 %6193, %v230_v27   ;;  %v257_v27 = vld [vmem:[%s13030_s0 + $0x338] sm:$0xff] }
  0x9d   :  { %v6743_v32 = vpop.permute.xlu1 %1128  ;;  %v6745_v33 = vpop.permute.xlu0 %1123 }
  0x9e   :  { %13230 = vst [vmem:[#allocation16_spill] sm:$0xff] %v6743_v32  ;;  %13231 = vst [vmem:[#allocation17_spill] sm:$0xff] %v6745_v33  ;;  %1448 = vperm.xlu1 %6194, %v233_v30   ;;  %1443 = vperm.xlu0 %6193, %v232_v31   ;;  %v256_v30 = vld [vmem:[%s13030_s0 + $0x330] sm:$0xff]  ;;  %v389_v32 = vld [vmem:[%s13030_s0 + $0x20a] sm:$0x7] }
  0xa1   :  { %v6753_v36 = vpop.permute.xlu1 %1138  ;;  %v6755_v37 = vpop.permute.xlu0 %1133 }
  0xa2   :  { %13232 = vst [vmem:[#allocation18_spill] sm:$0xff] %v6753_v36  ;;  %13233 = vst [vmem:[#allocation19_spill] sm:$0xff] %v6755_v37  ;;  %1458 = vperm.xlu1 %6194, %v235_v34   ;;  %1453 = vperm.xlu0 %6193, %v234_v35   ;;  %v259_v35 = vld [vmem:[%s13030_s0 + $0x348] sm:$0xff] }
  0xa5   :  { %v6763_v40 = vpop.permute.xlu1 %1148  ;;  %v6765_v41 = vpop.permute.xlu0 %1143 }
  0xa6   :  { %13234 = vst [vmem:[#allocation20_spill] sm:$0xff] %v6763_v40  ;;  %13235 = vst [vmem:[#allocation21_spill] sm:$0xff] %v6765_v41  ;;  %1468 = vperm.xlu1 %6194, %v237_v38   ;;  %1463 = vperm.xlu0 %6193, %v236_v39   ;;  %v258_v38 = vld [vmem:[%s13030_s0 + $0x340] sm:$0x1f]  ;;  %v385_v40 = vld [vmem:[%s13030_s0 + $0x1da] sm:$0x7] }
  0xa9   :  { %v6773_v44 = vpop.permute.xlu1 %1158  ;;  %v6775_v45 = vpop.permute.xlu0 %1153 }
  0xaa   :  { %13236 = vst [vmem:[#allocation22_spill] sm:$0xff] %v6773_v44  ;;  %13237 = vst [vmem:[#allocation23_spill] sm:$0xff] %v6775_v45  ;;  %1478 = vperm.xlu1 %6194, %v239_v42   ;;  %1473 = vperm.xlu0 %6193, %v238_v43   ;;  %v261_v43 = vld [vmem:[%s13030_s0 + $0x358] sm:$0x1f] }
  0xad   :  { %v6783_v48 = vpop.permute.xlu1 %1168  ;;  %v6785_v49 = vpop.permute.xlu0 %1163 }
  0xae   :  { %13238 = vst [vmem:[#allocation24_spill] sm:$0xff] %v6783_v48  ;;  %13239 = vst [vmem:[#allocation25_spill] sm:$0xff] %v6785_v49  ;;  %1488 = vperm.xlu1 %6194, %v241_v46   ;;  %1483 = vperm.xlu0 %6193, %v240_v47   ;;  %v260_v46 = vld [vmem:[%s13030_s0 + $0x350] sm:$0xff]  ;;  %v381_v48 = vld [vmem:[%s13030_s0 + $0x1aa] sm:$0x7] }
  0xb1   :  { %v6793_v52 = vpop.permute.xlu1 %1178  ;;  %v6795_v53 = vpop.permute.xlu0 %1173 }
  0xb2   :  { %13240 = vst [vmem:[#allocation26_spill] sm:$0xff] %v6793_v52  ;;  %13241 = vst [vmem:[#allocation27_spill] sm:$0xff] %v6795_v53  ;;  %1498 = vperm.xlu1 %6194, %v243_v50   ;;  %1493 = vperm.xlu0 %6193, %v242_v51   ;;  %v263_v51 = vld [vmem:[%s13030_s0 + $0x368] sm:$0xff] }
  0xb5   :  { %v6803_v56 = vpop.permute.xlu1 %1188  ;;  %v6805_v57 = vpop.permute.xlu0 %1183 }
  0xb6   :  { %13242 = vst [vmem:[#allocation28_spill] sm:$0xff] %v6803_v56  ;;  %13243 = vst [vmem:[#allocation29_spill] sm:$0xff] %v6805_v57  ;;  %1508 = vperm.xlu1 %6194, %v245_v54   ;;  %1503 = vperm.xlu0 %6193, %v244_v55   ;;  %v262_v54 = vld [vmem:[%s13030_s0 + $0x360] sm:$0xff]  ;;  %v377_v56 = vld [vmem:[%s13030_s0 + $0x17a] sm:$0x7] }
  0xb9   :  { %v6813_v60 = vpop.permute.xlu1 %1198  ;;  %v6815_v61 = vpop.permute.xlu0 %1193 }
  0xba   :  { %13244 = vst [vmem:[#allocation30_spill] sm:$0xff] %v6813_v60  ;;  %13245 = vst [vmem:[#allocation31_spill] sm:$0xff] %v6815_v61  ;;  %1518 = vperm.xlu1 %6194, %v247_v58   ;;  %1513 = vperm.xlu0 %6193, %v246_v59   ;;  %v265_v59 = vld [vmem:[%s13030_s0 + $0x378] sm:$0xff] }
  0xbd   :  { %v6823_v1 = vpop.permute.xlu1 %1208  ;;  %v6825_v2 = vpop.permute.xlu0 %1203 }
  0xbe   :  { %13246 = vst [vmem:[#allocation32_spill] sm:$0xff] %v6823_v1  ;;  %13247 = vst [vmem:[#allocation33_spill] sm:$0xff] %v6825_v2  ;;  %1528 = vperm.xlu1 %6194, %v249_v62   ;;  %1523 = vperm.xlu0 %6193, %v248_v63   ;;  %v264_v62 = vld [vmem:[%s13030_s0 + $0x370] sm:$0x1f]  ;;  %v373_v1 = vld [vmem:[%s13030_s0 + $0x14a] sm:$0x7] }
  0xc1   :  { %v6833_v7 = vpop.permute.xlu1 %1218  ;;  %v6835_v10 = vpop.permute.xlu0 %1213 }
  0xc2   :  { %13248 = vst [vmem:[#allocation34_spill] sm:$0xff] %v6833_v7  ;;  %13249 = vst [vmem:[#allocation35_spill] sm:$0xff] %v6835_v10  ;;  %1538 = vperm.xlu1 %6194, %v251_v3   ;;  %1533 = vperm.xlu0 %6193, %v250_v6   ;;  %v267_v6 = vld [vmem:[%s13030_s0 + $0x388] sm:$0x1f] }
  0xc5   :  { %v6843_v15 = vpop.permute.xlu1 %1228  ;;  %v6845_v18 = vpop.permute.xlu0 %1223 }
  0xc6   :  { %13250 = vst [vmem:[#allocation36_spill] sm:$0xff] %v6843_v15  ;;  %13251 = vst [vmem:[#allocation37_spill] sm:$0xff] %v6845_v18  ;;  %1548 = vperm.xlu1 %6194, %v253_v11   ;;  %1543 = vperm.xlu0 %6193, %v252_v14   ;;  %v266_v11 = vld [vmem:[%s13030_s0 + $0x380] sm:$0xff]  ;;  %v369_v15 = vld [vmem:[%s13030_s0 + $0x11a] sm:$0x7] }
  0xc9   :  { %v6853_v23 = vpop.permute.xlu1 %1238  ;;  %v6855_v26 = vpop.permute.xlu0 %1233 }
  0xca   :  { %13252 = vst [vmem:[#allocation38_spill] sm:$0xff] %v6853_v23  ;;  %13253 = vst [vmem:[#allocation39_spill] sm:$0xff] %v6855_v26  ;;  %1558 = vperm.xlu1 %6194, %v255_v19   ;;  %1553 = vperm.xlu0 %6193, %v254_v22   ;;  %v269_v22 = vld [vmem:[%s13030_s0 + $0x398] sm:$0xff] }
  0xcd   :  { %v6863_v31 = vpop.permute.xlu1 %1248  ;;  %v6865_v34 = vpop.permute.xlu0 %1243 }
  0xce   :  { %13254 = vst [vmem:[#allocation40_spill] sm:$0xff] %v6863_v31  ;;  %13255 = vst [vmem:[#allocation41_spill] sm:$0xff] %v6865_v34  ;;  %1568 = vperm.xlu1 %6194, %v257_v27   ;;  %1563 = vperm.xlu0 %6193, %v256_v30   ;;  %v268_v27 = vld [vmem:[%s13030_s0 + $0x390] sm:$0xff]  ;;  %v365_v31 = vld [vmem:[%s13030_s0 + $0xea] sm:$0x7] }
  0xd1   :  { %v6873_v39 = vpop.permute.xlu1 %1258  ;;  %v6875_v42 = vpop.permute.xlu0 %1253 }
  0xd2   :  { %13256 = vst [vmem:[#allocation42_spill] sm:$0xff] %v6873_v39  ;;  %13257 = vst [vmem:[#allocation43_spill] sm:$0xff] %v6875_v42  ;;  %1578 = vperm.xlu1 %6194, %v259_v35   ;;  %1573 = vperm.xlu0 %6193, %v258_v38   ;;  %v271_v38 = vld [vmem:[%s13030_s0 + $0x3a8] sm:$0xff] }
  0xd5   :  { %v6883_v47 = vpop.permute.xlu1 %1268  ;;  %v6885_v50 = vpop.permute.xlu0 %1263 }
  0xd6   :  { %13258 = vst [vmem:[#allocation44_spill] sm:$0xff] %v6883_v47  ;;  %13259 = vst [vmem:[#allocation45_spill] sm:$0xff] %v6885_v50  ;;  %1588 = vperm.xlu1 %6194, %v261_v43   ;;  %1583 = vperm.xlu0 %6193, %v260_v46   ;;  %v270_v43 = vld [vmem:[%s13030_s0 + $0x3a0] sm:$0x1f]  ;;  %v361_v47 = vld [vmem:[%s13030_s0 + $0xba] sm:$0x7] }
  0xd9   :  { %v6893_v55 = vpop.permute.xlu1 %1278  ;;  %v6895_v58 = vpop.permute.xlu0 %1273 }
  0xda   :  { %13260 = vst [vmem:[#allocation46_spill] sm:$0xff] %v6893_v55  ;;  %13261 = vst [vmem:[#allocation47_spill] sm:$0xff] %v6895_v58  ;;  %1598 = vperm.xlu1 %6194, %v263_v51   ;;  %1593 = vperm.xlu0 %6193, %v262_v54   ;;  %v273_v54 = vld [vmem:[%s13030_s0 + $0x3b8] sm:$0x1f] }
  0xdd   :  { %v6903_v63 = vpop.permute.xlu1 %1288  ;;  %v6905_v3 = vpop.permute.xlu0 %1283 }
  0xde   :  { %13262 = vst [vmem:[#allocation48_spill] sm:$0xff] %v6903_v63  ;;  %13263 = vst [vmem:[#allocation49_spill] sm:$0xff] %v6905_v3  ;;  %1608 = vperm.xlu1 %6194, %v265_v59   ;;  %1603 = vperm.xlu0 %6193, %v264_v62   ;;  %v272_v59 = vld [vmem:[%s13030_s0 + $0x3b0] sm:$0xff]  ;;  %v357_v63 = vld [vmem:[%s13030_s0 + $0x8a] sm:$0x7] }
  0xe1   :  { %v6913_v14 = vpop.permute.xlu1 %1298  ;;  %v6915_v19 = vpop.permute.xlu0 %1293 }
  0xe2   :  { %13264 = vst [vmem:[#allocation50_spill] sm:$0xff] %v6913_v14  ;;  %13265 = vst [vmem:[#allocation51_spill] sm:$0xff] %v6915_v19  ;;  %1618 = vperm.xlu1 %6194, %v267_v6   ;;  %1613 = vperm.xlu0 %6193, %v266_v11   ;;  %v275_v11 = vld [vmem:[%s13030_s0 + $0x3c8] sm:$0xff] }
  0xe5   :  { %v6923_v30 = vpop.permute.xlu1 %1308  ;;  %v6925_v35 = vpop.permute.xlu0 %1303 }
  0xe6   :  { %13266 = vst [vmem:[#allocation52_spill] sm:$0xff] %v6923_v30  ;;  %13267 = vst [vmem:[#allocation53_spill] sm:$0xff] %v6925_v35  ;;  %1628 = vperm.xlu1 %6194, %v269_v22   ;;  %1623 = vperm.xlu0 %6193, %v268_v27   ;;  %v274_v22 = vld [vmem:[%s13030_s0 + $0x3c0] sm:$0xff]  ;;  %v353_v30 = vld [vmem:[%s13030_s0 + $0x5a] sm:$0x7] }
  0xe9   :  { %v6933_v46 = vpop.permute.xlu1 %1318  ;;  %v6935_v51 = vpop.permute.xlu0 %1313 }
  0xea   :  { %13268 = vst [vmem:[#allocation54_spill] sm:$0xff] %v6933_v46  ;;  %13269 = vst [vmem:[#allocation55_spill] sm:$0xff] %v6935_v51  ;;  %1638 = vperm.xlu1 %6194, %v271_v38   ;;  %1633 = vperm.xlu0 %6193, %v270_v43   ;;  %v277_v43 = vld [vmem:[%s13030_s0 + $0x3d8] sm:$0xff] }
  0xed   :  { %v6943_v62 = vpop.permute.xlu1 %1328  ;;  %v6945_v6 = vpop.permute.xlu0 %1323 }
  0xee   :  { %13270 = vst [vmem:[#allocation56_spill] sm:$0xff] %v6943_v62  ;;  %13271 = vst [vmem:[#allocation57_spill] sm:$0xff] %v6945_v6  ;;  %1648 = vperm.xlu1 %6194, %v273_v54   ;;  %1643 = vperm.xlu0 %6193, %v272_v59   ;;  %v276_v54 = vld [vmem:[%s13030_s0 + $0x3d0] sm:$0x1f]  ;;  %v349_v62 = vld [vmem:[%s13030_s0 + $0x2a] sm:$0x7] }
  0xf1   :  { %v6953_v27 = vpop.permute.xlu1 %1338  ;;  %v6955_v38 = vpop.permute.xlu0 %1333 }
  0xf2   :  { %13272 = vst [vmem:[#allocation58_spill] sm:$0xff] %v6953_v27  ;;  %13273 = vst [vmem:[#allocation59_spill] sm:$0xff] %v6955_v38  ;;  %1658 = vperm.xlu1 %6194, %v275_v11   ;;  %1653 = vperm.xlu0 %6193, %v274_v22   ;;  %v279_v38 = vld [vmem:[%s13030_s0 + $0x3e8] sm:$0x1f]  ;;  %v278_v11 = vld [vmem:[%s13030_s0 + $0x3e0] sm:$0xff] }
  0xf3   :  { %v347_v27 = vld [vmem:[%s13030_s0 + $0x12] sm:$0x7] }
  0xf5   :  { %v6963_v59 = vpop.permute.xlu1 %1348  ;;  %v6965_v0 = vpop.permute.xlu0 %1343 }
  0xf6   :  { %13274 = vst [vmem:[#allocation60_spill] sm:$0xff] %v6963_v59  ;;  %13275 = vst [vmem:[#allocation61_spill] sm:$0xff] %v6965_v0  ;;  %1668 = vperm.xlu1 %6194, %v277_v43   ;;  %1663 = vperm.xlu0 %6193, %v276_v54   ;;  %v281_v0 = vld [vmem:[%s13030_s0 + $0x3f8] sm:$0xff]  ;;  %v280_v43 = vld [vmem:[%s13030_s0 + $0x3f0] sm:$0xff] }
  0xf9   :  { %v6973_v22 = vpop.permute.xlu1 %1358  ;;  %v6975_v6 = vpop.permute.xlu0 %1353 }
  0xfa   :  { %13276 = vst [vmem:[#allocation62_spill] sm:$0xff] %v6973_v22  ;;  %13277 = vst [vmem:[#allocation63_spill] sm:$0xff] %v6975_v6  ;;  %1678 = vperm.xlu1 %6194, %v279_v38   ;;  %1673 = vperm.xlu0 %6193, %v278_v11   ;;  %v283_v6 = vld [vmem:[%s13030_s0 + $0x408] sm:$0xff]  ;;  %v282_v38 = vld [vmem:[%s13030_s0 + $0x400] sm:$0x1f] }
  0xfd   :  { %v6983_v54 = vpop.permute.xlu1 %1368  ;;  %v6985_v59 = vpop.permute.xlu0 %1363 }
  0xfe   :  { %13278 = vst [vmem:[#allocation64_spill] sm:$0xff] %v6983_v54  ;;  %13279 = vst [vmem:[#allocation65_spill] sm:$0xff] %v6985_v59  ;;  %1688 = vperm.xlu1 %6194, %v281_v0   ;;  %1683 = vperm.xlu0 %6193, %v280_v43   ;;  %v285_v59 = vld [vmem:[%s13030_s0 + $0x418] sm:$0x1f]  ;;  %v284_v0 = vld [vmem:[%s13030_s0 + $0x410] sm:$0xff] }
 0x101   :  { %v6993_v11 = vpop.permute.xlu1 %1378  ;;  %v6995_v22 = vpop.permute.xlu0 %1373 }
 0x102   :  { %13280 = vst [vmem:[#allocation66_spill] sm:$0xff] %v6993_v11  ;;  %13281 = vst [vmem:[#allocation67_spill] sm:$0xff] %v6995_v22  ;;  %1698 = vperm.xlu1 %6194, %v283_v6   ;;  %1693 = vperm.xlu0 %6193, %v282_v38   ;;  %v287_v22 = vld [vmem:[%s13030_s0 + $0x428] sm:$0xff]  ;;  %v286_v6 = vld [vmem:[%s13030_s0 + $0x420] sm:$0xff] }
 0x105   :  { %v7003_v43 = vpop.permute.xlu1 %1388  ;;  %v7005_v54 = vpop.permute.xlu0 %1383 }
 0x106   :  { %13282 = vst [vmem:[#allocation68_spill] sm:$0xff] %v7003_v43  ;;  %13283 = vst [vmem:[#allocation69_spill] sm:$0xff] %v7005_v54  ;;  %1708 = vperm.xlu1 %6194, %v285_v59   ;;  %1703 = vperm.xlu0 %6193, %v284_v0   ;;  %v289_v54 = vld [vmem:[%s13030_s0 + $0x438] sm:$0xff]  ;;  %v288_v59 = vld [vmem:[%s13030_s0 + $0x430] sm:$0x1f] }
 0x109   :  { %v7013_v38 = vpop.permute.xlu1 %1398  ;;  %v7015_v11 = vpop.permute.xlu0 %1393 }
 0x10a   :  { %13284 = vst [vmem:[#allocation70_spill] sm:$0xff] %v7013_v38  ;;  %13285 = vst [vmem:[#allocation71_spill] sm:$0xff] %v7015_v11  ;;  %1718 = vperm.xlu1 %6194, %v287_v22   ;;  %1713 = vperm.xlu0 %6193, %v286_v6   ;;  %v291_v11 = vld [vmem:[%s13030_s0 + $0x448] sm:$0x1f]  ;;  %v290_v22 = vld [vmem:[%s13030_s0 + $0x440] sm:$0xff] }
 0x10d   :  { %v7023_v0 = vpop.permute.xlu1 %1408  ;;  %v7025_v43 = vpop.permute.xlu0 %1403 }
 0x10e   :  { %13286 = vst [vmem:[#allocation72_spill] sm:$0xff] %v7023_v0  ;;  %13287 = vst [vmem:[#allocation73_spill] sm:$0xff] %v7025_v43  ;;  %1728 = vperm.xlu1 %6194, %v289_v54   ;;  %1723 = vperm.xlu0 %6193, %v288_v59   ;;  %v293_v43 = vld [vmem:[%s13030_s0 + $0x458] sm:$0xff]  ;;  %v292_v54 = vld [vmem:[%s13030_s0 + $0x450] sm:$0xff] }
 0x111   :  { %v7033_v6 = vpop.permute.xlu1 %1418  ;;  %v7035_v38 = vpop.permute.xlu0 %1413 }
 0x112   :  { %13288 = vst [vmem:[#allocation74_spill] sm:$0xff] %v7033_v6  ;;  %13289 = vst [vmem:[#allocation75_spill] sm:$0xff] %v7035_v38  ;;  %1738 = vperm.xlu1 %6194, %v291_v11   ;;  %1733 = vperm.xlu0 %6193, %v290_v22   ;;  %v295_v38 = vld [vmem:[%s13030_s0 + $0x468] sm:$0xff]  ;;  %v294_v11 = vld [vmem:[%s13030_s0 + $0x460] sm:$0x1f] }
 0x115   :  { %v7043_v59 = vpop.permute.xlu1 %1428  ;;  %v7045_v0 = vpop.permute.xlu0 %1423 }
 0x116   :  { %13290 = vst [vmem:[#allocation76_spill] sm:$0xff] %v7043_v59  ;;  %13291 = vst [vmem:[#allocation77_spill] sm:$0xff] %v7045_v0  ;;  %1748 = vperm.xlu1 %6194, %v293_v43   ;;  %1743 = vperm.xlu0 %6193, %v292_v54   ;;  %v297_v0 = vld [vmem:[%s13030_s0 + $0x478] sm:$0x1f]  ;;  %v296_v43 = vld [vmem:[%s13030_s0 + $0x470] sm:$0xff] }
 0x119   :  { %v7053_v22 = vpop.permute.xlu1 %1438  ;;  %v7055_v6 = vpop.permute.xlu0 %1433 }
 0x11a   :  { %13292 = vst [vmem:[#allocation78_spill] sm:$0xff] %v7053_v22  ;;  %13293 = vst [vmem:[#allocation79_spill] sm:$0xff] %v7055_v6  ;;  %1758 = vperm.xlu1 %6194, %v295_v38   ;;  %1753 = vperm.xlu0 %6193, %v294_v11   ;;  %v299_v6 = vld [vmem:[%s13030_s0 + $0x488] sm:$0xff]  ;;  %v298_v38 = vld [vmem:[%s13030_s0 + $0x480] sm:$0xff] }
 0x11d   :  { %v7063_v54 = vpop.permute.xlu1 %1448  ;;  %v7065_v59 = vpop.permute.xlu0 %1443 }
 0x11e   :  { %13294 = vst [vmem:[#allocation80_spill] sm:$0xff] %v7063_v54  ;;  %13295 = vst [vmem:[#allocation81_spill] sm:$0xff] %v7065_v59  ;;  %1768 = vperm.xlu1 %6194, %v297_v0   ;;  %1763 = vperm.xlu0 %6193, %v296_v43   ;;  %v301_v59 = vld [vmem:[%s13030_s0 + $0x498] sm:$0xff]  ;;  %v300_v0 = vld [vmem:[%s13030_s0 + $0x490] sm:$0x1f] }
 0x121   :  { %v7073_v11 = vpop.permute.xlu1 %1458  ;;  %v7075_v22 = vpop.permute.xlu0 %1453 }
 0x122   :  { %13296 = vst [vmem:[#allocation82_spill] sm:$0xff] %v7073_v11  ;;  %13297 = vst [vmem:[#allocation83_spill] sm:$0xff] %v7075_v22  ;;  %1778 = vperm.xlu1 %6194, %v299_v6   ;;  %1773 = vperm.xlu0 %6193, %v298_v38   ;;  %v303_v22 = vld [vmem:[%s13030_s0 + $0x4a8] sm:$0x1f]  ;;  %v302_v6 = vld [vmem:[%s13030_s0 + $0x4a0] sm:$0xff] }
 0x125   :  { %v7083_v43 = vpop.permute.xlu1 %1468  ;;  %v7085_v54 = vpop.permute.xlu0 %1463 }
 0x126   :  { %13298 = vst [vmem:[#allocation84_spill] sm:$0xff] %v7083_v43  ;;  %13299 = vst [vmem:[#allocation85_spill] sm:$0xff] %v7085_v54  ;;  %1788 = vperm.xlu1 %6194, %v301_v59   ;;  %1783 = vperm.xlu0 %6193, %v300_v0   ;;  %v305_v54 = vld [vmem:[%s13030_s0 + $0x4b8] sm:$0xff]  ;;  %v304_v59 = vld [vmem:[%s13030_s0 + $0x4b0] sm:$0xff] }
 0x129   :  { %v7093_v38 = vpop.permute.xlu1 %1478  ;;  %v7095_v11 = vpop.permute.xlu0 %1473 }
 0x12a   :  { %13300 = vst [vmem:[#allocation86_spill] sm:$0xff] %v7093_v38  ;;  %13301 = vst [vmem:[#allocation87_spill] sm:$0xff] %v7095_v11  ;;  %1798 = vperm.xlu1 %6194, %v303_v22   ;;  %1793 = vperm.xlu0 %6193, %v302_v6   ;;  %v307_v11 = vld [vmem:[%s13030_s0 + $0x4c8] sm:$0xff]  ;;  %v306_v22 = vld [vmem:[%s13030_s0 + $0x4c0] sm:$0x1f] }
 0x12d   :  { %v7103_v0 = vpop.permute.xlu1 %1488  ;;  %v7105_v43 = vpop.permute.xlu0 %1483 }
 0x12e   :  { %13302 = vst [vmem:[#allocation88_spill] sm:$0xff] %v7103_v0  ;;  %13303 = vst [vmem:[#allocation89_spill] sm:$0xff] %v7105_v43  ;;  %1808 = vperm.xlu1 %6194, %v305_v54   ;;  %1803 = vperm.xlu0 %6193, %v304_v59   ;;  %v309_v43 = vld [vmem:[%s13030_s0 + $0x4d8] sm:$0x1f]  ;;  %v308_v54 = vld [vmem:[%s13030_s0 + $0x4d0] sm:$0xff] }
 0x131   :  { %v7113_v6 = vpop.permute.xlu1 %1498  ;;  %v7115_v38 = vpop.permute.xlu0 %1493 }
 0x132   :  { %13304 = vst [vmem:[#allocation90_spill] sm:$0xff] %v7113_v6  ;;  %13305 = vst [vmem:[#allocation91_spill] sm:$0xff] %v7115_v38  ;;  %1818 = vperm.xlu1 %6194, %v307_v11   ;;  %1813 = vperm.xlu0 %6193, %v306_v22   ;;  %v311_v38 = vld [vmem:[%s13030_s0 + $0x4e8] sm:$0xff]  ;;  %v310_v11 = vld [vmem:[%s13030_s0 + $0x4e0] sm:$0xff] }
 0x135   :  { %v7123_v59 = vpop.permute.xlu1 %1508  ;;  %v7125_v0 = vpop.permute.xlu0 %1503 }
 0x136   :  { %13306 = vst [vmem:[#allocation92_spill] sm:$0xff] %v7123_v59  ;;  %13307 = vst [vmem:[#allocation93_spill] sm:$0xff] %v7125_v0  ;;  %1828 = vperm.xlu1 %6194, %v309_v43   ;;  %1823 = vperm.xlu0 %6193, %v308_v54   ;;  %v313_v0 = vld [vmem:[%s13030_s0 + $0x4f8] sm:$0xff]  ;;  %v312_v43 = vld [vmem:[%s13030_s0 + $0x4f0] sm:$0x1f] }
 0x139   :  { %v7133_v22 = vpop.permute.xlu1 %1518  ;;  %v7135_v6 = vpop.permute.xlu0 %1513 }
 0x13a   :  { %13308 = vst [vmem:[#allocation94_spill] sm:$0xff] %v7133_v22  ;;  %13309 = vst [vmem:[#allocation95_spill] sm:$0xff] %v7135_v6  ;;  %1838 = vperm.xlu1 %6194, %v311_v38   ;;  %1833 = vperm.xlu0 %6193, %v310_v11   ;;  %v315_v6 = vld [vmem:[%s13030_s0 + $0x508] sm:$0x1f]  ;;  %v314_v38 = vld [vmem:[%s13030_s0 + $0x500] sm:$0xff] }
 0x13d   :  { %v7143_v54 = vpop.permute.xlu1 %1528  ;;  %v7145_v59 = vpop.permute.xlu0 %1523 }
 0x13e   :  { %13310 = vst [vmem:[#allocation96_spill] sm:$0xff] %v7143_v54  ;;  %13311 = vst [vmem:[#allocation97_spill] sm:$0xff] %v7145_v59  ;;  %1848 = vperm.xlu1 %6194, %v313_v0   ;;  %1843 = vperm.xlu0 %6193, %v312_v43   ;;  %v317_v59 = vld [vmem:[%s13030_s0 + $0x518] sm:$0xff]  ;;  %v316_v0 = vld [vmem:[%s13030_s0 + $0x510] sm:$0xff] }
 0x141   :  { %v7153_v11 = vpop.permute.xlu1 %1538  ;;  %v7155_v22 = vpop.permute.xlu0 %1533 }
 0x142   :  { %13312 = vst [vmem:[#allocation98_spill] sm:$0xff] %v7153_v11  ;;  %13313 = vst [vmem:[#allocation99_spill] sm:$0xff] %v7155_v22  ;;  %1858 = vperm.xlu1 %6194, %v315_v6   ;;  %1853 = vperm.xlu0 %6193, %v314_v38   ;;  %v319_v22 = vld [vmem:[%s13030_s0 + $0x528] sm:$0xff]  ;;  %v318_v6 = vld [vmem:[%s13030_s0 + $0x520] sm:$0x1f] }
 0x145   :  { %v7163_v43 = vpop.permute.xlu1 %1548  ;;  %v7165_v54 = vpop.permute.xlu0 %1543 }
 0x146   :  { %13314 = vst [vmem:[#allocation100_spill] sm:$0xff] %v7163_v43  ;;  %13315 = vst [vmem:[#allocation101_spill] sm:$0xff] %v7165_v54  ;;  %1868 = vperm.xlu1 %6194, %v317_v59   ;;  %1863 = vperm.xlu0 %6193, %v316_v0   ;;  %v321_v54 = vld [vmem:[%s13030_s0 + $0x538] sm:$0x1f]  ;;  %v320_v59 = vld [vmem:[%s13030_s0 + $0x530] sm:$0xff] }
 0x149   :  { %v7173_v38 = vpop.permute.xlu1 %1558  ;;  %v7175_v11 = vpop.permute.xlu0 %1553 }
 0x14a   :  { %13316 = vst [vmem:[#allocation102_spill] sm:$0xff] %v7173_v38  ;;  %13317 = vst [vmem:[#allocation103_spill] sm:$0xff] %v7175_v11  ;;  %1878 = vperm.xlu1 %6194, %v319_v22   ;;  %1873 = vperm.xlu0 %6193, %v318_v6   ;;  %v323_v11 = vld [vmem:[%s13030_s0 + $0x548] sm:$0xff]  ;;  %v322_v22 = vld [vmem:[%s13030_s0 + $0x540] sm:$0xff] }
 0x14d   :  { %v7183_v0 = vpop.permute.xlu1 %1568  ;;  %v7185_v43 = vpop.permute.xlu0 %1563 }
 0x14e   :  { %13318 = vst [vmem:[#allocation104_spill] sm:$0xff] %v7183_v0  ;;  %13319 = vst [vmem:[#allocation105_spill] sm:$0xff] %v7185_v43  ;;  %1888 = vperm.xlu1 %6194, %v321_v54   ;;  %1883 = vperm.xlu0 %6193, %v320_v59   ;;  %v325_v43 = vld [vmem:[%s13030_s0 + $0x558] sm:$0xff]  ;;  %v324_v54 = vld [vmem:[%s13030_s0 + $0x550] sm:$0x1f] }
 0x151   :  { %v7193_v6 = vpop.permute.xlu1 %1578  ;;  %v7195_v38 = vpop.permute.xlu0 %1573 }
 0x152   :  { %13320 = vst [vmem:[#allocation106_spill] sm:$0xff] %v7193_v6  ;;  %13321 = vst [vmem:[#allocation107_spill] sm:$0xff] %v7195_v38  ;;  %1898 = vperm.xlu1 %6194, %v323_v11   ;;  %1893 = vperm.xlu0 %6193, %v322_v22   ;;  %v327_v38 = vld [vmem:[%s13030_s0 + $0x568] sm:$0x1f]  ;;  %v326_v11 = vld [vmem:[%s13030_s0 + $0x560] sm:$0xff] }
 0x155   :  { %v7203_v59 = vpop.permute.xlu1 %1588  ;;  %v7205_v0 = vpop.permute.xlu0 %1583 }
 0x156   :  { %13322 = vst [vmem:[#allocation108_spill] sm:$0xff] %v7203_v59  ;;  %13323 = vst [vmem:[#allocation109_spill] sm:$0xff] %v7205_v0  ;;  %1908 = vperm.xlu1 %6194, %v325_v43   ;;  %1903 = vperm.xlu0 %6193, %v324_v54   ;;  %v329_v0 = vld [vmem:[%s13030_s0 + $0x578] sm:$0xff]  ;;  %v328_v43 = vld [vmem:[%s13030_s0 + $0x570] sm:$0xff] }
 0x159   :  { %v7213_v22 = vpop.permute.xlu1 %1598  ;;  %v7215_v6 = vpop.permute.xlu0 %1593 }
 0x15a   :  { %13324 = vst [vmem:[#allocation110_spill] sm:$0xff] %v7213_v22  ;;  %13325 = vst [vmem:[#allocation111_spill] sm:$0xff] %v7215_v6  ;;  %1918 = vperm.xlu1 %6194, %v327_v38   ;;  %1913 = vperm.xlu0 %6193, %v326_v11   ;;  %v331_v6 = vld [vmem:[%s13030_s0 + $0x588] sm:$0xff]  ;;  %v330_v38 = vld [vmem:[%s13030_s0 + $0x580] sm:$0x1f] }
 0x15d   :  { %v7223_v54 = vpop.permute.xlu1 %1608  ;;  %v7225_v59 = vpop.permute.xlu0 %1603 }
 0x15e   :  { %13326 = vst [vmem:[#allocation112_spill] sm:$0xff] %v7223_v54  ;;  %13327 = vst [vmem:[#allocation113_spill] sm:$0xff] %v7225_v59  ;;  %1928 = vperm.xlu1 %6194, %v329_v0   ;;  %1923 = vperm.xlu0 %6193, %v328_v43   ;;  %v333_v59 = vld [vmem:[%s13030_s0 + $0x598] sm:$0x1f]  ;;  %v332_v0 = vld [vmem:[%s13030_s0 + $0x590] sm:$0xff] }
 0x161   :  { %v7233_v11 = vpop.permute.xlu1 %1618  ;;  %v7235_v22 = vpop.permute.xlu0 %1613 }
 0x162   :  { %13328 = vst [vmem:[#allocation114_spill] sm:$0xff] %v7233_v11  ;;  %13329 = vst [vmem:[#allocation115_spill] sm:$0xff] %v7235_v22  ;;  %1938 = vperm.xlu1 %6194, %v331_v6   ;;  %1933 = vperm.xlu0 %6193, %v330_v38   ;;  %v335_v22 = vld [vmem:[%s13030_s0 + $0x5a8] sm:$0xff]  ;;  %v334_v6 = vld [vmem:[%s13030_s0 + $0x5a0] sm:$0xff] }
 0x165   :  { %v7243_v43 = vpop.permute.xlu1 %1628  ;;  %v7245_v54 = vpop.permute.xlu0 %1623 }
 0x166   :  { %13330 = vst [vmem:[#allocation116_spill] sm:$0xff] %v7243_v43  ;;  %13331 = vst [vmem:[#allocation117_spill] sm:$0xff] %v7245_v54  ;;  %1948 = vperm.xlu1 %6194, %v333_v59   ;;  %1943 = vperm.xlu0 %6193, %v332_v0   ;;  %v337_v54 = vld [vmem:[%s13030_s0 + $0x5b8] sm:$0xff]  ;;  %v336_v59 = vld [vmem:[%s13030_s0 + $0x5b0] sm:$0x1f] }
 0x169   :  { %v7253_v38 = vpop.permute.xlu1 %1638  ;;  %v7255_v11 = vpop.permute.xlu0 %1633 }
 0x16a   :  { %13332 = vst [vmem:[#allocation118_spill] sm:$0xff] %v7253_v38  ;;  %13333 = vst [vmem:[#allocation119_spill] sm:$0xff] %v7255_v11  ;;  %1958 = vperm.xlu1 %6194, %v335_v22   ;;  %1953 = vperm.xlu0 %6193, %v334_v6   ;;  %v339_v11 = vld [vmem:[%s13030_s0 + $0x5c8] sm:$0x1f]  ;;  %v338_v22 = vld [vmem:[%s13030_s0 + $0x5c0] sm:$0xff] }
 0x16d   :  { %v7263_v0 = vpop.permute.xlu1 %1648  ;;  %v7265_v43 = vpop.permute.xlu0 %1643 }
 0x16e   :  { %13334 = vst [vmem:[#allocation120_spill] sm:$0xff] %v7263_v0  ;;  %13335 = vst [vmem:[#allocation121_spill] sm:$0xff] %v7265_v43  ;;  %1968 = vperm.xlu1 %6194, %v337_v54   ;;  %1963 = vperm.xlu0 %6193, %v336_v59   ;;  %v341_v43 = vld [vmem:[%s13030_s0 + $0x5d8] sm:$0xff]  ;;  %v340_v54 = vld [vmem:[%s13030_s0 + $0x5d0] sm:$0xff] }
 0x171   :  { %v7273_v6 = vpop.permute.xlu1 %1658  ;;  %v7275_v38 = vpop.permute.xlu0 %1653 }
 0x172   :  { %13336 = vst [vmem:[#allocation122_spill] sm:$0xff] %v7273_v6  ;;  %13337 = vst [vmem:[#allocation123_spill] sm:$0xff] %v7275_v38  ;;  %1978 = vperm.xlu1 %6194, %v339_v11   ;;  %1973 = vperm.xlu0 %6193, %v338_v22   ;;  %v343_v38 = vld [vmem:[%s13030_s0 + $0x5e8] sm:$0xff]  ;;  %v342_v11 = vld [vmem:[%s13030_s0 + $0x5e0] sm:$0x1f] }
 0x173   :  { %v7296_v22 = vld [vmem:[%s13030_s0 + $0x1] sm:$0xff] }
 0x175   :  { %v7283_v59 = vpop.permute.xlu1 %1668  ;;  %v7285_v0 = vpop.permute.xlu0 %1663 }
 0x176   :  { %13338 = vst [vmem:[#allocation124_spill] sm:$0xff] %v7283_v59  ;;  %13339 = vst [vmem:[#allocation125_spill] sm:$0xff] %v7285_v0  ;;  %1988 = vperm.xlu1 %6194, %v341_v43   ;;  %1983 = vperm.xlu0 %6193, %v340_v54   ;;  %v345_v43 = vld [vmem:[%s13030_s0 + $0x5f8] sm:$0x1f]  ;;  %v344_v54 = vld [vmem:[%s13030_s0 + $0x5f0] sm:$0xff]  ;;  %v13034_v0 = vrot.slane %v7296_v22, 5 }
 0x179   :  { %v7298_v6 = vpop.permute.xlu1 %1678  ;;  %v7300_v59 = vpop.permute.xlu0 %1673 }
 0x17a   :  { %13340 = vst [vmem:[#allocation126_spill] sm:$0xff] %v7298_v6  ;;  %13341 = vst [vmem:[#allocation127_spill] sm:$0xff] %v7300_v59  ;;  %1998 = vperm.xlu1 %6194, %v343_v38   ;;  %1993 = vperm.xlu0 %6193, %v342_v11   ;;  %v7315_v38 = vld [vmem:[%s13030_s0 + $0x19] sm:$0xff]  ;;  %v7324_v6 = vsel %vm730_vm0, %v347_v27, %v13034_v0  ;;  %v6199_v27 = vld [vmem:[%s13030_s0 + $0x8] sm:$0xff] }
 0x17b   :  { %13344 = vst [vmem:[#allocation130_spill] sm:$0xff] %v7324_v6  ;;  %v13037_v51 = vrot.slane %v7315_v38, 5  ;;  %v479_v0 = vld [vmem:[%s13030_s0 + $0x39] sm:$0x3] }
 0x17d   :  { %v7317_v11 = vpop.permute.xlu1 %1688  ;;  %v7319_v59 = vpop.permute.xlu0 %1683 }
 0x17e   :  { %13342 = vst [vmem:[#allocation128_spill] sm:$0xff] %v7317_v11  ;;  %13343 = vst [vmem:[#allocation129_spill] sm:$0xff] %v7319_v59  ;;  %2008 = vperm.xlu1 %6194, %v345_v43   ;;  %2003 = vperm.xlu0 %6193, %v344_v54   ;;  %v13035_v11 = vmov 1   ;;  %v7342_v43 = vsel %vm730_vm0, %v349_v62, %v13037_v51  ;;  %v7347_v54 = vld [vmem:[%s13030_s0 + $0x31] sm:$0xff]  ;;  %v738_v59 = vrot.slane %v479_v0, 5 }
 0x17f   :  { %13347 = vst [vmem:[#allocation133_spill] sm:$0xff] %v7342_v43  ;;  %v6200_v62 = vld [vmem:[%s13030_s0 + $0x10] sm:$0x1f]  ;;  %v13038_v51 = vrot.slane %v7347_v54, 5 }
 0x181   :  { %v7330_v35 = vpop.permute.xlu1 %1698  ;;  %v7332_v46 = vpop.permute.xlu0 %1693  ;;  %v7379_v19 = vsel %vm730_vm0, %v13038_v51, %v738_v59  ;;  %v483_v51 = vld [vmem:[%s13030_s0 + $0x69] sm:$0x3] }
 0x182   :  { %13345 = vst [vmem:[#allocation131_spill] sm:$0xff] %v7330_v35  ;;  %13346 = vst [vmem:[#allocation132_spill] sm:$0xff] %v7332_v46  ;;  %6195 = vset.pattern.permute.xlu1 %v13035_v11  ;;  %3362 = vperm.xlu0 %6193, %v7324_v6   ;;  %v744_v3 = vrot.slane %v483_v51, 5 }
 0x183   :  { %2208 = vperm.xlu1 %6195, %v6199_v27   ;;  %v350_v27 = vld [vmem:[%s13030_s0 + $0x3a] sm:$0xff]  ;;  %13352 = vst [vmem:[#allocation138_spill] sm:$0xff] %v7379_v19 }
 0x185   :  { %v7352_v11 = vpop.permute.xlu1 %1708  ;;  %v7354_v46 = vpop.permute.xlu0 %1703 }
 0x186   :  { %13348 = vst [vmem:[#allocation134_spill] sm:$0xff] %v7352_v11  ;;  %13349 = vst [vmem:[#allocation135_spill] sm:$0xff] %v7354_v46  ;;  %3376 = vperm.xlu0 %6193, %v7342_v43   ;;  %v7367_v11 = vld [vmem:[%s13030_s0 + $0x49] sm:$0xff] }
 0x187   :  { %2212 = vperm.xlu1 %6195, %v6200_v62   ;;  %v6201_v62 = vld [vmem:[%s13030_s0 + $0x20] sm:$0xff]  ;;  %v13039_v0 = vrot.slane %v7367_v11, 5  ;;  %v453_v43 = vld [vmem:[%s13030_s0 + $0x50a] sm:$0x7] }
 0x189   :  { %v7369_v46 = vpop.permute.xlu1 %1718  ;;  %v7371_v35 = vpop.permute.xlu0 %1713  ;;  %v7396_v59 = vsel %vm730_vm0, %v353_v30, %v13039_v0  ;;  %v6203_v30 = vld [vmem:[%s13030_s0 + $0x40] sm:$0x1f] }
 0x18a   :  { %13350 = vst [vmem:[#allocation136_spill] sm:$0xff] %v7369_v46  ;;  %13351 = vst [vmem:[#allocation137_spill] sm:$0xff] %v7371_v35  ;;  %3385 = vperm.xlu0 %6193, %v350_v27   ;;  %v6202_v27 = vld [vmem:[%s13030_s0 + $0x30] sm:$0xff] }
 0x18b   :  { %2220 = vperm.xlu1 %6195, %v6201_v62   ;;  %13355 = vst [vmem:[#allocation141_spill] sm:$0xff] %v7396_v59  ;;  %v7401_v62 = vld [vmem:[%s13030_s0 + $0x61] sm:$0xff] }
 0x18c   :  { %v13040_v0 = vrot.slane %v7401_v62, 5 }
 0x18d   :  { %v7385_v46 = vpop.permute.xlu1 %1728  ;;  %v7387_v35 = vpop.permute.xlu0 %1723 }
 0x18e   :  { %13353 = vst [vmem:[#allocation139_spill] sm:$0xff] %v7385_v46  ;;  %13354 = vst [vmem:[#allocation140_spill] sm:$0xff] %v7387_v35  ;;  %3394 = vperm.xlu0 %6193, %v7379_v19   ;;  %v7433_v58 = vsel %vm730_vm0, %v13040_v0, %v744_v3  ;;  %v487_v0 = vld [vmem:[%s13030_s0 + $0x99] sm:$0x3] }
 0x18f   :  { %2228 = vperm.xlu1 %6195, %v6202_v27   ;;  %v354_v27 = vld [vmem:[%s13030_s0 + $0x6a] sm:$0xff]  ;;  %13360 = vst [vmem:[#allocation146_spill] sm:$0xff] %v7433_v58  ;;  %v750_v50 = vrot.slane %v487_v0, 5 }
 0x191   :  { %v7406_v35 = vpop.permute.xlu1 %1738  ;;  %v7408_v46 = vpop.permute.xlu0 %1733 }
 0x192   :  { %13356 = vst [vmem:[#allocation142_spill] sm:$0xff] %v7406_v35  ;;  %13357 = vst [vmem:[#allocation143_spill] sm:$0xff] %v7408_v46  ;;  %3404 = vperm.xlu0 %6193, %v7396_v59   ;;  %v7421_v35 = vld [vmem:[%s13030_s0 + $0x79] sm:$0xff] }
 0x193   :  { %2236 = vperm.xlu1 %6195, %v6203_v30   ;;  %v6204_v30 = vld [vmem:[%s13030_s0 + $0x50] sm:$0xff]  ;;  %v13041_v51 = vrot.slane %v7421_v35, 5  ;;  %v449_v59 = vld [vmem:[%s13030_s0 + $0x4da] sm:$0x7] }
 0x195   :  { %v7423_v46 = vpop.permute.xlu1 %1748  ;;  %v7425_v14 = vpop.permute.xlu0 %1743  ;;  %v7450_v3 = vsel %vm730_vm0, %v357_v63, %v13041_v51  ;;  %v6206_v63 = vld [vmem:[%s13030_s0 + $0x70] sm:$0x1f] }
 0x196   :  { %13358 = vst [vmem:[#allocation144_spill] sm:$0xff] %v7423_v46  ;;  %13359 = vst [vmem:[#allocation145_spill] sm:$0xff] %v7425_v14  ;;  %3413 = vperm.xlu0 %6193, %v354_v27   ;;  %v6205_v27 = vld [vmem:[%s13030_s0 + $0x60] sm:$0xff] }
 0x197   :  { %2244 = vperm.xlu1 %6195, %v6204_v30   ;;  %13363 = vst [vmem:[#allocation149_spill] sm:$0xff] %v7450_v3  ;;  %v7455_v30 = vld [vmem:[%s13030_s0 + $0x91] sm:$0xff] }
 0x198   :  { %v13042_v51 = vrot.slane %v7455_v30, 5 }
 0x199   :  { %v7439_v46 = vpop.permute.xlu1 %1758  ;;  %v7441_v14 = vpop.permute.xlu0 %1753 }
 0x19a   :  { %13361 = vst [vmem:[#allocation147_spill] sm:$0xff] %v7439_v46  ;;  %13362 = vst [vmem:[#allocation148_spill] sm:$0xff] %v7441_v14  ;;  %3422 = vperm.xlu0 %6193, %v7433_v58   ;;  %v7487_v42 = vsel %vm730_vm0, %v13042_v51, %v750_v50  ;;  %v491_v51 = vld [vmem:[%s13030_s0 + $0xc9] sm:$0x3] }
 0x19b   :  { %2252 = vperm.xlu1 %6195, %v6205_v27   ;;  %v358_v27 = vld [vmem:[%s13030_s0 + $0x9a] sm:$0xff]  ;;  %13368 = vst [vmem:[#allocation154_spill] sm:$0xff] %v7487_v42  ;;  %v756_v34 = vrot.slane %v491_v51, 5 }
 0x19d   :  { %v7460_v14 = vpop.permute.xlu1 %1768  ;;  %v7462_v46 = vpop.permute.xlu0 %1763 }
 0x19e   :  { %13364 = vst [vmem:[#allocation150_spill] sm:$0xff] %v7460_v14  ;;  %13365 = vst [vmem:[#allocation151_spill] sm:$0xff] %v7462_v46  ;;  %3432 = vperm.xlu0 %6193, %v7450_v3   ;;  %v7475_v14 = vld [vmem:[%s13030_s0 + $0xa9] sm:$0xff] }
 0x19f   :  { %2260 = vperm.xlu1 %6195, %v6206_v63   ;;  %v6207_v63 = vld [vmem:[%s13030_s0 + $0x80] sm:$0xff]  ;;  %v13043_v0 = vrot.slane %v7475_v14, 5  ;;  %v445_v3 = vld [vmem:[%s13030_s0 + $0x4aa] sm:$0x7] }
 0x1a1   :  { %v7477_v46 = vpop.permute.xlu1 %1778  ;;  %v7479_v55 = vpop.permute.xlu0 %1773  ;;  %v7504_v50 = vsel %vm730_vm0, %v361_v47, %v13043_v0  ;;  %v6209_v47 = vld [vmem:[%s13030_s0 + $0xa0] sm:$0x1f] }
 0x1a2   :  { %13366 = vst [vmem:[#allocation152_spill] sm:$0xff] %v7477_v46  ;;  %13367 = vst [vmem:[#allocation153_spill] sm:$0xff] %v7479_v55  ;;  %3441 = vperm.xlu0 %6193, %v358_v27   ;;  %v6208_v27 = vld [vmem:[%s13030_s0 + $0x90] sm:$0xff] }
 0x1a3   :  { %2268 = vperm.xlu1 %6195, %v6207_v63   ;;  %13371 = vst [vmem:[#allocation157_spill] sm:$0xff] %v7504_v50  ;;  %v7509_v63 = vld [vmem:[%s13030_s0 + $0xc1] sm:$0xff] }
 0x1a4   :  { %v13044_v0 = vrot.slane %v7509_v63, 5 }
 0x1a5   :  { %v7493_v46 = vpop.permute.xlu1 %1788  ;;  %v7495_v55 = vpop.permute.xlu0 %1783 }
 0x1a6   :  { %13369 = vst [vmem:[#allocation155_spill] sm:$0xff] %v7493_v46  ;;  %13370 = vst [vmem:[#allocation156_spill] sm:$0xff] %v7495_v55  ;;  %3450 = vperm.xlu0 %6193, %v7487_v42   ;;  %v7541_v26 = vsel %vm730_vm0, %v13044_v0, %v756_v34  ;;  %v495_v0 = vld [vmem:[%s13030_s0 + $0xf9] sm:$0x3] }
 0x1a7   :  { %2276 = vperm.xlu1 %6195, %v6208_v27   ;;  %v362_v27 = vld [vmem:[%s13030_s0 + $0xca] sm:$0xff]  ;;  %13376 = vst [vmem:[#allocation162_spill] sm:$0xff] %v7541_v26  ;;  %v762_v18 = vrot.slane %v495_v0, 5 }
 0x1a9   :  { %v7514_v55 = vpop.permute.xlu1 %1798  ;;  %v7516_v46 = vpop.permute.xlu0 %1793 }
 0x1aa   :  { %13372 = vst [vmem:[#allocation158_spill] sm:$0xff] %v7514_v55  ;;  %13373 = vst [vmem:[#allocation159_spill] sm:$0xff] %v7516_v46  ;;  %3460 = vperm.xlu0 %6193, %v7504_v50   ;;  %v7529_v55 = vld [vmem:[%s13030_s0 + $0xd9] sm:$0xff] }
 0x1ab   :  { %2284 = vperm.xlu1 %6195, %v6209_v47   ;;  %v6210_v47 = vld [vmem:[%s13030_s0 + $0xb0] sm:$0xff]  ;;  %v13045_v51 = vrot.slane %v7529_v55, 5  ;;  %v441_v50 = vld [vmem:[%s13030_s0 + $0x47a] sm:$0x7] }
 0x1ad   :  { %v7531_v46 = vpop.permute.xlu1 %1808  ;;  %v7533_v39 = vpop.permute.xlu0 %1803  ;;  %v7558_v34 = vsel %vm730_vm0, %v365_v31, %v13045_v51  ;;  %v6212_v31 = vld [vmem:[%s13030_s0 + $0xd0] sm:$0x1f] }
 0x1ae   :  { %13374 = vst [vmem:[#allocation160_spill] sm:$0xff] %v7531_v46  ;;  %13375 = vst [vmem:[#allocation161_spill] sm:$0xff] %v7533_v39  ;;  %3469 = vperm.xlu0 %6193, %v362_v27   ;;  %v6211_v27 = vld [vmem:[%s13030_s0 + $0xc0] sm:$0xff] }
 0x1af   :  { %2292 = vperm.xlu1 %6195, %v6210_v47   ;;  %13379 = vst [vmem:[#allocation165_spill] sm:$0xff] %v7558_v34  ;;  %v7563_v47 = vld [vmem:[%s13030_s0 + $0xf1] sm:$0xff] }
 0x1b0   :  { %v13046_v51 = vrot.slane %v7563_v47, 5 }
 0x1b1   :  { %v7547_v46 = vpop.permute.xlu1 %1818  ;;  %v7549_v39 = vpop.permute.xlu0 %1813 }
 0x1b2   :  { %13377 = vst [vmem:[#allocation163_spill] sm:$0xff] %v7547_v46  ;;  %13378 = vst [vmem:[#allocation164_spill] sm:$0xff] %v7549_v39  ;;  %3478 = vperm.xlu0 %6193, %v7541_v26   ;;  %v7595_v10 = vsel %vm730_vm0, %v13046_v51, %v762_v18  ;;  %v499_v51 = vld [vmem:[%s13030_s0 + $0x129] sm:$0x3] }
 0x1b3   :  { %2300 = vperm.xlu1 %6195, %v6211_v27   ;;  %v366_v27 = vld [vmem:[%s13030_s0 + $0xfa] sm:$0xff]  ;;  %13384 = vst [vmem:[#allocation170_spill] sm:$0xff] %v7595_v10  ;;  %v768_v2 = vrot.slane %v499_v51, 5 }
 0x1b5   :  { %v7568_v39 = vpop.permute.xlu1 %1828  ;;  %v7570_v46 = vpop.permute.xlu0 %1823 }
 0x1b6   :  { %13380 = vst [vmem:[#allocation166_spill] sm:$0xff] %v7568_v39  ;;  %13381 = vst [vmem:[#allocation167_spill] sm:$0xff] %v7570_v46  ;;  %3488 = vperm.xlu0 %6193, %v7558_v34   ;;  %v7583_v39 = vld [vmem:[%s13030_s0 + $0x109] sm:$0xff] }
 0x1b7   :  { %2308 = vperm.xlu1 %6195, %v6212_v31   ;;  %v6213_v31 = vld [vmem:[%s13030_s0 + $0xe0] sm:$0xff]  ;;  %v13047_v0 = vrot.slane %v7583_v39, 5  ;;  %v437_v34 = vld [vmem:[%s13030_s0 + $0x44a] sm:$0x7] }
 0x1b9   :  { %v7585_v46 = vpop.permute.xlu1 %1838  ;;  %v7587_v23 = vpop.permute.xlu0 %1833  ;;  %v7612_v18 = vsel %vm730_vm0, %v369_v15, %v13047_v0  ;;  %v6215_v15 = vld [vmem:[%s13030_s0 + $0x100] sm:$0x1f] }
 0x1ba   :  { %13382 = vst [vmem:[#allocation168_spill] sm:$0xff] %v7585_v46  ;;  %13383 = vst [vmem:[#allocation169_spill] sm:$0xff] %v7587_v23  ;;  %3497 = vperm.xlu0 %6193, %v366_v27   ;;  %v6214_v27 = vld [vmem:[%s13030_s0 + $0xf0] sm:$0xff] }
 0x1bb   :  { %2316 = vperm.xlu1 %6195, %v6213_v31   ;;  %13387 = vst [vmem:[#allocation173_spill] sm:$0xff] %v7612_v18  ;;  %v7617_v31 = vld [vmem:[%s13030_s0 + $0x121] sm:$0xff] }
 0x1bc   :  { %v13048_v0 = vrot.slane %v7617_v31, 5 }
 0x1bd   :  { %v7601_v46 = vpop.permute.xlu1 %1848  ;;  %v7603_v23 = vpop.permute.xlu0 %1843 }
 0x1be   :  { %13385 = vst [vmem:[#allocation171_spill] sm:$0xff] %v7601_v46  ;;  %13386 = vst [vmem:[#allocation172_spill] sm:$0xff] %v7603_v23  ;;  %3506 = vperm.xlu0 %6193, %v7595_v10   ;;  %v7649_v61 = vsel %vm730_vm0, %v13048_v0, %v768_v2  ;;  %v503_v0 = vld [vmem:[%s13030_s0 + $0x159] sm:$0x3] }
 0x1bf   :  { %2324 = vperm.xlu1 %6195, %v6214_v27   ;;  %v370_v27 = vld [vmem:[%s13030_s0 + $0x12a] sm:$0xff]  ;;  %13392 = vst [vmem:[#allocation178_spill] sm:$0xff] %v7649_v61  ;;  %v774_v57 = vrot.slane %v503_v0, 5 }
 0x1c1   :  { %v7622_v23 = vpop.permute.xlu1 %1858  ;;  %v7624_v46 = vpop.permute.xlu0 %1853 }
 0x1c2   :  { %13388 = vst [vmem:[#allocation174_spill] sm:$0xff] %v7622_v23  ;;  %13389 = vst [vmem:[#allocation175_spill] sm:$0xff] %v7624_v46  ;;  %3516 = vperm.xlu0 %6193, %v7612_v18   ;;  %v7637_v23 = vld [vmem:[%s13030_s0 + $0x139] sm:$0xff] }
 0x1c3   :  { %2332 = vperm.xlu1 %6195, %v6215_v15   ;;  %v6216_v15 = vld [vmem:[%s13030_s0 + $0x110] sm:$0xff]  ;;  %v13049_v51 = vrot.slane %v7637_v23, 5  ;;  %v433_v18 = vld [vmem:[%s13030_s0 + $0x41a] sm:$0x7] }
 0x1c5   :  { %v7639_v46 = vpop.permute.xlu1 %1868  ;;  %v7641_v7 = vpop.permute.xlu0 %1863  ;;  %v7666_v2 = vsel %vm730_vm0, %v373_v1, %v13049_v51  ;;  %v6218_v1 = vld [vmem:[%s13030_s0 + $0x130] sm:$0x1f] }
 0x1c6   :  { %13390 = vst [vmem:[#allocation176_spill] sm:$0xff] %v7639_v46  ;;  %13391 = vst [vmem:[#allocation177_spill] sm:$0xff] %v7641_v7  ;;  %3525 = vperm.xlu0 %6193, %v370_v27   ;;  %v6217_v27 = vld [vmem:[%s13030_s0 + $0x120] sm:$0xff] }
 0x1c7   :  { %2340 = vperm.xlu1 %6195, %v6216_v15   ;;  %13395 = vst [vmem:[#allocation181_spill] sm:$0xff] %v7666_v2  ;;  %v7671_v15 = vld [vmem:[%s13030_s0 + $0x151] sm:$0xff] }
 0x1c8   :  { %v13050_v51 = vrot.slane %v7671_v15, 5 }
 0x1c9   :  { %v7655_v46 = vpop.permute.xlu1 %1878  ;;  %v7657_v7 = vpop.permute.xlu0 %1873 }
 0x1ca   :  { %13393 = vst [vmem:[#allocation179_spill] sm:$0xff] %v7655_v46  ;;  %13394 = vst [vmem:[#allocation180_spill] sm:$0xff] %v7657_v7  ;;  %3534 = vperm.xlu0 %6193, %v7649_v61   ;;  %v7703_v53 = vsel %vm730_vm0, %v13050_v51, %v774_v57  ;;  %v507_v51 = vld [vmem:[%s13030_s0 + $0x189] sm:$0x3] }
 0x1cb   :  { %2348 = vperm.xlu1 %6195, %v6217_v27   ;;  %v374_v27 = vld [vmem:[%s13030_s0 + $0x15a] sm:$0xff]  ;;  %13400 = vst [vmem:[#allocation186_spill] sm:$0xff] %v7703_v53  ;;  %v780_v49 = vrot.slane %v507_v51, 5 }
 0x1cd   :  { %v7676_v7 = vpop.permute.xlu1 %1888  ;;  %v7678_v46 = vpop.permute.xlu0 %1883 }
 0x1ce   :  { %13396 = vst [vmem:[#allocation182_spill] sm:$0xff] %v7676_v7  ;;  %13397 = vst [vmem:[#allocation183_spill] sm:$0xff] %v7678_v46  ;;  %3544 = vperm.xlu0 %6193, %v7666_v2   ;;  %v7691_v7 = vld [vmem:[%s13030_s0 + $0x169] sm:$0xff] }
 0x1cf   :  { %2356 = vperm.xlu1 %6195, %v6218_v1   ;;  %v6219_v1 = vld [vmem:[%s13030_s0 + $0x140] sm:$0xff]  ;;  %v13051_v0 = vrot.slane %v7691_v7, 5  ;;  %v429_v2 = vld [vmem:[%s13030_s0 + $0x3ea] sm:$0x7] }
 0x1d1   :  { %v7693_v46 = vpop.permute.xlu1 %1898  ;;  %v7695_v60 = vpop.permute.xlu0 %1893  ;;  %v7720_v57 = vsel %vm730_vm0, %v377_v56, %v13051_v0  ;;  %v6221_v56 = vld [vmem:[%s13030_s0 + $0x160] sm:$0x1f] }
 0x1d2   :  { %13398 = vst [vmem:[#allocation184_spill] sm:$0xff] %v7693_v46  ;;  %13399 = vst [vmem:[#allocation185_spill] sm:$0xff] %v7695_v60  ;;  %3553 = vperm.xlu0 %6193, %v374_v27   ;;  %v6220_v27 = vld [vmem:[%s13030_s0 + $0x150] sm:$0xff] }
 0x1d3   :  { %2364 = vperm.xlu1 %6195, %v6219_v1   ;;  %13403 = vst [vmem:[#allocation189_spill] sm:$0xff] %v7720_v57  ;;  %v7725_v1 = vld [vmem:[%s13030_s0 + $0x181] sm:$0xff] }
 0x1d4   :  { %v13052_v0 = vrot.slane %v7725_v1, 5 }
 0x1d5   :  { %v7709_v46 = vpop.permute.xlu1 %1908  ;;  %v7711_v60 = vpop.permute.xlu0 %1903 }
 0x1d6   :  { %13401 = vst [vmem:[#allocation187_spill] sm:$0xff] %v7709_v46  ;;  %13402 = vst [vmem:[#allocation188_spill] sm:$0xff] %v7711_v60  ;;  %3562 = vperm.xlu0 %6193, %v7703_v53   ;;  %v7757_v45 = vsel %vm730_vm0, %v13052_v0, %v780_v49  ;;  %v511_v0 = vld [vmem:[%s13030_s0 + $0x1b9] sm:$0x3] }
 0x1d7   :  { %2372 = vperm.xlu1 %6195, %v6220_v27   ;;  %v378_v27 = vld [vmem:[%s13030_s0 + $0x18a] sm:$0xff]  ;;  %13408 = vst [vmem:[#allocation194_spill] sm:$0xff] %v7757_v45  ;;  %v786_v41 = vrot.slane %v511_v0, 5 }
 0x1d9   :  { %v7730_v60 = vpop.permute.xlu1 %1918  ;;  %v7732_v46 = vpop.permute.xlu0 %1913 }
 0x1da   :  { %13404 = vst [vmem:[#allocation190_spill] sm:$0xff] %v7730_v60  ;;  %13405 = vst [vmem:[#allocation191_spill] sm:$0xff] %v7732_v46  ;;  %3572 = vperm.xlu0 %6193, %v7720_v57   ;;  %v7745_v60 = vld [vmem:[%s13030_s0 + $0x199] sm:$0xff] }
 0x1db   :  { %2380 = vperm.xlu1 %6195, %v6221_v56   ;;  %v6222_v56 = vld [vmem:[%s13030_s0 + $0x170] sm:$0xff]  ;;  %v13053_v51 = vrot.slane %v7745_v60, 5  ;;  %v425_v57 = vld [vmem:[%s13030_s0 + $0x3ba] sm:$0x7] }
 0x1dd   :  { %v7747_v46 = vpop.permute.xlu1 %1928  ;;  %v7749_v52 = vpop.permute.xlu0 %1923  ;;  %v7774_v49 = vsel %vm730_vm0, %v381_v48, %v13053_v51  ;;  %v6224_v48 = vld [vmem:[%s13030_s0 + $0x190] sm:$0x1f] }
 0x1de   :  { %13406 = vst [vmem:[#allocation192_spill] sm:$0xff] %v7747_v46  ;;  %13407 = vst [vmem:[#allocation193_spill] sm:$0xff] %v7749_v52  ;;  %3581 = vperm.xlu0 %6193, %v378_v27   ;;  %v6223_v27 = vld [vmem:[%s13030_s0 + $0x180] sm:$0xff] }
 0x1df   :  { %2388 = vperm.xlu1 %6195, %v6222_v56   ;;  %13411 = vst [vmem:[#allocation197_spill] sm:$0xff] %v7774_v49  ;;  %v7779_v56 = vld [vmem:[%s13030_s0 + $0x1b1] sm:$0xff] }
 0x1e0   :  { %v13054_v51 = vrot.slane %v7779_v56, 5 }
 0x1e1   :  { %v7763_v46 = vpop.permute.xlu1 %1938  ;;  %v7765_v52 = vpop.permute.xlu0 %1933 }
 0x1e2   :  { %13409 = vst [vmem:[#allocation195_spill] sm:$0xff] %v7763_v46  ;;  %13410 = vst [vmem:[#allocation196_spill] sm:$0xff] %v7765_v52  ;;  %3590 = vperm.xlu0 %6193, %v7757_v45   ;;  %v7811_v37 = vsel %vm730_vm0, %v13054_v51, %v786_v41  ;;  %v515_v51 = vld [vmem:[%s13030_s0 + $0x1e9] sm:$0x3] }
 0x1e3   :  { %2396 = vperm.xlu1 %6195, %v6223_v27   ;;  %v382_v27 = vld [vmem:[%s13030_s0 + $0x1ba] sm:$0xff]  ;;  %13416 = vst [vmem:[#allocation202_spill] sm:$0xff] %v7811_v37  ;;  %v792_v33 = vrot.slane %v515_v51, 5 }
 0x1e5   :  { %v7784_v52 = vpop.permute.xlu1 %1948  ;;  %v7786_v46 = vpop.permute.xlu0 %1943 }
 0x1e6   :  { %13412 = vst [vmem:[#allocation198_spill] sm:$0xff] %v7784_v52  ;;  %13413 = vst [vmem:[#allocation199_spill] sm:$0xff] %v7786_v46  ;;  %3600 = vperm.xlu0 %6193, %v7774_v49   ;;  %v7799_v52 = vld [vmem:[%s13030_s0 + $0x1c9] sm:$0xff] }
 0x1e7   :  { %2404 = vperm.xlu1 %6195, %v6224_v48   ;;  %v6225_v48 = vld [vmem:[%s13030_s0 + $0x1a0] sm:$0xff]  ;;  %v13055_v0 = vrot.slane %v7799_v52, 5  ;;  %v421_v49 = vld [vmem:[%s13030_s0 + $0x38a] sm:$0x7] }
 0x1e9   :  { %v7801_v46 = vpop.permute.xlu1 %1958  ;;  %v7803_v44 = vpop.permute.xlu0 %1953  ;;  %v7828_v41 = vsel %vm730_vm0, %v385_v40, %v13055_v0  ;;  %v6227_v40 = vld [vmem:[%s13030_s0 + $0x1c0] sm:$0x1f] }
 0x1ea   :  { %13414 = vst [vmem:[#allocation200_spill] sm:$0xff] %v7801_v46  ;;  %13415 = vst [vmem:[#allocation201_spill] sm:$0xff] %v7803_v44  ;;  %3609 = vperm.xlu0 %6193, %v382_v27   ;;  %v6226_v27 = vld [vmem:[%s13030_s0 + $0x1b0] sm:$0xff] }
 0x1eb   :  { %2412 = vperm.xlu1 %6195, %v6225_v48   ;;  %13419 = vst [vmem:[#allocation205_spill] sm:$0xff] %v7828_v41  ;;  %v7833_v48 = vld [vmem:[%s13030_s0 + $0x1e1] sm:$0xff] }
 0x1ec   :  { %v13056_v0 = vrot.slane %v7833_v48, 5 }
 0x1ed   :  { %v7817_v46 = vpop.permute.xlu1 %1968  ;;  %v7819_v44 = vpop.permute.xlu0 %1963 }
 0x1ee   :  { %13417 = vst [vmem:[#allocation203_spill] sm:$0xff] %v7817_v46  ;;  %13418 = vst [vmem:[#allocation204_spill] sm:$0xff] %v7819_v44  ;;  %3618 = vperm.xlu0 %6193, %v7811_v37   ;;  %v7865_v29 = vsel %vm730_vm0, %v13056_v0, %v792_v33  ;;  %v519_v0 = vld [vmem:[%s13030_s0 + $0x219] sm:$0x3] }
 0x1ef   :  { %2420 = vperm.xlu1 %6195, %v6226_v27   ;;  %v386_v27 = vld [vmem:[%s13030_s0 + $0x1ea] sm:$0xff]  ;;  %13424 = vst [vmem:[#allocation210_spill] sm:$0xff] %v7865_v29  ;;  %v798_v25 = vrot.slane %v519_v0, 5 }
 0x1f1   :  { %v7838_v44 = vpop.permute.xlu1 %1978  ;;  %v7840_v46 = vpop.permute.xlu0 %1973 }
 0x1f2   :  { %13420 = vst [vmem:[#allocation206_spill] sm:$0xff] %v7838_v44  ;;  %13421 = vst [vmem:[#allocation207_spill] sm:$0xff] %v7840_v46  ;;  %3628 = vperm.xlu0 %6193, %v7828_v41   ;;  %v7853_v44 = vld [vmem:[%s13030_s0 + $0x1f9] sm:$0xff] }
 0x1f3   :  { %2428 = vperm.xlu1 %6195, %v6227_v40   ;;  %v6228_v40 = vld [vmem:[%s13030_s0 + $0x1d0] sm:$0xff]  ;;  %v13057_v51 = vrot.slane %v7853_v44, 5 }
 0x1f5   :  { %v7855_v46 = vpop.permute.xlu1 %1988  ;;  %v7857_v36 = vpop.permute.xlu0 %1983  ;;  %v7882_v33 = vsel %vm730_vm0, %v389_v32, %v13057_v51  ;;  %v6230_v32 = vld [vmem:[%s13030_s0 + $0x1f0] sm:$0x1f] }
 0x1f6   :  { %13422 = vst [vmem:[#allocation208_spill] sm:$0xff] %v7855_v46  ;;  %13423 = vst [vmem:[#allocation209_spill] sm:$0xff] %v7857_v36  ;;  %3637 = vperm.xlu0 %6193, %v386_v27   ;;  %v6229_v27 = vld [vmem:[%s13030_s0 + $0x1e0] sm:$0xff] }
 0x1f7   :  { %2436 = vperm.xlu1 %6195, %v6228_v40   ;;  %13427 = vst [vmem:[#allocation213_spill] sm:$0xff] %v7882_v33  ;;  %v7887_v40 = vld [vmem:[%s13030_s0 + $0x211] sm:$0xff] }
 0x1f8   :  { %v13058_v51 = vrot.slane %v7887_v40, 5 }
 0x1f9   :  { %v7871_v46 = vpop.permute.xlu1 %1998  ;;  %v7873_v36 = vpop.permute.xlu0 %1993 }
 0x1fa   :  { %13425 = vst [vmem:[#allocation211_spill] sm:$0xff] %v7871_v46  ;;  %13426 = vst [vmem:[#allocation212_spill] sm:$0xff] %v7873_v36  ;;  %3646 = vperm.xlu0 %6193, %v7865_v29   ;;  %v7919_v21 = vsel %vm730_vm0, %v13058_v51, %v798_v25  ;;  %v523_v51 = vld [vmem:[%s13030_s0 + $0x249] sm:$0x3] }
 0x1fb   :  { %2444 = vperm.xlu1 %6195, %v6229_v27   ;;  %v390_v27 = vld [vmem:[%s13030_s0 + $0x21a] sm:$0xff]  ;;  %13432 = vst [vmem:[#allocation218_spill] sm:$0xff] %v7919_v21  ;;  %v804_v13 = vrot.slane %v523_v51, 5 }
 0x1fd   :  { %v7892_v36 = vpop.permute.xlu1 %2008  ;;  %v7894_v46 = vpop.permute.xlu0 %2003 }
 0x1fe   :  { %13428 = vst [vmem:[#allocation214_spill] sm:$0xff] %v7892_v36  ;;  %13429 = vst [vmem:[#allocation215_spill] sm:$0xff] %v7894_v46  ;;  %3656 = vperm.xlu0 %6193, %v7882_v33   ;;  %v7907_v36 = vld [vmem:[%s13030_s0 + $0x229] sm:$0xff] }
 0x1ff   :  { %2452 = vperm.xlu1 %6195, %v6230_v32   ;;  %v6231_v32 = vld [vmem:[%s13030_s0 + $0x200] sm:$0xff]  ;;  %v13060_v0 = vrot.slane %v7907_v36, 5 }
 0x201   :  { %v7909_v46 = vpop.permute.xlu0 %3362  ;;  %v7936_v25 = vsel %vm730_vm0, %v393_v24, %v13060_v0  ;;  %v6233_v24 = vld [vmem:[%s13030_s0 + $0x220] sm:$0x1f] }
 0x202   :  { %13430 = vst [vmem:[#allocation216_spill] sm:$0xff] %v7909_v46  ;;  %v7911_v28 = vpop.permute.xlu1 %2208  ;;  %3665 = vperm.xlu0 %6193, %v390_v27   ;;  %v6232_v27 = vld [vmem:[%s13030_s0 + $0x210] sm:$0xff]  ;;  %13435 = vst [vmem:[#allocation221_spill] sm:$0xff] %v7936_v25 }
 0x203   :  { %13431 = vst [vmem:[#allocation217_spill] sm:$0xff] %v7911_v28  ;;  %2460 = vperm.xlu1 %6195, %v6231_v32   ;;  %v7941_v32 = vld [vmem:[%s13030_s0 + $0x241] sm:$0xff] }
 0x204   :  { %v13063_v0 = vrot.slane %v7941_v32, 5 }
 0x205   :  { %v7925_v17 = vpop.permute.xlu0 %3376 }
 0x206   :  { %13433 = vst [vmem:[#allocation219_spill] sm:$0xff] %v7925_v17  ;;  %v7927_v20 = vpop.permute.xlu1 %2212  ;;  %3674 = vperm.xlu0 %6193, %v7919_v21  }
 0x207   :  { %13434 = vst [vmem:[#allocation220_spill] sm:$0xff] %v7927_v20  ;;  %2468 = vperm.xlu1 %6195, %v6232_v27   ;;  %v394_v27 = vld [vmem:[%s13030_s0 + $0x24a] sm:$0xff] }
 0x208   :  { %v397_v20 = vld [vmem:[%s13030_s0 + $0x26a] sm:$0x7] }
 0x209   :  { %v7946_v21 = vpop.permute.xlu0 %3385 }
 0x20a   :  { %13436 = vst [vmem:[#allocation222_spill] sm:$0xff] %v7946_v21  ;;  %v7948_v17 = vpop.permute.xlu1 %2220  ;;  %3684 = vperm.xlu0 %6193, %v7936_v25   ;;  %v7961_v21 = vld [vmem:[%s13030_s0 + $0x259] sm:$0xff] }
 0x20b   :  { %13437 = vst [vmem:[#allocation223_spill] sm:$0xff] %v7948_v17  ;;  %2476 = vperm.xlu1 %6195, %v6233_v24   ;;  %v6234_v24 = vld [vmem:[%s13030_s0 + $0x230] sm:$0xff]  ;;  %v7973_v17 = vsel %vm730_vm0, %v13063_v0, %v804_v13  ;;  %v13065_v51 = vrot.slane %v7961_v21, 5  ;;  %v527_v0 = vld [vmem:[%s13030_s0 + $0x279] sm:$0x3] }
 0x20c   :  { %13440 = vst [vmem:[#allocation226_spill] sm:$0xff] %v7973_v17 }
 0x20d   :  { %v7963_v33 = vpop.permute.xlu0 %3394  ;;  %v7990_v13 = vsel %vm730_vm0, %v397_v20, %v13065_v51  ;;  %v6236_v20 = vld [vmem:[%s13030_s0 + $0x250] sm:$0x1f] }
 0x20e   :  { %13438 = vst [vmem:[#allocation224_spill] sm:$0xff] %v7963_v33  ;;  %v7965_v25 = vpop.permute.xlu1 %2228  ;;  %3693 = vperm.xlu0 %6193, %v394_v27   ;;  %v6235_v27 = vld [vmem:[%s13030_s0 + $0x240] sm:$0xff]  ;;  %13443 = vst [vmem:[#allocation229_spill] sm:$0xff] %v7990_v13 }
 0x20f   :  { %13439 = vst [vmem:[#allocation225_spill] sm:$0xff] %v7965_v25  ;;  %2484 = vperm.xlu1 %6195, %v6234_v24   ;;  %v7995_v24 = vld [vmem:[%s13030_s0 + $0x271] sm:$0xff] }
 0x210   :  { %v13067_v51 = vrot.slane %v7995_v24, 5 }
 0x211   :  { %v7979_v33 = vpop.permute.xlu0 %3404 }
 0x212   :  { %13441 = vst [vmem:[#allocation227_spill] sm:$0xff] %v7979_v33  ;;  %v7981_v25 = vpop.permute.xlu1 %2236  ;;  %3702 = vperm.xlu0 %6193, %v7973_v17  }
 0x213   :  { %13442 = vst [vmem:[#allocation228_spill] sm:$0xff] %v7981_v25  ;;  %2492 = vperm.xlu1 %6195, %v6235_v27   ;;  %v398_v27 = vld [vmem:[%s13030_s0 + $0x27a] sm:$0xff]  ;;  %v810_v25 = vrot.slane %v527_v0, 5 }
 0x215   :  { %v8000_v17 = vpop.permute.xlu0 %3413  ;;  %v8027_v46 = vsel %vm730_vm0, %v13067_v51, %v810_v25  ;;  %v531_v51 = vld [vmem:[%s13030_s0 + $0x2a9] sm:$0x3] }
 0x216   :  { %13444 = vst [vmem:[#allocation230_spill] sm:$0xff] %v8000_v17  ;;  %v8002_v33 = vpop.permute.xlu1 %2244  ;;  %3712 = vperm.xlu0 %6193, %v7990_v13   ;;  %v8015_v17 = vld [vmem:[%s13030_s0 + $0x289] sm:$0xff]  ;;  %13448 = vst [vmem:[#allocation234_spill] sm:$0xff] %v8027_v46 }
 0x217   :  { %13445 = vst [vmem:[#allocation231_spill] sm:$0xff] %v8002_v33  ;;  %2500 = vperm.xlu1 %6195, %v6236_v20   ;;  %v6237_v20 = vld [vmem:[%s13030_s0 + $0x260] sm:$0xff]  ;;  %v13069_v0 = vrot.slane %v8015_v17, 5 }
 0x219   :  { %v8017_v33 = vpop.permute.xlu0 %3422  ;;  %v8044_v25 = vsel %vm730_vm0, %v401_v16, %v13069_v0  ;;  %v6239_v16 = vld [vmem:[%s13030_s0 + $0x280] sm:$0x1f] }
 0x21a   :  { %13446 = vst [vmem:[#allocation232_spill] sm:$0xff] %v8017_v33  ;;  %v8019_v13 = vpop.permute.xlu1 %2252  ;;  %3721 = vperm.xlu0 %6193, %v398_v27   ;;  %v6238_v27 = vld [vmem:[%s13030_s0 + $0x270] sm:$0xff]  ;;  %13451 = vst [vmem:[#allocation237_spill] sm:$0xff] %v8044_v25 }
 0x21b   :  { %13447 = vst [vmem:[#allocation233_spill] sm:$0xff] %v8019_v13  ;;  %2508 = vperm.xlu1 %6195, %v6237_v20   ;;  %v8049_v20 = vld [vmem:[%s13030_s0 + $0x2a1] sm:$0xff] }
 0x21c   :  { %v13072_v0 = vrot.slane %v8049_v20, 5 }
 0x21d   :  { %v8033_v33 = vpop.permute.xlu0 %3432 }
 0x21e   :  { %13449 = vst [vmem:[#allocation235_spill] sm:$0xff] %v8033_v33  ;;  %v8035_v13 = vpop.permute.xlu1 %2260  ;;  %3730 = vperm.xlu0 %6193, %v8027_v46  }
 0x21f   :  { %13450 = vst [vmem:[#allocation236_spill] sm:$0xff] %v8035_v13  ;;  %2516 = vperm.xlu1 %6195, %v6238_v27   ;;  %v402_v27 = vld [vmem:[%s13030_s0 + $0x2aa] sm:$0xff]  ;;  %v816_v13 = vrot.slane %v531_v51, 5 }
 0x221   :  { %v8054_v46 = vpop.permute.xlu0 %3441  ;;  %v8081_v29 = vsel %vm730_vm0, %v13072_v0, %v816_v13  ;;  %v535_v0 = vld [vmem:[%s13030_s0 + $0x2d9] sm:$0x3] }
 0x222   :  { %13452 = vst [vmem:[#allocation238_spill] sm:$0xff] %v8054_v46  ;;  %v8056_v33 = vpop.permute.xlu1 %2268  ;;  %3740 = vperm.xlu0 %6193, %v8044_v25   ;;  %v8069_v46 = vld [vmem:[%s13030_s0 + $0x2b9] sm:$0xff]  ;;  %13456 = vst [vmem:[#allocation242_spill] sm:$0xff] %v8081_v29 }
 0x223   :  { %13453 = vst [vmem:[#allocation239_spill] sm:$0xff] %v8056_v33  ;;  %2524 = vperm.xlu1 %6195, %v6239_v16   ;;  %v6240_v16 = vld [vmem:[%s13030_s0 + $0x290] sm:$0xff]  ;;  %v13074_v51 = vrot.slane %v8069_v46, 5 }
 0x225   :  { %v8071_v33 = vpop.permute.xlu0 %3450  ;;  %v8098_v13 = vsel %vm730_vm0, %v405_v4, %v13074_v51  ;;  %v6242_v4 = vld [vmem:[%s13030_s0 + $0x2b0] sm:$0x1f] }
 0x226   :  { %13454 = vst [vmem:[#allocation240_spill] sm:$0xff] %v8071_v33  ;;  %v8073_v25 = vpop.permute.xlu1 %2276  ;;  %3749 = vperm.xlu0 %6193, %v402_v27   ;;  %v6241_v27 = vld [vmem:[%s13030_s0 + $0x2a0] sm:$0xff]  ;;  %13459 = vst [vmem:[#allocation245_spill] sm:$0xff] %v8098_v13 }
 0x227   :  { %13455 = vst [vmem:[#allocation241_spill] sm:$0xff] %v8073_v25  ;;  %2532 = vperm.xlu1 %6195, %v6240_v16   ;;  %v8103_v16 = vld [vmem:[%s13030_s0 + $0x2d1] sm:$0xff] }
 0x228   :  { %v13076_v51 = vrot.slane %v8103_v16, 5 }
 0x229   :  { %v8087_v33 = vpop.permute.xlu0 %3460 }
 0x22a   :  { %13457 = vst [vmem:[#allocation243_spill] sm:$0xff] %v8087_v33  ;;  %v8089_v25 = vpop.permute.xlu1 %2284  ;;  %3758 = vperm.xlu0 %6193, %v8081_v29  }
 0x22b   :  { %13458 = vst [vmem:[#allocation244_spill] sm:$0xff] %v8089_v25  ;;  %2540 = vperm.xlu1 %6195, %v6241_v27   ;;  %v406_v27 = vld [vmem:[%s13030_s0 + $0x2da] sm:$0xff]  ;;  %v822_v25 = vrot.slane %v535_v0, 5 }
 0x22d   :  { %v8108_v29 = vpop.permute.xlu0 %3469  ;;  %v8135_v12 = vsel %vm730_vm0, %v13076_v51, %v822_v25  ;;  %v539_v51 = vld [vmem:[%s13030_s0 + $0x309] sm:$0x3] }
 0x22e   :  { %13460 = vst [vmem:[#allocation246_spill] sm:$0xff] %v8108_v29  ;;  %v8110_v33 = vpop.permute.xlu1 %2292  ;;  %3768 = vperm.xlu0 %6193, %v8098_v13   ;;  %v8123_v29 = vld [vmem:[%s13030_s0 + $0x2e9] sm:$0xff]  ;;  %13464 = vst [vmem:[#allocation250_spill] sm:$0xff] %v8135_v12 }
 0x22f   :  { %13461 = vst [vmem:[#allocation247_spill] sm:$0xff] %v8110_v33  ;;  %2548 = vperm.xlu1 %6195, %v6242_v4   ;;  %v6243_v4 = vld [vmem:[%s13030_s0 + $0x2c0] sm:$0xff]  ;;  %v13078_v0 = vrot.slane %v8123_v29, 5 }
 0x231   :  { %v8125_v33 = vpop.permute.xlu0 %3478  ;;  %v8152_v25 = vsel %vm730_vm0, %v409_v9, %v13078_v0  ;;  %v6245_v9 = vld [vmem:[%s13030_s0 + $0x2e0] sm:$0x1f] }
 0x232   :  { %13462 = vst [vmem:[#allocation248_spill] sm:$0xff] %v8125_v33  ;;  %v8127_v13 = vpop.permute.xlu1 %2300  ;;  %3777 = vperm.xlu0 %6193, %v406_v27   ;;  %v6244_v27 = vld [vmem:[%s13030_s0 + $0x2d0] sm:$0xff]  ;;  %13467 = vst [vmem:[#allocation253_spill] sm:$0xff] %v8152_v25 }
 0x233   :  { %13463 = vst [vmem:[#allocation249_spill] sm:$0xff] %v8127_v13  ;;  %2556 = vperm.xlu1 %6195, %v6243_v4   ;;  %v8157_v4 = vld [vmem:[%s13030_s0 + $0x301] sm:$0xff] }
 0x234   :  { %v13080_v0 = vrot.slane %v8157_v4, 5 }
 0x235   :  { %v8141_v33 = vpop.permute.xlu0 %3488 }
 0x236   :  { %13465 = vst [vmem:[#allocation251_spill] sm:$0xff] %v8141_v33  ;;  %v8143_v13 = vpop.permute.xlu1 %2308  ;;  %3786 = vperm.xlu0 %6193, %v8135_v12  }
 0x237   :  { %13466 = vst [vmem:[#allocation252_spill] sm:$0xff] %v8143_v13  ;;  %2564 = vperm.xlu1 %6195, %v6244_v27   ;;  %v410_v27 = vld [vmem:[%s13030_s0 + $0x30a] sm:$0xff]  ;;  %v828_v13 = vrot.slane %v539_v51, 5 }
 0x239   :  { %v8162_v12 = vpop.permute.xlu0 %3497  ;;  %v8189_v28 = vsel %vm730_vm0, %v13080_v0, %v828_v13  ;;  %v543_v0 = vld [vmem:[%s13030_s0 + $0x339] sm:$0x3] }
 0x23a   :  { %13468 = vst [vmem:[#allocation254_spill] sm:$0xff] %v8162_v12  ;;  %v8164_v33 = vpop.permute.xlu1 %2316  ;;  %3796 = vperm.xlu0 %6193, %v8152_v25   ;;  %v8177_v12 = vld [vmem:[%s13030_s0 + $0x319] sm:$0xff]  ;;  %13472 = vst [vmem:[#allocation258_spill] sm:$0xff] %v8189_v28 }
 0x23b   :  { %13469 = vst [vmem:[#allocation255_spill] sm:$0xff] %v8164_v33  ;;  %2572 = vperm.xlu1 %6195, %v6245_v9   ;;  %v6246_v9 = vld [vmem:[%s13030_s0 + $0x2f0] sm:$0xff]  ;;  %v13082_v51 = vrot.slane %v8177_v12, 5 }
 0x23d   :  { %v8179_v33 = vpop.permute.xlu0 %3506  ;;  %v8206_v13 = vsel %vm730_vm0, %v413_v8, %v13082_v51  ;;  %v6248_v8 = vld [vmem:[%s13030_s0 + $0x310] sm:$0x1f] }
 0x23e   :  { %13470 = vst [vmem:[#allocation256_spill] sm:$0xff] %v8179_v33  ;;  %v8181_v25 = vpop.permute.xlu1 %2324  ;;  %3805 = vperm.xlu0 %6193, %v410_v27   ;;  %v6247_v27 = vld [vmem:[%s13030_s0 + $0x300] sm:$0xff]  ;;  %13475 = vst [vmem:[#allocation261_spill] sm:$0xff] %v8206_v13 }
 0x23f   :  { %13471 = vst [vmem:[#allocation257_spill] sm:$0xff] %v8181_v25  ;;  %2580 = vperm.xlu1 %6195, %v6246_v9   ;;  %v8211_v9 = vld [vmem:[%s13030_s0 + $0x331] sm:$0xff] }
 0x240   :  { %v13085_v51 = vrot.slane %v8211_v9, 5 }
 0x241   :  { %v8195_v33 = vpop.permute.xlu0 %3516 }
 0x242   :  { %13473 = vst [vmem:[#allocation259_spill] sm:$0xff] %v8195_v33  ;;  %v8197_v25 = vpop.permute.xlu1 %2332  ;;  %3814 = vperm.xlu0 %6193, %v8189_v28  }
 0x243   :  { %13474 = vst [vmem:[#allocation260_spill] sm:$0xff] %v8197_v25  ;;  %2588 = vperm.xlu1 %6195, %v6247_v27   ;;  %v414_v27 = vld [vmem:[%s13030_s0 + $0x33a] sm:$0xff]  ;;  %v834_v25 = vrot.slane %v543_v0, 5 }
 0x245   :  { %v8216_v28 = vpop.permute.xlu0 %3525  ;;  %v8243_v41 = vsel %vm730_vm0, %v13085_v51, %v834_v25  ;;  %v547_v51 = vld [vmem:[%s13030_s0 + $0x369] sm:$0x3] }
 0x246   :  { %13476 = vst [vmem:[#allocation262_spill] sm:$0xff] %v8216_v28  ;;  %v8218_v33 = vpop.permute.xlu1 %2340  ;;  %3824 = vperm.xlu0 %6193, %v8206_v13   ;;  %v8231_v28 = vld [vmem:[%s13030_s0 + $0x349] sm:$0xff]  ;;  %13480 = vst [vmem:[#allocation266_spill] sm:$0xff] %v8243_v41 }
 0x247   :  { %13477 = vst [vmem:[#allocation263_spill] sm:$0xff] %v8218_v33  ;;  %2596 = vperm.xlu1 %6195, %v6248_v8   ;;  %v6249_v8 = vld [vmem:[%s13030_s0 + $0x320] sm:$0xff]  ;;  %v13087_v0 = vrot.slane %v8231_v28, 5 }
 0x249   :  { %v8233_v33 = vpop.permute.xlu0 %3534  ;;  %v8260_v25 = vsel %vm730_vm0, %v417_v5, %v13087_v0  ;;  %v6251_v5 = vld [vmem:[%s13030_s0 + $0x340] sm:$0x1f] }
 0x24a   :  { %13478 = vst [vmem:[#allocation264_spill] sm:$0xff] %v8233_v33  ;;  %v8235_v13 = vpop.permute.xlu1 %2348  ;;  %3833 = vperm.xlu0 %6193, %v414_v27   ;;  %v6250_v27 = vld [vmem:[%s13030_s0 + $0x330] sm:$0xff]  ;;  %13483 = vst [vmem:[#allocation269_spill] sm:$0xff] %v8260_v25 }
 0x24b   :  { %13479 = vst [vmem:[#allocation265_spill] sm:$0xff] %v8235_v13  ;;  %2604 = vperm.xlu1 %6195, %v6249_v8   ;;  %v8265_v8 = vld [vmem:[%s13030_s0 + $0x361] sm:$0xff] }
 0x24c   :  { %v13091_v0 = vrot.slane %v8265_v8, 5 }
 0x24d   :  { %v8249_v33 = vpop.permute.xlu0 %3544 }
 0x24e   :  { %13481 = vst [vmem:[#allocation267_spill] sm:$0xff] %v8249_v33  ;;  %v8251_v13 = vpop.permute.xlu1 %2356  ;;  %3842 = vperm.xlu0 %6193, %v8243_v41  }
 0x24f   :  { %13482 = vst [vmem:[#allocation268_spill] sm:$0xff] %v8251_v13  ;;  %2612 = vperm.xlu1 %6195, %v6250_v27   ;;  %v418_v27 = vld [vmem:[%s13030_s0 + $0x36a] sm:$0xff]  ;;  %v840_v13 = vrot.slane %v547_v51, 5 }
 0x251   :  { %v8270_v41 = vpop.permute.xlu0 %3553  ;;  %v8297_v37 = vsel %vm730_vm0, %v13091_v0, %v840_v13  ;;  %v551_v0 = vld [vmem:[%s13030_s0 + $0x399] sm:$0x3] }
 0x252   :  { %13484 = vst [vmem:[#allocation270_spill] sm:$0xff] %v8270_v41  ;;  %v8272_v33 = vpop.permute.xlu1 %2364  ;;  %3852 = vperm.xlu0 %6193, %v8260_v25   ;;  %v8285_v41 = vld [vmem:[%s13030_s0 + $0x379] sm:$0xff]  ;;  %13488 = vst [vmem:[#allocation274_spill] sm:$0xff] %v8297_v37 }
 0x253   :  { %13485 = vst [vmem:[#allocation271_spill] sm:$0xff] %v8272_v33  ;;  %2620 = vperm.xlu1 %6195, %v6251_v5   ;;  %v6252_v5 = vld [vmem:[%s13030_s0 + $0x350] sm:$0xff]  ;;  %v13093_v51 = vrot.slane %v8285_v41, 5 }
 0x255   :  { %v8287_v33 = vpop.permute.xlu0 %3562  ;;  %v8314_v13 = vsel %vm730_vm0, %v421_v49, %v13093_v51  ;;  %v6254_v49 = vld [vmem:[%s13030_s0 + $0x370] sm:$0x1f] }
 0x256   :  { %13486 = vst [vmem:[#allocation272_spill] sm:$0xff] %v8287_v33  ;;  %v8289_v25 = vpop.permute.xlu1 %2372  ;;  %3861 = vperm.xlu0 %6193, %v418_v27   ;;  %v6253_v27 = vld [vmem:[%s13030_s0 + $0x360] sm:$0xff]  ;;  %13491 = vst [vmem:[#allocation277_spill] sm:$0xff] %v8314_v13 }
 0x257   :  { %13487 = vst [vmem:[#allocation273_spill] sm:$0xff] %v8289_v25  ;;  %2628 = vperm.xlu1 %6195, %v6252_v5   ;;  %v8319_v5 = vld [vmem:[%s13030_s0 + $0x391] sm:$0xff] }
 0x258   :  { %v13097_v51 = vrot.slane %v8319_v5, 5 }
 0x259   :  { %v8303_v33 = vpop.permute.xlu0 %3572 }
 0x25a   :  { %13489 = vst [vmem:[#allocation275_spill] sm:$0xff] %v8303_v33  ;;  %v8305_v25 = vpop.permute.xlu1 %2380  ;;  %3870 = vperm.xlu0 %6193, %v8297_v37  }
 0x25b   :  { %13490 = vst [vmem:[#allocation276_spill] sm:$0xff] %v8305_v25  ;;  %2636 = vperm.xlu1 %6195, %v6253_v27   ;;  %v422_v27 = vld [vmem:[%s13030_s0 + $0x39a] sm:$0xff]  ;;  %v846_v25 = vrot.slane %v551_v0, 5 }
 0x25d   :  { %v8324_v37 = vpop.permute.xlu0 %3581  ;;  %v8351_v45 = vsel %vm730_vm0, %v13097_v51, %v846_v25  ;;  %v555_v51 = vld [vmem:[%s13030_s0 + $0x3c9] sm:$0x3] }
 0x25e   :  { %13492 = vst [vmem:[#allocation278_spill] sm:$0xff] %v8324_v37  ;;  %v8326_v33 = vpop.permute.xlu1 %2388  ;;  %3880 = vperm.xlu0 %6193, %v8314_v13   ;;  %v8339_v37 = vld [vmem:[%s13030_s0 + $0x3a9] sm:$0xff]  ;;  %13496 = vst [vmem:[#allocation282_spill] sm:$0xff] %v8351_v45 }
 0x25f   :  { %13493 = vst [vmem:[#allocation279_spill] sm:$0xff] %v8326_v33  ;;  %2644 = vperm.xlu1 %6195, %v6254_v49   ;;  %v6255_v49 = vld [vmem:[%s13030_s0 + $0x380] sm:$0xff]  ;;  %v13099_v0 = vrot.slane %v8339_v37, 5 }
 0x261   :  { %v8341_v33 = vpop.permute.xlu0 %3590  ;;  %v8368_v25 = vsel %vm730_vm0, %v425_v57, %v13099_v0  ;;  %v6257_v57 = vld [vmem:[%s13030_s0 + $0x3a0] sm:$0x1f] }
 0x262   :  { %13494 = vst [vmem:[#allocation280_spill] sm:$0xff] %v8341_v33  ;;  %v8343_v13 = vpop.permute.xlu1 %2396  ;;  %3889 = vperm.xlu0 %6193, %v422_v27   ;;  %v6256_v27 = vld [vmem:[%s13030_s0 + $0x390] sm:$0xff]  ;;  %13499 = vst [vmem:[#allocation285_spill] sm:$0xff] %v8368_v25 }
 0x263   :  { %13495 = vst [vmem:[#allocation281_spill] sm:$0xff] %v8343_v13  ;;  %2652 = vperm.xlu1 %6195, %v6255_v49   ;;  %v8373_v49 = vld [vmem:[%s13030_s0 + $0x3c1] sm:$0xff] }
 0x264   :  { %v13103_v0 = vrot.slane %v8373_v49, 5 }
 0x265   :  { %v8357_v33 = vpop.permute.xlu0 %3600 }
 0x266   :  { %13497 = vst [vmem:[#allocation283_spill] sm:$0xff] %v8357_v33  ;;  %v8359_v13 = vpop.permute.xlu1 %2404  ;;  %3898 = vperm.xlu0 %6193, %v8351_v45  }
 0x267   :  { %13498 = vst [vmem:[#allocation284_spill] sm:$0xff] %v8359_v13  ;;  %2660 = vperm.xlu1 %6195, %v6256_v27   ;;  %v426_v27 = vld [vmem:[%s13030_s0 + $0x3ca] sm:$0xff]  ;;  %v852_v13 = vrot.slane %v555_v51, 5 }
 0x269   :  { %v8378_v45 = vpop.permute.xlu0 %3609  ;;  %v8405_v53 = vsel %vm730_vm0, %v13103_v0, %v852_v13  ;;  %v559_v0 = vld [vmem:[%s13030_s0 + $0x3f9] sm:$0x3] }
 0x26a   :  { %13500 = vst [vmem:[#allocation286_spill] sm:$0xff] %v8378_v45  ;;  %v8380_v33 = vpop.permute.xlu1 %2412  ;;  %3908 = vperm.xlu0 %6193, %v8368_v25   ;;  %v8393_v45 = vld [vmem:[%s13030_s0 + $0x3d9] sm:$0xff]  ;;  %13504 = vst [vmem:[#allocation290_spill] sm:$0xff] %v8405_v53 }
 0x26b   :  { %13501 = vst [vmem:[#allocation287_spill] sm:$0xff] %v8380_v33  ;;  %2668 = vperm.xlu1 %6195, %v6257_v57   ;;  %v6258_v57 = vld [vmem:[%s13030_s0 + $0x3b0] sm:$0xff]  ;;  %v13105_v51 = vrot.slane %v8393_v45, 5 }
 0x26d   :  { %v8395_v33 = vpop.permute.xlu0 %3618  ;;  %v8422_v13 = vsel %vm730_vm0, %v429_v2, %v13105_v51  ;;  %v6260_v2 = vld [vmem:[%s13030_s0 + $0x3d0] sm:$0x1f] }
 0x26e   :  { %13502 = vst [vmem:[#allocation288_spill] sm:$0xff] %v8395_v33  ;;  %v8397_v25 = vpop.permute.xlu1 %2420  ;;  %3917 = vperm.xlu0 %6193, %v426_v27   ;;  %v6259_v27 = vld [vmem:[%s13030_s0 + $0x3c0] sm:$0xff]  ;;  %13507 = vst [vmem:[#allocation293_spill] sm:$0xff] %v8422_v13 }
 0x26f   :  { %13503 = vst [vmem:[#allocation289_spill] sm:$0xff] %v8397_v25  ;;  %2676 = vperm.xlu1 %6195, %v6258_v57   ;;  %v8427_v57 = vld [vmem:[%s13030_s0 + $0x3f1] sm:$0xff] }
 0x270   :  { %v13109_v51 = vrot.slane %v8427_v57, 5 }
 0x271   :  { %v8411_v33 = vpop.permute.xlu0 %3628 }
 0x272   :  { %13505 = vst [vmem:[#allocation291_spill] sm:$0xff] %v8411_v33  ;;  %v8413_v25 = vpop.permute.xlu1 %2428  ;;  %3926 = vperm.xlu0 %6193, %v8405_v53  }
 0x273   :  { %13506 = vst [vmem:[#allocation292_spill] sm:$0xff] %v8413_v25  ;;  %2684 = vperm.xlu1 %6195, %v6259_v27   ;;  %v430_v27 = vld [vmem:[%s13030_s0 + $0x3fa] sm:$0xff]  ;;  %v858_v25 = vrot.slane %v559_v0, 5 }
 0x275   :  { %v8432_v53 = vpop.permute.xlu0 %3637  ;;  %v8459_v61 = vsel %vm730_vm0, %v13109_v51, %v858_v25  ;;  %v563_v51 = vld [vmem:[%s13030_s0 + $0x429] sm:$0x3] }
 0x276   :  { %13508 = vst [vmem:[#allocation294_spill] sm:$0xff] %v8432_v53  ;;  %v8434_v33 = vpop.permute.xlu1 %2436  ;;  %3936 = vperm.xlu0 %6193, %v8422_v13   ;;  %v8447_v53 = vld [vmem:[%s13030_s0 + $0x409] sm:$0xff]  ;;  %13512 = vst [vmem:[#allocation298_spill] sm:$0xff] %v8459_v61 }
 0x277   :  { %13509 = vst [vmem:[#allocation295_spill] sm:$0xff] %v8434_v33  ;;  %2692 = vperm.xlu1 %6195, %v6260_v2   ;;  %v6261_v2 = vld [vmem:[%s13030_s0 + $0x3e0] sm:$0xff]  ;;  %v13111_v0 = vrot.slane %v8447_v53, 5 }
 0x279   :  { %v8449_v33 = vpop.permute.xlu0 %3646  ;;  %v8476_v25 = vsel %vm730_vm0, %v433_v18, %v13111_v0  ;;  %v6263_v18 = vld [vmem:[%s13030_s0 + $0x400] sm:$0x1f] }
 0x27a   :  { %13510 = vst [vmem:[#allocation296_spill] sm:$0xff] %v8449_v33  ;;  %v8451_v13 = vpop.permute.xlu1 %2444  ;;  %3945 = vperm.xlu0 %6193, %v430_v27   ;;  %v6262_v27 = vld [vmem:[%s13030_s0 + $0x3f0] sm:$0xff]  ;;  %13515 = vst [vmem:[#allocation301_spill] sm:$0xff] %v8476_v25 }
 0x27b   :  { %13511 = vst [vmem:[#allocation297_spill] sm:$0xff] %v8451_v13  ;;  %2700 = vperm.xlu1 %6195, %v6261_v2   ;;  %v8481_v2 = vld [vmem:[%s13030_s0 + $0x421] sm:$0xff] }
 0x27c   :  { %v13115_v0 = vrot.slane %v8481_v2, 5 }
 0x27d   :  { %v8465_v33 = vpop.permute.xlu0 %3656 }
 0x27e   :  { %13513 = vst [vmem:[#allocation299_spill] sm:$0xff] %v8465_v33  ;;  %v8467_v13 = vpop.permute.xlu1 %2452  ;;  %3954 = vperm.xlu0 %6193, %v8459_v61  }
 0x27f   :  { %13514 = vst [vmem:[#allocation300_spill] sm:$0xff] %v8467_v13  ;;  %2708 = vperm.xlu1 %6195, %v6262_v27   ;;  %v434_v27 = vld [vmem:[%s13030_s0 + $0x42a] sm:$0xff]  ;;  %v864_v13 = vrot.slane %v563_v51, 5 }
 0x281   :  { %v8486_v61 = vpop.permute.xlu0 %3665  ;;  %v8513_v10 = vsel %vm730_vm0, %v13115_v0, %v864_v13  ;;  %v567_v0 = vld [vmem:[%s13030_s0 + $0x459] sm:$0x3] }
 0x282   :  { %13516 = vst [vmem:[#allocation302_spill] sm:$0xff] %v8486_v61  ;;  %v8488_v33 = vpop.permute.xlu1 %2460  ;;  %3964 = vperm.xlu0 %6193, %v8476_v25   ;;  %v8501_v61 = vld [vmem:[%s13030_s0 + $0x439] sm:$0xff]  ;;  %13520 = vst [vmem:[#allocation306_spill] sm:$0xff] %v8513_v10 }
 0x283   :  { %13517 = vst [vmem:[#allocation303_spill] sm:$0xff] %v8488_v33  ;;  %2716 = vperm.xlu1 %6195, %v6263_v18   ;;  %v6264_v18 = vld [vmem:[%s13030_s0 + $0x410] sm:$0xff]  ;;  %v13117_v51 = vrot.slane %v8501_v61, 5 }
 0x285   :  { %v8503_v33 = vpop.permute.xlu0 %3674  ;;  %v8530_v13 = vsel %vm730_vm0, %v437_v34, %v13117_v51  ;;  %v6266_v34 = vld [vmem:[%s13030_s0 + $0x430] sm:$0x1f] }
 0x286   :  { %13518 = vst [vmem:[#allocation304_spill] sm:$0xff] %v8503_v33  ;;  %v8505_v25 = vpop.permute.xlu1 %2468  ;;  %3973 = vperm.xlu0 %6193, %v434_v27   ;;  %v6265_v27 = vld [vmem:[%s13030_s0 + $0x420] sm:$0xff]  ;;  %13523 = vst [vmem:[#allocation309_spill] sm:$0xff] %v8530_v13 }
 0x287   :  { %13519 = vst [vmem:[#allocation305_spill] sm:$0xff] %v8505_v25  ;;  %2724 = vperm.xlu1 %6195, %v6264_v18   ;;  %v8535_v18 = vld [vmem:[%s13030_s0 + $0x451] sm:$0xff] }
 0x288   :  { %v13121_v51 = vrot.slane %v8535_v18, 5 }
 0x289   :  { %v8519_v33 = vpop.permute.xlu0 %3684 }
 0x28a   :  { %13521 = vst [vmem:[#allocation307_spill] sm:$0xff] %v8519_v33  ;;  %v8521_v25 = vpop.permute.xlu1 %2476  ;;  %3982 = vperm.xlu0 %6193, %v8513_v10  }
 0x28b   :  { %13522 = vst [vmem:[#allocation308_spill] sm:$0xff] %v8521_v25  ;;  %2732 = vperm.xlu1 %6195, %v6265_v27   ;;  %v438_v27 = vld [vmem:[%s13030_s0 + $0x45a] sm:$0xff]  ;;  %v870_v25 = vrot.slane %v567_v0, 5 }
 0x28d   :  { %v8540_v10 = vpop.permute.xlu0 %3693  ;;  %v8567_v26 = vsel %vm730_vm0, %v13121_v51, %v870_v25  ;;  %v571_v51 = vld [vmem:[%s13030_s0 + $0x489] sm:$0x3] }
 0x28e   :  { %13524 = vst [vmem:[#allocation310_spill] sm:$0xff] %v8540_v10  ;;  %v8542_v33 = vpop.permute.xlu1 %2484  ;;  %3992 = vperm.xlu0 %6193, %v8530_v13   ;;  %v8555_v10 = vld [vmem:[%s13030_s0 + $0x469] sm:$0xff]  ;;  %13528 = vst [vmem:[#allocation314_spill] sm:$0xff] %v8567_v26 }
 0x28f   :  { %13525 = vst [vmem:[#allocation311_spill] sm:$0xff] %v8542_v33  ;;  %2740 = vperm.xlu1 %6195, %v6266_v34   ;;  %v6267_v34 = vld [vmem:[%s13030_s0 + $0x440] sm:$0xff]  ;;  %v13123_v0 = vrot.slane %v8555_v10, 5 }
 0x291   :  { %v8557_v33 = vpop.permute.xlu0 %3702  ;;  %v8584_v25 = vsel %vm730_vm0, %v441_v50, %v13123_v0  ;;  %v6269_v50 = vld [vmem:[%s13030_s0 + $0x460] sm:$0x1f] }
 0x292   :  { %13526 = vst [vmem:[#allocation312_spill] sm:$0xff] %v8557_v33  ;;  %v8559_v13 = vpop.permute.xlu1 %2492  ;;  %4001 = vperm.xlu0 %6193, %v438_v27   ;;  %v6268_v27 = vld [vmem:[%s13030_s0 + $0x450] sm:$0xff]  ;;  %13531 = vst [vmem:[#allocation317_spill] sm:$0xff] %v8584_v25 }
 0x293   :  { %13527 = vst [vmem:[#allocation313_spill] sm:$0xff] %v8559_v13  ;;  %2748 = vperm.xlu1 %6195, %v6267_v34   ;;  %v8589_v34 = vld [vmem:[%s13030_s0 + $0x481] sm:$0xff] }
 0x294   :  { %v13127_v0 = vrot.slane %v8589_v34, 5 }
 0x295   :  { %v8573_v33 = vpop.permute.xlu0 %3712 }
 0x296   :  { %13529 = vst [vmem:[#allocation315_spill] sm:$0xff] %v8573_v33  ;;  %v8575_v13 = vpop.permute.xlu1 %2500  ;;  %4010 = vperm.xlu0 %6193, %v8567_v26  }
 0x297   :  { %13530 = vst [vmem:[#allocation316_spill] sm:$0xff] %v8575_v13  ;;  %2756 = vperm.xlu1 %6195, %v6268_v27   ;;  %v442_v27 = vld [vmem:[%s13030_s0 + $0x48a] sm:$0xff]  ;;  %v876_v13 = vrot.slane %v571_v51, 5 }
 0x299   :  { %v8594_v26 = vpop.permute.xlu0 %3721  ;;  %v8621_v42 = vsel %vm730_vm0, %v13127_v0, %v876_v13  ;;  %v575_v0 = vld [vmem:[%s13030_s0 + $0x4b9] sm:$0x3] }
 0x29a   :  { %13532 = vst [vmem:[#allocation318_spill] sm:$0xff] %v8594_v26  ;;  %v8596_v33 = vpop.permute.xlu1 %2508  ;;  %4020 = vperm.xlu0 %6193, %v8584_v25   ;;  %v8609_v26 = vld [vmem:[%s13030_s0 + $0x499] sm:$0xff]  ;;  %13536 = vst [vmem:[#allocation322_spill] sm:$0xff] %v8621_v42 }
 0x29b   :  { %13533 = vst [vmem:[#allocation319_spill] sm:$0xff] %v8596_v33  ;;  %2764 = vperm.xlu1 %6195, %v6269_v50   ;;  %v6270_v50 = vld [vmem:[%s13030_s0 + $0x470] sm:$0xff]  ;;  %v13129_v51 = vrot.slane %v8609_v26, 5 }
 0x29d   :  { %v8611_v33 = vpop.permute.xlu0 %3730  ;;  %v8638_v13 = vsel %vm730_vm0, %v445_v3, %v13129_v51  ;;  %v6272_v3 = vld [vmem:[%s13030_s0 + $0x490] sm:$0x1f] }
 0x29e   :  { %13534 = vst [vmem:[#allocation320_spill] sm:$0xff] %v8611_v33  ;;  %v8613_v25 = vpop.permute.xlu1 %2516  ;;  %4029 = vperm.xlu0 %6193, %v442_v27   ;;  %v6271_v27 = vld [vmem:[%s13030_s0 + $0x480] sm:$0xff]  ;;  %13539 = vst [vmem:[#allocation325_spill] sm:$0xff] %v8638_v13 }
 0x29f   :  { %13535 = vst [vmem:[#allocation321_spill] sm:$0xff] %v8613_v25  ;;  %2772 = vperm.xlu1 %6195, %v6270_v50   ;;  %v8643_v50 = vld [vmem:[%s13030_s0 + $0x4b1] sm:$0xff] }
 0x2a0   :  { %v13133_v51 = vrot.slane %v8643_v50, 5 }
 0x2a1   :  { %v8627_v33 = vpop.permute.xlu0 %3740 }
 0x2a2   :  { %13537 = vst [vmem:[#allocation323_spill] sm:$0xff] %v8627_v33  ;;  %v8629_v25 = vpop.permute.xlu1 %2524  ;;  %4038 = vperm.xlu0 %6193, %v8621_v42  }
 0x2a3   :  { %13538 = vst [vmem:[#allocation324_spill] sm:$0xff] %v8629_v25  ;;  %2780 = vperm.xlu1 %6195, %v6271_v27   ;;  %v446_v27 = vld [vmem:[%s13030_s0 + $0x4ba] sm:$0xff]  ;;  %v882_v25 = vrot.slane %v575_v0, 5 }
 0x2a5   :  { %v8648_v42 = vpop.permute.xlu0 %3749  ;;  %v8675_v58 = vsel %vm730_vm0, %v13133_v51, %v882_v25  ;;  %v579_v51 = vld [vmem:[%s13030_s0 + $0x4e9] sm:$0x3] }
 0x2a6   :  { %13540 = vst [vmem:[#allocation326_spill] sm:$0xff] %v8648_v42  ;;  %v8650_v33 = vpop.permute.xlu1 %2532  ;;  %4048 = vperm.xlu0 %6193, %v8638_v13   ;;  %v8663_v42 = vld [vmem:[%s13030_s0 + $0x4c9] sm:$0xff]  ;;  %13544 = vst [vmem:[#allocation330_spill] sm:$0xff] %v8675_v58 }
 0x2a7   :  { %13541 = vst [vmem:[#allocation327_spill] sm:$0xff] %v8650_v33  ;;  %2788 = vperm.xlu1 %6195, %v6272_v3   ;;  %v6273_v3 = vld [vmem:[%s13030_s0 + $0x4a0] sm:$0xff]  ;;  %v13135_v0 = vrot.slane %v8663_v42, 5 }
 0x2a9   :  { %v8665_v33 = vpop.permute.xlu0 %3758  ;;  %v8692_v25 = vsel %vm730_vm0, %v449_v59, %v13135_v0  ;;  %v6275_v59 = vld [vmem:[%s13030_s0 + $0x4c0] sm:$0x1f] }
 0x2aa   :  { %13542 = vst [vmem:[#allocation328_spill] sm:$0xff] %v8665_v33  ;;  %v8667_v13 = vpop.permute.xlu1 %2540  ;;  %4057 = vperm.xlu0 %6193, %v446_v27   ;;  %v6274_v27 = vld [vmem:[%s13030_s0 + $0x4b0] sm:$0xff]  ;;  %13547 = vst [vmem:[#allocation333_spill] sm:$0xff] %v8692_v25 }
 0x2ab   :  { %13543 = vst [vmem:[#allocation329_spill] sm:$0xff] %v8667_v13  ;;  %2796 = vperm.xlu1 %6195, %v6273_v3   ;;  %v8697_v3 = vld [vmem:[%s13030_s0 + $0x4e1] sm:$0xff] }
 0x2ac   :  { %v13139_v0 = vrot.slane %v8697_v3, 5 }
 0x2ad   :  { %v8681_v33 = vpop.permute.xlu0 %3768 }
 0x2ae   :  { %13545 = vst [vmem:[#allocation331_spill] sm:$0xff] %v8681_v33  ;;  %v8683_v13 = vpop.permute.xlu1 %2548  ;;  %4066 = vperm.xlu0 %6193, %v8675_v58  }
 0x2af   :  { %13546 = vst [vmem:[#allocation332_spill] sm:$0xff] %v8683_v13  ;;  %2804 = vperm.xlu1 %6195, %v6274_v27   ;;  %v450_v27 = vld [vmem:[%s13030_s0 + $0x4ea] sm:$0xff]  ;;  %v888_v13 = vrot.slane %v579_v51, 5 }
 0x2b1   :  { %v8702_v58 = vpop.permute.xlu0 %3777  ;;  %v8729_v19 = vsel %vm730_vm0, %v13139_v0, %v888_v13  ;;  %v583_v0 = vld [vmem:[%s13030_s0 + $0x519] sm:$0x3] }
 0x2b2   :  { %13548 = vst [vmem:[#allocation334_spill] sm:$0xff] %v8702_v58  ;;  %v8704_v33 = vpop.permute.xlu1 %2556  ;;  %4076 = vperm.xlu0 %6193, %v8692_v25   ;;  %v8717_v58 = vld [vmem:[%s13030_s0 + $0x4f9] sm:$0xff]  ;;  %13553 = vst [vmem:[#allocation339_spill] sm:$0xff] %v8729_v19 }
 0x2b3   :  { %13549 = vst [vmem:[#allocation335_spill] sm:$0xff] %v8704_v33  ;;  %2812 = vperm.xlu1 %6195, %v6275_v59   ;;  %13550 = vst [vmem:[#allocation336_spill] sm:$0xff] %v8717_v58  ;;  %v6276_v59 = vld [vmem:[%s13030_s0 + $0x4d0] sm:$0xff]  ;;  %v13141_v51 = vrot.slane %v8717_v58, 5  ;;  %v457_v58 = vld [vmem:[%s13030_s0 + $0x53a] sm:$0x7] }
 0x2b5   :  { %v8719_v33 = vpop.permute.xlu0 %3786  ;;  %v8746_v13 = vsel %vm730_vm0, %v453_v43, %v13141_v51  ;;  %v6278_v43 = vld [vmem:[%s13030_s0 + $0x4f0] sm:$0x1f] }
 0x2b6   :  { %13551 = vst [vmem:[#allocation337_spill] sm:$0xff] %v8719_v33  ;;  %v8721_v25 = vpop.permute.xlu1 %2564  ;;  %4085 = vperm.xlu0 %6193, %v450_v27   ;;  %v6277_v27 = vld [vmem:[%s13030_s0 + $0x4e0] sm:$0xff]  ;;  %13556 = vst [vmem:[#allocation342_spill] sm:$0xff] %v8746_v13 }
 0x2b7   :  { %13552 = vst [vmem:[#allocation338_spill] sm:$0xff] %v8721_v25  ;;  %2820 = vperm.xlu1 %6195, %v6276_v59   ;;  %v8751_v59 = vld [vmem:[%s13030_s0 + $0x511] sm:$0xff] }
 0x2b8   :  { %13557 = vst [vmem:[#allocation343_spill] sm:$0xff] %v8751_v59  ;;  %v13145_v51 = vrot.slane %v8751_v59, 5  ;;  %v461_v59 = vld [vmem:[%s13030_s0 + $0x56a] sm:$0x7] }
 0x2b9   :  { %v8735_v33 = vpop.permute.xlu0 %3796 }
 0x2ba   :  { %13554 = vst [vmem:[#allocation340_spill] sm:$0xff] %v8735_v33  ;;  %v8737_v25 = vpop.permute.xlu1 %2572  ;;  %4094 = vperm.xlu0 %6193, %v8729_v19  }
 0x2bb   :  { %13555 = vst [vmem:[#allocation341_spill] sm:$0xff] %v8737_v25  ;;  %2828 = vperm.xlu1 %6195, %v6277_v27   ;;  %v454_v27 = vld [vmem:[%s13030_s0 + $0x51a] sm:$0xff]  ;;  %v894_v25 = vrot.slane %v583_v0, 5 }
 0x2bd   :  { %v8756_v19 = vpop.permute.xlu0 %3805  ;;  %v8783_v6 = vsel %vm730_vm0, %v13145_v51, %v894_v25  ;;  %v587_v51 = vld [vmem:[%s13030_s0 + $0x549] sm:$0x3] }
 0x2be   :  { %13558 = vst [vmem:[#allocation344_spill] sm:$0xff] %v8756_v19  ;;  %v8758_v33 = vpop.permute.xlu1 %2580  ;;  %4104 = vperm.xlu0 %6193, %v8746_v13   ;;  %v8771_v19 = vld [vmem:[%s13030_s0 + $0x529] sm:$0xff]  ;;  %13563 = vst [vmem:[#allocation349_spill] sm:$0xff] %v8783_v6 }
 0x2bf   :  { %13559 = vst [vmem:[#allocation345_spill] sm:$0xff] %v8758_v33  ;;  %2836 = vperm.xlu1 %6195, %v6278_v43   ;;  %13560 = vst [vmem:[#allocation346_spill] sm:$0xff] %v8771_v19  ;;  %v6279_v43 = vld [vmem:[%s13030_s0 + $0x500] sm:$0xff]  ;;  %v13147_v0 = vrot.slane %v8771_v19, 5 }
 0x2c1   :  { %v8773_v33 = vpop.permute.xlu0 %3814  ;;  %v8800_v25 = vsel %vm730_vm0, %v457_v58, %v13147_v0  ;;  %v6281_v58 = vld [vmem:[%s13030_s0 + $0x520] sm:$0x1f] }
 0x2c2   :  { %13561 = vst [vmem:[#allocation347_spill] sm:$0xff] %v8773_v33  ;;  %v8775_v13 = vpop.permute.xlu1 %2588  ;;  %4113 = vperm.xlu0 %6193, %v454_v27   ;;  %v6280_v27 = vld [vmem:[%s13030_s0 + $0x510] sm:$0xff]  ;;  %13566 = vst [vmem:[#allocation352_spill] sm:$0xff] %v8800_v25 }
 0x2c3   :  { %13562 = vst [vmem:[#allocation348_spill] sm:$0xff] %v8775_v13  ;;  %2844 = vperm.xlu1 %6195, %v6279_v43   ;;  %v8805_v43 = vld [vmem:[%s13030_s0 + $0x541] sm:$0xff] }
 0x2c4   :  { %13567 = vst [vmem:[#allocation353_spill] sm:$0xff] %v8805_v43  ;;  %v13151_v0 = vrot.slane %v8805_v43, 5  ;;  %v465_v43 = vld [vmem:[%s13030_s0 + $0x59a] sm:$0x7] }
 0x2c5   :  { %v8789_v33 = vpop.permute.xlu0 %3824 }
 0x2c6   :  { %13564 = vst [vmem:[#allocation350_spill] sm:$0xff] %v8789_v33  ;;  %v8791_v13 = vpop.permute.xlu1 %2596  ;;  %4122 = vperm.xlu0 %6193, %v8783_v6  }
 0x2c7   :  { %13565 = vst [vmem:[#allocation351_spill] sm:$0xff] %v8791_v13  ;;  %2852 = vperm.xlu1 %6195, %v6280_v27   ;;  %v458_v27 = vld [vmem:[%s13030_s0 + $0x54a] sm:$0xff]  ;;  %v900_v13 = vrot.slane %v587_v51, 5 }
 0x2c9   :  { %v8810_v6 = vpop.permute.xlu0 %3833  ;;  %v8837_v19 = vsel %vm730_vm0, %v13151_v0, %v900_v13  ;;  %v591_v0 = vld [vmem:[%s13030_s0 + $0x579] sm:$0x3] }
 0x2ca   :  { %13568 = vst [vmem:[#allocation354_spill] sm:$0xff] %v8810_v6  ;;  %v8812_v33 = vpop.permute.xlu1 %2604  ;;  %4132 = vperm.xlu0 %6193, %v8800_v25   ;;  %v8825_v6 = vld [vmem:[%s13030_s0 + $0x559] sm:$0xff]  ;;  %13573 = vst [vmem:[#allocation359_spill] sm:$0xff] %v8837_v19 }
 0x2cb   :  { %13569 = vst [vmem:[#allocation355_spill] sm:$0xff] %v8812_v33  ;;  %2860 = vperm.xlu1 %6195, %v6281_v58   ;;  %13570 = vst [vmem:[#allocation356_spill] sm:$0xff] %v8825_v6  ;;  %v6282_v58 = vld [vmem:[%s13030_s0 + $0x530] sm:$0xff]  ;;  %v13153_v51 = vrot.slane %v8825_v6, 5 }
 0x2cd   :  { %v8827_v33 = vpop.permute.xlu0 %3842  ;;  %v8854_v13 = vsel %vm730_vm0, %v461_v59, %v13153_v51  ;;  %v6284_v59 = vld [vmem:[%s13030_s0 + $0x550] sm:$0x1f] }
 0x2ce   :  { %13571 = vst [vmem:[#allocation357_spill] sm:$0xff] %v8827_v33  ;;  %v8829_v25 = vpop.permute.xlu1 %2612  ;;  %4141 = vperm.xlu0 %6193, %v458_v27   ;;  %v6283_v27 = vld [vmem:[%s13030_s0 + $0x540] sm:$0xff]  ;;  %13576 = vst [vmem:[#allocation362_spill] sm:$0xff] %v8854_v13 }
 0x2cf   :  { %13572 = vst [vmem:[#allocation358_spill] sm:$0xff] %v8829_v25  ;;  %2868 = vperm.xlu1 %6195, %v6282_v58   ;;  %v8859_v58 = vld [vmem:[%s13030_s0 + $0x571] sm:$0xff] }
 0x2d0   :  { %13577 = vst [vmem:[#allocation363_spill] sm:$0xff] %v8859_v58  ;;  %v13157_v51 = vrot.slane %v8859_v58, 5  ;;  %v469_v58 = vld [vmem:[%s13030_s0 + $0x5ca] sm:$0x7] }
 0x2d1   :  { %v8843_v33 = vpop.permute.xlu0 %3852 }
 0x2d2   :  { %13574 = vst [vmem:[#allocation360_spill] sm:$0xff] %v8843_v33  ;;  %v8845_v25 = vpop.permute.xlu1 %2620  ;;  %4150 = vperm.xlu0 %6193, %v8837_v19  }
 0x2d3   :  { %13575 = vst [vmem:[#allocation361_spill] sm:$0xff] %v8845_v25  ;;  %2876 = vperm.xlu1 %6195, %v6283_v27   ;;  %v462_v27 = vld [vmem:[%s13030_s0 + $0x57a] sm:$0xff]  ;;  %v906_v25 = vrot.slane %v591_v0, 5 }
 0x2d5   :  { %v8864_v19 = vpop.permute.xlu0 %3861  ;;  %v8891_v6 = vsel %vm730_vm0, %v13157_v51, %v906_v25  ;;  %v595_v51 = vld [vmem:[%s13030_s0 + $0x5a9] sm:$0x3] }
 0x2d6   :  { %13578 = vst [vmem:[#allocation364_spill] sm:$0xff] %v8864_v19  ;;  %v8866_v33 = vpop.permute.xlu1 %2628  ;;  %4160 = vperm.xlu0 %6193, %v8854_v13   ;;  %v8879_v19 = vld [vmem:[%s13030_s0 + $0x589] sm:$0xff]  ;;  %13583 = vst [vmem:[#allocation369_spill] sm:$0xff] %v8891_v6 }
 0x2d7   :  { %13579 = vst [vmem:[#allocation365_spill] sm:$0xff] %v8866_v33  ;;  %2884 = vperm.xlu1 %6195, %v6284_v59   ;;  %13580 = vst [vmem:[#allocation366_spill] sm:$0xff] %v8879_v19  ;;  %v6285_v59 = vld [vmem:[%s13030_s0 + $0x560] sm:$0xff]  ;;  %v13159_v0 = vrot.slane %v8879_v19, 5 }
 0x2d9   :  { %v8881_v33 = vpop.permute.xlu0 %3870  ;;  %v8908_v25 = vsel %vm730_vm0, %v465_v43, %v13159_v0  ;;  %v6287_v43 = vld [vmem:[%s13030_s0 + $0x580] sm:$0x1f] }
 0x2da   :  { %13581 = vst [vmem:[#allocation367_spill] sm:$0xff] %v8881_v33  ;;  %v8883_v13 = vpop.permute.xlu1 %2636  ;;  %4169 = vperm.xlu0 %6193, %v462_v27   ;;  %v6286_v27 = vld [vmem:[%s13030_s0 + $0x570] sm:$0xff]  ;;  %13586 = vst [vmem:[#allocation372_spill] sm:$0xff] %v8908_v25 }
 0x2db   :  { %13582 = vst [vmem:[#allocation368_spill] sm:$0xff] %v8883_v13  ;;  %2892 = vperm.xlu1 %6195, %v6285_v59   ;;  %v8913_v59 = vld [vmem:[%s13030_s0 + $0x5a1] sm:$0xff] }
 0x2dc   :  { %13587 = vst [vmem:[#allocation373_spill] sm:$0xff] %v8913_v59  ;;  %v13163_v0 = vrot.slane %v8913_v59, 5  ;;  %v473_v59 = vld [vmem:[%s13030_s0 + $0x5fa] sm:$0x7] }
 0x2dd   :  { %v8897_v33 = vpop.permute.xlu0 %3880 }
 0x2de   :  { %13584 = vst [vmem:[#allocation370_spill] sm:$0xff] %v8897_v33  ;;  %v8899_v13 = vpop.permute.xlu1 %2644  ;;  %4178 = vperm.xlu0 %6193, %v8891_v6  }
 0x2df   :  { %13585 = vst [vmem:[#allocation371_spill] sm:$0xff] %v8899_v13  ;;  %2900 = vperm.xlu1 %6195, %v6286_v27   ;;  %v466_v27 = vld [vmem:[%s13030_s0 + $0x5aa] sm:$0xff]  ;;  %v912_v13 = vrot.slane %v595_v51, 5 }
 0x2e1   :  { %v8918_v6 = vpop.permute.xlu0 %3889  ;;  %v8945_v19 = vsel %vm730_vm0, %v13163_v0, %v912_v13  ;;  %v599_v0 = vld [vmem:[%s13030_s0 + $0x5d9] sm:$0x3] }
 0x2e2   :  { %13588 = vst [vmem:[#allocation374_spill] sm:$0xff] %v8918_v6  ;;  %v8920_v33 = vpop.permute.xlu1 %2652  ;;  %4188 = vperm.xlu0 %6193, %v8908_v25   ;;  %v8933_v6 = vld [vmem:[%s13030_s0 + $0x5b9] sm:$0xff]  ;;  %13593 = vst [vmem:[#allocation379_spill] sm:$0xff] %v8945_v19 }
 0x2e3   :  { %13589 = vst [vmem:[#allocation375_spill] sm:$0xff] %v8920_v33  ;;  %2908 = vperm.xlu1 %6195, %v6287_v43   ;;  %13590 = vst [vmem:[#allocation376_spill] sm:$0xff] %v8933_v6  ;;  %v6288_v43 = vld [vmem:[%s13030_s0 + $0x590] sm:$0xff]  ;;  %v13165_v51 = vrot.slane %v8933_v6, 5 }
 0x2e5   :  { %v8935_v33 = vpop.permute.xlu0 %3898  ;;  %v8962_v13 = vsel %vm730_vm0, %v469_v58, %v13165_v51  ;;  %v6290_v58 = vld [vmem:[%s13030_s0 + $0x5b0] sm:$0x1f] }
 0x2e6   :  { %13591 = vst [vmem:[#allocation377_spill] sm:$0xff] %v8935_v33  ;;  %v8937_v25 = vpop.permute.xlu1 %2660  ;;  %4197 = vperm.xlu0 %6193, %v466_v27   ;;  %v6289_v27 = vld [vmem:[%s13030_s0 + $0x5a0] sm:$0xff]  ;;  %13596 = vst [vmem:[#allocation382_spill] sm:$0xff] %v8962_v13 }
 0x2e7   :  { %13592 = vst [vmem:[#allocation378_spill] sm:$0xff] %v8937_v25  ;;  %2916 = vperm.xlu1 %6195, %v6288_v43   ;;  %v8967_v43 = vld [vmem:[%s13030_s0 + $0x5d1] sm:$0xff] }
 0x2e8   :  { %v13169_v51 = vrot.slane %v8967_v43, 5 }
 0x2e9   :  { %v8951_v33 = vpop.permute.xlu0 %3908 }
 0x2ea   :  { %13594 = vst [vmem:[#allocation380_spill] sm:$0xff] %v8951_v33  ;;  %v8953_v25 = vpop.permute.xlu1 %2668  ;;  %4206 = vperm.xlu0 %6193, %v8945_v19  }
 0x2eb   :  { %13595 = vst [vmem:[#allocation381_spill] sm:$0xff] %v8953_v25  ;;  %2924 = vperm.xlu1 %6195, %v6289_v27   ;;  %v470_v27 = vld [vmem:[%s13030_s0 + $0x5da] sm:$0xff]  ;;  %v918_v25 = vrot.slane %v599_v0, 5 }
 0x2ed   :  { %v8972_v19 = vpop.permute.xlu0 %3917  ;;  %v8999_v6 = vsel %vm730_vm0, %v13169_v51, %v918_v25 }
 0x2ee   :  { %13597 = vst [vmem:[#allocation383_spill] sm:$0xff] %v8972_v19  ;;  %v8974_v33 = vpop.permute.xlu1 %2676  ;;  %4216 = vperm.xlu0 %6193, %v8962_v13   ;;  %v8987_v19 = vld [vmem:[%s13030_s0 + $0x5e9] sm:$0xff]  ;;  %13602 = vst [vmem:[#allocation388_spill] sm:$0xff] %v8999_v6 }
 0x2ef   :  { %13598 = vst [vmem:[#allocation384_spill] sm:$0xff] %v8974_v33  ;;  %2932 = vperm.xlu1 %6195, %v6290_v58   ;;  %13599 = vst [vmem:[#allocation385_spill] sm:$0xff] %v8987_v19  ;;  %v6291_v58 = vld [vmem:[%s13030_s0 + $0x5c0] sm:$0xff]  ;;  %v13171_v0 = vrot.slane %v8987_v19, 5 }
 0x2f1   :  { %v8989_v33 = vpop.permute.xlu0 %3926  ;;  %v9016_v25 = vsel %vm730_vm0, %v473_v59, %v13171_v0  ;;  %v475_v59 = vld [vmem:[%s13030_s0 + $0x9] sm:$0x3]  ;;  %v6294_v0 = vld [vmem:[%s13030_s0 + $0x5f0] sm:$0xff] }
 0x2f2   :  { %13600 = vst [vmem:[#allocation386_spill] sm:$0xff] %v8989_v33  ;;  %v8991_v13 = vpop.permute.xlu1 %2684  ;;  %4225 = vperm.xlu0 %6193, %v470_v27   ;;  %v6292_v27 = vld [vmem:[%s13030_s0 + $0x5d0] sm:$0xff]  ;;  %13605 = vst [vmem:[#allocation391_spill] sm:$0xff] %v9016_v25 }
 0x2f3   :  { %13601 = vst [vmem:[#allocation387_spill] sm:$0xff] %v8991_v13  ;;  %2940 = vperm.xlu1 %6195, %v6291_v58  }
 0x2f5   :  { %v9005_v33 = vpop.permute.xlu0 %3936 }
 0x2f6   :  { %13603 = vst [vmem:[#allocation389_spill] sm:$0xff] %v9005_v33  ;;  %v9007_v13 = vpop.permute.xlu1 %2692  ;;  %4234 = vperm.xlu0 %6193, %v8999_v6   ;;  %v6293_v6 = vld [vmem:[%s13030_s0 + $0x5e0] sm:$0x1f] }
 0x2f7   :  { %13604 = vst [vmem:[#allocation390_spill] sm:$0xff] %v9007_v13  ;;  %2948 = vperm.xlu1 %6195, %v6292_v27   ;;  %v13610_v27 = vmov 1  }
 0x2f9   :  { %v9018_v58 = vpop.permute.xlu0 %3945 }
 0x2fa   :  { %13606 = vst [vmem:[#allocation392_spill] sm:$0xff] %v9018_v58  ;;  %v9020_v51 = vpop.permute.xlu1 %2700  ;;  %4244 = vperm.xlu0 %6193, %v9016_v25   ;;  %v6295_v25 = vld [vmem:[%s13030_s0] sm:$0xff]  ;;  %v732_v58 = vrot.slane %v475_v59, 5 }
 0x2fb   :  { %13607 = vst [vmem:[#allocation393_spill] sm:$0xff] %v9020_v51  ;;  %2956 = vperm.xlu1 %6195, %v6293_v6   ;;  %v13613_v51 = vmov 0   ;;  %v477_v59 = vld [vmem:[%s13030_s0 + $0x21] sm:$0x3] }
 0x2fd   :  { %v9026_v33 = vpop.permute.xlu0 %3954 }
 0x2fe   :  { %13608 = vst [vmem:[#allocation394_spill] sm:$0xff] %v9026_v33  ;;  %v9028_v13 = vpop.permute.xlu1 %2708  ;;  %6197 = vset.pattern.permute.xlu0 %v13610_v27  ;;  %v346_v33 = vld [vmem:[%s13030_s0 + $0xa] sm:$0xff] }
 0x2ff   :  { %13609 = vst [vmem:[#allocation395_spill] sm:$0xff] %v9028_v13  ;;  %2964 = vperm.xlu1 %6195, %v6294_v0   ;;  %2204 = vperm.xlu0 %6197, %v6295_v25   ;;  %v6296_v0 = vld [vmem:[%s13030_s0 + $0x18] sm:$0xff]  ;;  %v13615_v25 = vrot.slane %v7296_v22, 5  ;;  %v348_v22 = vld [vmem:[%s13030_s0 + $0x22] sm:$0xff] }
 0x301   :  { %v9040_v6 = vpop.permute.xlu0 %3964 }
 0x302   :  { %13611 = vst [vmem:[#allocation396_spill] sm:$0xff] %v9040_v6  ;;  %v9045_v13 = vpop.permute.xlu1 %2716  ;;  %v9056_v6 = vsel %vm730_vm0, %v13615_v25, %v732_v58  ;;  %v735_v58 = vrot.slane %v477_v59, 5  ;;  %v6298_v25 = vld [vmem:[%s13030_s0 + $0x38] sm:$0xff]  ;;  %v351_v59 = vld [vmem:[%s13030_s0 + $0x42] sm:$0x7] }
 0x303   :  { %13612 = vst [vmem:[#allocation397_spill] sm:$0xff] %v9045_v13  ;;  %6196 = vset.pattern.permute.xlu1 %v13613_v51  ;;  %2216 = vperm.xlu0 %6197, %v6296_v0   ;;  %v6297_v51 = vld [vmem:[%s13030_s0 + $0x28] sm:$0x1f] }
 0x304   :  { %3357 = vperm.xlu1 %6196, %v346_v33  }
 0x305   :  { %v9051_v27 = vpop.permute.xlu0 %3973 }
 0x306   :  { %13614 = vst [vmem:[#allocation398_spill] sm:$0xff] %v9051_v27  ;;  %v9058_v19 = vpop.permute.xlu1 %2724 }
 0x307   :  { %13616 = vst [vmem:[#allocation399_spill] sm:$0xff] %v9058_v19  ;;  %2224 = vperm.xlu0 %6197, %v6297_v51   ;;  %v13620_v51 = vrot.slane %v7315_v38, 5  ;;  %v13623_v38 = vrot.slane %v7347_v54, 5  ;;  %v352_v54 = vld [vmem:[%s13030_s0 + $0x52] sm:$0xff] }
 0x308   :  { %3366 = vperm.xlu1 %6196, %v9056_v6  }
 0x309   :  { %v9067_v33 = vpop.permute.xlu0 %3982  ;;  %v9082_v19 = vsel %vm730_vm0, %v13620_v51, %v735_v58  ;;  %v9098_v58 = vsel %vm730_vm0, %v351_v59, %v13623_v38  ;;  %v481_v51 = vld [vmem:[%s13030_s0 + $0x51] sm:$0x3] }
 0x30a   :  { %13617 = vst [vmem:[#allocation400_spill] sm:$0xff] %v9067_v33  ;;  %v9072_v0 = vpop.permute.xlu1 %2732  ;;  %v741_v59 = vrot.slane %v481_v51, 5  ;;  %v355_v51 = vld [vmem:[%s13030_s0 + $0x72] sm:$0x7] }
 0x30b   :  { %13618 = vst [vmem:[#allocation401_spill] sm:$0xff] %v9072_v0  ;;  %2232 = vperm.xlu0 %6197, %v6298_v25   ;;  %v6299_v0 = vld [vmem:[%s13030_s0 + $0x48] sm:$0xff] }
 0x30c   :  { %3371 = vperm.xlu1 %6196, %v348_v22  }
 0x30d   :  { %v9077_v27 = vpop.permute.xlu0 %3992 }
 0x30e   :  { %13619 = vst [vmem:[#allocation402_spill] sm:$0xff] %v9077_v27  ;;  %v9084_v33 = vpop.permute.xlu1 %2740  ;;  %v6300_v27 = vld [vmem:[%s13030_s0 + $0x58] sm:$0x1f] }
 0x30f   :  { %13621 = vst [vmem:[#allocation403_spill] sm:$0xff] %v9084_v33  ;;  %2240 = vperm.xlu0 %6197, %v6299_v0  }
 0x310   :  { %3380 = vperm.xlu1 %6196, %v9082_v19  }
 0x311   :  { %v9093_v22 = vpop.permute.xlu0 %4001 }
 0x312   :  { %13622 = vst [vmem:[#allocation404_spill] sm:$0xff] %v9093_v22  ;;  %v9100_v25 = vpop.permute.xlu1 %2748  ;;  %v6301_v22 = vld [vmem:[%s13030_s0 + $0x68] sm:$0xff] }
 0x313   :  { %13624 = vst [vmem:[#allocation405_spill] sm:$0xff] %v9100_v25  ;;  %2248 = vperm.xlu0 %6197, %v6300_v27   ;;  %v13628_v27 = vrot.slane %v7367_v11, 5  ;;  %v13631_v11 = vrot.slane %v7401_v62, 5  ;;  %v356_v62 = vld [vmem:[%s13030_s0 + $0x82] sm:$0xff] }
 0x314   :  { %3390 = vperm.xlu1 %6196, %v9098_v58  }
 0x315   :  { %v9109_v0 = vpop.permute.xlu0 %4010  ;;  %v9124_v33 = vsel %vm730_vm0, %v13628_v27, %v741_v59  ;;  %v485_v27 = vld [vmem:[%s13030_s0 + $0x81] sm:$0x3] }
 0x316   :  { %13625 = vst [vmem:[#allocation406_spill] sm:$0xff] %v9109_v0  ;;  %v9114_v38 = vpop.permute.xlu1 %2756 }
 0x317   :  { %13626 = vst [vmem:[#allocation407_spill] sm:$0xff] %v9114_v38  ;;  %2256 = vperm.xlu0 %6197, %v6301_v22   ;;  %v6302_v38 = vld [vmem:[%s13030_s0 + $0x78] sm:$0xff] }
 0x318   :  { %3399 = vperm.xlu1 %6196, %v352_v54   ;;  %v9140_v54 = vsel %vm730_vm0, %v355_v51, %v13631_v11  ;;  %v747_v51 = vrot.slane %v485_v27, 5  ;;  %v359_v27 = vld [vmem:[%s13030_s0 + $0xa2] sm:$0x7] }
 0x319   :  { %v9119_v25 = vpop.permute.xlu0 %4020 }
 0x31a   :  { %13627 = vst [vmem:[#allocation408_spill] sm:$0xff] %v9119_v25  ;;  %v9126_v0 = vpop.permute.xlu1 %2764  ;;  %v6303_v25 = vld [vmem:[%s13030_s0 + $0x88] sm:$0x1f] }
 0x31b   :  { %13629 = vst [vmem:[#allocation409_spill] sm:$0xff] %v9126_v0  ;;  %2264 = vperm.xlu0 %6197, %v6302_v38  }
 0x31c   :  { %3408 = vperm.xlu1 %6196, %v9124_v33  }
 0x31d   :  { %v9135_v22 = vpop.permute.xlu0 %4029 }
 0x31e   :  { %13630 = vst [vmem:[#allocation410_spill] sm:$0xff] %v9135_v22  ;;  %v9142_v59 = vpop.permute.xlu1 %2772  ;;  %v6304_v22 = vld [vmem:[%s13030_s0 + $0x98] sm:$0xff] }
 0x31f   :  { %13632 = vst [vmem:[#allocation411_spill] sm:$0xff] %v9142_v59  ;;  %2272 = vperm.xlu0 %6197, %v6303_v25   ;;  %v13636_v25 = vrot.slane %v7421_v35, 5  ;;  %v13639_v35 = vrot.slane %v7455_v30, 5  ;;  %v360_v30 = vld [vmem:[%s13030_s0 + $0xb2] sm:$0xff] }
 0x320   :  { %3418 = vperm.xlu1 %6196, %v9140_v54  }
 0x321   :  { %v9151_v38 = vpop.permute.xlu0 %4038  ;;  %v9166_v0 = vsel %vm730_vm0, %v13636_v25, %v747_v51  ;;  %v489_v25 = vld [vmem:[%s13030_s0 + $0xb1] sm:$0x3] }
 0x322   :  { %13633 = vst [vmem:[#allocation412_spill] sm:$0xff] %v9151_v38  ;;  %v9156_v11 = vpop.permute.xlu1 %2780 }
 0x323   :  { %13634 = vst [vmem:[#allocation413_spill] sm:$0xff] %v9156_v11  ;;  %2280 = vperm.xlu0 %6197, %v6304_v22   ;;  %v6305_v11 = vld [vmem:[%s13030_s0 + $0xa8] sm:$0xff] }
 0x324   :  { %3427 = vperm.xlu1 %6196, %v356_v62   ;;  %v9182_v62 = vsel %vm730_vm0, %v359_v27, %v13639_v35  ;;  %v753_v27 = vrot.slane %v489_v25, 5  ;;  %v363_v25 = vld [vmem:[%s13030_s0 + $0xd2] sm:$0x7] }
 0x325   :  { %v9161_v59 = vpop.permute.xlu0 %4048 }
 0x326   :  { %13635 = vst [vmem:[#allocation414_spill] sm:$0xff] %v9161_v59  ;;  %v9168_v38 = vpop.permute.xlu1 %2788  ;;  %v6306_v59 = vld [vmem:[%s13030_s0 + $0xb8] sm:$0x1f] }
 0x327   :  { %13637 = vst [vmem:[#allocation415_spill] sm:$0xff] %v9168_v38  ;;  %2288 = vperm.xlu0 %6197, %v6305_v11  }
 0x328   :  { %3436 = vperm.xlu1 %6196, %v9166_v0  }
 0x329   :  { %v9177_v22 = vpop.permute.xlu0 %4057 }
 0x32a   :  { %13638 = vst [vmem:[#allocation416_spill] sm:$0xff] %v9177_v22  ;;  %v9184_v51 = vpop.permute.xlu1 %2796  ;;  %v6307_v22 = vld [vmem:[%s13030_s0 + $0xc8] sm:$0xff] }
 0x32b   :  { %13640 = vst [vmem:[#allocation417_spill] sm:$0xff] %v9184_v51  ;;  %2296 = vperm.xlu0 %6197, %v6306_v59   ;;  %v13644_v59 = vrot.slane %v7475_v14, 5  ;;  %v13647_v14 = vrot.slane %v7509_v63, 5  ;;  %v364_v63 = vld [vmem:[%s13030_s0 + $0xe2] sm:$0xff] }
 0x32c   :  { %3446 = vperm.xlu1 %6196, %v9182_v62  }
 0x32d   :  { %v9193_v11 = vpop.permute.xlu0 %4066  ;;  %v9208_v38 = vsel %vm730_vm0, %v13644_v59, %v753_v27  ;;  %v493_v59 = vld [vmem:[%s13030_s0 + $0xe1] sm:$0x3] }
 0x32e   :  { %13641 = vst [vmem:[#allocation418_spill] sm:$0xff] %v9193_v11  ;;  %v9198_v35 = vpop.permute.xlu1 %2804 }
 0x32f   :  { %13642 = vst [vmem:[#allocation419_spill] sm:$0xff] %v9198_v35  ;;  %2304 = vperm.xlu0 %6197, %v6307_v22   ;;  %v6308_v35 = vld [vmem:[%s13030_s0 + $0xd8] sm:$0xff] }
 0x330   :  { %3455 = vperm.xlu1 %6196, %v360_v30   ;;  %v9224_v30 = vsel %vm730_vm0, %v363_v25, %v13647_v14  ;;  %v759_v25 = vrot.slane %v493_v59, 5  ;;  %v367_v59 = vld [vmem:[%s13030_s0 + $0x102] sm:$0x7] }
 0x331   :  { %v9203_v51 = vpop.permute.xlu0 %4076 }
 0x332   :  { %13643 = vst [vmem:[#allocation420_spill] sm:$0xff] %v9203_v51  ;;  %v9210_v11 = vpop.permute.xlu1 %2812  ;;  %v6309_v51 = vld [vmem:[%s13030_s0 + $0xe8] sm:$0x1f] }
 0x333   :  { %13645 = vst [vmem:[#allocation421_spill] sm:$0xff] %v9210_v11  ;;  %2312 = vperm.xlu0 %6197, %v6308_v35  }
 0x334   :  { %3464 = vperm.xlu1 %6196, %v9208_v38  }
 0x335   :  { %v9219_v22 = vpop.permute.xlu0 %4085 }
 0x336   :  { %13646 = vst [vmem:[#allocation422_spill] sm:$0xff] %v9219_v22  ;;  %v9226_v27 = vpop.permute.xlu1 %2820  ;;  %v6310_v22 = vld [vmem:[%s13030_s0 + $0xf8] sm:$0xff] }
 0x337   :  { %13648 = vst [vmem:[#allocation423_spill] sm:$0xff] %v9226_v27  ;;  %2320 = vperm.xlu0 %6197, %v6309_v51   ;;  %v13652_v51 = vrot.slane %v7529_v55, 5  ;;  %v13655_v55 = vrot.slane %v7563_v47, 5  ;;  %v368_v47 = vld [vmem:[%s13030_s0 + $0x112] sm:$0xff] }
 0x338   :  { %3474 = vperm.xlu1 %6196, %v9224_v30  }
 0x339   :  { %v9235_v35 = vpop.permute.xlu0 %4094  ;;  %v9250_v11 = vsel %vm730_vm0, %v13652_v51, %v759_v25  ;;  %v497_v51 = vld [vmem:[%s13030_s0 + $0x111] sm:$0x3] }
 0x33a   :  { %13649 = vst [vmem:[#allocation424_spill] sm:$0xff] %v9235_v35  ;;  %v9240_v14 = vpop.permute.xlu1 %2828 }
 0x33b   :  { %13650 = vst [vmem:[#allocation425_spill] sm:$0xff] %v9240_v14  ;;  %2328 = vperm.xlu0 %6197, %v6310_v22   ;;  %v6311_v14 = vld [vmem:[%s13030_s0 + $0x108] sm:$0xff] }
 0x33c   :  { %3483 = vperm.xlu1 %6196, %v364_v63   ;;  %v9266_v63 = vsel %vm730_vm0, %v367_v59, %v13655_v55  ;;  %v765_v59 = vrot.slane %v497_v51, 5  ;;  %v371_v51 = vld [vmem:[%s13030_s0 + $0x132] sm:$0x7] }
 0x33d   :  { %v9245_v27 = vpop.permute.xlu0 %4104 }
 0x33e   :  { %13651 = vst [vmem:[#allocation426_spill] sm:$0xff] %v9245_v27  ;;  %v9252_v35 = vpop.permute.xlu1 %2836  ;;  %v6312_v27 = vld [vmem:[%s13030_s0 + $0x118] sm:$0x1f] }
 0x33f   :  { %13653 = vst [vmem:[#allocation427_spill] sm:$0xff] %v9252_v35  ;;  %2336 = vperm.xlu0 %6197, %v6311_v14  }
 0x340   :  { %3492 = vperm.xlu1 %6196, %v9250_v11  }
 0x341   :  { %v9261_v22 = vpop.permute.xlu0 %4113 }
 0x342   :  { %13654 = vst [vmem:[#allocation428_spill] sm:$0xff] %v9261_v22  ;;  %v9268_v25 = vpop.permute.xlu1 %2844  ;;  %v6313_v22 = vld [vmem:[%s13030_s0 + $0x128] sm:$0xff] }
 0x343   :  { %13656 = vst [vmem:[#allocation429_spill] sm:$0xff] %v9268_v25  ;;  %2344 = vperm.xlu0 %6197, %v6312_v27   ;;  %v13660_v27 = vrot.slane %v7583_v39, 5  ;;  %v13663_v39 = vrot.slane %v7617_v31, 5  ;;  %v372_v31 = vld [vmem:[%s13030_s0 + $0x142] sm:$0xff] }
 0x344   :  { %3502 = vperm.xlu1 %6196, %v9266_v63  }
 0x345   :  { %v9277_v14 = vpop.permute.xlu0 %4122  ;;  %v9292_v35 = vsel %vm730_vm0, %v13660_v27, %v765_v59  ;;  %v501_v27 = vld [vmem:[%s13030_s0 + $0x141] sm:$0x3] }
 0x346   :  { %13657 = vst [vmem:[#allocation430_spill] sm:$0xff] %v9277_v14  ;;  %v9282_v55 = vpop.permute.xlu1 %2852 }
 0x347   :  { %13658 = vst [vmem:[#allocation431_spill] sm:$0xff] %v9282_v55  ;;  %2352 = vperm.xlu0 %6197, %v6313_v22   ;;  %v6314_v55 = vld [vmem:[%s13030_s0 + $0x138] sm:$0xff] }
 0x348   :  { %3511 = vperm.xlu1 %6196, %v368_v47   ;;  %v9308_v47 = vsel %vm730_vm0, %v371_v51, %v13663_v39  ;;  %v771_v51 = vrot.slane %v501_v27, 5  ;;  %v375_v27 = vld [vmem:[%s13030_s0 + $0x162] sm:$0x7] }
 0x349   :  { %v9287_v25 = vpop.permute.xlu0 %4132 }
 0x34a   :  { %13659 = vst [vmem:[#allocation432_spill] sm:$0xff] %v9287_v25  ;;  %v9294_v14 = vpop.permute.xlu1 %2860  ;;  %v6315_v25 = vld [vmem:[%s13030_s0 + $0x148] sm:$0x1f] }
 0x34b   :  { %13661 = vst [vmem:[#allocation433_spill] sm:$0xff] %v9294_v14  ;;  %2360 = vperm.xlu0 %6197, %v6314_v55  }
 0x34c   :  { %3520 = vperm.xlu1 %6196, %v9292_v35  }
 0x34d   :  { %v9303_v22 = vpop.permute.xlu0 %4141 }
 0x34e   :  { %13662 = vst [vmem:[#allocation434_spill] sm:$0xff] %v9303_v22  ;;  %v9310_v59 = vpop.permute.xlu1 %2868  ;;  %v6316_v22 = vld [vmem:[%s13030_s0 + $0x158] sm:$0xff] }
 0x34f   :  { %13664 = vst [vmem:[#allocation435_spill] sm:$0xff] %v9310_v59  ;;  %2368 = vperm.xlu0 %6197, %v6315_v25   ;;  %v13668_v25 = vrot.slane %v7637_v23, 5  ;;  %v13671_v23 = vrot.slane %v7671_v15, 5  ;;  %v376_v15 = vld [vmem:[%s13030_s0 + $0x172] sm:$0xff] }
 0x350   :  { %3530 = vperm.xlu1 %6196, %v9308_v47  }
 0x351   :  { %v9319_v55 = vpop.permute.xlu0 %4150  ;;  %v9334_v14 = vsel %vm730_vm0, %v13668_v25, %v771_v51  ;;  %v505_v25 = vld [vmem:[%s13030_s0 + $0x171] sm:$0x3] }
 0x352   :  { %13665 = vst [vmem:[#allocation436_spill] sm:$0xff] %v9319_v55  ;;  %v9324_v39 = vpop.permute.xlu1 %2876 }
 0x353   :  { %13666 = vst [vmem:[#allocation437_spill] sm:$0xff] %v9324_v39  ;;  %2376 = vperm.xlu0 %6197, %v6316_v22   ;;  %v6317_v39 = vld [vmem:[%s13030_s0 + $0x168] sm:$0xff] }
 0x354   :  { %3539 = vperm.xlu1 %6196, %v372_v31   ;;  %v9350_v31 = vsel %vm730_vm0, %v375_v27, %v13671_v23  ;;  %v777_v27 = vrot.slane %v505_v25, 5  ;;  %v379_v25 = vld [vmem:[%s13030_s0 + $0x192] sm:$0x7] }
 0x355   :  { %v9329_v59 = vpop.permute.xlu0 %4160 }
 0x356   :  { %13667 = vst [vmem:[#allocation438_spill] sm:$0xff] %v9329_v59  ;;  %v9336_v55 = vpop.permute.xlu1 %2884  ;;  %v6318_v59 = vld [vmem:[%s13030_s0 + $0x178] sm:$0x1f] }
 0x357   :  { %13669 = vst [vmem:[#allocation439_spill] sm:$0xff] %v9336_v55  ;;  %2384 = vperm.xlu0 %6197, %v6317_v39  }
 0x358   :  { %3548 = vperm.xlu1 %6196, %v9334_v14  }
 0x359   :  { %v9345_v22 = vpop.permute.xlu0 %4169 }
 0x35a   :  { %13670 = vst [vmem:[#allocation440_spill] sm:$0xff] %v9345_v22  ;;  %v9352_v51 = vpop.permute.xlu1 %2892  ;;  %v6319_v22 = vld [vmem:[%s13030_s0 + $0x188] sm:$0xff] }
 0x35b   :  { %13672 = vst [vmem:[#allocation441_spill] sm:$0xff] %v9352_v51  ;;  %2392 = vperm.xlu0 %6197, %v6318_v59   ;;  %v13676_v59 = vrot.slane %v7691_v7, 5  ;;  %v13679_v7 = vrot.slane %v7725_v1, 5  ;;  %v380_v1 = vld [vmem:[%s13030_s0 + $0x1a2] sm:$0xff] }
 0x35c   :  { %3558 = vperm.xlu1 %6196, %v9350_v31  }
 0x35d   :  { %v9361_v39 = vpop.permute.xlu0 %4178  ;;  %v9376_v55 = vsel %vm730_vm0, %v13676_v59, %v777_v27  ;;  %v509_v59 = vld [vmem:[%s13030_s0 + $0x1a1] sm:$0x3] }
 0x35e   :  { %13673 = vst [vmem:[#allocation442_spill] sm:$0xff] %v9361_v39  ;;  %v9366_v23 = vpop.permute.xlu1 %2900 }
 0x35f   :  { %13674 = vst [vmem:[#allocation443_spill] sm:$0xff] %v9366_v23  ;;  %2400 = vperm.xlu0 %6197, %v6319_v22   ;;  %v6320_v23 = vld [vmem:[%s13030_s0 + $0x198] sm:$0xff] }
 0x360   :  { %3567 = vperm.xlu1 %6196, %v376_v15   ;;  %v9392_v15 = vsel %vm730_vm0, %v379_v25, %v13679_v7  ;;  %v783_v25 = vrot.slane %v509_v59, 5  ;;  %v383_v59 = vld [vmem:[%s13030_s0 + $0x1c2] sm:$0x7] }
 0x361   :  { %v9371_v51 = vpop.permute.xlu0 %4188 }
 0x362   :  { %13675 = vst [vmem:[#allocation444_spill] sm:$0xff] %v9371_v51  ;;  %v9378_v39 = vpop.permute.xlu1 %2908  ;;  %v6321_v51 = vld [vmem:[%s13030_s0 + $0x1a8] sm:$0x1f] }
 0x363   :  { %13677 = vst [vmem:[#allocation445_spill] sm:$0xff] %v9378_v39  ;;  %2408 = vperm.xlu0 %6197, %v6320_v23  }
 0x364   :  { %3576 = vperm.xlu1 %6196, %v9376_v55  }
 0x365   :  { %v9387_v22 = vpop.permute.xlu0 %4197 }
 0x366   :  { %13678 = vst [vmem:[#allocation446_spill] sm:$0xff] %v9387_v22  ;;  %v9394_v27 = vpop.permute.xlu1 %2916  ;;  %v6322_v22 = vld [vmem:[%s13030_s0 + $0x1b8] sm:$0xff] }
 0x367   :  { %13680 = vst [vmem:[#allocation447_spill] sm:$0xff] %v9394_v27  ;;  %2416 = vperm.xlu0 %6197, %v6321_v51   ;;  %v13684_v51 = vrot.slane %v7745_v60, 5  ;;  %v13687_v60 = vrot.slane %v7779_v56, 5  ;;  %v384_v56 = vld [vmem:[%s13030_s0 + $0x1d2] sm:$0xff] }
 0x368   :  { %3586 = vperm.xlu1 %6196, %v9392_v15  }
 0x369   :  { %v9403_v23 = vpop.permute.xlu0 %4206  ;;  %v9418_v39 = vsel %vm730_vm0, %v13684_v51, %v783_v25  ;;  %v513_v51 = vld [vmem:[%s13030_s0 + $0x1d1] sm:$0x3] }
 0x36a   :  { %13681 = vst [vmem:[#allocation448_spill] sm:$0xff] %v9403_v23  ;;  %v9408_v7 = vpop.permute.xlu1 %2924 }
 0x36b   :  { %13682 = vst [vmem:[#allocation449_spill] sm:$0xff] %v9408_v7  ;;  %2424 = vperm.xlu0 %6197, %v6322_v22   ;;  %v6323_v7 = vld [vmem:[%s13030_s0 + $0x1c8] sm:$0xff] }
 0x36c   :  { %3595 = vperm.xlu1 %6196, %v380_v1   ;;  %v9434_v1 = vsel %vm730_vm0, %v383_v59, %v13687_v60  ;;  %v789_v59 = vrot.slane %v513_v51, 5  ;;  %v387_v51 = vld [vmem:[%s13030_s0 + $0x1f2] sm:$0x7] }
 0x36d   :  { %v9413_v27 = vpop.permute.xlu0 %4216 }
 0x36e   :  { %13683 = vst [vmem:[#allocation450_spill] sm:$0xff] %v9413_v27  ;;  %v9420_v23 = vpop.permute.xlu1 %2932  ;;  %v6324_v27 = vld [vmem:[%s13030_s0 + $0x1d8] sm:$0x1f] }
 0x36f   :  { %13685 = vst [vmem:[#allocation451_spill] sm:$0xff] %v9420_v23  ;;  %2432 = vperm.xlu0 %6197, %v6323_v7  }
 0x370   :  { %3604 = vperm.xlu1 %6196, %v9418_v39  }
 0x371   :  { %v9429_v22 = vpop.permute.xlu0 %4225 }
 0x372   :  { %13686 = vst [vmem:[#allocation452_spill] sm:$0xff] %v9429_v22  ;;  %v9436_v25 = vpop.permute.xlu1 %2940  ;;  %v6325_v22 = vld [vmem:[%s13030_s0 + $0x1e8] sm:$0xff] }
 0x373   :  { %13688 = vst [vmem:[#allocation453_spill] sm:$0xff] %v9436_v25  ;;  %2440 = vperm.xlu0 %6197, %v6324_v27   ;;  %v13692_v27 = vrot.slane %v7799_v52, 5 }
 0x374   :  { %3614 = vperm.xlu1 %6196, %v9434_v1  }
 0x375   :  { %v9445_v7 = vpop.permute.xlu0 %4234  ;;  %v9460_v23 = vsel %vm730_vm0, %v13692_v27, %v789_v59  ;;  %v517_v27 = vld [vmem:[%s13030_s0 + $0x201] sm:$0x3] }
 0x376   :  { %13689 = vst [vmem:[#allocation454_spill] sm:$0xff] %v9445_v7  ;;  %v9450_v60 = vpop.permute.xlu1 %2948 }
 0x377   :  { %13690 = vst [vmem:[#allocation455_spill] sm:$0xff] %v9450_v60  ;;  %2448 = vperm.xlu0 %6197, %v6325_v22   ;;  %v6326_v60 = vld [vmem:[%s13030_s0 + $0x1f8] sm:$0xff]  ;;  %v13694_v22 = vrot.slane %v7833_v48, 5  ;;  %v388_v48 = vld [vmem:[%s13030_s0 + $0x202] sm:$0xff] }
 0x378   :  { %3623 = vperm.xlu1 %6196, %v384_v56  }
 0x379   :  { %v9455_v25 = vpop.permute.xlu0 %4244  ;;  %v9474_v52 = vsel %vm730_vm0, %v387_v51, %v13694_v22 }
 0x37a   :  { %13691 = vst [vmem:[#allocation456_spill] sm:$0xff] %v9455_v25  ;;  %v9462_v7 = vpop.permute.xlu1 %2956  ;;  %v6327_v25 = vld [vmem:[%s13030_s0 + $0x208] sm:$0x1f] }
 0x37b   :  { %13693 = vst [vmem:[#allocation457_spill] sm:$0xff] %v9462_v7  ;;  %2456 = vperm.xlu0 %6197, %v6326_v60   ;;  %v795_v60 = vrot.slane %v517_v27, 5  ;;  %v13698_v7 = vrot.slane %v7853_v44, 5  ;;  %v391_v27 = vld [vmem:[%s13030_s0 + $0x222] sm:$0x7]  ;;  %v13701_v44 = vrot.slane %v7887_v40, 5 }
 0x37c   :  { %3632 = vperm.xlu1 %6196, %v9460_v23   ;;  %v392_v40 = vld [vmem:[%s13030_s0 + $0x232] sm:$0xff] }
 0x37e   :  { %v9476_v56 = vpop.permute.xlu1 %2964  ;;  %v9478_v59 = vpop.permute.xlu0 %2204 }
 0x37f   :  { %13695 = vst [vmem:[#allocation458_spill] sm:$0xff] %v9476_v56  ;;  %2464 = vperm.xlu0 %6197, %v6327_v25   ;;  %v6328_v56 = vld [vmem:[%s13030_s0 + $0x218] sm:$0xff]  ;;  %v9500_v25 = vsel %vm730_vm0, %v13698_v7, %v795_v60  ;;  %v9516_v7 = vsel %vm730_vm0, %v391_v27, %v13701_v44 }
 0x380   :  { %3642 = vperm.xlu1 %6196, %v9474_v52   ;;  %13702 = vst [vmem:[#allocation463_spill] sm:$0xff] %v9516_v7 }
 0x382   :  { %v9490_v51 = vpop.permute.xlu0 %2216 }
 0x383   :  { %13696 = vst [vmem:[#allocation459_spill] sm:$0xff] %v9490_v51  ;;  %v9492_v22 = vpop.permute.xlu1 %3357  ;;  %2472 = vperm.xlu0 %6197, %v6328_v56  }
 0x384   :  { %13697 = vst [vmem:[#allocation460_spill] sm:$0xff] %v9492_v22  ;;  %3651 = vperm.xlu1 %6196, %v388_v48   ;;  %v6329_v22 = vld [vmem:[%s13030_s0 + $0x228] sm:$0xff]  ;;  %v521_v48 = vld [vmem:[%s13030_s0 + $0x231] sm:$0x3] }
 0x386   :  { %v9502_v13 = vpop.permute.xlu0 %2224 }
 0x387   :  { %13699 = vst [vmem:[#allocation461_spill] sm:$0xff] %v9502_v13  ;;  %v9507_v51 = vpop.permute.xlu1 %3366  ;;  %2480 = vperm.xlu0 %6197, %v6329_v22   ;;  %v801_v22 = vrot.slane %v521_v48, 5  ;;  %v13706_v13 = vrot.slane %v7907_v36, 5  ;;  %v395_v48 = vld [vmem:[%s13030_s0 + $0x252] sm:$0x7]  ;;  %v13709_v36 = vrot.slane %v7941_v32, 5 }
 0x388   :  { %13700 = vst [vmem:[#allocation462_spill] sm:$0xff] %v9507_v51  ;;  %3660 = vperm.xlu1 %6196, %v9500_v25   ;;  %v6330_v51 = vld [vmem:[%s13030_s0 + $0x238] sm:$0x1f]  ;;  %v396_v32 = vld [vmem:[%s13030_s0 + $0x262] sm:$0xff] }
 0x38a   :  { %v9518_v56 = vpop.permute.xlu0 %2232 }
 0x38b   :  { %13703 = vst [vmem:[#allocation464_spill] sm:$0xff] %v9518_v56  ;;  %v9523_v60 = vpop.permute.xlu1 %3371  ;;  %2488 = vperm.xlu0 %6197, %v6330_v51   ;;  %v6331_v56 = vld [vmem:[%s13030_s0 + $0x248] sm:$0xff]  ;;  %v9542_v51 = vsel %vm730_vm0, %v13706_v13, %v801_v22  ;;  %v9558_v13 = vsel %vm730_vm0, %v395_v48, %v13709_v36 }
 0x38c   :  { %3670 = vperm.xlu1 %6196, %v9516_v7   ;;  %13707 = vst [vmem:[#allocation467_spill] sm:$0xff] %v9542_v51  ;;  %13710 = vst [vmem:[#allocation469_spill] sm:$0xff] %v9558_v13 }
 0x38e   :  { %v9532_v27 = vpop.permute.xlu0 %2240 }
 0x38f   :  { %13704 = vst [vmem:[#allocation465_spill] sm:$0xff] %v9532_v27  ;;  %v9534_v44 = vpop.permute.xlu1 %3380  ;;  %2496 = vperm.xlu0 %6197, %v6331_v56  }
 0x390   :  { %13705 = vst [vmem:[#allocation466_spill] sm:$0xff] %v9534_v44  ;;  %3679 = vperm.xlu1 %6196, %v392_v40   ;;  %v6332_v44 = vld [vmem:[%s13030_s0 + $0x258] sm:$0xff]  ;;  %v525_v40 = vld [vmem:[%s13030_s0 + $0x261] sm:$0x3] }
 0x392   :  { %v9544_v7 = vpop.permute.xlu0 %2248 }
 0x393   :  { %13708 = vst [vmem:[#allocation468_spill] sm:$0xff] %v9544_v7  ;;  %v9549_v27 = vpop.permute.xlu1 %3390  ;;  %2504 = vperm.xlu0 %6197, %v6332_v44   ;;  %v6333_v7 = vld [vmem:[%s13030_s0 + $0x268] sm:$0x1f]  ;;  %v807_v44 = vrot.slane %v525_v40, 5  ;;  %v399_v40 = vld [vmem:[%s13030_s0 + $0x282] sm:$0x7] }
 0x394   :  { %3688 = vperm.xlu1 %6196, %v9542_v51   ;;  %v13714_v51 = vrot.slane %v7961_v21, 5  ;;  %v13717_v21 = vrot.slane %v7995_v24, 5  ;;  %v400_v24 = vld [vmem:[%s13030_s0 + $0x292] sm:$0xff] }
 0x396   :  { %v9560_v56 = vpop.permute.xlu0 %2256 }
 0x397   :  { %13711 = vst [vmem:[#allocation470_spill] sm:$0xff] %v9560_v56  ;;  %v9565_v22 = vpop.permute.xlu1 %3399  ;;  %2512 = vperm.xlu0 %6197, %v6333_v7   ;;  %v6334_v56 = vld [vmem:[%s13030_s0 + $0x278] sm:$0xff]  ;;  %v9584_v7 = vsel %vm730_vm0, %v13714_v51, %v807_v44  ;;  %v9600_v51 = vsel %vm730_vm0, %v399_v40, %v13717_v21 }
 0x398   :  { %3698 = vperm.xlu1 %6196, %v9558_v13   ;;  %13715 = vst [vmem:[#allocation473_spill] sm:$0xff] %v9584_v7  ;;  %13718 = vst [vmem:[#allocation475_spill] sm:$0xff] %v9600_v51 }
 0x39a   :  { %v9574_v48 = vpop.permute.xlu0 %2264 }
 0x39b   :  { %13712 = vst [vmem:[#allocation471_spill] sm:$0xff] %v9574_v48  ;;  %v9576_v36 = vpop.permute.xlu1 %3408  ;;  %2520 = vperm.xlu0 %6197, %v6334_v56  }
 0x39c   :  { %13713 = vst [vmem:[#allocation472_spill] sm:$0xff] %v9576_v36  ;;  %3707 = vperm.xlu1 %6196, %v396_v32   ;;  %v6335_v36 = vld [vmem:[%s13030_s0 + $0x288] sm:$0xff]  ;;  %v529_v32 = vld [vmem:[%s13030_s0 + $0x291] sm:$0x3] }
 0x39e   :  { %v9586_v13 = vpop.permute.xlu0 %2272 }
 0x39f   :  { %13716 = vst [vmem:[#allocation474_spill] sm:$0xff] %v9586_v13  ;;  %v9591_v48 = vpop.permute.xlu1 %3418  ;;  %2528 = vperm.xlu0 %6197, %v6335_v36   ;;  %v6336_v13 = vld [vmem:[%s13030_s0 + $0x298] sm:$0x1f]  ;;  %v813_v36 = vrot.slane %v529_v32, 5  ;;  %v403_v32 = vld [vmem:[%s13030_s0 + $0x2b2] sm:$0x7] }
 0x3a0   :  { %3716 = vperm.xlu1 %6196, %v9584_v7   ;;  %v13722_v7 = vrot.slane %v8015_v17, 5  ;;  %v13725_v17 = vrot.slane %v8049_v20, 5  ;;  %v404_v20 = vld [vmem:[%s13030_s0 + $0x2c2] sm:$0xff] }
 0x3a2   :  { %v9602_v56 = vpop.permute.xlu0 %2280 }
 0x3a3   :  { %13719 = vst [vmem:[#allocation476_spill] sm:$0xff] %v9602_v56  ;;  %v9607_v44 = vpop.permute.xlu1 %3427  ;;  %2536 = vperm.xlu0 %6197, %v6336_v13   ;;  %v6337_v56 = vld [vmem:[%s13030_s0 + $0x2a8] sm:$0xff]  ;;  %v9626_v13 = vsel %vm730_vm0, %v13722_v7, %v813_v36  ;;  %v9642_v7 = vsel %vm730_vm0, %v403_v32, %v13725_v17 }
 0x3a4   :  { %3726 = vperm.xlu1 %6196, %v9600_v51   ;;  %13723 = vst [vmem:[#allocation479_spill] sm:$0xff] %v9626_v13  ;;  %13726 = vst [vmem:[#allocation481_spill] sm:$0xff] %v9642_v7 }
 0x3a6   :  { %v9616_v40 = vpop.permute.xlu0 %2288 }
 0x3a7   :  { %13720 = vst [vmem:[#allocation477_spill] sm:$0xff] %v9616_v40  ;;  %v9618_v21 = vpop.permute.xlu1 %3436  ;;  %2544 = vperm.xlu0 %6197, %v6337_v56  }
 0x3a8   :  { %13721 = vst [vmem:[#allocation478_spill] sm:$0xff] %v9618_v21  ;;  %3735 = vperm.xlu1 %6196, %v400_v24   ;;  %v6338_v21 = vld [vmem:[%s13030_s0 + $0x2b8] sm:$0xff]  ;;  %v533_v24 = vld [vmem:[%s13030_s0 + $0x2c1] sm:$0x3] }
 0x3aa   :  { %v9628_v51 = vpop.permute.xlu0 %2296 }
 0x3ab   :  { %13724 = vst [vmem:[#allocation480_spill] sm:$0xff] %v9628_v51  ;;  %v9633_v40 = vpop.permute.xlu1 %3446  ;;  %2552 = vperm.xlu0 %6197, %v6338_v21   ;;  %v6339_v51 = vld [vmem:[%s13030_s0 + $0x2c8] sm:$0x1f]  ;;  %v819_v21 = vrot.slane %v533_v24, 5  ;;  %v407_v24 = vld [vmem:[%s13030_s0 + $0x2e2] sm:$0x7] }
 0x3ac   :  { %3744 = vperm.xlu1 %6196, %v9626_v13   ;;  %v13730_v13 = vrot.slane %v8069_v46, 5  ;;  %v13733_v46 = vrot.slane %v8103_v16, 5  ;;  %v408_v16 = vld [vmem:[%s13030_s0 + $0x2f2] sm:$0xff] }
 0x3ae   :  { %v9644_v56 = vpop.permute.xlu0 %2304 }
 0x3af   :  { %13727 = vst [vmem:[#allocation482_spill] sm:$0xff] %v9644_v56  ;;  %v9649_v36 = vpop.permute.xlu1 %3455  ;;  %2560 = vperm.xlu0 %6197, %v6339_v51   ;;  %v6340_v56 = vld [vmem:[%s13030_s0 + $0x2d8] sm:$0xff]  ;;  %v9668_v51 = vsel %vm730_vm0, %v13730_v13, %v819_v21  ;;  %v9684_v13 = vsel %vm730_vm0, %v407_v24, %v13733_v46 }
 0x3b0   :  { %3754 = vperm.xlu1 %6196, %v9642_v7   ;;  %13731 = vst [vmem:[#allocation485_spill] sm:$0xff] %v9668_v51  ;;  %13734 = vst [vmem:[#allocation487_spill] sm:$0xff] %v9684_v13 }
 0x3b2   :  { %v9658_v32 = vpop.permute.xlu0 %2312 }
 0x3b3   :  { %13728 = vst [vmem:[#allocation483_spill] sm:$0xff] %v9658_v32  ;;  %v9660_v17 = vpop.permute.xlu1 %3464  ;;  %2568 = vperm.xlu0 %6197, %v6340_v56  }
 0x3b4   :  { %13729 = vst [vmem:[#allocation484_spill] sm:$0xff] %v9660_v17  ;;  %3763 = vperm.xlu1 %6196, %v404_v20   ;;  %v6341_v17 = vld [vmem:[%s13030_s0 + $0x2e8] sm:$0xff]  ;;  %v537_v20 = vld [vmem:[%s13030_s0 + $0x2f1] sm:$0x3] }
 0x3b6   :  { %v9670_v7 = vpop.permute.xlu0 %2320 }
 0x3b7   :  { %13732 = vst [vmem:[#allocation486_spill] sm:$0xff] %v9670_v7  ;;  %v9675_v32 = vpop.permute.xlu1 %3474  ;;  %2576 = vperm.xlu0 %6197, %v6341_v17   ;;  %v6342_v7 = vld [vmem:[%s13030_s0 + $0x2f8] sm:$0x1f]  ;;  %v825_v17 = vrot.slane %v537_v20, 5  ;;  %v411_v20 = vld [vmem:[%s13030_s0 + $0x312] sm:$0x7] }
 0x3b8   :  { %3772 = vperm.xlu1 %6196, %v9668_v51   ;;  %v13738_v51 = vrot.slane %v8123_v29, 5  ;;  %v13741_v29 = vrot.slane %v8157_v4, 5  ;;  %v412_v4 = vld [vmem:[%s13030_s0 + $0x322] sm:$0xff] }
 0x3ba   :  { %v9686_v56 = vpop.permute.xlu0 %2328 }
 0x3bb   :  { %13735 = vst [vmem:[#allocation488_spill] sm:$0xff] %v9686_v56  ;;  %v9691_v21 = vpop.permute.xlu1 %3483  ;;  %2584 = vperm.xlu0 %6197, %v6342_v7   ;;  %v6343_v56 = vld [vmem:[%s13030_s0 + $0x308] sm:$0xff]  ;;  %v9710_v7 = vsel %vm730_vm0, %v13738_v51, %v825_v17  ;;  %v9726_v51 = vsel %vm730_vm0, %v411_v20, %v13741_v29 }
 0x3bc   :  { %3782 = vperm.xlu1 %6196, %v9684_v13   ;;  %13739 = vst [vmem:[#allocation491_spill] sm:$0xff] %v9710_v7  ;;  %13742 = vst [vmem:[#allocation493_spill] sm:$0xff] %v9726_v51 }
 0x3be   :  { %v9700_v24 = vpop.permute.xlu0 %2336 }
 0x3bf   :  { %13736 = vst [vmem:[#allocation489_spill] sm:$0xff] %v9700_v24  ;;  %v9702_v46 = vpop.permute.xlu1 %3492  ;;  %2592 = vperm.xlu0 %6197, %v6343_v56  }
 0x3c0   :  { %13737 = vst [vmem:[#allocation490_spill] sm:$0xff] %v9702_v46  ;;  %3791 = vperm.xlu1 %6196, %v408_v16   ;;  %v6344_v46 = vld [vmem:[%s13030_s0 + $0x318] sm:$0xff]  ;;  %v541_v16 = vld [vmem:[%s13030_s0 + $0x321] sm:$0x3] }
 0x3c2   :  { %v9712_v13 = vpop.permute.xlu0 %2344 }
 0x3c3   :  { %13740 = vst [vmem:[#allocation492_spill] sm:$0xff] %v9712_v13  ;;  %v9717_v24 = vpop.permute.xlu1 %3502  ;;  %2600 = vperm.xlu0 %6197, %v6344_v46   ;;  %v6345_v13 = vld [vmem:[%s13030_s0 + $0x328] sm:$0x1f]  ;;  %v831_v46 = vrot.slane %v541_v16, 5  ;;  %v415_v16 = vld [vmem:[%s13030_s0 + $0x342] sm:$0x7] }
 0x3c4   :  { %3800 = vperm.xlu1 %6196, %v9710_v7   ;;  %v13746_v7 = vrot.slane %v8177_v12, 5  ;;  %v13749_v12 = vrot.slane %v8211_v9, 5  ;;  %v416_v9 = vld [vmem:[%s13030_s0 + $0x352] sm:$0xff] }
 0x3c6   :  { %v9728_v56 = vpop.permute.xlu0 %2352 }
 0x3c7   :  { %13743 = vst [vmem:[#allocation494_spill] sm:$0xff] %v9728_v56  ;;  %v9733_v17 = vpop.permute.xlu1 %3511  ;;  %2608 = vperm.xlu0 %6197, %v6345_v13   ;;  %v6346_v56 = vld [vmem:[%s13030_s0 + $0x338] sm:$0xff]  ;;  %v9752_v13 = vsel %vm730_vm0, %v13746_v7, %v831_v46  ;;  %v9768_v7 = vsel %vm730_vm0, %v415_v16, %v13749_v12 }
 0x3c8   :  { %3810 = vperm.xlu1 %6196, %v9726_v51   ;;  %13747 = vst [vmem:[#allocation497_spill] sm:$0xff] %v9752_v13  ;;  %13750 = vst [vmem:[#allocation499_spill] sm:$0xff] %v9768_v7 }
 0x3ca   :  { %v9742_v20 = vpop.permute.xlu0 %2360 }
 0x3cb   :  { %13744 = vst [vmem:[#allocation495_spill] sm:$0xff] %v9742_v20  ;;  %v9744_v29 = vpop.permute.xlu1 %3520  ;;  %2616 = vperm.xlu0 %6197, %v6346_v56  }
 0x3cc   :  { %13745 = vst [vmem:[#allocation496_spill] sm:$0xff] %v9744_v29  ;;  %3819 = vperm.xlu1 %6196, %v412_v4   ;;  %v6347_v29 = vld [vmem:[%s13030_s0 + $0x348] sm:$0xff]  ;;  %v545_v4 = vld [vmem:[%s13030_s0 + $0x351] sm:$0x3] }
 0x3ce   :  { %v9754_v51 = vpop.permute.xlu0 %2368 }
 0x3cf   :  { %13748 = vst [vmem:[#allocation498_spill] sm:$0xff] %v9754_v51  ;;  %v9759_v20 = vpop.permute.xlu1 %3530  ;;  %2624 = vperm.xlu0 %6197, %v6347_v29   ;;  %v6348_v51 = vld [vmem:[%s13030_s0 + $0x358] sm:$0x1f]  ;;  %v837_v29 = vrot.slane %v545_v4, 5  ;;  %v419_v4 = vld [vmem:[%s13030_s0 + $0x372] sm:$0x7] }
 0x3d0   :  { %3828 = vperm.xlu1 %6196, %v9752_v13   ;;  %v13754_v13 = vrot.slane %v8231_v28, 5  ;;  %v13757_v28 = vrot.slane %v8265_v8, 5  ;;  %v420_v8 = vld [vmem:[%s13030_s0 + $0x382] sm:$0xff] }
 0x3d2   :  { %v9770_v56 = vpop.permute.xlu0 %2376 }
 0x3d3   :  { %13751 = vst [vmem:[#allocation500_spill] sm:$0xff] %v9770_v56  ;;  %v9775_v46 = vpop.permute.xlu1 %3539  ;;  %2632 = vperm.xlu0 %6197, %v6348_v51   ;;  %v6349_v56 = vld [vmem:[%s13030_s0 + $0x368] sm:$0xff]  ;;  %v9794_v51 = vsel %vm730_vm0, %v13754_v13, %v837_v29  ;;  %v9810_v13 = vsel %vm730_vm0, %v419_v4, %v13757_v28 }
 0x3d4   :  { %3838 = vperm.xlu1 %6196, %v9768_v7   ;;  %13755 = vst [vmem:[#allocation503_spill] sm:$0xff] %v9794_v51  ;;  %13758 = vst [vmem:[#allocation505_spill] sm:$0xff] %v9810_v13 }
 0x3d6   :  { %v9784_v16 = vpop.permute.xlu0 %2384 }
 0x3d7   :  { %13752 = vst [vmem:[#allocation501_spill] sm:$0xff] %v9784_v16  ;;  %v9786_v12 = vpop.permute.xlu1 %3548  ;;  %2640 = vperm.xlu0 %6197, %v6349_v56  }
 0x3d8   :  { %13753 = vst [vmem:[#allocation502_spill] sm:$0xff] %v9786_v12  ;;  %3847 = vperm.xlu1 %6196, %v416_v9   ;;  %v6350_v12 = vld [vmem:[%s13030_s0 + $0x378] sm:$0xff]  ;;  %v549_v9 = vld [vmem:[%s13030_s0 + $0x381] sm:$0x3] }
 0x3da   :  { %v9796_v7 = vpop.permute.xlu0 %2392 }
 0x3db   :  { %13756 = vst [vmem:[#allocation504_spill] sm:$0xff] %v9796_v7  ;;  %v9801_v16 = vpop.permute.xlu1 %3558  ;;  %2648 = vperm.xlu0 %6197, %v6350_v12   ;;  %v6351_v7 = vld [vmem:[%s13030_s0 + $0x388] sm:$0x1f]  ;;  %v843_v12 = vrot.slane %v549_v9, 5  ;;  %v423_v9 = vld [vmem:[%s13030_s0 + $0x3a2] sm:$0x7] }
 0x3dc   :  { %3856 = vperm.xlu1 %6196, %v9794_v51   ;;  %v13762_v51 = vrot.slane %v8285_v41, 5  ;;  %v13765_v41 = vrot.slane %v8319_v5, 5  ;;  %v424_v5 = vld [vmem:[%s13030_s0 + $0x3b2] sm:$0xff] }
 0x3de   :  { %v9812_v56 = vpop.permute.xlu0 %2400 }
 0x3df   :  { %13759 = vst [vmem:[#allocation506_spill] sm:$0xff] %v9812_v56  ;;  %v9817_v29 = vpop.permute.xlu1 %3567  ;;  %2656 = vperm.xlu0 %6197, %v6351_v7   ;;  %v6352_v56 = vld [vmem:[%s13030_s0 + $0x398] sm:$0xff]  ;;  %v9836_v7 = vsel %vm730_vm0, %v13762_v51, %v843_v12  ;;  %v9852_v51 = vsel %vm730_vm0, %v423_v9, %v13765_v41 }
 0x3e0   :  { %3866 = vperm.xlu1 %6196, %v9810_v13   ;;  %13763 = vst [vmem:[#allocation509_spill] sm:$0xff] %v9836_v7  ;;  %13766 = vst [vmem:[#allocation511_spill] sm:$0xff] %v9852_v51 }
 0x3e2   :  { %v9826_v4 = vpop.permute.xlu0 %2408 }
 0x3e3   :  { %13760 = vst [vmem:[#allocation507_spill] sm:$0xff] %v9826_v4  ;;  %v9828_v28 = vpop.permute.xlu1 %3576  ;;  %2664 = vperm.xlu0 %6197, %v6352_v56  }
 0x3e4   :  { %13761 = vst [vmem:[#allocation508_spill] sm:$0xff] %v9828_v28  ;;  %3875 = vperm.xlu1 %6196, %v420_v8   ;;  %v6353_v28 = vld [vmem:[%s13030_s0 + $0x3a8] sm:$0xff]  ;;  %v553_v8 = vld [vmem:[%s13030_s0 + $0x3b1] sm:$0x3] }
 0x3e6   :  { %v9838_v13 = vpop.permute.xlu0 %2416 }
 0x3e7   :  { %13764 = vst [vmem:[#allocation510_spill] sm:$0xff] %v9838_v13  ;;  %v9843_v4 = vpop.permute.xlu1 %3586  ;;  %2672 = vperm.xlu0 %6197, %v6353_v28   ;;  %v6354_v13 = vld [vmem:[%s13030_s0 + $0x3b8] sm:$0x1f]  ;;  %v849_v28 = vrot.slane %v553_v8, 5  ;;  %v427_v8 = vld [vmem:[%s13030_s0 + $0x3d2] sm:$0x7] }
 0x3e8   :  { %3884 = vperm.xlu1 %6196, %v9836_v7   ;;  %v13770_v7 = vrot.slane %v8339_v37, 5  ;;  %v13773_v37 = vrot.slane %v8373_v49, 5  ;;  %v428_v49 = vld [vmem:[%s13030_s0 + $0x3e2] sm:$0xff] }
 0x3ea   :  { %v9854_v56 = vpop.permute.xlu0 %2424 }
 0x3eb   :  { %13767 = vst [vmem:[#allocation512_spill] sm:$0xff] %v9854_v56  ;;  %v9859_v12 = vpop.permute.xlu1 %3595  ;;  %2680 = vperm.xlu0 %6197, %v6354_v13   ;;  %v6355_v56 = vld [vmem:[%s13030_s0 + $0x3c8] sm:$0xff]  ;;  %v9878_v13 = vsel %vm730_vm0, %v13770_v7, %v849_v28  ;;  %v9894_v7 = vsel %vm730_vm0, %v427_v8, %v13773_v37 }
 0x3ec   :  { %3894 = vperm.xlu1 %6196, %v9852_v51   ;;  %13771 = vst [vmem:[#allocation515_spill] sm:$0xff] %v9878_v13  ;;  %13774 = vst [vmem:[#allocation517_spill] sm:$0xff] %v9894_v7 }
 0x3ee   :  { %v9868_v9 = vpop.permute.xlu0 %2432 }
 0x3ef   :  { %13768 = vst [vmem:[#allocation513_spill] sm:$0xff] %v9868_v9  ;;  %v9870_v41 = vpop.permute.xlu1 %3604  ;;  %2688 = vperm.xlu0 %6197, %v6355_v56  }
 0x3f0   :  { %13769 = vst [vmem:[#allocation514_spill] sm:$0xff] %v9870_v41  ;;  %3903 = vperm.xlu1 %6196, %v424_v5   ;;  %v6356_v41 = vld [vmem:[%s13030_s0 + $0x3d8] sm:$0xff]  ;;  %v557_v5 = vld [vmem:[%s13030_s0 + $0x3e1] sm:$0x3] }
 0x3f2   :  { %v9880_v51 = vpop.permute.xlu0 %2440 }
 0x3f3   :  { %13772 = vst [vmem:[#allocation516_spill] sm:$0xff] %v9880_v51  ;;  %v9885_v9 = vpop.permute.xlu1 %3614  ;;  %2696 = vperm.xlu0 %6197, %v6356_v41   ;;  %v6357_v51 = vld [vmem:[%s13030_s0 + $0x3e8] sm:$0x1f]  ;;  %v855_v41 = vrot.slane %v557_v5, 5  ;;  %v431_v5 = vld [vmem:[%s13030_s0 + $0x402] sm:$0x7] }
 0x3f4   :  { %3912 = vperm.xlu1 %6196, %v9878_v13   ;;  %v13778_v13 = vrot.slane %v8393_v45, 5  ;;  %v13781_v45 = vrot.slane %v8427_v57, 5  ;;  %v432_v57 = vld [vmem:[%s13030_s0 + $0x412] sm:$0xff] }
 0x3f6   :  { %v9896_v56 = vpop.permute.xlu0 %2448 }
 0x3f7   :  { %13775 = vst [vmem:[#allocation518_spill] sm:$0xff] %v9896_v56  ;;  %v9901_v28 = vpop.permute.xlu1 %3623  ;;  %2704 = vperm.xlu0 %6197, %v6357_v51   ;;  %v6358_v56 = vld [vmem:[%s13030_s0 + $0x3f8] sm:$0xff]  ;;  %v9920_v51 = vsel %vm730_vm0, %v13778_v13, %v855_v41  ;;  %v9936_v13 = vsel %vm730_vm0, %v431_v5, %v13781_v45 }
 0x3f8   :  { %3922 = vperm.xlu1 %6196, %v9894_v7   ;;  %13779 = vst [vmem:[#allocation521_spill] sm:$0xff] %v9920_v51  ;;  %13782 = vst [vmem:[#allocation523_spill] sm:$0xff] %v9936_v13 }
 0x3fa   :  { %v9910_v8 = vpop.permute.xlu0 %2456 }
 0x3fb   :  { %13776 = vst [vmem:[#allocation519_spill] sm:$0xff] %v9910_v8  ;;  %v9912_v37 = vpop.permute.xlu1 %3632  ;;  %2712 = vperm.xlu0 %6197, %v6358_v56  }
 0x3fc   :  { %13777 = vst [vmem:[#allocation520_spill] sm:$0xff] %v9912_v37  ;;  %3931 = vperm.xlu1 %6196, %v428_v49   ;;  %v6359_v37 = vld [vmem:[%s13030_s0 + $0x408] sm:$0xff]  ;;  %v561_v49 = vld [vmem:[%s13030_s0 + $0x411] sm:$0x3] }
 0x3fe   :  { %v9922_v7 = vpop.permute.xlu0 %2464 }
 0x3ff   :  { %13780 = vst [vmem:[#allocation522_spill] sm:$0xff] %v9922_v7  ;;  %v9927_v8 = vpop.permute.xlu1 %3642  ;;  %2720 = vperm.xlu0 %6197, %v6359_v37   ;;  %v6360_v7 = vld [vmem:[%s13030_s0 + $0x418] sm:$0x1f]  ;;  %v861_v37 = vrot.slane %v561_v49, 5  ;;  %v435_v49 = vld [vmem:[%s13030_s0 + $0x432] sm:$0x7] }
 0x400   :  { %3940 = vperm.xlu1 %6196, %v9920_v51   ;;  %v13786_v51 = vrot.slane %v8447_v53, 5  ;;  %v13789_v53 = vrot.slane %v8481_v2, 5  ;;  %v436_v2 = vld [vmem:[%s13030_s0 + $0x442] sm:$0xff] }
 0x402   :  { %v9938_v56 = vpop.permute.xlu0 %2472 }
 0x403   :  { %13783 = vst [vmem:[#allocation524_spill] sm:$0xff] %v9938_v56  ;;  %v9943_v41 = vpop.permute.xlu1 %3651  ;;  %2728 = vperm.xlu0 %6197, %v6360_v7   ;;  %v6361_v56 = vld [vmem:[%s13030_s0 + $0x428] sm:$0xff]  ;;  %v9962_v7 = vsel %vm730_vm0, %v13786_v51, %v861_v37  ;;  %v9978_v51 = vsel %vm730_vm0, %v435_v49, %v13789_v53 }
 0x404   :  { %3950 = vperm.xlu1 %6196, %v9936_v13   ;;  %13787 = vst [vmem:[#allocation527_spill] sm:$0xff] %v9962_v7  ;;  %13790 = vst [vmem:[#allocation529_spill] sm:$0xff] %v9978_v51 }
 0x406   :  { %v9952_v5 = vpop.permute.xlu0 %2480 }
 0x407   :  { %13784 = vst [vmem:[#allocation525_spill] sm:$0xff] %v9952_v5  ;;  %v9954_v45 = vpop.permute.xlu1 %3660  ;;  %2736 = vperm.xlu0 %6197, %v6361_v56  }
 0x408   :  { %13785 = vst [vmem:[#allocation526_spill] sm:$0xff] %v9954_v45  ;;  %3959 = vperm.xlu1 %6196, %v432_v57   ;;  %v6362_v45 = vld [vmem:[%s13030_s0 + $0x438] sm:$0xff]  ;;  %v565_v57 = vld [vmem:[%s13030_s0 + $0x441] sm:$0x3] }
 0x40a   :  { %v9964_v13 = vpop.permute.xlu0 %2488 }
 0x40b   :  { %13788 = vst [vmem:[#allocation528_spill] sm:$0xff] %v9964_v13  ;;  %v9969_v5 = vpop.permute.xlu1 %3670  ;;  %2744 = vperm.xlu0 %6197, %v6362_v45   ;;  %v6363_v13 = vld [vmem:[%s13030_s0 + $0x448] sm:$0x1f]  ;;  %v867_v45 = vrot.slane %v565_v57, 5  ;;  %v439_v57 = vld [vmem:[%s13030_s0 + $0x462] sm:$0x7] }
 0x40c   :  { %3968 = vperm.xlu1 %6196, %v9962_v7   ;;  %v13794_v7 = vrot.slane %v8501_v61, 5  ;;  %v13797_v61 = vrot.slane %v8535_v18, 5  ;;  %v440_v18 = vld [vmem:[%s13030_s0 + $0x472] sm:$0xff] }
 0x40e   :  { %v9980_v56 = vpop.permute.xlu0 %2496 }
 0x40f   :  { %13791 = vst [vmem:[#allocation530_spill] sm:$0xff] %v9980_v56  ;;  %v9985_v37 = vpop.permute.xlu1 %3679  ;;  %2752 = vperm.xlu0 %6197, %v6363_v13   ;;  %v6364_v56 = vld [vmem:[%s13030_s0 + $0x458] sm:$0xff]  ;;  %v10004_v13 = vsel %vm730_vm0, %v13794_v7, %v867_v45  ;;  %v10020_v7 = vsel %vm730_vm0, %v439_v57, %v13797_v61 }
 0x410   :  { %3978 = vperm.xlu1 %6196, %v9978_v51   ;;  %13795 = vst [vmem:[#allocation533_spill] sm:$0xff] %v10004_v13  ;;  %13798 = vst [vmem:[#allocation535_spill] sm:$0xff] %v10020_v7 }
 0x412   :  { %v9994_v49 = vpop.permute.xlu0 %2504 }
 0x413   :  { %13792 = vst [vmem:[#allocation531_spill] sm:$0xff] %v9994_v49  ;;  %v9996_v53 = vpop.permute.xlu1 %3688  ;;  %2760 = vperm.xlu0 %6197, %v6364_v56  }
 0x414   :  { %13793 = vst [vmem:[#allocation532_spill] sm:$0xff] %v9996_v53  ;;  %3987 = vperm.xlu1 %6196, %v436_v2   ;;  %v6365_v53 = vld [vmem:[%s13030_s0 + $0x468] sm:$0xff]  ;;  %v569_v2 = vld [vmem:[%s13030_s0 + $0x471] sm:$0x3] }
 0x416   :  { %v10006_v51 = vpop.permute.xlu0 %2512 }
 0x417   :  { %13796 = vst [vmem:[#allocation534_spill] sm:$0xff] %v10006_v51  ;;  %v10011_v49 = vpop.permute.xlu1 %3698  ;;  %2768 = vperm.xlu0 %6197, %v6365_v53   ;;  %v6366_v51 = vld [vmem:[%s13030_s0 + $0x478] sm:$0x1f]  ;;  %v873_v53 = vrot.slane %v569_v2, 5  ;;  %v443_v2 = vld [vmem:[%s13030_s0 + $0x492] sm:$0x7] }
 0x418   :  { %3996 = vperm.xlu1 %6196, %v10004_v13   ;;  %v13802_v13 = vrot.slane %v8555_v10, 5  ;;  %v13806_v10 = vrot.slane %v8589_v34, 5  ;;  %v444_v34 = vld [vmem:[%s13030_s0 + $0x4a2] sm:$0xff] }
 0x41a   :  { %v10022_v56 = vpop.permute.xlu0 %2520 }
 0x41b   :  { %13799 = vst [vmem:[#allocation536_spill] sm:$0xff] %v10022_v56  ;;  %v10027_v45 = vpop.permute.xlu1 %3707  ;;  %2776 = vperm.xlu0 %6197, %v6366_v51   ;;  %v6367_v56 = vld [vmem:[%s13030_s0 + $0x488] sm:$0xff]  ;;  %v10046_v51 = vsel %vm730_vm0, %v13802_v13, %v873_v53  ;;  %v10062_v13 = vsel %vm730_vm0, %v443_v2, %v13806_v10 }
 0x41c   :  { %4006 = vperm.xlu1 %6196, %v10020_v7   ;;  %13803 = vst [vmem:[#allocation539_spill] sm:$0xff] %v10046_v51  ;;  %13807 = vst [vmem:[#allocation542_spill] sm:$0xff] %v10062_v13 }
 0x41e   :  { %v10036_v57 = vpop.permute.xlu0 %2528 }
 0x41f   :  { %13800 = vst [vmem:[#allocation537_spill] sm:$0xff] %v10036_v57  ;;  %v10038_v61 = vpop.permute.xlu1 %3716  ;;  %2784 = vperm.xlu0 %6197, %v6367_v56  }
 0x420   :  { %13801 = vst [vmem:[#allocation538_spill] sm:$0xff] %v10038_v61  ;;  %4015 = vperm.xlu1 %6196, %v440_v18   ;;  %v6368_v61 = vld [vmem:[%s13030_s0 + $0x498] sm:$0xff]  ;;  %v573_v18 = vld [vmem:[%s13030_s0 + $0x4a1] sm:$0x3] }
 0x422   :  { %v10048_v7 = vpop.permute.xlu0 %2536 }
 0x423   :  { %13804 = vst [vmem:[#allocation540_spill] sm:$0xff] %v10048_v7  ;;  %v10053_v57 = vpop.permute.xlu1 %3726  ;;  %2792 = vperm.xlu0 %6197, %v6368_v61   ;;  %v6369_v7 = vld [vmem:[%s13030_s0 + $0x4a8] sm:$0x1f]  ;;  %v879_v61 = vrot.slane %v573_v18, 5  ;;  %v447_v18 = vld [vmem:[%s13030_s0 + $0x4c2] sm:$0x7] }
 0x424   :  { %13805 = vst [vmem:[#allocation541_spill] sm:$0xff] %v10053_v57  ;;  %4024 = vperm.xlu1 %6196, %v10046_v51   ;;  %v13812_v51 = vrot.slane %v8609_v26, 5  ;;  %v13816_v26 = vrot.slane %v8643_v50, 5  ;;  %v448_v50 = vld [vmem:[%s13030_s0 + $0x4d2] sm:$0xff] }
 0x426   :  { %v10064_v56 = vpop.permute.xlu0 %2544 }
 0x427   :  { %13808 = vst [vmem:[#allocation543_spill] sm:$0xff] %v10064_v56  ;;  %v10069_v53 = vpop.permute.xlu1 %3735  ;;  %2800 = vperm.xlu0 %6197, %v6369_v7   ;;  %v6370_v56 = vld [vmem:[%s13030_s0 + $0x4b8] sm:$0xff]  ;;  %v10088_v7 = vsel %vm730_vm0, %v13812_v51, %v879_v61  ;;  %v10104_v51 = vsel %vm730_vm0, %v447_v18, %v13816_v26 }
 0x428   :  { %13809 = vst [vmem:[#allocation544_spill] sm:$0xff] %v10069_v53  ;;  %4034 = vperm.xlu1 %6196, %v10062_v13   ;;  %13813 = vst [vmem:[#allocation547_spill] sm:$0xff] %v10088_v7  ;;  %v14000_v53 = vld [vmem:[#allocation10_spill] sm:$0xff] }
 0x429   :  { %13817 = vst [vmem:[#allocation550_spill] sm:$0xff] %v10104_v51 }
 0x42a   :  { %v10078_v2 = vpop.permute.xlu0 %2552 }
 0x42b   :  { %13810 = vst [vmem:[#allocation545_spill] sm:$0xff] %v10078_v2  ;;  %v10080_v10 = vpop.permute.xlu1 %3744  ;;  %2808 = vperm.xlu0 %6197, %v6370_v56  }
 0x42c   :  { %13811 = vst [vmem:[#allocation546_spill] sm:$0xff] %v10080_v10  ;;  %4043 = vperm.xlu1 %6196, %v444_v34   ;;  %v6371_v10 = vld [vmem:[%s13030_s0 + $0x4c8] sm:$0xff]  ;;  %v577_v34 = vld [vmem:[%s13030_s0 + $0x4d1] sm:$0x3] }
 0x42e   :  { %v10090_v13 = vpop.permute.xlu0 %2560 }
 0x42f   :  { %13814 = vst [vmem:[#allocation548_spill] sm:$0xff] %v10090_v13  ;;  %v10095_v2 = vpop.permute.xlu1 %3754  ;;  %2816 = vperm.xlu0 %6197, %v6371_v10   ;;  %v6372_v13 = vld [vmem:[%s13030_s0 + $0x4d8] sm:$0x1f]  ;;  %v885_v10 = vrot.slane %v577_v34, 5  ;;  %v451_v34 = vld [vmem:[%s13030_s0 + $0x4f2] sm:$0x7] }
 0x430   :  { %13815 = vst [vmem:[#allocation549_spill] sm:$0xff] %v10095_v2  ;;  %4052 = vperm.xlu1 %6196, %v10088_v7   ;;  %v13822_v7 = vrot.slane %v8663_v42, 5  ;;  %v13826_v42 = vrot.slane %v8697_v3, 5  ;;  %v452_v3 = vld [vmem:[%s13030_s0 + $0x502] sm:$0xff] }
 0x432   :  { %v10106_v56 = vpop.permute.xlu0 %2568 }
 0x433   :  { %13818 = vst [vmem:[#allocation551_spill] sm:$0xff] %v10106_v56  ;;  %v10111_v61 = vpop.permute.xlu1 %3763  ;;  %2824 = vperm.xlu0 %6197, %v6372_v13   ;;  %v6373_v56 = vld [vmem:[%s13030_s0 + $0x4e8] sm:$0xff]  ;;  %v10130_v13 = vsel %vm730_vm0, %v13822_v7, %v885_v10  ;;  %v10146_v7 = vsel %vm730_vm0, %v451_v34, %v13826_v42 }
 0x434   :  { %13819 = vst [vmem:[#allocation552_spill] sm:$0xff] %v10111_v61  ;;  %4062 = vperm.xlu1 %6196, %v10104_v51   ;;  %13823 = vst [vmem:[#allocation555_spill] sm:$0xff] %v10130_v13  ;;  %v13979_v61 = vld [vmem:[#allocation205_spill] sm:$0xff] }
 0x435   :  { %13827 = vst [vmem:[#allocation558_spill] sm:$0xff] %v10146_v7 }
 0x436   :  { %v10120_v18 = vpop.permute.xlu0 %2576 }
 0x437   :  { %13820 = vst [vmem:[#allocation553_spill] sm:$0xff] %v10120_v18  ;;  %v10122_v26 = vpop.permute.xlu1 %3772  ;;  %2832 = vperm.xlu0 %6197, %v6373_v56  }
 0x438   :  { %13821 = vst [vmem:[#allocation554_spill] sm:$0xff] %v10122_v26  ;;  %4071 = vperm.xlu1 %6196, %v448_v50   ;;  %v6374_v26 = vld [vmem:[%s13030_s0 + $0x4f8] sm:$0xff]  ;;  %v581_v50 = vld [vmem:[%s13030_s0 + $0x501] sm:$0x3] }
 0x43a   :  { %v10132_v51 = vpop.permute.xlu0 %2584 }
 0x43b   :  { %13824 = vst [vmem:[#allocation556_spill] sm:$0xff] %v10132_v51  ;;  %v10137_v18 = vpop.permute.xlu1 %3782  ;;  %2840 = vperm.xlu0 %6197, %v6374_v26   ;;  %v6375_v51 = vld [vmem:[%s13030_s0 + $0x508] sm:$0x1f]  ;;  %v891_v26 = vrot.slane %v581_v50, 5  ;;  %v455_v50 = vld [vmem:[%s13030_s0 + $0x522] sm:$0x7] }
 0x43c   :  { %13825 = vst [vmem:[#allocation557_spill] sm:$0xff] %v10137_v18  ;;  %4080 = vperm.xlu1 %6196, %v10130_v13   ;;  %v13832_v13 = vld [vmem:[#allocation336_spill] sm:$0xff] }
 0x43e   :  { %v10148_v56 = vpop.permute.xlu0 %2592 }
 0x43f   :  { %13828 = vst [vmem:[#allocation559_spill] sm:$0xff] %v10148_v56  ;;  %v10153_v10 = vpop.permute.xlu1 %3791  ;;  %2848 = vperm.xlu0 %6197, %v6375_v51   ;;  %v6376_v56 = vld [vmem:[%s13030_s0 + $0x518] sm:$0xff] }
 0x440   :  { %13829 = vst [vmem:[#allocation560_spill] sm:$0xff] %v10153_v10  ;;  %4090 = vperm.xlu1 %6196, %v10146_v7   ;;  %v13833_v10 = vrot.slane %v13832_v13, 5 }
 0x442   :  { %v10162_v34 = vpop.permute.xlu0 %2600  ;;  %v10172_v51 = vsel %vm730_vm0, %v13833_v10, %v891_v26  ;;  %v585_v26 = vld [vmem:[%s13030_s0 + $0x531] sm:$0x3] }
 0x443   :  { %13830 = vst [vmem:[#allocation561_spill] sm:$0xff] %v10162_v34  ;;  %v10164_v42 = vpop.permute.xlu1 %3800  ;;  %2856 = vperm.xlu0 %6197, %v6376_v56   ;;  %13834 = vst [vmem:[#allocation336_spill] sm:$0xff] %v10172_v51  ;;  %v13837_v56 = vld [vmem:[#allocation343_spill] sm:$0xff] }
 0x444   :  { %13831 = vst [vmem:[#allocation562_spill] sm:$0xff] %v10164_v42  ;;  %4099 = vperm.xlu1 %6196, %v452_v3   ;;  %v6377_v42 = vld [vmem:[%s13030_s0 + $0x528] sm:$0xff]  ;;  %v13838_v13 = vrot.slane %v13837_v56, 5 }
 0x446   :  { %v10174_v7 = vpop.permute.xlu0 %2608  ;;  %v10188_v10 = vsel %vm730_vm0, %v455_v50, %v13838_v13  ;;  %v897_v50 = vrot.slane %v585_v26, 5  ;;  %v459_v26 = vld [vmem:[%s13030_s0 + $0x552] sm:$0x7] }
 0x447   :  { %13835 = vst [vmem:[#allocation563_spill] sm:$0xff] %v10174_v7  ;;  %v10179_v34 = vpop.permute.xlu1 %3810  ;;  %2864 = vperm.xlu0 %6197, %v6377_v42   ;;  %13839 = vst [vmem:[#allocation343_spill] sm:$0xff] %v10188_v10  ;;  %v456_v42 = vld [vmem:[%s13030_s0 + $0x532] sm:$0xff] }
 0x448   :  { %13836 = vst [vmem:[#allocation564_spill] sm:$0xff] %v10179_v34  ;;  %4108 = vperm.xlu1 %6196, %v10172_v51   ;;  %v6378_v34 = vld [vmem:[%s13030_s0 + $0x538] sm:$0x1f]  ;;  %v13844_v51 = vld [vmem:[#allocation346_spill] sm:$0xff] }
 0x44a   :  { %v10190_v3 = vpop.permute.xlu0 %2616 }
 0x44b   :  { %13840 = vst [vmem:[#allocation565_spill] sm:$0xff] %v10190_v3  ;;  %v10195_v7 = vpop.permute.xlu1 %3819  ;;  %2872 = vperm.xlu0 %6197, %v6378_v34   ;;  %v6379_v3 = vld [vmem:[%s13030_s0 + $0x548] sm:$0xff] }
 0x44c   :  { %13841 = vst [vmem:[#allocation566_spill] sm:$0xff] %v10195_v7  ;;  %4118 = vperm.xlu1 %6196, %v10188_v10   ;;  %v13845_v7 = vrot.slane %v13844_v51, 5 }
 0x44e   :  { %v10204_v56 = vpop.permute.xlu0 %2624  ;;  %v10214_v34 = vsel %vm730_vm0, %v13845_v7, %v897_v50  ;;  %v589_v50 = vld [vmem:[%s13030_s0 + $0x561] sm:$0x3] }
 0x44f   :  { %13842 = vst [vmem:[#allocation567_spill] sm:$0xff] %v10204_v56  ;;  %v10206_v13 = vpop.permute.xlu1 %3828  ;;  %2880 = vperm.xlu0 %6197, %v6379_v3   ;;  %13846 = vst [vmem:[#allocation346_spill] sm:$0xff] %v10214_v34  ;;  %v13849_v3 = vld [vmem:[#allocation353_spill] sm:$0xff] }
 0x450   :  { %13843 = vst [vmem:[#allocation568_spill] sm:$0xff] %v10206_v13  ;;  %4127 = vperm.xlu1 %6196, %v456_v42   ;;  %v6380_v13 = vld [vmem:[%s13030_s0 + $0x558] sm:$0xff]  ;;  %v13850_v51 = vrot.slane %v13849_v3, 5 }
 0x452   :  { %v10216_v10 = vpop.permute.xlu0 %2632  ;;  %v10230_v7 = vsel %vm730_vm0, %v459_v26, %v13850_v51  ;;  %v903_v26 = vrot.slane %v589_v50, 5  ;;  %v463_v50 = vld [vmem:[%s13030_s0 + $0x582] sm:$0x7] }
 0x453   :  { %13847 = vst [vmem:[#allocation569_spill] sm:$0xff] %v10216_v10  ;;  %v10221_v56 = vpop.permute.xlu1 %3838  ;;  %2888 = vperm.xlu0 %6197, %v6380_v13   ;;  %13851 = vst [vmem:[#allocation353_spill] sm:$0xff] %v10230_v7  ;;  %v460_v13 = vld [vmem:[%s13030_s0 + $0x562] sm:$0xff] }
 0x454   :  { %13848 = vst [vmem:[#allocation570_spill] sm:$0xff] %v10221_v56  ;;  %4136 = vperm.xlu1 %6196, %v10214_v34   ;;  %v6381_v56 = vld [vmem:[%s13030_s0 + $0x568] sm:$0x1f]  ;;  %v13856_v34 = vld [vmem:[#allocation356_spill] sm:$0xff] }
 0x456   :  { %v10232_v42 = vpop.permute.xlu0 %2640 }
 0x457   :  { %13852 = vst [vmem:[#allocation571_spill] sm:$0xff] %v10232_v42  ;;  %v10237_v10 = vpop.permute.xlu1 %3847  ;;  %2896 = vperm.xlu0 %6197, %v6381_v56   ;;  %v6382_v42 = vld [vmem:[%s13030_s0 + $0x578] sm:$0xff] }
 0x458   :  { %13853 = vst [vmem:[#allocation572_spill] sm:$0xff] %v10237_v10  ;;  %4146 = vperm.xlu1 %6196, %v10230_v7   ;;  %v13857_v10 = vrot.slane %v13856_v34, 5 }
 0x45a   :  { %v10246_v3 = vpop.permute.xlu0 %2648  ;;  %v10256_v56 = vsel %vm730_vm0, %v13857_v10, %v903_v26  ;;  %v593_v26 = vld [vmem:[%s13030_s0 + $0x591] sm:$0x3] }
 0x45b   :  { %13854 = vst [vmem:[#allocation573_spill] sm:$0xff] %v10246_v3  ;;  %v10248_v51 = vpop.permute.xlu1 %3856  ;;  %2904 = vperm.xlu0 %6197, %v6382_v42   ;;  %13858 = vst [vmem:[#allocation356_spill] sm:$0xff] %v10256_v56  ;;  %v13861_v42 = vld [vmem:[#allocation363_spill] sm:$0xff] }
 0x45c   :  { %13855 = vst [vmem:[#allocation574_spill] sm:$0xff] %v10248_v51  ;;  %4155 = vperm.xlu1 %6196, %v460_v13   ;;  %v6383_v51 = vld [vmem:[%s13030_s0 + $0x588] sm:$0xff]  ;;  %v13862_v34 = vrot.slane %v13861_v42, 5 }
 0x45e   :  { %v10258_v7 = vpop.permute.xlu0 %2656  ;;  %v10272_v10 = vsel %vm730_vm0, %v463_v50, %v13862_v34  ;;  %v909_v50 = vrot.slane %v593_v26, 5  ;;  %v467_v26 = vld [vmem:[%s13030_s0 + $0x5b2] sm:$0x7] }
 0x45f   :  { %13859 = vst [vmem:[#allocation575_spill] sm:$0xff] %v10258_v7  ;;  %v10263_v3 = vpop.permute.xlu1 %3866  ;;  %2912 = vperm.xlu0 %6197, %v6383_v51   ;;  %13863 = vst [vmem:[#allocation363_spill] sm:$0xff] %v10272_v10  ;;  %v464_v51 = vld [vmem:[%s13030_s0 + $0x592] sm:$0xff] }
 0x460   :  { %13860 = vst [vmem:[#allocation576_spill] sm:$0xff] %v10263_v3  ;;  %4164 = vperm.xlu1 %6196, %v10256_v56   ;;  %v6384_v3 = vld [vmem:[%s13030_s0 + $0x598] sm:$0x1f]  ;;  %v13868_v56 = vld [vmem:[#allocation366_spill] sm:$0xff] }
 0x462   :  { %v10274_v13 = vpop.permute.xlu0 %2664 }
 0x463   :  { %13864 = vst [vmem:[#allocation577_spill] sm:$0xff] %v10274_v13  ;;  %v10279_v7 = vpop.permute.xlu1 %3875  ;;  %2920 = vperm.xlu0 %6197, %v6384_v3   ;;  %v6385_v13 = vld [vmem:[%s13030_s0 + $0x5a8] sm:$0xff] }
 0x464   :  { %13865 = vst [vmem:[#allocation578_spill] sm:$0xff] %v10279_v7  ;;  %4174 = vperm.xlu1 %6196, %v10272_v10   ;;  %v13869_v7 = vrot.slane %v13868_v56, 5 }
 0x466   :  { %v10288_v42 = vpop.permute.xlu0 %2672  ;;  %v10298_v3 = vsel %vm730_vm0, %v13869_v7, %v909_v50  ;;  %v597_v50 = vld [vmem:[%s13030_s0 + $0x5c1] sm:$0x3] }
 0x467   :  { %13866 = vst [vmem:[#allocation579_spill] sm:$0xff] %v10288_v42  ;;  %v10290_v34 = vpop.permute.xlu1 %3884  ;;  %2928 = vperm.xlu0 %6197, %v6385_v13   ;;  %13870 = vst [vmem:[#allocation366_spill] sm:$0xff] %v10298_v3  ;;  %v13873_v13 = vld [vmem:[#allocation373_spill] sm:$0xff] }
 0x468   :  { %13867 = vst [vmem:[#allocation580_spill] sm:$0xff] %v10290_v34  ;;  %4183 = vperm.xlu1 %6196, %v464_v51   ;;  %v6386_v34 = vld [vmem:[%s13030_s0 + $0x5b8] sm:$0xff]  ;;  %v13874_v56 = vrot.slane %v13873_v13, 5 }
 0x46a   :  { %v10300_v10 = vpop.permute.xlu0 %2680  ;;  %v10314_v7 = vsel %vm730_vm0, %v467_v26, %v13874_v56  ;;  %v915_v26 = vrot.slane %v597_v50, 5  ;;  %v471_v50 = vld [vmem:[%s13030_s0 + $0x5e2] sm:$0x7] }
 0x46b   :  { %13871 = vst [vmem:[#allocation581_spill] sm:$0xff] %v10300_v10  ;;  %v10305_v42 = vpop.permute.xlu1 %3894  ;;  %2936 = vperm.xlu0 %6197, %v6386_v34   ;;  %13875 = vst [vmem:[#allocation373_spill] sm:$0xff] %v10314_v7  ;;  %v468_v34 = vld [vmem:[%s13030_s0 + $0x5c2] sm:$0xff] }
 0x46c   :  { %13872 = vst [vmem:[#allocation582_spill] sm:$0xff] %v10305_v42  ;;  %4192 = vperm.xlu1 %6196, %v10298_v3   ;;  %v6387_v42 = vld [vmem:[%s13030_s0 + $0x5c8] sm:$0x1f]  ;;  %v13880_v3 = vld [vmem:[#allocation376_spill] sm:$0xff] }
 0x46e   :  { %v10316_v51 = vpop.permute.xlu0 %2688 }
 0x46f   :  { %13876 = vst [vmem:[#allocation583_spill] sm:$0xff] %v10316_v51  ;;  %v10321_v10 = vpop.permute.xlu1 %3903  ;;  %2944 = vperm.xlu0 %6197, %v6387_v42   ;;  %v6388_v51 = vld [vmem:[%s13030_s0 + $0x5d8] sm:$0xff] }
 0x470   :  { %13877 = vst [vmem:[#allocation584_spill] sm:$0xff] %v10321_v10  ;;  %4202 = vperm.xlu1 %6196, %v10314_v7   ;;  %v13881_v10 = vrot.slane %v13880_v3, 5  ;;  %v13885_v3 = vrot.slane %v8967_v43, 5  ;;  %v472_v43 = vld [vmem:[%s13030_s0 + $0x5f2] sm:$0xff] }
 0x472   :  { %v10330_v13 = vpop.permute.xlu0 %2696  ;;  %v10340_v42 = vsel %vm730_vm0, %v13881_v10, %v915_v26  ;;  %v10356_v10 = vsel %vm730_vm0, %v471_v50, %v13885_v3 }
 0x473   :  { %13878 = vst [vmem:[#allocation585_spill] sm:$0xff] %v10330_v13  ;;  %v10332_v56 = vpop.permute.xlu1 %3912  ;;  %2952 = vperm.xlu0 %6197, %v6388_v51   ;;  %13882 = vst [vmem:[#allocation376_spill] sm:$0xff] %v10340_v42 }
 0x474   :  { %13879 = vst [vmem:[#allocation586_spill] sm:$0xff] %v10332_v56  ;;  %4211 = vperm.xlu1 %6196, %v468_v34   ;;  %v6389_v56 = vld [vmem:[%s13030_s0 + $0x5e8] sm:$0xff]  ;;  %13886 = vst [vmem:[#allocation589_spill] sm:$0xff] %v10356_v10  ;;  %v601_v34 = vld [vmem:[%s13030_s0 + $0x5f1] sm:$0x3] }
 0x476   :  { %v10342_v7 = vpop.permute.xlu0 %2704 }
 0x477   :  { %13883 = vst [vmem:[#allocation587_spill] sm:$0xff] %v10342_v7  ;;  %v10347_v13 = vpop.permute.xlu1 %3922  ;;  %2960 = vperm.xlu0 %6197, %v6389_v56   ;;  %v6390_v7 = vld [vmem:[%s13030_s0 + $0x5f8] sm:$0x1f]  ;;  %v921_v56 = vrot.slane %v601_v34, 5  ;;  %v6392_v34 = vld [vmem:[%s13030_s0 + $0x22] sm:$0xff] }
 0x478   :  { %13884 = vst [vmem:[#allocation588_spill] sm:$0xff] %v10347_v13  ;;  %4220 = vperm.xlu1 %6196, %v10340_v42   ;;  %v13891_v42 = vld [vmem:[#allocation385_spill] sm:$0xff] }
 0x47a   :  { %v10358_v51 = vpop.permute.xlu0 %2712 }
 0x47b   :  { %13887 = vst [vmem:[#allocation590_spill] sm:$0xff] %v10358_v51  ;;  %v10363_v26 = vpop.permute.xlu1 %3931  ;;  %2968 = vperm.xlu0 %6197, %v6390_v7   ;;  %v6391_v51 = vld [vmem:[%s13030_s0 + $0xa] sm:$0xff] }
 0x47c   :  { %13888 = vst [vmem:[#allocation591_spill] sm:$0xff] %v10363_v26  ;;  %4230 = vperm.xlu1 %6196, %v10356_v10   ;;  %v13892_v26 = vrot.slane %v13891_v42, 5  ;;  %v13898_v42 = vmov 1  }
 0x47e   :  { %v10372_v50 = vpop.permute.xlu0 %2720  ;;  %v10382_v7 = vsel %vm730_vm0, %v13892_v26, %v921_v56  ;;  %v13899_v26 = vld [vmem:[#allocation130_spill] sm:$0xff] }
 0x47f   :  { %13889 = vst [vmem:[#allocation592_spill] sm:$0xff] %v10372_v50  ;;  %v10374_v3 = vpop.permute.xlu1 %3940  ;;  %4636 = vperm.xlu0 %6197, %v6391_v51   ;;  %13893 = vst [vmem:[#allocation385_spill] sm:$0xff] %v10382_v7 }
 0x480   :  { %13890 = vst [vmem:[#allocation593_spill] sm:$0xff] %v10374_v3  ;;  %4239 = vperm.xlu1 %6196, %v472_v43  }
 0x482   :  { %v10384_v10 = vpop.permute.xlu0 %2728 }
 0x483   :  { %13894 = vst [vmem:[#allocation594_spill] sm:$0xff] %v10384_v10  ;;  %v10386_v13 = vpop.permute.xlu1 %3950  ;;  %4648 = vperm.xlu0 %6197, %v6392_v34  }
 0x484   :  { %13895 = vst [vmem:[#allocation595_spill] sm:$0xff] %v10386_v13  ;;  %4248 = vperm.xlu1 %6196, %v10382_v7  }
 0x486   :  { %v10392_v50 = vpop.permute.xlu0 %2736 }
 0x487   :  { %13896 = vst [vmem:[#allocation596_spill] sm:$0xff] %v10392_v50  ;;  %v10394_v51 = vpop.permute.xlu1 %3959  ;;  %4656 = vperm.xlu0 %6197, %v9082_v19   ;;  %v6393_v19 = vld [vmem:[%s13030_s0 + $0x52] sm:$0xff] }
 0x488   :  { %13897 = vst [vmem:[#allocation597_spill] sm:$0xff] %v10394_v51  ;;  %6198 = vset.pattern.permute.xlu1 %v13898_v42  ;;  %v13904_v42 = vld [vmem:[#allocation133_spill] sm:$0xff] }
 0x489   :  { %4640 = vperm.xlu1 %6198, %v13899_v26  }
 0x48a   :  { %v10399_v43 = vpop.permute.xlu0 %2744 }
 0x48b   :  { %13900 = vst [vmem:[#allocation130_spill] sm:$0xff] %v10399_v43  ;;  %v10401_v56 = vpop.permute.xlu1 %3968  ;;  %4664 = vperm.xlu0 %6197, %v9098_v58  }
 0x48c   :  { %13901 = vst [vmem:[#allocation598_spill] sm:$0xff] %v10401_v56 }
 0x48d   :  { %4644 = vperm.xlu1 %6198, %v9056_v6   ;;  %v6394_v6 = vld [vmem:[%s13030_s0 + $0x3a] sm:$0xff] }
 0x48e   :  { %v10405_v34 = vpop.permute.xlu0 %2752 }
 0x48f   :  { %13902 = vst [vmem:[#allocation599_spill] sm:$0xff] %v10405_v34  ;;  %v10407_v10 = vpop.permute.xlu1 %3978  ;;  %4672 = vperm.xlu0 %6197, %v6393_v19   ;;  %v13909_v19 = vld [vmem:[#allocation138_spill] sm:$0xff] }
 0x490   :  { %13903 = vst [vmem:[#allocation600_spill] sm:$0xff] %v10407_v10  ;;  %v6187_v10 = vld [vmem:[%s13031_s1 + $0x8] ss:$0 sm:$0xff] }
 0x491   :  { %4652 = vperm.xlu1 %6198, %v13904_v42  }
 0x492   :  { %v10413_v26 = vpop.permute.xlu0 %2760 }
 0x493   :  { %13905 = vst [vmem:[#allocation133_spill] sm:$0xff] %v10413_v26  ;;  %v10415_v43 = vpop.permute.xlu1 %3987  ;;  %4680 = vperm.xlu0 %6197, %v9124_v33   ;;  %v6395_v33 = vld [vmem:[%s13030_s0 + $0x82] sm:$0xff] }
 0x494   :  { %13906 = vst [vmem:[#allocation601_spill] sm:$0xff] %v10415_v43  ;;  %v13912_v43 = vld [vmem:[#allocation141_spill] sm:$0xff] }
 0x495   :  { %4660 = vperm.xlu1 %6198, %v6394_v6  }
 0x496   :  { %v10421_v58 = vpop.permute.xlu0 %2768 }
 0x497   :  { %13907 = vst [vmem:[#allocation602_spill] sm:$0xff] %v10421_v58  ;;  %v10423_v34 = vpop.permute.xlu1 %3996  ;;  %4688 = vperm.xlu0 %6197, %v9140_v54   ;;  %v6396_v54 = vld [vmem:[%s13030_s0 + $0x6a] sm:$0xff] }
 0x498   :  { %13908 = vst [vmem:[#allocation603_spill] sm:$0xff] %v10423_v34 }
 0x499   :  { %4668 = vperm.xlu1 %6198, %v13909_v19  }
 0x49a   :  { %v10427_v42 = vpop.permute.xlu0 %2776 }
 0x49b   :  { %13910 = vst [vmem:[#allocation138_spill] sm:$0xff] %v10427_v42  ;;  %v10429_v26 = vpop.permute.xlu1 %4006  ;;  %4696 = vperm.xlu0 %6197, %v6395_v33   ;;  %v13917_v33 = vld [vmem:[#allocation146_spill] sm:$0xff] }
 0x49c   :  { %13911 = vst [vmem:[#allocation604_spill] sm:$0xff] %v10429_v26 }
 0x49d   :  { %4676 = vperm.xlu1 %6198, %v13912_v43  }
 0x49e   :  { %v10435_v6 = vpop.permute.xlu0 %2784 }
 0x49f   :  { %13913 = vst [vmem:[#allocation141_spill] sm:$0xff] %v10435_v6  ;;  %v10437_v58 = vpop.permute.xlu1 %4015  ;;  %4704 = vperm.xlu0 %6197, %v9166_v0   ;;  %v6397_v0 = vld [vmem:[%s13030_s0 + $0xb2] sm:$0xff] }
 0x4a0   :  { %13914 = vst [vmem:[#allocation605_spill] sm:$0xff] %v10437_v58  ;;  %v13920_v58 = vld [vmem:[#allocation149_spill] sm:$0xff] }
 0x4a1   :  { %4684 = vperm.xlu1 %6198, %v6396_v54  }
 0x4a2   :  { %v10443_v19 = vpop.permute.xlu0 %2792 }
 0x4a3   :  { %13915 = vst [vmem:[#allocation606_spill] sm:$0xff] %v10443_v19  ;;  %v10445_v42 = vpop.permute.xlu1 %4024  ;;  %4712 = vperm.xlu0 %6197, %v9182_v62   ;;  %v6398_v62 = vld [vmem:[%s13030_s0 + $0x9a] sm:$0xff] }
 0x4a4   :  { %13916 = vst [vmem:[#allocation607_spill] sm:$0xff] %v10445_v42 }
 0x4a5   :  { %4692 = vperm.xlu1 %6198, %v13917_v33  }
 0x4a6   :  { %v10449_v43 = vpop.permute.xlu0 %2800 }
 0x4a7   :  { %13918 = vst [vmem:[#allocation146_spill] sm:$0xff] %v10449_v43  ;;  %v10451_v6 = vpop.permute.xlu1 %4034  ;;  %4720 = vperm.xlu0 %6197, %v6397_v0   ;;  %v13925_v0 = vld [vmem:[#allocation154_spill] sm:$0xff] }
 0x4a8   :  { %13919 = vst [vmem:[#allocation608_spill] sm:$0xff] %v10451_v6 }
 0x4a9   :  { %4700 = vperm.xlu1 %6198, %v13920_v58  }
 0x4aa   :  { %v10457_v54 = vpop.permute.xlu0 %2808 }
 0x4ab   :  { %13921 = vst [vmem:[#allocation149_spill] sm:$0xff] %v10457_v54  ;;  %v10459_v19 = vpop.permute.xlu1 %4043  ;;  %4728 = vperm.xlu0 %6197, %v9208_v38   ;;  %v6399_v38 = vld [vmem:[%s13030_s0 + $0xe2] sm:$0xff] }
 0x4ac   :  { %13922 = vst [vmem:[#allocation609_spill] sm:$0xff] %v10459_v19  ;;  %v13928_v19 = vld [vmem:[#allocation157_spill] sm:$0xff] }
 0x4ad   :  { %4708 = vperm.xlu1 %6198, %v6398_v62  }
 0x4ae   :  { %v10465_v33 = vpop.permute.xlu0 %2816 }
 0x4af   :  { %13923 = vst [vmem:[#allocation610_spill] sm:$0xff] %v10465_v33  ;;  %v10467_v43 = vpop.permute.xlu1 %4052  ;;  %4736 = vperm.xlu0 %6197, %v9224_v30   ;;  %v6400_v30 = vld [vmem:[%s13030_s0 + $0xca] sm:$0xff] }
 0x4b0   :  { %13924 = vst [vmem:[#allocation611_spill] sm:$0xff] %v10467_v43 }
 0x4b1   :  { %4716 = vperm.xlu1 %6198, %v13925_v0  }
 0x4b2   :  { %v10471_v58 = vpop.permute.xlu0 %2824 }
 0x4b3   :  { %13926 = vst [vmem:[#allocation154_spill] sm:$0xff] %v10471_v58  ;;  %v10473_v54 = vpop.permute.xlu1 %4062  ;;  %4744 = vperm.xlu0 %6197, %v6399_v38   ;;  %v13933_v38 = vld [vmem:[#allocation162_spill] sm:$0xff] }
 0x4b4   :  { %13927 = vst [vmem:[#allocation612_spill] sm:$0xff] %v10473_v54 }
 0x4b5   :  { %4724 = vperm.xlu1 %6198, %v13928_v19  }
 0x4b6   :  { %v10479_v62 = vpop.permute.xlu0 %2832 }
 0x4b7   :  { %13929 = vst [vmem:[#allocation157_spill] sm:$0xff] %v10479_v62  ;;  %v10481_v33 = vpop.permute.xlu1 %4071  ;;  %4752 = vperm.xlu0 %6197, %v9250_v11   ;;  %v6401_v11 = vld [vmem:[%s13030_s0 + $0x112] sm:$0xff] }
 0x4b8   :  { %13930 = vst [vmem:[#allocation613_spill] sm:$0xff] %v10481_v33  ;;  %v13936_v33 = vld [vmem:[#allocation165_spill] sm:$0xff] }
 0x4b9   :  { %4732 = vperm.xlu1 %6198, %v6400_v30  }
 0x4ba   :  { %v10487_v0 = vpop.permute.xlu0 %2840 }
 0x4bb   :  { %13931 = vst [vmem:[#allocation614_spill] sm:$0xff] %v10487_v0  ;;  %v10489_v58 = vpop.permute.xlu1 %4080  ;;  %4760 = vperm.xlu0 %6197, %v9266_v63   ;;  %v6402_v63 = vld [vmem:[%s13030_s0 + $0xfa] sm:$0xff] }
 0x4bc   :  { %13932 = vst [vmem:[#allocation615_spill] sm:$0xff] %v10489_v58  ;;  %v13968_v58 = vld [vmem:[#allocation197_spill] sm:$0xff] }
 0x4bd   :  { %4740 = vperm.xlu1 %6198, %v13933_v38  }
 0x4be   :  { %v10493_v19 = vpop.permute.xlu0 %2848 }
 0x4bf   :  { %13934 = vst [vmem:[#allocation162_spill] sm:$0xff] %v10493_v19  ;;  %v10495_v62 = vpop.permute.xlu1 %4090  ;;  %4768 = vperm.xlu0 %6197, %v6401_v11   ;;  %v13941_v11 = vld [vmem:[#allocation170_spill] sm:$0xff] }
 0x4c0   :  { %13935 = vst [vmem:[#allocation616_spill] sm:$0xff] %v10495_v62  ;;  %v6184_v62 = vld [vmem:[%s13031_s1 + $0x7] ss:$0 sm:$0xff] }
 0x4c1   :  { %4748 = vperm.xlu1 %6198, %v13936_v33   ;;  %v102_v6 = vmul.f32 0.0, %v6184_v62 }
 0x4c2   :  { %v10501_v30 = vpop.permute.xlu0 %2856 }
 0x4c3   :  { %13937 = vst [vmem:[#allocation165_spill] sm:$0xff] %v10501_v30  ;;  %v10503_v0 = vpop.permute.xlu1 %4099  ;;  %4776 = vperm.xlu0 %6197, %v9292_v35   ;;  %v6403_v35 = vld [vmem:[%s13030_s0 + $0x142] sm:$0xff] }
 0x4c4   :  { %13938 = vst [vmem:[#allocation617_spill] sm:$0xff] %v10503_v0  ;;  %v13944_v0 = vld [vmem:[#allocation173_spill] sm:$0xff] }
 0x4c5   :  { %4756 = vperm.xlu1 %6198, %v6402_v63  }
 0x4c6   :  { %v10509_v38 = vpop.permute.xlu0 %2864 }
 0x4c7   :  { %13939 = vst [vmem:[#allocation618_spill] sm:$0xff] %v10509_v38  ;;  %v10511_v19 = vpop.permute.xlu1 %4108  ;;  %4784 = vperm.xlu0 %6197, %v9308_v47   ;;  %v6404_v47 = vld [vmem:[%s13030_s0 + $0x12a] sm:$0xff] }
 0x4c8   :  { %13940 = vst [vmem:[#allocation619_spill] sm:$0xff] %v10511_v19 }
 0x4c9   :  { %4764 = vperm.xlu1 %6198, %v13941_v11  }
 0x4ca   :  { %v10515_v33 = vpop.permute.xlu0 %2872 }
 0x4cb   :  { %13942 = vst [vmem:[#allocation170_spill] sm:$0xff] %v10515_v33  ;;  %v10517_v30 = vpop.permute.xlu1 %4118  ;;  %4792 = vperm.xlu0 %6197, %v6403_v35   ;;  %v13949_v35 = vld [vmem:[#allocation178_spill] sm:$0xff] }
 0x4cc   :  { %13943 = vst [vmem:[#allocation620_spill] sm:$0xff] %v10517_v30 }
 0x4cd   :  { %4772 = vperm.xlu1 %6198, %v13944_v0  }
 0x4ce   :  { %v10523_v63 = vpop.permute.xlu0 %2880 }
 0x4cf   :  { %13945 = vst [vmem:[#allocation173_spill] sm:$0xff] %v10523_v63  ;;  %v10525_v38 = vpop.permute.xlu1 %4127  ;;  %4800 = vperm.xlu0 %6197, %v9334_v14   ;;  %v6405_v14 = vld [vmem:[%s13030_s0 + $0x172] sm:$0xff] }
 0x4d0   :  { %13946 = vst [vmem:[#allocation621_spill] sm:$0xff] %v10525_v38  ;;  %v13952_v38 = vld [vmem:[#allocation181_spill] sm:$0xff] }
 0x4d1   :  { %4780 = vperm.xlu1 %6198, %v6404_v47  }
 0x4d2   :  { %v10531_v11 = vpop.permute.xlu0 %2888 }
 0x4d3   :  { %13947 = vst [vmem:[#allocation622_spill] sm:$0xff] %v10531_v11  ;;  %v10533_v33 = vpop.permute.xlu1 %4136  ;;  %4808 = vperm.xlu0 %6197, %v9350_v31   ;;  %v6406_v31 = vld [vmem:[%s13030_s0 + $0x15a] sm:$0xff] }
 0x4d4   :  { %13948 = vst [vmem:[#allocation623_spill] sm:$0xff] %v10533_v33 }
 0x4d5   :  { %4788 = vperm.xlu1 %6198, %v13949_v35  }
 0x4d6   :  { %v10537_v0 = vpop.permute.xlu0 %2896 }
 0x4d7   :  { %13950 = vst [vmem:[#allocation178_spill] sm:$0xff] %v10537_v0  ;;  %v10539_v63 = vpop.permute.xlu1 %4146  ;;  %4816 = vperm.xlu0 %6197, %v6405_v14   ;;  %v11_v14 = vlaneseq }
 0x4d8   :  { %13951 = vst [vmem:[#allocation624_spill] sm:$0xff] %v10539_v63  ;;  %v13957_v63 = vld [vmem:[#allocation186_spill] sm:$0xff] }
 0x4d9   :  { %4796 = vperm.xlu1 %6198, %v13952_v38  }
 0x4da   :  { %v10545_v47 = vpop.permute.xlu0 %2904 }
 0x4db   :  { %13953 = vst [vmem:[#allocation181_spill] sm:$0xff] %v10545_v47  ;;  %v10547_v11 = vpop.permute.xlu1 %4155  ;;  %4824 = vperm.xlu0 %6197, %v9376_v55   ;;  %v6407_v55 = vld [vmem:[%s13030_s0 + $0x1a2] sm:$0xff] }
 0x4dc   :  { %13954 = vst [vmem:[#allocation625_spill] sm:$0xff] %v10547_v11  ;;  %v12_v11 = vshrl.u32 %v11_v14, 7  ;;  %v6457_v14 = vmov 0.0  }
 0x4dd   :  { %4804 = vperm.xlu1 %6198, %v6406_v31   ;;  %v13960_v31 = vld [vmem:[#allocation189_spill] sm:$0xff] }
 0x4de   :  { %v10553_v35 = vpop.permute.xlu0 %2912  ;;  %vm15_vm1 = vcmp.eq.s32.totalorder %v12_v11, 0  ;;  %vm24_vm2 = vcmp.ge.s32.totalorder %v12_v11, 1 }
 0x4df   :  { %13955 = vst [vmem:[#allocation626_spill] sm:$0xff] %v10553_v35  ;;  %v10555_v0 = vpop.permute.xlu1 %4164  ;;  %4832 = vperm.xlu0 %6197, %v9392_v15   ;;  %v6408_v15 = vld [vmem:[%s13030_s0 + $0x18a] sm:$0xff] }
 0x4e0   :  { %13956 = vst [vmem:[#allocation627_spill] sm:$0xff] %v10555_v0 }
 0x4e1   :  { %4812 = vperm.xlu1 %6198, %v13957_v63  }
 0x4e2   :  { %v10559_v38 = vpop.permute.xlu0 %2920 }
 0x4e3   :  { %13958 = vst [vmem:[#allocation186_spill] sm:$0xff] %v10559_v38  ;;  %v10561_v47 = vpop.permute.xlu1 %4174  ;;  %4840 = vperm.xlu0 %6197, %v6407_v55   ;;  %v13_v38 = vadd.s32 8, %v12_v11  ;;  %v6179_v11 = vld [vmem:[%s13031_s1] ss:$0 sm:$0xff] }
 0x4e4   :  { %13959 = vst [vmem:[#allocation628_spill] sm:$0xff] %v10561_v47 }
 0x4e5   :  { %4820 = vperm.xlu1 %6198, %v13960_v31   ;;  %v6175_v31 = vsel %vm15_vm1, 1.0, %v6457_v14  ;;  %vm28_vm3 = vcmp.le.s32.totalorder %v13_v38, 10  ;;  %vm40_vm4 = vcmp.gt.s32.totalorder %v13_v38, 10 }
 0x4e6   :  { %v10567_v35 = vpop.permute.xlu0 %2928  ;;  %v53_v33 = vmul.f32 %v6179_v11, %v6175_v31  ;;  %v10611_v54 = vsel %vm28_vm3, 1.0, %v6457_v14 }
 0x4e7   :  { %13961 = vst [vmem:[#allocation189_spill] sm:$0xff] %v10567_v35  ;;  %v10569_v0 = vpop.permute.xlu1 %4183  ;;  %4848 = vperm.xlu0 %6197, %v9418_v39   ;;  %v10580_v35 = vsel %vm24_vm2, 1.0, %v6457_v14  ;;  %v6182_v39 = vld [vmem:[%s13031_s1 + $0x1] ss:$0 sm:$0xff] }
 0x4e8   :  { %13962 = vst [vmem:[#allocation629_spill] sm:$0xff] %v10569_v0  ;;  %v6183_v0 = vld [vmem:[%s13031_s1 + $0x3] ss:$0 sm:$0xff]  ;;  %v84_v34 = vmul.f32 0.0, %v6182_v39 }
 0x4e9   :  { %4828 = vperm.xlu1 %6198, %v6408_v15   ;;  %v13965_v15 = vld [vmem:[#allocation194_spill] sm:$0xff]  ;;  %v93_v38 = vmul.f32 0.0, %v6183_v0 }
 0x4ea   :  { %v10575_v63 = vpop.permute.xlu0 %2936 }
 0x4eb   :  { %13963 = vst [vmem:[#allocation630_spill] sm:$0xff] %v10575_v63  ;;  %v10577_v55 = vpop.permute.xlu1 %4192  ;;  %4856 = vperm.xlu0 %6197, %v9434_v1   ;;  %v6180_v1 = vld [vmem:[%s13031_s1 + $0x2] ss:$0 sm:$0xff]  ;;  %v83_v63 = vmul.f32 %v6182_v39, %v6175_v31  ;;  %v96_v51 = vadd.f32 %v93_v38, %v84_v34  ;;  %v13978_v38 = vld [vmem:[#allocation459_spill] sm:$0xff] }
 0x4ec   :  { %13964 = vst [vmem:[#allocation631_spill] sm:$0xff] %v10577_v55  ;;  %v91_v55 = vmul.f32 %v6183_v0, %v10580_v35  ;;  %v61_v30 = vmul.f32 %v6180_v1, %v10580_v35 }
 0x4ed   :  { %4836 = vperm.xlu1 %6198, %v13965_v15   ;;  %v6409_v15 = vld [vmem:[%s13030_s0 + $0x1d2] sm:$0xff] }
 0x4ee   :  { %v10596_v47 = vpop.permute.xlu0 %2944  ;;  %v94_v43 = vadd.f32 %v91_v55, %v83_v63  ;;  %v64_v42 = vadd.f32 %v61_v30, %v53_v33  ;;  %v6188_v63 = vld [vmem:[%s13031_s1 + $0x9] ss:$0 sm:$0xff]  ;;  %v54_v55 = vmul.f32 0.0, %v6179_v11  ;;  %v62_v30 = vmul.f32 %v6180_v1, %v10611_v54  ;;  %v6410_v33 = vld [vmem:[%s13030_s0 + $0x1ba] sm:$0xff]  ;;  %v6185_v11 = vld [vmem:[%s13031_s1 + $0x4] ss:$0 sm:$0xff] }
 0x4ef   :  { %13966 = vst [vmem:[#allocation194_spill] sm:$0xff] %v10596_v47  ;;  %v10599_v19 = vpop.permute.xlu1 %4202  ;;  %4864 = vperm.xlu0 %6197, %v6409_v15   ;;  %v6181_v47 = vld [vmem:[%s13031_s1 + $0x6] ss:$0 sm:$0xff] }
 0x4f0   :  { %13967 = vst [vmem:[#allocation632_spill] sm:$0xff] %v10599_v19  ;;  %v72_v26 = vmul.f32 0.0, %v6181_v47  ;;  %v10631_v39 = vadd.f32 %v102_v6, %v94_v43  ;;  %v10646_v6 = vmul.f32 %v6185_v11, %v10580_v35 }
 0x4f1   :  { %4844 = vperm.xlu1 %6198, %v13968_v58   ;;  %v92_v58 = vmul.f32 %v6183_v0, %v10611_v54 }
 0x4f2   :  { %v10613_v19 = vpop.permute.xlu0 %2952  ;;  %v10635_v50 = vadd.f32 %v72_v26, %v64_v42  ;;  %v2971_v26 = vmul.f32 %v9478_v59, %v10631_v39  ;;  %v6186_v42 = vld [vmem:[%s13031_s1 + $0x5] ss:$0 sm:$0xff]  ;;  %v13975_v59 = vld [vmem:[#allocation460_spill] sm:$0xff] }
 0x4f3   :  { %13969 = vst [vmem:[#allocation197_spill] sm:$0xff] %v10613_v19  ;;  %v10615_v15 = vpop.permute.xlu1 %4211  ;;  %4872 = vperm.xlu0 %6197, %v9460_v23   ;;  %v63_v19 = vmul.f32 0.0, %v6180_v1  ;;  %v10629_v23 = vsel %vm40_vm4, 1.0, %v6457_v14  ;;  %v129_v1 = vmul.f32 %v6187_v10, %v6175_v31  ;;  %v95_v14 = vadd.f32 %v92_v58, %v84_v34 }
 0x4f4   :  { %13970 = vst [vmem:[#allocation633_spill] sm:$0xff] %v10615_v15  ;;  %v103_v0 = vmul.f32 %v6184_v62, %v10629_v23  ;;  %v65_v31 = vadd.f32 %v62_v30, %v54_v55  ;;  %v73_v58 = vmul.f32 %v6181_v47, %v10629_v23  ;;  %v4251_v13 = vmul.f32 %v13975_v59, %v10646_v6 }
 0x4f5   :  { %4852 = vperm.xlu1 %6198, %v6410_v33   ;;  %v137_v33 = vmul.f32 %v6188_v63, %v10580_v35  ;;  %v66_v43 = vadd.f32 %v63_v19, %v54_v55  ;;  %v6411_v19 = vld [vmem:[%s13030_s0 + $0x202] sm:$0xff]  ;;  %v10672_v55 = vmul.f32 %v6186_v42, %v10580_v35  ;;  %v2974_v59 = vmul.f32 %v13978_v38, %v10631_v39 }
 0x4f6   :  { %v10633_v15 = vpop.permute.xlu0 %2960  ;;  %v10686_v35 = vadd.f32 %v6184_v62, %v96_v51  ;;  %v10698_v51 = vmul.f32 0.0, %v6185_v11  ;;  %v13983_v62 = vld [vmem:[#allocation461_spill] sm:$0xff] }
 0x4f7   :  { %13971 = vst [vmem:[#allocation634_spill] sm:$0xff] %v10633_v15  ;;  %v10640_v56 = vpop.permute.xlu1 %4220  ;;  %4880 = vperm.xlu0 %6197, %v9474_v52   ;;  %v10656_v52 = vld [vmem:[%s13031_s1 + $0xa] ss:$0 sm:$0xff]  ;;  %v13973_v15 = vld [vmem:[#allocation202_spill] sm:$0xff] }
 0x4f8   :  { %13972 = vst [vmem:[#allocation635_spill] sm:$0xff] %v10640_v56  ;;  %v13974_v56 = vld [vmem:[#allocation3_spill] sm:$0xff]  ;;  %v148_v30 = vmul.f32 0.0, %v10656_v52 }
 0x4f9   :  { %4860 = vperm.xlu1 %6198, %v13973_v15   ;;  %v2011_v7 = vmul.f32 %v13974_v56, %v10635_v50  ;;  %v140_v15 = vadd.f32 %v137_v33, %v129_v1  ;;  %v10675_v56 = vadd.f32 %v103_v0, %v95_v14  ;;  %v4254_v33 = vmul.f32 %v9523_v60, %v10646_v6 }
 0x4fa   :  { %v10664_v3 = vpop.permute.xlu0 %2968  ;;  %v2976_v60 = vmul.f32 %v13983_v62, %v10686_v35 }
 0x4fb   :  { %13976 = vst [vmem:[#allocation202_spill] sm:$0xff] %v10664_v3  ;;  %v10666_v18 = vpop.permute.xlu1 %4230  ;;  %4888 = vperm.xlu0 %6197, %v6411_v19   ;;  %v3163_v34 = vadd.f32 %v2971_v26, %v2011_v7  ;;  %v10679_v3 = vadd.f32 %v6181_v47, %v66_v43  ;;  %v13980_v19 = vld [vmem:[#allocation4_spill] sm:$0xff]  ;;  %v10690_v7 = vadd.f32 %v148_v30, %v140_v15  ;;  %v130_v26 = vmul.f32 0.0, %v6187_v10  ;;  %v13982_v43 = vld [vmem:[#allocation217_spill] sm:$0xff]  ;;  %v13985_v10 = vld [vmem:[#allocation6_spill] sm:$0xff] }
 0x4fc   :  { %13977 = vst [vmem:[#allocation3_spill] sm:$0xff] %v10666_v18  ;;  %v10681_v18 = vadd.f32 %v73_v58, %v65_v31  ;;  %v2014_v2 = vmul.f32 %v13980_v19, %v10635_v50  ;;  %v2972_v31 = vmul.f32 %v13982_v43, %v10675_v56  ;;  %v13984_v58 = vld [vmem:[#allocation5_spill] sm:$0xff]  ;;  %v10711_v19 = vmul.f32 %v6185_v11, %v10611_v54 }
 0x4fd   :  { %4868 = vperm.xlu1 %6198, %v13979_v61   ;;  %v4443_v1 = vadd.f32 %v4251_v13, %v3163_v34  ;;  %v139_v61 = vmul.f32 0.0, %v6188_v63  ;;  %v6412_v34 = vld [vmem:[%s13030_s0 + $0x1ea] sm:$0xff]  ;;  %v2016_v38 = vmul.f32 %v13985_v10, %v10679_v3  ;;  %v13989_v10 = vld [vmem:[#allocation2_spill] sm:$0xff] }
 0x4fe   :  { %v4637_v14 = vpop.permute.xlu0 %4636  ;;  %v3166_v13 = vadd.f32 %v2974_v59, %v2014_v2  ;;  %v2012_v15 = vmul.f32 %v13984_v58, %v10681_v18  ;;  %v13986_v59 = vld [vmem:[#allocation466_spill] sm:$0xff]  ;;  %v13988_v58 = vld [vmem:[#allocation463_spill] sm:$0xff]  ;;  %v2013_v11 = vmul.f32 %v13989_v10, %v10679_v3  ;;  %v13994_v10 = vld [vmem:[#allocation220_spill] sm:$0xff] }
 0x4ff   :  { %v5403_v0 = vmul.f32 %v4637_v14, %v10672_v55  ;;  %v10693_v47 = vpop.permute.xlu1 %4239  ;;  %4896 = vperm.xlu0 %6197, %v9500_v25   ;;  %v138_v25 = vmul.f32 %v6188_v63, %v10611_v54  ;;  %v4256_v14 = vmul.f32 %v13986_v59, %v10698_v51  ;;  %v10720_v63 = vmul.f32 0.0, %v6186_v42 }
 0x500   :  { %13981 = vst [vmem:[#allocation460_spill] sm:$0xff] %v10693_v47  ;;  %v4446_v2 = vadd.f32 %v4254_v33, %v3166_v13  ;;  %v3164_v47 = vadd.f32 %v2972_v31, %v2012_v15  ;;  %v3168_v33 = vadd.f32 %v2976_v60, %v2016_v38  ;;  %v13990_v13 = vld [vmem:[#allocation464_spill] sm:$0xff] }
 0x501   :  { %v5595_v30 = vadd.f32 %v5403_v0, %v4443_v1  ;;  %4876 = vperm.xlu1 %6198, %v6412_v34   ;;  %v142_v34 = vadd.f32 %v139_v61, %v130_v26  ;;  %v2978_v59 = vmul.f32 %v13990_v13, %v10675_v56  ;;  %v149_v61 = vmul.f32 %v10656_v52, %v10629_v23  ;;  %v13992_v31 = vld [vmem:[#allocation8_spill] sm:$0xff] }
 0x502   :  { %v4649_v43 = vpop.permute.xlu0 %4648  ;;  %v2018_v60 = vmul.f32 %v13992_v31, %v10681_v18  ;;  %v13993_v15 = vld [vmem:[#allocation216_spill] sm:$0xff]  ;;  %v2973_v13 = vmul.f32 %v13994_v10, %v10686_v35 }
 0x503   :  { %v5787_v1 = vadd.f32 %v5595_v30, %v10690_v7  ;;  %v5406_v0 = vmul.f32 %v4649_v43, %v10672_v55  ;;  %v10717_v62 = vpop.permute.xlu1 %4248  ;;  %4904 = vperm.xlu0 %6197, %v13988_v58   ;;  %v13991_v43 = vld [vmem:[#allocation210_spill] sm:$0xff]  ;;  %v10731_v58 = vmul.f32 %v6186_v42, %v10611_v54  ;;  %v4252_v38 = vmul.f32 %v13993_v15, %v10711_v19 }
 0x504   :  { %13987 = vst [vmem:[#allocation459_spill] sm:$0xff] %v10717_v62  ;;  %v141_v62 = vadd.f32 %v138_v25, %v130_v26  ;;  %v10745_v42 = vadd.f32 %v10656_v52, %v142_v34  ;;  %v6413_v26 = vld [vmem:[%s13030_s0 + $0x232] sm:$0xff]  ;;  %v13995_v25 = vld [vmem:[#allocation223_spill] sm:$0xff]  ;;  %v3170_v52 = vadd.f32 %v2978_v59, %v2018_v60  ;;  %v3165_v57 = vadd.f32 %v2973_v13, %v2013_v11 }
 0x505   :  { %5979 = vst [vmem:[%s13032_s2] sm:$0xff] %v5787_v1  ;;  %v5598_v30 = vadd.f32 %v5406_v0, %v4446_v2  ;;  %4884 = vperm.xlu1 %6198, %v13991_v43   ;;  %v4448_v1 = vadd.f32 %v4256_v14, %v3168_v33  ;;  %v4258_v0 = vmul.f32 %v9549_v27, %v10711_v19  ;;  %v13996_v14 = vld [vmem:[#allocation462_spill] sm:$0xff]  ;;  %v13997_v27 = vld [vmem:[#allocation465_spill] sm:$0xff]  ;;  %v14003_v11 = vld [vmem:[#allocation468_spill] sm:$0xff] }
 0x506   :  { %v4657_v2 = vpop.permute.xlu0 %4656  ;;  %v2975_v43 = vmul.f32 %v13995_v25, %v10675_v56  ;;  %v4253_v33 = vmul.f32 %v13996_v14, %v10698_v51  ;;  %v2980_v31 = vmul.f32 %v13997_v27, %v10631_v39  ;;  %v4444_v15 = vadd.f32 %v4252_v38, %v3164_v47  ;;  %v13999_v25 = vld [vmem:[#allocation7_spill] sm:$0xff] }
 0x507   :  { %v5790_v54 = vadd.f32 %v5598_v30, %v10690_v7  ;;  %v5408_v23 = vmul.f32 %v4657_v2, %v10720_v63  ;;  %4912 = vperm.xlu0 %6197, %v6413_v26   ;;  %v10760_v10 = vadd.f32 %v149_v61, %v141_v62  ;;  %v13998_v26 = vld [vmem:[#allocation213_spill] sm:$0xff]  ;;  %v2015_v14 = vmul.f32 %v13999_v25, %v10681_v18 }
 0x508   :  { %v4641_v30 = vpop.permute.xlu1 %4640  ;;  %v2020_v27 = vmul.f32 %v14000_v53, %v10635_v50  ;;  %v4260_v47 = vmul.f32 %v9565_v22, %v10646_v6  ;;  %v4450_v60 = vadd.f32 %v4258_v0, %v3170_v52  ;;  %v2982_v13 = vmul.f32 %v14003_v11, %v10686_v35 }
 0x509   :  { %5982 = vst [vmem:[%s13032_s2 + $0x18] sm:$0xff] %v5790_v54  ;;  %v5600_v34 = vadd.f32 %v5408_v23, %v4448_v1  ;;  %v5404_v2 = vmul.f32 %v4641_v30, %v10731_v58  ;;  %4892 = vperm.xlu1 %6198, %v13998_v26   ;;  %v14001_v1 = vld [vmem:[#allocation467_spill] sm:$0xff]  ;;  %v3167_v54 = vadd.f32 %v2975_v43, %v2015_v14  ;;  %v14002_v23 = vld [vmem:[#allocation225_spill] sm:$0xff] }
 0x50a   :  { %v4665_v59 = vpop.permute.xlu0 %4664  ;;  %v2977_v30 = vmul.f32 %v14002_v23, %v10631_v39  ;;  %v4445_v26 = vadd.f32 %v4253_v33, %v3165_v57  ;;  %v3172_v25 = vadd.f32 %v2980_v31, %v2020_v27  ;;  %v6414_v43 = vld [vmem:[%s13030_s0 + $0x21a] sm:$0xff]  ;;  %v14005_v31 = vld [vmem:[#allocation12_spill] sm:$0xff] }
 0x50b   :  { %v5792_v38 = vadd.f32 %v5600_v34, %v10745_v42  ;;  %v5596_v62 = vadd.f32 %v5404_v2, %v4444_v15  ;;  %v5410_v61 = vmul.f32 %v4665_v59, %v10731_v58  ;;  %4920 = vperm.xlu0 %6197, %v14001_v1   ;;  %v14004_v57 = vld [vmem:[#allocation9_spill] sm:$0xff]  ;;  %v2022_v52 = vmul.f32 %v14005_v31, %v10679_v3  ;;  %v14006_v34 = vld [vmem:[#allocation219_spill] sm:$0xff]  ;;  %v14007_v59 = vld [vmem:[#allocation472_spill] sm:$0xff] }
 0x50c   :  { %v4645_v53 = vpop.permute.xlu1 %4644  ;;  %v2017_v33 = vmul.f32 %v14004_v57, %v10635_v50  ;;  %v4255_v2 = vmul.f32 %v14006_v34, %v10711_v19  ;;  %v4452_v14 = vadd.f32 %v4260_v47, %v3172_v25  ;;  %v14008_v1 = vld [vmem:[#allocation469_spill] sm:$0xff]  ;;  %v14010_v47 = vld [vmem:[#allocation470_spill] sm:$0xff] }
 0x50d   :  { %5984 = vst [vmem:[%s13032_s2 + $0x28] sm:$0x1f] %v5792_v38  ;;  %v5788_v22 = vadd.f32 %v5596_v62, %v10760_v10  ;;  %v5602_v0 = vadd.f32 %v5410_v61, %v4450_v60  ;;  %v5405_v15 = vmul.f32 %v4645_v53, %v10720_v63  ;;  %4900 = vperm.xlu1 %6198, %v6414_v43   ;;  %v14009_v53 = vld [vmem:[#allocation228_spill] sm:$0xff]  ;;  %v14013_v34 = vld [vmem:[#allocation14_spill] sm:$0xff] }
 0x50e   :  { %v4673_v27 = vpop.permute.xlu0 %4672  ;;  %v4262_v60 = vmul.f32 %v14007_v59, %v10698_v51  ;;  %v3169_v23 = vadd.f32 %v2977_v30, %v2017_v33  ;;  %v2979_v11 = vmul.f32 %v14009_v53, %v10686_v35  ;;  %v2984_v25 = vmul.f32 %v14010_v47, %v10675_v56  ;;  %v14012_v30 = vld [vmem:[#allocation11_spill] sm:$0xff] }
 0x50f   :  { %5980 = vst [vmem:[%s13032_s2 + $0x8] sm:$0xff] %v5788_v22  ;;  %v5794_v38 = vadd.f32 %v5602_v0, %v10760_v10  ;;  %v5597_v62 = vadd.f32 %v5405_v15, %v4445_v26  ;;  %v5412_v61 = vmul.f32 %v4673_v27, %v10672_v55  ;;  %4928 = vperm.xlu0 %6197, %v14008_v1   ;;  %v14011_v15 = vld [vmem:[#allocation218_spill] sm:$0xff]  ;;  %v14015_v53 = vld [vmem:[#allocation231_spill] sm:$0xff] }
 0x510   :  { %v4653_v43 = vpop.permute.xlu1 %4652  ;;  %v4447_v57 = vadd.f32 %v4255_v2, %v3167_v54  ;;  %v3174_v31 = vadd.f32 %v2982_v13, %v2022_v52  ;;  %v2019_v33 = vmul.f32 %v14012_v30, %v10679_v3  ;;  %v2024_v27 = vmul.f32 %v14013_v34, %v10681_v18  ;;  %v14014_v54 = vld [vmem:[#allocation222_spill] sm:$0xff] }
 0x511   :  { %5986 = vst [vmem:[%s13032_s2 + $0x38] sm:$0xff] %v5794_v38  ;;  %v5789_v26 = vadd.f32 %v5597_v62, %v10745_v42  ;;  %v5604_v22 = vadd.f32 %v5412_v61, %v4452_v14  ;;  %v5407_v0 = vmul.f32 %v4653_v43, %v10731_v58  ;;  %4908 = vperm.xlu1 %6198, %v14011_v15   ;;  %v6415_v61 = vld [vmem:[%s13030_s0 + $0x262] sm:$0xff]  ;;  %v14017_v15 = vld [vmem:[#allocation221_spill] sm:$0xff] }
 0x512   :  { %v4257_v13 = vmul.f32 %v14014_v54, %v10646_v6  ;;  %v4264_v52 = vmul.f32 %v9591_v48, %v10711_v19  ;;  %v4681_v2 = vpop.permute.xlu0 %4680  ;;  %v4454_v59 = vadd.f32 %v4262_v60, %v3174_v31  ;;  %v3171_v1 = vadd.f32 %v2979_v11, %v2019_v33  ;;  %v14016_v31 = vld [vmem:[#allocation471_spill] sm:$0xff]  ;;  %v14018_v11 = vld [vmem:[#allocation13_spill] sm:$0xff]  ;;  %v14020_v33 = vld [vmem:[#allocation224_spill] sm:$0xff] }
 0x513   :  { %5981 = vst [vmem:[%s13032_s2 + $0x10] sm:$0x1f] %v5789_v26  ;;  %v5796_v14 = vadd.f32 %v5604_v22, %v10690_v7  ;;  %v5599_v38 = vadd.f32 %v5407_v0, %v4447_v57  ;;  %v5414_v62 = vmul.f32 %v4681_v2, %v10720_v63  ;;  %4936 = vperm.xlu0 %6197, %v6415_v61   ;;  %v14022_v61 = vld [vmem:[#allocation233_spill] sm:$0xff] }
 0x514   :  { %v2981_v48 = vmul.f32 %v14015_v53, %v10675_v56  ;;  %v3176_v47 = vadd.f32 %v2984_v25, %v2024_v27  ;;  %v4661_v60 = vpop.permute.xlu1 %4660  ;;  %v4449_v43 = vadd.f32 %v4257_v13, %v3169_v23  ;;  %v2986_v26 = vmul.f32 %v14016_v31, %v10631_v39  ;;  %v14019_v25 = vld [vmem:[#allocation16_spill] sm:$0xff] }
 0x515   :  { %5988 = vst [vmem:[%s13032_s2 + $0x48] sm:$0xff] %v5796_v14  ;;  %v5791_v57 = vadd.f32 %v5599_v38, %v10760_v10  ;;  %v5606_v22 = vadd.f32 %v5414_v62, %v4454_v59  ;;  %v5409_v0 = vmul.f32 %v4661_v60, %v10672_v55  ;;  %4916 = vperm.xlu1 %6198, %v14017_v15   ;;  %v14021_v38 = vld [vmem:[#allocation473_spill] sm:$0xff] }
 0x516   :  { %v2021_v30 = vmul.f32 %v14018_v11, %v10681_v18  ;;  %v2026_v23 = vmul.f32 %v14019_v25, %v10635_v50  ;;  %v4259_v34 = vmul.f32 %v14020_v33, %v10698_v51  ;;  %v4456_v27 = vadd.f32 %v4264_v52, %v3176_v47  ;;  %v4689_v54 = vpop.permute.xlu0 %4688  ;;  %v14023_v52 = vld [vmem:[#allocation474_spill] sm:$0xff]  ;;  %v14026_v11 = vld [vmem:[#allocation227_spill] sm:$0xff] }
 0x517   :  { %v4266_v13 = vmul.f32 %v9607_v44, %v10646_v6  ;;  %5983 = vst [vmem:[%s13032_s2 + $0x20] sm:$0xff] %v5791_v57  ;;  %v5798_v2 = vadd.f32 %v5606_v22, %v10745_v42  ;;  %v5601_v59 = vadd.f32 %v5409_v0, %v4449_v43  ;;  %v5416_v14 = vmul.f32 %v4689_v54, %v10731_v58  ;;  %v14024_v0 = vld [vmem:[#allocation15_spill] sm:$0xff]  ;;  %v14027_v25 = vld [vmem:[#allocation478_spill] sm:$0xff] }
 0x518   :  { %4944 = vperm.xlu0 %6197, %v14021_v38   ;;  %v3173_v62 = vadd.f32 %v2981_v48, %v2021_v30  ;;  %v2983_v53 = vmul.f32 %v14022_v61, %v10631_v39  ;;  %v2988_v47 = vmul.f32 %v14023_v52, %v10686_v35  ;;  %v4669_v60 = vpop.permute.xlu1 %4668  ;;  %v4451_v44 = vadd.f32 %v4259_v34, %v3171_v1  ;;  %v6416_v48 = vld [vmem:[%s13030_s0 + $0x24a] sm:$0xff]  ;;  %v14025_v1 = vld [vmem:[#allocation18_spill] sm:$0xff] }
 0x519   :  { %v3178_v31 = vadd.f32 %v2986_v26, %v2026_v23  ;;  %5990 = vst [vmem:[%s13032_s2 + $0x58] sm:$0x1f] %v5798_v2  ;;  %v5793_v43 = vadd.f32 %v5601_v59, %v10690_v7  ;;  %v5608_v57 = vadd.f32 %v5416_v14, %v4456_v27  ;;  %v5411_v22 = vmul.f32 %v4669_v60, %v10720_v63  ;;  %v14028_v59 = vld [vmem:[#allocation475_spill] sm:$0xff]  ;;  %v14029_v38 = vld [vmem:[#allocation236_spill] sm:$0xff] }
 0x51a   :  { %4924 = vperm.xlu1 %6198, %v6416_v48   ;;  %v2023_v15 = vmul.f32 %v14024_v0, %v10635_v50  ;;  %v2028_v26 = vmul.f32 %v14025_v1, %v10679_v3  ;;  %v4261_v30 = vmul.f32 %v14026_v11, %v10711_v19  ;;  %v4268_v23 = vmul.f32 %v14027_v25, %v10698_v51  ;;  %v4697_v33 = vpop.permute.xlu0 %4696 }
 0x51b   :  { %v4458_v34 = vadd.f32 %v4266_v13, %v3178_v31  ;;  %5985 = vst [vmem:[%s13032_s2 + $0x30] sm:$0xff] %v5793_v43  ;;  %v5800_v27 = vadd.f32 %v5608_v57, %v10760_v10  ;;  %v5603_v54 = vadd.f32 %v5411_v22, %v4451_v44  ;;  %v5418_v2 = vmul.f32 %v4697_v33, %v10672_v55  ;;  %v14030_v13 = vld [vmem:[#allocation476_spill] sm:$0xff]  ;;  %v14031_v22 = vld [vmem:[#allocation226_spill] sm:$0xff] }
 0x51c   :  { %4952 = vperm.xlu0 %6197, %v14028_v59   ;;  %v3175_v14 = vadd.f32 %v2983_v53, %v2023_v15  ;;  %v2985_v61 = vmul.f32 %v14029_v38, %v10686_v35  ;;  %v3180_v52 = vadd.f32 %v2988_v47, %v2028_v26  ;;  %v4677_v60 = vpop.permute.xlu1 %4676  ;;  %v4453_v48 = vadd.f32 %v4261_v30, %v3173_v62  ;;  %v14032_v53 = vld [vmem:[#allocation17_spill] sm:$0xff]  ;;  %v14033_v47 = vld [vmem:[#allocation20_spill] sm:$0xff]  ;;  %v14034_v15 = vld [vmem:[#allocation230_spill] sm:$0xff] }
 0x51d   :  { %v2990_v31 = vmul.f32 %v14030_v13, %v10675_v56  ;;  %5992 = vst [vmem:[%s13032_s2 + $0x68] sm:$0xff] %v5800_v27  ;;  %v5795_v44 = vadd.f32 %v5603_v54, %v10745_v42  ;;  %v5610_v43 = vadd.f32 %v5418_v2, %v4458_v34  ;;  %v5413_v57 = vmul.f32 %v4677_v60, %v10731_v58  ;;  %v6417_v27 = vld [vmem:[%s13030_s0 + $0x292] sm:$0xff] }
 0x51e   :  { %4932 = vperm.xlu1 %6198, %v14031_v22   ;;  %v2025_v0 = vmul.f32 %v14032_v53, %v10679_v3  ;;  %v2030_v62 = vmul.f32 %v14033_v47, %v10681_v18  ;;  %v4263_v1 = vmul.f32 %v14034_v15, %v10646_v6  ;;  %v4460_v26 = vadd.f32 %v4268_v23, %v3180_v52  ;;  %v4705_v11 = vpop.permute.xlu0 %4704  ;;  %v14035_v23 = vld [vmem:[#allocation239_spill] sm:$0xff]  ;;  %v14039_v22 = vld [vmem:[#allocation22_spill] sm:$0xff] }
 0x51f   :  { %v4270_v30 = vmul.f32 %v9633_v40, %v10711_v19  ;;  %5987 = vst [vmem:[%s13032_s2 + $0x40] sm:$0x1f] %v5795_v44  ;;  %v5802_v25 = vadd.f32 %v5610_v43, %v10690_v7  ;;  %v5605_v33 = vadd.f32 %v5413_v57, %v4453_v48  ;;  %v5420_v34 = vmul.f32 %v4705_v11, %v10720_v63  ;;  %v14036_v40 = vld [vmem:[#allocation477_spill] sm:$0xff]  ;;  %v14041_v11 = vld [vmem:[#allocation479_spill] sm:$0xff] }
 0x520   :  { %4960 = vperm.xlu0 %6197, %v6417_v27   ;;  %v3177_v54 = vadd.f32 %v2985_v61, %v2025_v0  ;;  %v2987_v2 = vmul.f32 %v14035_v23, %v10675_v56  ;;  %v2992_v59 = vmul.f32 %v14036_v40, %v10631_v39  ;;  %v4685_v38 = vpop.permute.xlu1 %4684  ;;  %v4455_v52 = vadd.f32 %v4263_v1, %v3175_v14  ;;  %v14037_v43 = vld [vmem:[#allocation229_spill] sm:$0xff]  ;;  %v14038_v61 = vld [vmem:[#allocation19_spill] sm:$0xff]  ;;  %v14040_v14 = vld [vmem:[#allocation232_spill] sm:$0xff] }
 0x521   :  { %v3182_v60 = vadd.f32 %v2990_v31, %v2030_v62  ;;  %5994 = vst [vmem:[%s13032_s2 + $0x78] sm:$0xff] %v5802_v25  ;;  %v5797_v48 = vadd.f32 %v5605_v33, %v10760_v10  ;;  %v5612_v13 = vadd.f32 %v5420_v34, %v4460_v26  ;;  %v5415_v44 = vmul.f32 %v4685_v38, %v10672_v55  ;;  %v14042_v33 = vld [vmem:[#allocation241_spill] sm:$0xff] }
 0x522   :  { %4940 = vperm.xlu1 %6198, %v14037_v43   ;;  %v2027_v57 = vmul.f32 %v14038_v61, %v10681_v18  ;;  %v2032_v53 = vmul.f32 %v14039_v22, %v10635_v50  ;;  %v4265_v31 = vmul.f32 %v14040_v14, %v10698_v51  ;;  %v4272_v0 = vmul.f32 %v9649_v36, %v10646_v6  ;;  %v4713_v47 = vpop.permute.xlu0 %4712  ;;  %v14047_v22 = vld [vmem:[#allocation484_spill] sm:$0xff] }
 0x523   :  { %v4462_v62 = vadd.f32 %v4270_v30, %v3182_v60  ;;  %5989 = vst [vmem:[%s13032_s2 + $0x50] sm:$0xff] %v5797_v48  ;;  %v5804_v15 = vadd.f32 %v5612_v13, %v10745_v42  ;;  %v5607_v1 = vadd.f32 %v5415_v44, %v4455_v52  ;;  %v5422_v26 = vmul.f32 %v4713_v47, %v10731_v58  ;;  %v14043_v30 = vld [vmem:[#allocation480_spill] sm:$0xff]  ;;  %v14046_v44 = vld [vmem:[#allocation235_spill] sm:$0xff] }
 0x524   :  { %4968 = vperm.xlu0 %6197, %v14041_v11   ;;  %v3179_v25 = vadd.f32 %v2987_v2, %v2027_v57  ;;  %v2989_v34 = vmul.f32 %v14042_v33, %v10631_v39  ;;  %v3184_v27 = vadd.f32 %v2992_v59, %v2032_v53  ;;  %v4693_v23 = vpop.permute.xlu1 %4692  ;;  %v4457_v36 = vadd.f32 %v4265_v31, %v3177_v54  ;;  %v6418_v2 = vld [vmem:[%s13030_s0 + $0x27a] sm:$0xff]  ;;  %v14045_v48 = vld [vmem:[#allocation24_spill] sm:$0xff] }
 0x525   :  { %v2994_v40 = vmul.f32 %v14043_v30, %v10686_v35  ;;  %5996 = vst [vmem:[%s13032_s2 + $0x88] sm:$0x1f] %v5804_v15  ;;  %v5799_v38 = vadd.f32 %v5607_v1, %v10690_v7  ;;  %v5614_v52 = vadd.f32 %v5422_v26, %v4462_v62  ;;  %v5417_v60 = vmul.f32 %v4693_v23, %v10720_v63  ;;  %v14044_v59 = vld [vmem:[#allocation21_spill] sm:$0xff]  ;;  %v14049_v1 = vld [vmem:[#allocation244_spill] sm:$0xff] }
 0x526   :  { %4948 = vperm.xlu1 %6198, %v6418_v2   ;;  %v2029_v54 = vmul.f32 %v14044_v59, %v10635_v50  ;;  %v2034_v13 = vmul.f32 %v14045_v48, %v10679_v3  ;;  %v4267_v43 = vmul.f32 %v14046_v44, %v10711_v19  ;;  %v4464_v61 = vadd.f32 %v4272_v0, %v3184_v27  ;;  %v4721_v57 = vpop.permute.xlu0 %4720  ;;  %v14048_v62 = vld [vmem:[#allocation481_spill] sm:$0xff]  ;;  %v14050_v0 = vld [vmem:[#allocation482_spill] sm:$0xff] }
 0x527   :  { %v4274_v53 = vmul.f32 %v14047_v22, %v10698_v51  ;;  %5991 = vst [vmem:[%s13032_s2 + $0x60] sm:$0xff] %v5799_v38  ;;  %v5806_v14 = vadd.f32 %v5614_v52, %v10760_v10  ;;  %v5609_v31 = vadd.f32 %v5417_v60, %v4457_v36  ;;  %v5424_v47 = vmul.f32 %v4721_v57, %v10672_v55  ;;  %v14051_v52 = vld [vmem:[#allocation234_spill] sm:$0xff] }
 0x528   :  { %4976 = vperm.xlu0 %6197, %v14048_v62   ;;  %v3181_v15 = vadd.f32 %v2989_v34, %v2029_v54  ;;  %v2991_v26 = vmul.f32 %v14049_v1, %v10686_v35  ;;  %v2996_v11 = vmul.f32 %v14050_v0, %v10675_v56  ;;  %v4701_v33 = vpop.permute.xlu1 %4700  ;;  %v4459_v27 = vadd.f32 %v4267_v43, %v3179_v25  ;;  %v14052_v34 = vld [vmem:[#allocation23_spill] sm:$0xff]  ;;  %v14053_v2 = vld [vmem:[#allocation26_spill] sm:$0xff] }
 0x529   :  { %v3186_v23 = vadd.f32 %v2994_v40, %v2034_v13  ;;  %5998 = vst [vmem:[%s13032_s2 + $0x98] sm:$0xff] %v5806_v14  ;;  %v5801_v36 = vadd.f32 %v5609_v31, %v10745_v42  ;;  %v5616_v30 = vadd.f32 %v5424_v47, %v4464_v61  ;;  %v5419_v38 = vmul.f32 %v4701_v33, %v10731_v58  ;;  %v14054_v25 = vld [vmem:[#allocation238_spill] sm:$0xff]  ;;  %v14055_v14 = vld [vmem:[#allocation247_spill] sm:$0xff] }
 0x52a   :  { %4956 = vperm.xlu1 %6198, %v14051_v52   ;;  %v2031_v60 = vmul.f32 %v14052_v34, %v10679_v3  ;;  %v2036_v59 = vmul.f32 %v14053_v2, %v10681_v18  ;;  %v4269_v40 = vmul.f32 %v14054_v25, %v10646_v6  ;;  %v4276_v54 = vmul.f32 %v9675_v32, %v10711_v19  ;;  %v4729_v48 = vpop.permute.xlu0 %4728  ;;  %v6419_v57 = vld [vmem:[%s13030_s0 + $0x2c2] sm:$0xff] }
 0x52b   :  { %v4466_v13 = vadd.f32 %v4274_v53, %v3186_v23  ;;  %5993 = vst [vmem:[%s13032_s2 + $0x70] sm:$0x1f] %v5801_v36  ;;  %v5808_v44 = vadd.f32 %v5616_v30, %v10690_v7  ;;  %v5611_v43 = vadd.f32 %v5419_v38, %v4459_v27  ;;  %v5426_v61 = vmul.f32 %v4729_v48, %v10720_v63  ;;  %v14056_v62 = vld [vmem:[#allocation483_spill] sm:$0xff]  ;;  %v14057_v23 = vld [vmem:[#allocation237_spill] sm:$0xff]  ;;  %v14060_v30 = vld [vmem:[#allocation240_spill] sm:$0xff] }
 0x52c   :  { %4984 = vperm.xlu0 %6197, %v6419_v57   ;;  %v3183_v22 = vadd.f32 %v2991_v26, %v2031_v60  ;;  %v2993_v32 = vmul.f32 %v14055_v14, %v10675_v56  ;;  %v3188_v31 = vadd.f32 %v2996_v11, %v2036_v59  ;;  %v4709_v53 = vpop.permute.xlu1 %4708  ;;  %v4461_v47 = vadd.f32 %v4269_v40, %v3181_v15  ;;  %v14058_v26 = vld [vmem:[#allocation25_spill] sm:$0xff]  ;;  %v14059_v11 = vld [vmem:[#allocation28_spill] sm:$0xff] }
 0x52d   :  { %v2998_v1 = vmul.f32 %v14056_v62, %v10631_v39  ;;  %6000 = vst [vmem:[%s13032_s2 + $0xa8] sm:$0xff] %v5808_v44  ;;  %v5803_v0 = vadd.f32 %v5611_v43, %v10760_v10  ;;  %v5618_v33 = vadd.f32 %v5426_v61, %v4466_v13  ;;  %v5421_v27 = vmul.f32 %v4709_v53, %v10672_v55  ;;  %v14061_v40 = vld [vmem:[#allocation485_spill] sm:$0xff] }
 0x52e   :  { %4964 = vperm.xlu1 %6198, %v14057_v23   ;;  %v2033_v36 = vmul.f32 %v14058_v26, %v10681_v18  ;;  %v2038_v15 = vmul.f32 %v14059_v11, %v10635_v50  ;;  %v4271_v38 = vmul.f32 %v14060_v30, %v10698_v51  ;;  %v4468_v52 = vadd.f32 %v4276_v54, %v3188_v31  ;;  %v4737_v34 = vpop.permute.xlu0 %4736  ;;  %v14062_v13 = vld [vmem:[#allocation249_spill] sm:$0xff]  ;;  %v14063_v54 = vld [vmem:[#allocation486_spill] sm:$0xff] }
 0x52f   :  { %v4278_v60 = vmul.f32 %v9691_v21, %v10646_v6  ;;  %5995 = vst [vmem:[%s13032_s2 + $0x80] sm:$0xff] %v5803_v0  ;;  %v5810_v2 = vadd.f32 %v5618_v33, %v10745_v42  ;;  %v5613_v59 = vadd.f32 %v5421_v27, %v4461_v47  ;;  %v5428_v25 = vmul.f32 %v4737_v34, %v10731_v58  ;;  %v14064_v47 = vld [vmem:[#allocation27_spill] sm:$0xff]  ;;  %v14067_v27 = vld [vmem:[#allocation490_spill] sm:$0xff]  ;;  %v14069_v34 = vld [vmem:[#allocation252_spill] sm:$0xff] }
 0x530   :  { %4992 = vperm.xlu0 %6197, %v14061_v40   ;;  %v3185_v48 = vadd.f32 %v2993_v32, %v2033_v36  ;;  %v2995_v44 = vmul.f32 %v14062_v13, %v10631_v39  ;;  %v3000_v43 = vmul.f32 %v14063_v54, %v10686_v35  ;;  %v4717_v61 = vpop.permute.xlu1 %4716  ;;  %v4463_v21 = vadd.f32 %v4271_v38, %v3183_v22  ;;  %v6420_v32 = vld [vmem:[%s13030_s0 + $0x2aa] sm:$0xff]  ;;  %v14065_v22 = vld [vmem:[#allocation30_spill] sm:$0xff] }
 0x531   :  { %v3190_v57 = vadd.f32 %v2998_v1, %v2038_v15  ;;  %6002 = vst [vmem:[%s13032_s2 + $0xb8] sm:$0x1f] %v5810_v2  ;;  %v5805_v14 = vadd.f32 %v5613_v59, %v10690_v7  ;;  %v5620_v31 = vadd.f32 %v5428_v25, %v4468_v52  ;;  %v5423_v53 = vmul.f32 %v4717_v61, %v10720_v63  ;;  %v14066_v0 = vld [vmem:[#allocation243_spill] sm:$0xff] }
 0x532   :  { %4972 = vperm.xlu1 %6198, %v6420_v32   ;;  %v2035_v62 = vmul.f32 %v14064_v47, %v10635_v50  ;;  %v2040_v1 = vmul.f32 %v14065_v22, %v10679_v3  ;;  %v4273_v33 = vmul.f32 %v14066_v0, %v10711_v19  ;;  %v4280_v23 = vmul.f32 %v14067_v27, %v10698_v51  ;;  %v4745_v26 = vpop.permute.xlu0 %4744  ;;  %v14068_v38 = vld [vmem:[#allocation487_spill] sm:$0xff] }
 0x533   :  { %v4470_v36 = vadd.f32 %v4278_v60, %v3190_v57  ;;  %5997 = vst [vmem:[%s13032_s2 + $0x90] sm:$0xff] %v5805_v14  ;;  %v5812_v11 = vadd.f32 %v5620_v31, %v10760_v10  ;;  %v5615_v15 = vadd.f32 %v5423_v53, %v4463_v21  ;;  %v5430_v30 = vmul.f32 %v4745_v26, %v10672_v55  ;;  %v14070_v60 = vld [vmem:[#allocation488_spill] sm:$0xff]  ;;  %v14071_v57 = vld [vmem:[#allocation242_spill] sm:$0xff] }
 0x534   :  { %5000 = vperm.xlu0 %6197, %v14068_v38   ;;  %v3187_v52 = vadd.f32 %v2995_v44, %v2035_v62  ;;  %v2997_v2 = vmul.f32 %v14069_v34, %v10686_v35  ;;  %v3192_v59 = vadd.f32 %v3000_v43, %v2040_v1  ;;  %v4725_v25 = vpop.permute.xlu1 %4724  ;;  %v4465_v40 = vadd.f32 %v4273_v33, %v3185_v48  ;;  %v14072_v44 = vld [vmem:[#allocation29_spill] sm:$0xff]  ;;  %v14073_v43 = vld [vmem:[#allocation32_spill] sm:$0xff]  ;;  %v14074_v31 = vld [vmem:[#allocation246_spill] sm:$0xff] }
 0x535   :  { %v3002_v13 = vmul.f32 %v14070_v60, %v10675_v56  ;;  %6004 = vst [vmem:[%s13032_s2 + $0xc8] sm:$0xff] %v5812_v11  ;;  %v5807_v54 = vadd.f32 %v5615_v15, %v10745_v42  ;;  %v5622_v61 = vadd.f32 %v5430_v30, %v4470_v36  ;;  %v5425_v21 = vmul.f32 %v4725_v25, %v10731_v58  ;;  %v6421_v33 = vld [vmem:[%s13030_s0 + $0x2f2] sm:$0xff]  ;;  %v14079_v60 = vld [vmem:[#allocation34_spill] sm:$0xff] }
 0x536   :  { %4980 = vperm.xlu1 %6198, %v14071_v57   ;;  %v2037_v14 = vmul.f32 %v14072_v44, %v10679_v3  ;;  %v2042_v48 = vmul.f32 %v14073_v43, %v10681_v18  ;;  %v4275_v53 = vmul.f32 %v14074_v31, %v10646_v6  ;;  %v4472_v32 = vadd.f32 %v4280_v23, %v3192_v59  ;;  %v4753_v47 = vpop.permute.xlu0 %4752  ;;  %v14075_v23 = vld [vmem:[#allocation255_spill] sm:$0xff]  ;;  %v14077_v25 = vld [vmem:[#allocation245_spill] sm:$0xff] }
 0x537   :  { %v4282_v62 = vmul.f32 %v9717_v24, %v10711_v19  ;;  %5999 = vst [vmem:[%s13032_s2 + $0xa0] sm:$0x1f] %v5807_v54  ;;  %v5814_v22 = vadd.f32 %v5622_v61, %v10690_v7  ;;  %v5617_v1 = vadd.f32 %v5425_v21, %v4465_v40  ;;  %v5432_v0 = vmul.f32 %v4753_v47, %v10720_v63  ;;  %v14076_v24 = vld [vmem:[#allocation489_spill] sm:$0xff] }
 0x538   :  { %5008 = vperm.xlu0 %6197, %v6421_v33   ;;  %v3189_v27 = vadd.f32 %v2997_v2, %v2037_v14  ;;  %v2999_v26 = vmul.f32 %v14075_v23, %v10675_v56  ;;  %v3004_v36 = vmul.f32 %v14076_v24, %v10631_v39  ;;  %v4733_v11 = vpop.permute.xlu1 %4732  ;;  %v4467_v15 = vadd.f32 %v4275_v53, %v3187_v52  ;;  %v14078_v2 = vld [vmem:[#allocation31_spill] sm:$0xff]  ;;  %v14080_v52 = vld [vmem:[#allocation248_spill] sm:$0xff]  ;;  %v14082_v53 = vld [vmem:[#allocation257_spill] sm:$0xff] }
 0x539   :  { %v3194_v30 = vadd.f32 %v3002_v13, %v2042_v48  ;;  %6006 = vst [vmem:[%s13032_s2 + $0xd8] sm:$0xff] %v5814_v22  ;;  %v5809_v38 = vadd.f32 %v5617_v1, %v10760_v10  ;;  %v5624_v34 = vadd.f32 %v5432_v0, %v4472_v32  ;;  %v5427_v59 = vmul.f32 %v4733_v11, %v10672_v55  ;;  %v14081_v48 = vld [vmem:[#allocation491_spill] sm:$0xff]  ;;  %v14084_v24 = vld [vmem:[#allocation33_spill] sm:$0xff] }
 0x53a   :  { %4988 = vperm.xlu1 %6198, %v14077_v25   ;;  %v2039_v40 = vmul.f32 %v14078_v2, %v10681_v18  ;;  %v2044_v54 = vmul.f32 %v14079_v60, %v10635_v50  ;;  %v4277_v13 = vmul.f32 %v14080_v52, %v10698_v51  ;;  %v4284_v61 = vmul.f32 %v9733_v17, %v10646_v6  ;;  %v4761_v21 = vpop.permute.xlu0 %4760 }
 0x53b   :  { %v4474_v57 = vadd.f32 %v4282_v62, %v3194_v30  ;;  %6001 = vst [vmem:[%s13032_s2 + $0xb0] sm:$0xff] %v5809_v38  ;;  %v5816_v44 = vadd.f32 %v5624_v34, %v10745_v42  ;;  %v5619_v14 = vadd.f32 %v5427_v59, %v4467_v15  ;;  %v5434_v43 = vmul.f32 %v4761_v21, %v10731_v58  ;;  %v14083_v62 = vld [vmem:[#allocation492_spill] sm:$0xff]  ;;  %v14086_v15 = vld [vmem:[#allocation251_spill] sm:$0xff] }
 0x53c   :  { %5016 = vperm.xlu0 %6197, %v14081_v48   ;;  %v3191_v31 = vadd.f32 %v2999_v26, %v2039_v40  ;;  %v3001_v32 = vmul.f32 %v14082_v53, %v10631_v39  ;;  %v3196_v47 = vadd.f32 %v3004_v36, %v2044_v54  ;;  %v4741_v22 = vpop.permute.xlu1 %4740  ;;  %v4469_v17 = vadd.f32 %v4277_v13, %v3189_v27  ;;  %v6422_v26 = vld [vmem:[%s13030_s0 + $0x2da] sm:$0xff]  ;;  %v14085_v36 = vld [vmem:[#allocation36_spill] sm:$0xff] }
 0x53d   :  { %v3006_v1 = vmul.f32 %v14083_v62, %v10686_v35  ;;  %6008 = vst [vmem:[%s13032_s2 + $0xe8] sm:$0x1f] %v5816_v44  ;;  %v5811_v0 = vadd.f32 %v5619_v14, %v10690_v7  ;;  %v5626_v33 = vadd.f32 %v5434_v43, %v4474_v57  ;;  %v5429_v23 = vmul.f32 %v4741_v22, %v10720_v63  ;;  %v14087_v59 = vld [vmem:[#allocation496_spill] sm:$0xff]  ;;  %v14088_v54 = vld [vmem:[#allocation493_spill] sm:$0xff]  ;;  %v14091_v22 = vld [vmem:[#allocation250_spill] sm:$0xff] }
 0x53e   :  { %4996 = vperm.xlu1 %6198, %v6422_v26   ;;  %v2041_v27 = vmul.f32 %v14084_v24, %v10635_v50  ;;  %v2046_v11 = vmul.f32 %v14085_v36, %v10679_v3  ;;  %v4279_v30 = vmul.f32 %v14086_v15, %v10711_v19  ;;  %v4476_v38 = vadd.f32 %v4284_v61, %v3196_v47  ;;  %v4769_v34 = vpop.permute.xlu0 %4768  ;;  %v14089_v13 = vld [vmem:[#allocation260_spill] sm:$0xff]  ;;  %v14090_v61 = vld [vmem:[#allocation494_spill] sm:$0xff] }
 0x53f   :  { %v4286_v25 = vmul.f32 %v14087_v59, %v10698_v51  ;;  %6003 = vst [vmem:[%s13032_s2 + $0xc0] sm:$0xff] %v5811_v0  ;;  %v5818_v2 = vadd.f32 %v5626_v33, %v10760_v10  ;;  %v5621_v40 = vadd.f32 %v5429_v23, %v4469_v17  ;;  %v5436_v60 = vmul.f32 %v4769_v34, %v10672_v55  ;;  %v14093_v62 = vld [vmem:[#allocation38_spill] sm:$0xff] }
 0x540   :  { %5024 = vperm.xlu0 %6197, %v14088_v54   ;;  %v3193_v52 = vadd.f32 %v3001_v32, %v2041_v27  ;;  %v3003_v21 = vmul.f32 %v14089_v13, %v10686_v35  ;;  %v3008_v57 = vmul.f32 %v14090_v61, %v10675_v56  ;;  %v4749_v44 = vpop.permute.xlu1 %4748  ;;  %v4471_v14 = vadd.f32 %v4279_v30, %v3191_v31  ;;  %v14092_v32 = vld [vmem:[#allocation35_spill] sm:$0xff]  ;;  %v14094_v31 = vld [vmem:[#allocation254_spill] sm:$0xff]  ;;  %v14097_v13 = vld [vmem:[#allocation253_spill] sm:$0xff] }
 0x541   :  { %v3198_v43 = vadd.f32 %v3006_v1, %v2046_v11  ;;  %6010 = vst [vmem:[%s13032_s2 + $0xf8] sm:$0xff] %v5818_v2  ;;  %v5813_v48 = vadd.f32 %v5621_v40, %v10745_v42  ;;  %v5628_v53 = vadd.f32 %v5436_v60, %v4476_v38  ;;  %v5431_v47 = vmul.f32 %v4749_v44, %v10731_v58  ;;  %v6423_v11 = vld [vmem:[%s13030_s0 + $0x322] sm:$0xff]  ;;  %v14100_v44 = vld [vmem:[#allocation256_spill] sm:$0xff] }
 0x542   :  { %5004 = vperm.xlu1 %6198, %v14091_v22   ;;  %v2043_v17 = vmul.f32 %v14092_v32, %v10679_v3  ;;  %v2048_v0 = vmul.f32 %v14093_v62, %v10681_v18  ;;  %v4281_v1 = vmul.f32 %v14094_v31, %v10646_v6  ;;  %v4288_v33 = vmul.f32 %v9759_v20, %v10711_v19  ;;  %v4777_v23 = vpop.permute.xlu0 %4776  ;;  %v14095_v30 = vld [vmem:[#allocation263_spill] sm:$0xff] }
 0x543   :  { %v4478_v26 = vadd.f32 %v4286_v25, %v3198_v43  ;;  %6005 = vst [vmem:[%s13032_s2 + $0xd0] sm:$0x1f] %v5813_v48  ;;  %v5820_v24 = vadd.f32 %v5628_v53, %v10690_v7  ;;  %v5623_v27 = vadd.f32 %v5431_v47, %v4471_v14  ;;  %v5438_v36 = vmul.f32 %v4777_v23, %v10720_v63  ;;  %v14096_v25 = vld [vmem:[#allocation495_spill] sm:$0xff] }
 0x544   :  { %5032 = vperm.xlu0 %6197, %v6423_v11   ;;  %v3195_v15 = vadd.f32 %v3003_v21, %v2043_v17  ;;  %v3005_v20 = vmul.f32 %v14095_v30, %v10675_v56  ;;  %v3200_v38 = vadd.f32 %v3008_v57, %v2048_v0  ;;  %v4757_v34 = vpop.permute.xlu1 %4756  ;;  %v4473_v59 = vadd.f32 %v4281_v1, %v3193_v52  ;;  %v14098_v21 = vld [vmem:[#allocation37_spill] sm:$0xff]  ;;  %v14099_v57 = vld [vmem:[#allocation40_spill] sm:$0xff]  ;;  %v14103_v1 = vld [vmem:[#allocation498_spill] sm:$0xff] }
 0x545   :  { %v3010_v2 = vmul.f32 %v14096_v25, %v10631_v39  ;;  %6012 = vst [vmem:[%s13032_s2 + $0x108] sm:$0xff] %v5820_v24  ;;  %v5815_v40 = vadd.f32 %v5623_v27, %v10760_v10  ;;  %v5630_v60 = vadd.f32 %v5438_v36, %v4478_v26  ;;  %v5433_v54 = vmul.f32 %v4757_v34, %v10672_v55  ;;  %v14101_v17 = vld [vmem:[#allocation497_spill] sm:$0xff]  ;;  %v6424_v11 = vld [vmem:[%s13030_s0 + $0x30a] sm:$0xff]  ;;  %v14107_v25 = vld [vmem:[#allocation502_spill] sm:$0xff] }
 0x546   :  { %5012 = vperm.xlu1 %6198, %v14097_v13   ;;  %v2045_v61 = vmul.f32 %v14098_v21, %v10681_v18  ;;  %v2050_v52 = vmul.f32 %v14099_v57, %v10635_v50  ;;  %v4283_v14 = vmul.f32 %v14100_v44, %v10698_v51  ;;  %v4480_v43 = vadd.f32 %v4288_v33, %v3200_v38  ;;  %v4785_v48 = vpop.permute.xlu0 %4784  ;;  %v14102_v0 = vld [vmem:[#allocation265_spill] sm:$0xff]  ;;  %v14104_v30 = vld [vmem:[#allocation39_spill] sm:$0xff] }
 0x547   :  { %v4290_v53 = vmul.f32 %v9775_v46, %v10646_v6  ;;  %6007 = vst [vmem:[%s13032_s2 + $0xe0] sm:$0xff] %v5815_v40  ;;  %v5822_v47 = vadd.f32 %v5630_v60, %v10745_v42  ;;  %v5625_v22 = vadd.f32 %v5433_v54, %v4473_v59  ;;  %v5440_v32 = vmul.f32 %v4785_v48, %v10731_v58  ;;  %v14106_v34 = vld [vmem:[#allocation259_spill] sm:$0xff] }
 0x548   :  { %5040 = vperm.xlu0 %6197, %v14101_v17   ;;  %v3197_v62 = vadd.f32 %v3005_v20, %v2045_v61  ;;  %v3007_v31 = vmul.f32 %v14102_v0, %v10631_v39  ;;  %v3012_v33 = vmul.f32 %v14103_v1, %v10686_v35  ;;  %v4765_v23 = vpop.permute.xlu1 %4764  ;;  %v4475_v46 = vadd.f32 %v4283_v14, %v3195_v15  ;;  %v14105_v15 = vld [vmem:[#allocation42_spill] sm:$0xff]  ;;  %v14108_v61 = vld [vmem:[#allocation499_spill] sm:$0xff] }
 0x549   :  { %v3202_v26 = vadd.f32 %v3010_v2, %v2050_v52  ;;  %6014 = vst [vmem:[%s13032_s2 + $0x118] sm:$0x1f] %v5822_v47  ;;  %v5817_v24 = vadd.f32 %v5625_v22, %v10690_v7  ;;  %v5632_v27 = vadd.f32 %v5440_v32, %v4480_v43  ;;  %v5435_v36 = vmul.f32 %v4765_v23, %v10720_v63  ;;  %v14109_v52 = vld [vmem:[#allocation268_spill] sm:$0xff]  ;;  %v14111_v0 = vld [vmem:[#allocation258_spill] sm:$0xff] }
 0x54a   :  { %5020 = vperm.xlu1 %6198, %v6424_v11   ;;  %v2047_v20 = vmul.f32 %v14104_v30, %v10635_v50  ;;  %v2052_v38 = vmul.f32 %v14105_v15, %v10679_v3  ;;  %v4285_v59 = vmul.f32 %v14106_v34, %v10711_v19  ;;  %v4292_v2 = vmul.f32 %v14107_v25, %v10698_v51  ;;  %v4793_v40 = vpop.permute.xlu0 %4792  ;;  %v14114_v23 = vld [vmem:[#allocation262_spill] sm:$0xff] }
 0x54b   :  { %v4482_v60 = vadd.f32 %v4290_v53, %v3202_v26  ;;  %6009 = vst [vmem:[%s13032_s2 + $0xf0] sm:$0xff] %v5817_v24  ;;  %v5824_v54 = vadd.f32 %v5632_v27, %v10760_v10  ;;  %v5627_v13 = vadd.f32 %v5435_v36, %v4475_v46  ;;  %v5442_v21 = vmul.f32 %v4793_v40, %v10672_v55  ;;  %v14110_v53 = vld [vmem:[#allocation500_spill] sm:$0xff] }
 0x54c   :  { %5048 = vperm.xlu0 %6197, %v14108_v61   ;;  %v3199_v57 = vadd.f32 %v3007_v31, %v2047_v20  ;;  %v3009_v44 = vmul.f32 %v14109_v52, %v10686_v35  ;;  %v3204_v14 = vadd.f32 %v3012_v33, %v2052_v38  ;;  %v4773_v43 = vpop.permute.xlu1 %4772  ;;  %v4477_v48 = vadd.f32 %v4285_v59, %v3197_v62  ;;  %v14112_v31 = vld [vmem:[#allocation41_spill] sm:$0xff]  ;;  %v14113_v33 = vld [vmem:[#allocation44_spill] sm:$0xff]  ;;  %v14115_v38 = vld [vmem:[#allocation271_spill] sm:$0xff] }
 0x54d   :  { %v3014_v47 = vmul.f32 %v14110_v53, %v10675_v56  ;;  %6016 = vst [vmem:[%s13032_s2 + $0x128] sm:$0xff] %v5824_v54  ;;  %v5819_v22 = vadd.f32 %v5627_v13, %v10745_v42  ;;  %v5634_v32 = vadd.f32 %v5442_v21, %v4482_v60  ;;  %v5437_v17 = vmul.f32 %v4773_v43, %v10731_v58  ;;  %v6425_v20 = vld [vmem:[%s13030_s0 + $0x352] sm:$0xff]  ;;  %v14118_v61 = vld [vmem:[#allocation43_spill] sm:$0xff] }
 0x54e   :  { %5028 = vperm.xlu1 %6198, %v14111_v0   ;;  %v2049_v1 = vmul.f32 %v14112_v31, %v10679_v3  ;;  %v2054_v62 = vmul.f32 %v14113_v33, %v10681_v18  ;;  %v4287_v46 = vmul.f32 %v14114_v23, %v10646_v6  ;;  %v4484_v26 = vadd.f32 %v4292_v2, %v3204_v14  ;;  %v4801_v24 = vpop.permute.xlu0 %4800  ;;  %v14117_v21 = vld [vmem:[#allocation261_spill] sm:$0xff]  ;;  %v14121_v0 = vld [vmem:[#allocation503_spill] sm:$0xff] }
 0x54f   :  { %v4294_v27 = vmul.f32 %v9801_v16, %v10711_v19  ;;  %6011 = vst [vmem:[%s13032_s2 + $0x100] sm:$0x1f] %v5819_v22  ;;  %v5826_v36 = vadd.f32 %v5634_v32, %v10690_v7  ;;  %v5629_v11 = vadd.f32 %v5437_v17, %v4477_v48  ;;  %v5444_v30 = vmul.f32 %v4801_v24, %v10720_v63  ;;  %v14116_v16 = vld [vmem:[#allocation501_spill] sm:$0xff] }
 0x550   :  { %5056 = vperm.xlu0 %6197, %v6425_v20   ;;  %v3201_v15 = vadd.f32 %v3009_v44, %v2049_v1  ;;  %v3011_v34 = vmul.f32 %v14115_v38, %v10675_v56  ;;  %v3016_v59 = vmul.f32 %v14116_v16, %v10631_v39  ;;  %v4781_v25 = vpop.permute.xlu1 %4780  ;;  %v4479_v2 = vadd.f32 %v4287_v46, %v3199_v57  ;;  %v14119_v44 = vld [vmem:[#allocation46_spill] sm:$0xff]  ;;  %v14120_v57 = vld [vmem:[#allocation264_spill] sm:$0xff]  ;;  %v14122_v1 = vld [vmem:[#allocation273_spill] sm:$0xff] }
 0x551   :  { %v3206_v40 = vadd.f32 %v3014_v47, %v2054_v62  ;;  %6018 = vst [vmem:[%s13032_s2 + $0x138] sm:$0xff] %v5826_v36  ;;  %v5821_v60 = vadd.f32 %v5629_v11, %v10760_v10  ;;  %v5636_v54 = vadd.f32 %v5444_v30, %v4484_v26  ;;  %v5439_v13 = vmul.f32 %v4781_v25, %v10672_v55  ;;  %v14123_v46 = vld [vmem:[#allocation504_spill] sm:$0xff]  ;;  %v6426_v11 = vld [vmem:[%s13030_s0 + $0x33a] sm:$0xff] }
 0x552   :  { %5036 = vperm.xlu1 %6198, %v14117_v21   ;;  %v2051_v52 = vmul.f32 %v14118_v61, %v10681_v18  ;;  %v2056_v14 = vmul.f32 %v14119_v44, %v10635_v50  ;;  %v4289_v43 = vmul.f32 %v14120_v57, %v10698_v51  ;;  %v4296_v48 = vmul.f32 %v9817_v29, %v10646_v6  ;;  %v4809_v53 = vpop.permute.xlu0 %4808  ;;  %v14124_v30 = vld [vmem:[#allocation45_spill] sm:$0xff] }
 0x553   :  { %v4486_v47 = vadd.f32 %v4294_v27, %v3206_v40  ;;  %6013 = vst [vmem:[%s13032_s2 + $0x110] sm:$0xff] %v5821_v60  ;;  %v5828_v22 = vadd.f32 %v5636_v54, %v10745_v42  ;;  %v5631_v32 = vadd.f32 %v5439_v13, %v4479_v2  ;;  %v5446_v17 = vmul.f32 %v4809_v53, %v10731_v58  ;;  %v14127_v2 = vld [vmem:[#allocation508_spill] sm:$0xff]  ;;  %v14128_v21 = vld [vmem:[#allocation505_spill] sm:$0xff] }
 0x554   :  { %5064 = vperm.xlu0 %6197, %v14121_v0   ;;  %v3203_v31 = vadd.f32 %v3011_v34, %v2051_v52  ;;  %v3013_v33 = vmul.f32 %v14122_v1, %v10631_v39  ;;  %v3208_v62 = vadd.f32 %v3016_v59, %v2056_v14  ;;  %v4789_v23 = vpop.permute.xlu1 %4788  ;;  %v4481_v29 = vadd.f32 %v4289_v43, %v3201_v15  ;;  %v14125_v15 = vld [vmem:[#allocation48_spill] sm:$0xff]  ;;  %v14126_v34 = vld [vmem:[#allocation267_spill] sm:$0xff]  ;;  %v14130_v14 = vld [vmem:[#allocation506_spill] sm:$0xff] }
 0x555   :  { %v3018_v26 = vmul.f32 %v14123_v46, %v10686_v35  ;;  %6020 = vst [vmem:[%s13032_s2 + $0x148] sm:$0x1f] %v5828_v22  ;;  %v5823_v24 = vadd.f32 %v5631_v32, %v10690_v7  ;;  %v5638_v27 = vadd.f32 %v5446_v17, %v4486_v47  ;;  %v5441_v36 = vmul.f32 %v4789_v23, %v10720_v63  ;;  %v14129_v52 = vld [vmem:[#allocation276_spill] sm:$0xff]  ;;  %v14131_v17 = vld [vmem:[#allocation266_spill] sm:$0xff]  ;;  %v14132_v0 = vld [vmem:[#allocation47_spill] sm:$0xff] }
 0x556   :  { %5044 = vperm.xlu1 %6198, %v6426_v11   ;;  %v2053_v20 = vmul.f32 %v14124_v30, %v10635_v50  ;;  %v2058_v38 = vmul.f32 %v14125_v15, %v10679_v3  ;;  %v4291_v16 = vmul.f32 %v14126_v34, %v10711_v19  ;;  %v4488_v59 = vadd.f32 %v4296_v48, %v3208_v62  ;;  %v4817_v25 = vpop.permute.xlu0 %4816  ;;  %v6427_v11 = vld [vmem:[%s13030_s0 + $0x382] sm:$0xff] }
 0x557   :  { %v4298_v40 = vmul.f32 %v14127_v2, %v10698_v51  ;;  %6015 = vst [vmem:[%s13032_s2 + $0x120] sm:$0xff] %v5823_v24  ;;  %v5830_v60 = vadd.f32 %v5638_v27, %v10760_v10  ;;  %v5633_v54 = vadd.f32 %v5441_v36, %v4481_v29  ;;  %v5448_v13 = vmul.f32 %v4817_v25, %v10672_v55 }
 0x558   :  { %5072 = vperm.xlu0 %6197, %v14128_v21   ;;  %v3205_v61 = vadd.f32 %v3013_v33, %v2053_v20  ;;  %v3015_v44 = vmul.f32 %v14129_v52, %v10686_v35  ;;  %v3020_v57 = vmul.f32 %v14130_v14, %v10675_v56  ;;  %v4797_v43 = vpop.permute.xlu1 %4796  ;;  %v4483_v48 = vadd.f32 %v4291_v16, %v3203_v31  ;;  %v14133_v33 = vld [vmem:[#allocation50_spill] sm:$0xff]  ;;  %v14135_v20 = vld [vmem:[#allocation279_spill] sm:$0xff]  ;;  %v14139_v21 = vld [vmem:[#allocation52_spill] sm:$0xff] }
 0x559   :  { %v3210_v53 = vadd.f32 %v3018_v26, %v2058_v38  ;;  %6022 = vst [vmem:[%s13032_s2 + $0x158] sm:$0xff] %v5830_v60  ;;  %v5825_v47 = vadd.f32 %v5633_v54, %v10745_v42  ;;  %v5640_v22 = vadd.f32 %v5448_v13, %v4488_v59  ;;  %v5443_v32 = vmul.f32 %v4797_v43, %v10731_v58  ;;  %v14134_v31 = vld [vmem:[#allocation270_spill] sm:$0xff]  ;;  %v14136_v16 = vld [vmem:[#allocation507_spill] sm:$0xff]  ;;  %v14137_v60 = vld [vmem:[#allocation269_spill] sm:$0xff] }
 0x55a   :  { %5052 = vperm.xlu1 %6198, %v14131_v17   ;;  %v2055_v1 = vmul.f32 %v14132_v0, %v10679_v3  ;;  %v2060_v62 = vmul.f32 %v14133_v33, %v10681_v18  ;;  %v4293_v23 = vmul.f32 %v14134_v31, %v10646_v6  ;;  %v4300_v29 = vmul.f32 %v9843_v4, %v10711_v19  ;;  %v4825_v46 = vpop.permute.xlu0 %4824  ;;  %v14138_v54 = vld [vmem:[#allocation49_spill] sm:$0xff]  ;;  %v14140_v52 = vld [vmem:[#allocation272_spill] sm:$0xff] }
 0x55b   :  { %v4490_v26 = vadd.f32 %v4298_v40, %v3210_v53  ;;  %6017 = vst [vmem:[%s13032_s2 + $0x130] sm:$0x1f] %v5825_v47  ;;  %v5832_v24 = vadd.f32 %v5640_v22, %v10690_v7  ;;  %v5635_v27 = vadd.f32 %v5443_v32, %v4483_v48  ;;  %v5450_v36 = vmul.f32 %v4825_v46, %v10720_v63  ;;  %v14141_v22 = vld [vmem:[#allocation509_spill] sm:$0xff] }
 0x55c   :  { %5080 = vperm.xlu0 %6197, %v6427_v11   ;;  %v3207_v30 = vadd.f32 %v3015_v44, %v2055_v1  ;;  %v3017_v4 = vmul.f32 %v14135_v20, %v10675_v56  ;;  %v3212_v15 = vadd.f32 %v3020_v57, %v2060_v62  ;;  %v4805_v38 = vpop.permute.xlu1 %4804  ;;  %v4485_v34 = vadd.f32 %v4293_v23, %v3205_v61  ;;  %v14142_v17 = vld [vmem:[#allocation281_spill] sm:$0xff]  ;;  %v14143_v1 = vld [vmem:[#allocation510_spill] sm:$0xff] }
 0x55d   :  { %v3022_v59 = vmul.f32 %v14136_v16, %v10631_v39  ;;  %6024 = vst [vmem:[%s13032_s2 + $0x168] sm:$0xff] %v5832_v24  ;;  %v5827_v25 = vadd.f32 %v5635_v27, %v10760_v10  ;;  %v5642_v2 = vadd.f32 %v5450_v36, %v4490_v26  ;;  %v5445_v40 = vmul.f32 %v4805_v38, %v10672_v55  ;;  %v6428_v26 = vld [vmem:[%s13030_s0 + $0x36a] sm:$0xff]  ;;  %v14145_v36 = vld [vmem:[#allocation54_spill] sm:$0xff] }
 0x55e   :  { %5060 = vperm.xlu1 %6198, %v14137_v60   ;;  %v2057_v13 = vmul.f32 %v14138_v54, %v10681_v18  ;;  %v2062_v61 = vmul.f32 %v14139_v21, %v10635_v50  ;;  %v4295_v44 = vmul.f32 %v14140_v52, %v10698_v51  ;;  %v4492_v14 = vadd.f32 %v4300_v29, %v3212_v15  ;;  %v4833_v57 = vpop.permute.xlu0 %4832  ;;  %v14144_v24 = vld [vmem:[#allocation51_spill] sm:$0xff]  ;;  %v14149_v60 = vld [vmem:[#allocation284_spill] sm:$0xff] }
 0x55f   :  { %v4302_v43 = vmul.f32 %v9859_v12, %v10646_v6  ;;  %6019 = vst [vmem:[%s13032_s2 + $0x140] sm:$0xff] %v5827_v25  ;;  %v5834_v48 = vadd.f32 %v5642_v2, %v10745_v42  ;;  %v5637_v53 = vadd.f32 %v5445_v40, %v4485_v34  ;;  %v5452_v47 = vmul.f32 %v4833_v57, %v10731_v58  ;;  %v14148_v2 = vld [vmem:[#allocation511_spill] sm:$0xff]  ;;  %v14150_v52 = vld [vmem:[#allocation512_spill] sm:$0xff] }
 0x560   :  { %5088 = vperm.xlu0 %6197, %v14141_v22   ;;  %v3209_v32 = vadd.f32 %v3017_v4, %v2057_v13  ;;  %v3019_v0 = vmul.f32 %v14142_v17, %v10631_v39  ;;  %v3024_v33 = vmul.f32 %v14143_v1, %v10686_v35  ;;  %v4813_v62 = vpop.permute.xlu1 %4812  ;;  %v4487_v12 = vadd.f32 %v4295_v44, %v3207_v30  ;;  %v14146_v30 = vld [vmem:[#allocation275_spill] sm:$0xff]  ;;  %v14147_v4 = vld [vmem:[#allocation514_spill] sm:$0xff]  ;;  %v14153_v22 = vld [vmem:[#allocation56_spill] sm:$0xff] }
 0x561   :  { %v3214_v31 = vadd.f32 %v3022_v59, %v2062_v61  ;;  %6026 = vst [vmem:[%s13032_s2 + $0x178] sm:$0x1f] %v5834_v48  ;;  %v5829_v23 = vadd.f32 %v5637_v53, %v10690_v7  ;;  %v5644_v29 = vadd.f32 %v5452_v47, %v4492_v14  ;;  %v5447_v46 = vmul.f32 %v4813_v62, %v10720_v63  ;;  %v14151_v48 = vld [vmem:[#allocation274_spill] sm:$0xff]  ;;  %v14152_v53 = vld [vmem:[#allocation53_spill] sm:$0xff] }
 0x562   :  { %5068 = vperm.xlu1 %6198, %v6428_v26   ;;  %v2059_v27 = vmul.f32 %v14144_v24, %v10635_v50  ;;  %v2064_v11 = vmul.f32 %v14145_v36, %v10679_v3  ;;  %v4297_v20 = vmul.f32 %v14146_v30, %v10711_v19  ;;  %v4304_v15 = vmul.f32 %v14147_v4, %v10698_v51  ;;  %v4841_v38 = vpop.permute.xlu0 %4840  ;;  %v14154_v17 = vld [vmem:[#allocation278_spill] sm:$0xff]  ;;  %v14155_v26 = vld [vmem:[#allocation287_spill] sm:$0xff] }
 0x563   :  { %v4494_v34 = vadd.f32 %v4302_v43, %v3214_v31  ;;  %6021 = vst [vmem:[%s13032_s2 + $0x150] sm:$0xff] %v5829_v23  ;;  %v5836_v16 = vadd.f32 %v5644_v29, %v10760_v10  ;;  %v5639_v59 = vadd.f32 %v5447_v46, %v4487_v12  ;;  %v5454_v25 = vmul.f32 %v4841_v38, %v10672_v55  ;;  %v6429_v29 = vld [vmem:[%s13030_s0 + $0x3b2] sm:$0xff] }
 0x564   :  { %5096 = vperm.xlu0 %6197, %v14148_v2   ;;  %v3211_v40 = vadd.f32 %v3019_v0, %v2059_v27  ;;  %v3021_v54 = vmul.f32 %v14149_v60, %v10686_v35  ;;  %v3216_v13 = vadd.f32 %v3024_v33, %v2064_v11  ;;  %v4821_v21 = vpop.permute.xlu1 %4820  ;;  %v4489_v61 = vadd.f32 %v4297_v20, %v3209_v32  ;;  %v14157_v38 = vld [vmem:[#allocation277_spill] sm:$0xff]  ;;  %v14160_v2 = vld [vmem:[#allocation280_spill] sm:$0xff] }
 0x565   :  { %v3026_v44 = vmul.f32 %v14150_v52, %v10675_v56  ;;  %6028 = vst [vmem:[%s13032_s2 + $0x188] sm:$0xff] %v5836_v16  ;;  %v5831_v14 = vadd.f32 %v5639_v59, %v10745_v42  ;;  %v5646_v57 = vadd.f32 %v5454_v25, %v4494_v34  ;;  %v5449_v43 = vmul.f32 %v4821_v21, %v10731_v58  ;;  %v14158_v34 = vld [vmem:[#allocation55_spill] sm:$0xff]  ;;  %v14159_v59 = vld [vmem:[#allocation58_spill] sm:$0xff] }
 0x566   :  { %5076 = vperm.xlu1 %6198, %v14151_v48   ;;  %v2061_v47 = vmul.f32 %v14152_v53, %v10679_v3  ;;  %v2066_v32 = vmul.f32 %v14153_v22, %v10681_v18  ;;  %v4299_v0 = vmul.f32 %v14154_v17, %v10646_v6  ;;  %v4496_v1 = vadd.f32 %v4304_v15, %v3216_v13  ;;  %v4849_v33 = vpop.permute.xlu0 %4848 }
 0x567   :  { %v4306_v62 = vmul.f32 %v9885_v9, %v10711_v19  ;;  %6023 = vst [vmem:[%s13032_s2 + $0x160] sm:$0x1f] %v5831_v14  ;;  %v5838_v12 = vadd.f32 %v5646_v57, %v10690_v7  ;;  %v5641_v31 = vadd.f32 %v5449_v43, %v4489_v61  ;;  %v5456_v23 = vmul.f32 %v4849_v33, %v10720_v63  ;;  %v14156_v9 = vld [vmem:[#allocation513_spill] sm:$0xff] }
 0x568   :  { %5104 = vperm.xlu0 %6197, %v6429_v29   ;;  %v3213_v46 = vadd.f32 %v3021_v54, %v2061_v47  ;;  %v3023_v24 = vmul.f32 %v14155_v26, %v10675_v56  ;;  %v3028_v27 = vmul.f32 %v14156_v9, %v10631_v39  ;;  %v4829_v36 = vpop.permute.xlu1 %4828  ;;  %v4491_v11 = vadd.f32 %v4299_v0, %v3211_v40  ;;  %v14162_v57 = vld [vmem:[#allocation289_spill] sm:$0xff]  ;;  %v14163_v47 = vld [vmem:[#allocation516_spill] sm:$0xff] }
 0x569   :  { %v3218_v30 = vadd.f32 %v3026_v44, %v2066_v32  ;;  %6030 = vst [vmem:[%s13032_s2 + $0x198] sm:$0xff] %v5838_v12  ;;  %v5833_v20 = vadd.f32 %v5641_v31, %v10760_v10  ;;  %v5648_v4 = vadd.f32 %v5456_v23, %v4496_v1  ;;  %v5451_v15 = vmul.f32 %v4829_v36, %v10672_v55  ;;  %v14161_v44 = vld [vmem:[#allocation515_spill] sm:$0xff]  ;;  %v6430_v1 = vld [vmem:[%s13030_s0 + $0x39a] sm:$0xff]  ;;  %v14165_v12 = vld [vmem:[#allocation60_spill] sm:$0xff] }
 0x56a   :  { %5084 = vperm.xlu1 %6198, %v14157_v38   ;;  %v2063_v16 = vmul.f32 %v14158_v34, %v10681_v18  ;;  %v2068_v25 = vmul.f32 %v14159_v59, %v10635_v50  ;;  %v4301_v40 = vmul.f32 %v14160_v2, %v10698_v51  ;;  %v4308_v60 = vmul.f32 %v9901_v28, %v10646_v6  ;;  %v4857_v54 = vpop.permute.xlu0 %4856  ;;  %v14164_v33 = vld [vmem:[#allocation57_spill] sm:$0xff]  ;;  %v14166_v23 = vld [vmem:[#allocation283_spill] sm:$0xff]  ;;  %v14170_v38 = vld [vmem:[#allocation518_spill] sm:$0xff] }
 0x56b   :  { %v4498_v13 = vadd.f32 %v4306_v62, %v3218_v30  ;;  %6025 = vst [vmem:[%s13032_s2 + $0x170] sm:$0xff] %v5833_v20  ;;  %v5840_v21 = vadd.f32 %v5648_v4, %v10745_v42  ;;  %v5643_v61 = vadd.f32 %v5451_v15, %v4491_v11  ;;  %v5458_v52 = vmul.f32 %v4857_v54, %v10731_v58  ;;  %v14168_v30 = vld [vmem:[#allocation517_spill] sm:$0xff]  ;;  %v14169_v4 = vld [vmem:[#allocation292_spill] sm:$0xff]  ;;  %v14171_v54 = vld [vmem:[#allocation282_spill] sm:$0xff] }
 0x56c   :  { %5112 = vperm.xlu0 %6197, %v14161_v44   ;;  %v3215_v14 = vadd.f32 %v3023_v24, %v2063_v16  ;;  %v3025_v43 = vmul.f32 %v14162_v57, %v10631_v39  ;;  %v3220_v48 = vadd.f32 %v3028_v27, %v2068_v25  ;;  %v4837_v53 = vpop.permute.xlu1 %4836  ;;  %v4493_v28 = vadd.f32 %v4301_v40, %v3213_v46  ;;  %v14167_v24 = vld [vmem:[#allocation520_spill] sm:$0xff]  ;;  %v14174_v44 = vld [vmem:[#allocation286_spill] sm:$0xff] }
 0x56d   :  { %v3030_v22 = vmul.f32 %v14163_v47, %v10686_v35  ;;  %6032 = vst [vmem:[%s13032_s2 + $0x1a8] sm:$0x1f] %v5840_v21  ;;  %v5835_v32 = vadd.f32 %v5643_v61, %v10690_v7  ;;  %v5650_v17 = vadd.f32 %v5458_v52, %v4498_v13  ;;  %v5453_v0 = vmul.f32 %v4837_v53, %v10720_v63  ;;  %v14172_v13 = vld [vmem:[#allocation59_spill] sm:$0xff]  ;;  %v14173_v61 = vld [vmem:[#allocation62_spill] sm:$0xff] }
 0x56e   :  { %5092 = vperm.xlu1 %6198, %v6430_v1   ;;  %v2065_v62 = vmul.f32 %v14164_v33, %v10635_v50  ;;  %v2070_v31 = vmul.f32 %v14165_v12, %v10679_v3  ;;  %v4303_v29 = vmul.f32 %v14166_v23, %v10711_v19  ;;  %v4500_v46 = vadd.f32 %v4308_v60, %v3220_v48  ;;  %v4865_v26 = vpop.permute.xlu0 %4864 }
 0x56f   :  { %v4310_v9 = vmul.f32 %v14167_v24, %v10698_v51  ;;  %6027 = vst [vmem:[%s13032_s2 + $0x180] sm:$0xff] %v5835_v32  ;;  %v5842_v27 = vadd.f32 %v5650_v17, %v10760_v10  ;;  %v5645_v36 = vadd.f32 %v5453_v0, %v4493_v28  ;;  %v5460_v11 = vmul.f32 %v4865_v26, %v10672_v55  ;;  %v14175_v17 = vld [vmem:[#allocation295_spill] sm:$0xff]  ;;  %v14178_v26 = vld [vmem:[#allocation61_spill] sm:$0xff] }
 0x570   :  { %5120 = vperm.xlu0 %6197, %v14168_v30   ;;  %v3217_v20 = vadd.f32 %v3025_v43, %v2065_v62  ;;  %v3027_v15 = vmul.f32 %v14169_v4, %v10686_v35  ;;  %v3032_v34 = vmul.f32 %v14170_v38, %v10675_v56  ;;  %v4845_v16 = vpop.permute.xlu1 %4844  ;;  %v4495_v59 = vadd.f32 %v4303_v29, %v3215_v14  ;;  %v14176_v62 = vld [vmem:[#allocation519_spill] sm:$0xff] }
 0x571   :  { %v3222_v25 = vadd.f32 %v3030_v22, %v2070_v31  ;;  %6034 = vst [vmem:[%s13032_s2 + $0x1b8] sm:$0xff] %v5842_v27  ;;  %v5837_v2 = vadd.f32 %v5645_v36, %v10745_v42  ;;  %v5652_v40 = vadd.f32 %v5460_v11, %v4500_v46  ;;  %v5455_v60 = vmul.f32 %v4845_v16, %v10731_v58  ;;  %v6431_v22 = vld [vmem:[%s13030_s0 + $0x3e2] sm:$0xff]  ;;  %v14177_v46 = vld [vmem:[#allocation285_spill] sm:$0xff]  ;;  %v14180_v36 = vld [vmem:[#allocation288_spill] sm:$0xff] }
 0x572   :  { %5100 = vperm.xlu1 %6198, %v14171_v54   ;;  %v2067_v21 = vmul.f32 %v14172_v13, %v10679_v3  ;;  %v2072_v52 = vmul.f32 %v14173_v61, %v10681_v18  ;;  %v4305_v14 = vmul.f32 %v14174_v44, %v10646_v6  ;;  %v4312_v57 = vmul.f32 %v9927_v8, %v10711_v19  ;;  %v4873_v43 = vpop.permute.xlu0 %4872  ;;  %v14181_v16 = vld [vmem:[#allocation521_spill] sm:$0xff]  ;;  %v6432_v44 = vld [vmem:[%s13030_s0 + $0x3ca] sm:$0xff] }
 0x573   :  { %v4502_v48 = vadd.f32 %v4310_v9, %v3222_v25  ;;  %6029 = vst [vmem:[%s13032_s2 + $0x190] sm:$0x1f] %v5837_v2  ;;  %v5844_v53 = vadd.f32 %v5652_v40, %v10690_v7  ;;  %v5647_v28 = vadd.f32 %v5455_v60, %v4495_v59  ;;  %v5462_v47 = vmul.f32 %v4873_v43, %v10720_v63  ;;  %v14179_v9 = vld [vmem:[#allocation64_spill] sm:$0xff]  ;;  %v14182_v25 = vld [vmem:[#allocation297_spill] sm:$0xff]  ;;  %v14183_v40 = vld [vmem:[#allocation522_spill] sm:$0xff] }
 0x574   :  { %5128 = vperm.xlu0 %6197, %v6431_v22   ;;  %v3219_v32 = vadd.f32 %v3027_v15, %v2067_v21  ;;  %v3029_v8 = vmul.f32 %v14175_v17, %v10675_v56  ;;  %v3224_v0 = vadd.f32 %v3032_v34, %v2072_v52  ;;  %v4853_v1 = vpop.permute.xlu1 %4852  ;;  %v4497_v33 = vadd.f32 %v4305_v14, %v3217_v20  ;;  %v14184_v14 = vld [vmem:[#allocation63_spill] sm:$0xff]  ;;  %v14185_v43 = vld [vmem:[#allocation66_spill] sm:$0xff] }
 0x575   :  { %v3034_v12 = vmul.f32 %v14176_v62, %v10631_v39  ;;  %6036 = vst [vmem:[%s13032_s2 + $0x1c8] sm:$0xff] %v5844_v53  ;;  %v5839_v31 = vadd.f32 %v5647_v28, %v10760_v10  ;;  %v5654_v23 = vadd.f32 %v5462_v47, %v4502_v48  ;;  %v5457_v29 = vmul.f32 %v4853_v1, %v10672_v55  ;;  %v14186_v53 = vld [vmem:[#allocation291_spill] sm:$0xff]  ;;  %v14187_v47 = vld [vmem:[#allocation526_spill] sm:$0xff] }
 0x576   :  { %5108 = vperm.xlu1 %6198, %v14177_v46   ;;  %v2069_v24 = vmul.f32 %v14178_v26, %v10681_v18  ;;  %v2074_v27 = vmul.f32 %v14179_v9, %v10635_v50  ;;  %v4307_v11 = vmul.f32 %v14180_v36, %v10698_v51  ;;  %v4504_v30 = vadd.f32 %v4312_v57, %v3224_v0  ;;  %v4881_v20 = vpop.permute.xlu0 %4880  ;;  %v14190_v26 = vld [vmem:[#allocation524_spill] sm:$0xff] }
 0x577   :  { %v4314_v4 = vmul.f32 %v9943_v41, %v10646_v6  ;;  %6031 = vst [vmem:[%s13032_s2 + $0x1a0] sm:$0xff] %v5839_v31  ;;  %v5846_v15 = vadd.f32 %v5654_v23, %v10745_v42  ;;  %v5649_v38 = vadd.f32 %v5457_v29, %v4497_v33  ;;  %v5464_v34 = vmul.f32 %v4881_v20, %v10731_v58  ;;  %v14188_v33 = vld [vmem:[#allocation523_spill] sm:$0xff] }
 0x578   :  { %5136 = vperm.xlu0 %6197, %v14181_v16   ;;  %v3221_v59 = vadd.f32 %v3029_v8, %v2069_v24  ;;  %v3031_v2 = vmul.f32 %v14182_v25, %v10631_v39  ;;  %v3036_v60 = vmul.f32 %v14183_v40, %v10686_v35  ;;  %v4861_v54 = vpop.permute.xlu1 %4860  ;;  %v4499_v41 = vadd.f32 %v4307_v11, %v3219_v32  ;;  %v14191_v11 = vld [vmem:[#allocation290_spill] sm:$0xff] }
 0x579   :  { %v3226_v13 = vadd.f32 %v3034_v12, %v2074_v27  ;;  %6038 = vst [vmem:[%s13032_s2 + $0x1d8] sm:$0x1f] %v5846_v15  ;;  %v5841_v21 = vadd.f32 %v5649_v38, %v10690_v7  ;;  %v5656_v61 = vadd.f32 %v5464_v34, %v4504_v30  ;;  %v5459_v52 = vmul.f32 %v4861_v54, %v10720_v63  ;;  %v14189_v12 = vld [vmem:[#allocation300_spill] sm:$0xff]  ;;  %v14192_v30 = vld [vmem:[#allocation65_spill] sm:$0xff]  ;;  %v14194_v38 = vld [vmem:[#allocation294_spill] sm:$0xff] }
 0x57a   :  { %5116 = vperm.xlu1 %6198, %v6432_v44   ;;  %v2071_v57 = vmul.f32 %v14184_v14, %v10635_v50  ;;  %v2076_v48 = vmul.f32 %v14185_v43, %v10679_v3  ;;  %v4309_v28 = vmul.f32 %v14186_v53, %v10711_v19  ;;  %v4316_v22 = vmul.f32 %v14187_v47, %v10698_v51  ;;  %v4889_v32 = vpop.permute.xlu0 %4888  ;;  %v6433_v54 = vld [vmem:[%s13030_s0 + $0x412] sm:$0xff] }
 0x57b   :  { %v4506_v17 = vadd.f32 %v4314_v4, %v3226_v13  ;;  %6033 = vst [vmem:[%s13032_s2 + $0x1b0] sm:$0xff] %v5841_v21  ;;  %v5848_v8 = vadd.f32 %v5656_v61, %v10760_v10  ;;  %v5651_v0 = vadd.f32 %v5459_v52, %v4499_v41  ;;  %v5466_v1 = vmul.f32 %v4889_v32, %v10672_v55  ;;  %v14193_v4 = vld [vmem:[#allocation68_spill] sm:$0xff]  ;;  %v14195_v13 = vld [vmem:[#allocation303_spill] sm:$0xff]  ;;  %v14197_v53 = vld [vmem:[#allocation293_spill] sm:$0xff] }
 0x57c   :  { %5144 = vperm.xlu0 %6197, %v14188_v33   ;;  %v3223_v62 = vadd.f32 %v3031_v2, %v2071_v57  ;;  %v3033_v31 = vmul.f32 %v14189_v12, %v10686_v35  ;;  %v3228_v23 = vadd.f32 %v3036_v60, %v2076_v48  ;;  %v4869_v29 = vpop.permute.xlu1 %4868  ;;  %v4501_v46 = vadd.f32 %v4309_v28, %v3221_v59  ;;  %v14198_v28 = vld [vmem:[#allocation67_spill] sm:$0xff] }
 0x57d   :  { %v3038_v24 = vmul.f32 %v14190_v26, %v10675_v56  ;;  %6040 = vst [vmem:[%s13032_s2 + $0x1e8] sm:$0xff] %v5848_v8  ;;  %v5843_v9 = vadd.f32 %v5651_v0, %v10745_v42  ;;  %v5658_v27 = vadd.f32 %v5466_v1, %v4506_v17  ;;  %v5461_v36 = vmul.f32 %v4869_v29, %v10731_v58  ;;  %v14200_v17 = vld [vmem:[#allocation296_spill] sm:$0xff] }
 0x57e   :  { %5124 = vperm.xlu1 %6198, %v14191_v11   ;;  %v2073_v20 = vmul.f32 %v14192_v30, %v10679_v3  ;;  %v2078_v15 = vmul.f32 %v14193_v4, %v10681_v18  ;;  %v4311_v34 = vmul.f32 %v14194_v38, %v10646_v6  ;;  %v4508_v16 = vadd.f32 %v4316_v22, %v3228_v23  ;;  %v4897_v59 = vpop.permute.xlu0 %4896  ;;  %v14199_v22 = vld [vmem:[#allocation70_spill] sm:$0xff]  ;;  %v14201_v23 = vld [vmem:[#allocation527_spill] sm:$0xff] }
 0x57f   :  { %v4318_v25 = vmul.f32 %v9969_v5, %v10711_v19  ;;  %6035 = vst [vmem:[%s13032_s2 + $0x1c0] sm:$0x1f] %v5843_v9  ;;  %v5850_v2 = vadd.f32 %v5658_v27, %v10690_v7  ;;  %v5653_v40 = vadd.f32 %v5461_v36, %v4501_v46  ;;  %v5468_v60 = vmul.f32 %v4897_v59, %v10720_v63  ;;  %v14196_v5 = vld [vmem:[#allocation525_spill] sm:$0xff]  ;;  %v14203_v27 = vld [vmem:[#allocation528_spill] sm:$0xff]  ;;  %v14206_v59 = vld [vmem:[#allocation299_spill] sm:$0xff] }
 0x580   :  { %5152 = vperm.xlu0 %6197, %v6433_v54   ;;  %v3225_v41 = vadd.f32 %v3033_v31, %v2073_v20  ;;  %v3035_v21 = vmul.f32 %v14195_v13, %v10675_v56  ;;  %v3040_v61 = vmul.f32 %v14196_v5, %v10631_v39  ;;  %v4877_v52 = vpop.permute.xlu1 %4876  ;;  %v4503_v44 = vadd.f32 %v4311_v34, %v3223_v62  ;;  %v14202_v46 = vld [vmem:[#allocation305_spill] sm:$0xff]  ;;  %v14205_v34 = vld [vmem:[#allocation72_spill] sm:$0xff] }
 0x581   :  { %v3230_v14 = vadd.f32 %v3038_v24, %v2078_v15  ;;  %6042 = vst [vmem:[%s13032_s2 + $0x1f8] sm:$0xff] %v5850_v2  ;;  %v5845_v57 = vadd.f32 %v5653_v40, %v10760_v10  ;;  %v5660_v43 = vadd.f32 %v5468_v60, %v4508_v16  ;;  %v5463_v48 = vmul.f32 %v4877_v52, %v10672_v55  ;;  %v6434_v4 = vld [vmem:[%s13030_s0 + $0x3fa] sm:$0xff]  ;;  %v14207_v60 = vld [vmem:[#allocation532_spill] sm:$0xff] }
 0x582   :  { %5132 = vperm.xlu1 %6198, %v14197_v53   ;;  %v2075_v47 = vmul.f32 %v14198_v28, %v10681_v18  ;;  %v2080_v32 = vmul.f32 %v14199_v22, %v10635_v50  ;;  %v4313_v8 = vmul.f32 %v14200_v17, %v10698_v51  ;;  %v4320_v0 = vmul.f32 %v9985_v37, %v10646_v6  ;;  %v4905_v1 = vpop.permute.xlu0 %4904  ;;  %v14204_v15 = vld [vmem:[#allocation69_spill] sm:$0xff]  ;;  %v14209_v52 = vld [vmem:[#allocation308_spill] sm:$0xff]  ;;  %v14212_v17 = vld [vmem:[#allocation71_spill] sm:$0xff] }
 0x583   :  { %v4510_v33 = vadd.f32 %v4318_v25, %v3230_v14  ;;  %6037 = vst [vmem:[%s13032_s2 + $0x1d0] sm:$0xff] %v5845_v57  ;;  %v5852_v62 = vadd.f32 %v5660_v43, %v10745_v42  ;;  %v5655_v12 = vadd.f32 %v5463_v48, %v4503_v44  ;;  %v5470_v31 = vmul.f32 %v4905_v1, %v10731_v58  ;;  %v14208_v5 = vld [vmem:[#allocation529_spill] sm:$0xff]  ;;  %v14210_v14 = vld [vmem:[#allocation530_spill] sm:$0xff] }
 0x584   :  { %5160 = vperm.xlu0 %6197, %v14201_v23   ;;  %v3227_v29 = vadd.f32 %v3035_v21, %v2075_v47  ;;  %v3037_v26 = vmul.f32 %v14202_v46, %v10631_v39  ;;  %v3232_v24 = vadd.f32 %v3040_v61, %v2080_v32  ;;  %v4885_v9 = vpop.permute.xlu1 %4884  ;;  %v4505_v37 = vadd.f32 %v4313_v8, %v3225_v41  ;;  %v14211_v32 = vld [vmem:[#allocation298_spill] sm:$0xff] }
 0x585   :  { %v3042_v36 = vmul.f32 %v14203_v27, %v10686_v35  ;;  %6044 = vst [vmem:[%s13032_s2 + $0x208] sm:$0x1f] %v5852_v62  ;;  %v5847_v11 = vadd.f32 %v5655_v12, %v10690_v7  ;;  %v5662_v30 = vadd.f32 %v5470_v31, %v4510_v33  ;;  %v5465_v20 = vmul.f32 %v4885_v9, %v10720_v63  ;;  %v14214_v33 = vld [vmem:[#allocation302_spill] sm:$0xff] }
 0x586   :  { %5140 = vperm.xlu1 %6198, %v6434_v4   ;;  %v2077_v38 = vmul.f32 %v14204_v15, %v10635_v50  ;;  %v2082_v16 = vmul.f32 %v14205_v34, %v10679_v3  ;;  %v4315_v25 = vmul.f32 %v14206_v59, %v10711_v19  ;;  %v4512_v2 = vadd.f32 %v4320_v0, %v3232_v24  ;;  %v4913_v40 = vpop.permute.xlu0 %4912  ;;  %v14213_v0 = vld [vmem:[#allocation74_spill] sm:$0xff]  ;;  %v14217_v34 = vld [vmem:[#allocation301_spill] sm:$0xff] }
 0x587   :  { %v4322_v54 = vmul.f32 %v14207_v60, %v10698_v51  ;;  %6039 = vst [vmem:[%s13032_s2 + $0x1e0] sm:$0xff] %v5847_v11  ;;  %v5854_v41 = vadd.f32 %v5662_v30, %v10760_v10  ;;  %v5657_v13 = vadd.f32 %v5465_v20, %v4505_v37  ;;  %v5472_v21 = vmul.f32 %v4913_v40, %v10672_v55  ;;  %v6435_v24 = vld [vmem:[%s13030_s0 + $0x442] sm:$0xff]  ;;  %v14220_v40 = vld [vmem:[#allocation304_spill] sm:$0xff] }
 0x588   :  { %5168 = vperm.xlu0 %6197, %v14208_v5   ;;  %v3229_v61 = vadd.f32 %v3037_v26, %v2077_v38  ;;  %v3039_v44 = vmul.f32 %v14209_v52, %v10686_v35  ;;  %v3044_v57 = vmul.f32 %v14210_v14, %v10675_v56  ;;  %v4893_v43 = vpop.permute.xlu1 %4892  ;;  %v4507_v48 = vadd.f32 %v4315_v25, %v3227_v29  ;;  %v14215_v37 = vld [vmem:[#allocation311_spill] sm:$0xff]  ;;  %v14219_v25 = vld [vmem:[#allocation76_spill] sm:$0xff]  ;;  %v14221_v52 = vld [vmem:[#allocation533_spill] sm:$0xff] }
 0x589   :  { %v3234_v53 = vadd.f32 %v3042_v36, %v2082_v16  ;;  %6046 = vst [vmem:[%s13032_s2 + $0x218] sm:$0xff] %v5854_v41  ;;  %v5849_v28 = vadd.f32 %v5657_v13, %v10745_v42  ;;  %v5664_v47 = vadd.f32 %v5472_v21, %v4512_v2  ;;  %v5467_v22 = vmul.f32 %v4893_v43, %v10731_v58  ;;  %v14216_v30 = vld [vmem:[#allocation531_spill] sm:$0xff]  ;;  %v14218_v16 = vld [vmem:[#allocation73_spill] sm:$0xff]  ;;  %v14223_v43 = vld [vmem:[#allocation534_spill] sm:$0xff] }
 0x58a   :  { %5148 = vperm.xlu1 %6198, %v14211_v32   ;;  %v2079_v8 = vmul.f32 %v14212_v17, %v10679_v3  ;;  %v2084_v1 = vmul.f32 %v14213_v0, %v10681_v18  ;;  %v4317_v62 = vmul.f32 %v14214_v33, %v10646_v6  ;;  %v4324_v12 = vmul.f32 %v10011_v49, %v10711_v19  ;;  %v4921_v31 = vpop.permute.xlu0 %4920  ;;  %v14222_v14 = vld [vmem:[#allocation313_spill] sm:$0xff]  ;;  %v6436_v17 = vld [vmem:[%s13030_s0 + $0x42a] sm:$0xff] }
 0x58b   :  { %v4514_v23 = vadd.f32 %v4322_v54, %v3234_v53  ;;  %6041 = vst [vmem:[%s13032_s2 + $0x1f0] sm:$0x1f] %v5849_v28  ;;  %v5856_v29 = vadd.f32 %v5664_v47, %v10690_v7  ;;  %v5659_v46 = vadd.f32 %v5467_v22, %v4507_v48  ;;  %v5474_v26 = vmul.f32 %v4921_v31, %v10720_v63  ;;  %v14227_v31 = vld [vmem:[#allocation538_spill] sm:$0xff] }
 0x58c   :  { %5176 = vperm.xlu0 %6197, %v6435_v24   ;;  %v3231_v9 = vadd.f32 %v3039_v44, %v2079_v8  ;;  %v3041_v49 = vmul.f32 %v14215_v37, %v10675_v56  ;;  %v3236_v27 = vadd.f32 %v3044_v57, %v2084_v1  ;;  %v4901_v36 = vpop.permute.xlu1 %4900  ;;  %v4509_v11 = vadd.f32 %v4317_v62, %v3229_v61  ;;  %v14224_v8 = vld [vmem:[#allocation75_spill] sm:$0xff]  ;;  %v14225_v1 = vld [vmem:[#allocation78_spill] sm:$0xff] }
 0x58d   :  { %v3046_v20 = vmul.f32 %v14216_v30, %v10631_v39  ;;  %6048 = vst [vmem:[%s13032_s2 + $0x228] sm:$0xff] %v5856_v29  ;;  %v5851_v4 = vadd.f32 %v5659_v46, %v10760_v10  ;;  %v5666_v15 = vadd.f32 %v5474_v26, %v4514_v23  ;;  %v5469_v38 = vmul.f32 %v4901_v36, %v10672_v55  ;;  %v14226_v62 = vld [vmem:[#allocation307_spill] sm:$0xff] }
 0x58e   :  { %5156 = vperm.xlu1 %6198, %v14217_v34   ;;  %v2081_v59 = vmul.f32 %v14218_v16, %v10681_v18  ;;  %v2086_v2 = vmul.f32 %v14219_v25, %v10635_v50  ;;  %v4319_v60 = vmul.f32 %v14220_v40, %v10698_v51  ;;  %v4516_v54 = vadd.f32 %v4324_v12, %v3236_v27  ;;  %v4929_v41 = vpop.permute.xlu0 %4928  ;;  %v14228_v37 = vld [vmem:[#allocation535_spill] sm:$0xff]  ;;  %v14229_v27 = vld [vmem:[#allocation316_spill] sm:$0xff]  ;;  %v14232_v25 = vld [vmem:[#allocation77_spill] sm:$0xff] }
 0x58f   :  { %v4326_v13 = vmul.f32 %v10027_v45, %v10646_v6  ;;  %6043 = vst [vmem:[%s13032_s2 + $0x200] sm:$0xff] %v5851_v4  ;;  %v5858_v21 = vadd.f32 %v5666_v15, %v10745_v42  ;;  %v5661_v5 = vadd.f32 %v5469_v38, %v4509_v11  ;;  %v5476_v61 = vmul.f32 %v4929_v41, %v10731_v58  ;;  %v14230_v4 = vld [vmem:[#allocation536_spill] sm:$0xff] }
 0x590   :  { %5184 = vperm.xlu0 %6197, %v14221_v52   ;;  %v3233_v44 = vadd.f32 %v3041_v49, %v2081_v59  ;;  %v3043_v57 = vmul.f32 %v14222_v14, %v10631_v39  ;;  %v3048_v48 = vmul.f32 %v14223_v43, %v10686_v35  ;;  %v4909_v53 = vpop.permute.xlu1 %4908  ;;  %v4511_v45 = vadd.f32 %v4319_v60, %v3231_v9  ;;  %v14231_v59 = vld [vmem:[#allocation306_spill] sm:$0xff]  ;;  %v14233_v40 = vld [vmem:[#allocation80_spill] sm:$0xff] }
 0x591   :  { %v3238_v28 = vadd.f32 %v3046_v20, %v2086_v2  ;;  %6050 = vst [vmem:[%s13032_s2 + $0x238] sm:$0x1f] %v5858_v21  ;;  %v5853_v47 = vadd.f32 %v5661_v5, %v10690_v7  ;;  %v5668_v22 = vadd.f32 %v5476_v61, %v4516_v54  ;;  %v5471_v32 = vmul.f32 %v4909_v53, %v10720_v63  ;;  %v14234_v54 = vld [vmem:[#allocation310_spill] sm:$0xff]  ;;  %v14235_v5 = vld [vmem:[#allocation541_spill] sm:$0xff] }
 0x592   :  { %5164 = vperm.xlu1 %6198, %v6436_v17   ;;  %v2083_v0 = vmul.f32 %v14224_v8, %v10635_v50  ;;  %v2088_v33 = vmul.f32 %v14225_v1, %v10679_v3  ;;  %v4321_v12 = vmul.f32 %v14226_v62, %v10711_v19  ;;  %v4328_v23 = vmul.f32 %v14227_v31, %v10698_v51  ;;  %v4937_v29 = vpop.permute.xlu0 %4936  ;;  %v14238_v1 = vld [vmem:[#allocation309_spill] sm:$0xff] }
 0x593   :  { %v4518_v46 = vadd.f32 %v4326_v13, %v3238_v28  ;;  %6045 = vst [vmem:[%s13032_s2 + $0x210] sm:$0xff] %v5853_v47  ;;  %v5860_v26 = vadd.f32 %v5668_v22, %v10760_v10  ;;  %v5663_v24 = vadd.f32 %v5471_v32, %v4511_v45  ;;  %v5478_v9 = vmul.f32 %v4937_v29, %v10672_v55  ;;  %v14237_v45 = vld [vmem:[#allocation537_spill] sm:$0xff] }
 0x594   :  { %5192 = vperm.xlu0 %6197, %v14228_v37   ;;  %v3235_v49 = vadd.f32 %v3043_v57, %v2083_v0  ;;  %v3045_v36 = vmul.f32 %v14229_v27, %v10686_v35  ;;  %v3240_v11 = vadd.f32 %v3048_v48, %v2088_v33  ;;  %v4917_v30 = vpop.permute.xlu1 %4916  ;;  %v4513_v20 = vadd.f32 %v4321_v12, %v3233_v44  ;;  %v6437_v57 = vld [vmem:[%s13030_s0 + $0x472] sm:$0xff]  ;;  %v14236_v48 = vld [vmem:[#allocation319_spill] sm:$0xff]  ;;  %v14240_v12 = vld [vmem:[#allocation82_spill] sm:$0xff] }
 0x595   :  { %v3050_v15 = vmul.f32 %v14230_v4, %v10675_v56  ;;  %6052 = vst [vmem:[%s13032_s2 + $0x248] sm:$0xff] %v5860_v26  ;;  %v5855_v38 = vadd.f32 %v5663_v24, %v10745_v42  ;;  %v5670_v34 = vadd.f32 %v5478_v9, %v4518_v46  ;;  %v5473_v16 = vmul.f32 %v4917_v30, %v10731_v58  ;;  %v14239_v33 = vld [vmem:[#allocation79_spill] sm:$0xff]  ;;  %v14242_v46 = vld [vmem:[#allocation544_spill] sm:$0xff]  ;;  %v14244_v30 = vld [vmem:[#allocation321_spill] sm:$0xff] }
 0x596   :  { %5172 = vperm.xlu1 %6198, %v14231_v59   ;;  %v2085_v2 = vmul.f32 %v14232_v25, %v10679_v3  ;;  %v2090_v60 = vmul.f32 %v14233_v40, %v10681_v18  ;;  %v4323_v41 = vmul.f32 %v14234_v54, %v10646_v6  ;;  %v4520_v13 = vadd.f32 %v4328_v23, %v3240_v11  ;;  %v14241_v23 = vld [vmem:[#allocation312_spill] sm:$0xff]  ;;  %v6438_v40 = vld [vmem:[%s13030_s0 + $0x45a] sm:$0xff] }
 0x597   :  { %v4945_v21 = vpop.permute.xlu0 %4944  ;;  %v4330_v61 = vmul.f32 %v14235_v5, %v10711_v19  ;;  %6047 = vst [vmem:[%s13032_s2 + $0x220] sm:$0x1f] %v5855_v38  ;;  %v5862_v52 = vadd.f32 %v5670_v34, %v10690_v7  ;;  %v5665_v44 = vadd.f32 %v5473_v16, %v4513_v20  ;;  %v3047_v53 = vmul.f32 %v14236_v48, %v10675_v56  ;;  %v14245_v34 = vld [vmem:[#allocation540_spill] sm:$0xff] }
 0x598   :  { %v5480_v14 = vmul.f32 %v4945_v21, %v10720_v63  ;;  %5200 = vperm.xlu0 %6197, %v6437_v57   ;;  %v3237_v43 = vadd.f32 %v3045_v36, %v2085_v2  ;;  %v3052_v28 = vmul.f32 %v14237_v45, %v10631_v39  ;;  %v4515_v22 = vadd.f32 %v4323_v41, %v3235_v49  ;;  %v14243_v36 = vld [vmem:[#allocation539_spill] sm:$0xff]  ;;  %v14247_v41 = vld [vmem:[#allocation84_spill] sm:$0xff] }
 0x599   :  { %v4925_v47 = vpop.permute.xlu1 %4924  ;;  %v3242_v32 = vadd.f32 %v3050_v15, %v2090_v60  ;;  %6054 = vst [vmem:[%s13032_s2 + $0x258] sm:$0xff] %v5862_v52  ;;  %v5857_v17 = vadd.f32 %v5665_v44, %v10760_v10  ;;  %v2087_v62 = vmul.f32 %v14239_v33, %v10681_v18  ;;  %v2092_v31 = vmul.f32 %v14240_v12, %v10635_v50  ;;  %v14246_v60 = vld [vmem:[#allocation81_spill] sm:$0xff]  ;;  %v14248_v21 = vld [vmem:[#allocation315_spill] sm:$0xff]  ;;  %v14249_v44 = vld [vmem:[#allocation546_spill] sm:$0xff] }
 0x59a   :  { %v5672_v8 = vadd.f32 %v5480_v14, %v4520_v13  ;;  %v5475_v0 = vmul.f32 %v4925_v47, %v10672_v55  ;;  %5180 = vperm.xlu1 %6198, %v14238_v1   ;;  %v4325_v29 = vmul.f32 %v14241_v23, %v10698_v51  ;;  %v4332_v26 = vmul.f32 %v14242_v46, %v10646_v6  ;;  %v14253_v12 = vld [vmem:[#allocation314_spill] sm:$0xff] }
 0x59b   :  { %v4953_v24 = vpop.permute.xlu0 %4952  ;;  %v4522_v9 = vadd.f32 %v4330_v61, %v3242_v32  ;;  %6049 = vst [vmem:[%s13032_s2 + $0x230] sm:$0xff] %v5857_v17  ;;  %v3239_v11 = vadd.f32 %v3047_v53, %v2087_v62  ;;  %v3049_v20 = vmul.f32 %v14244_v30, %v10631_v39  ;;  %v3244_v4 = vadd.f32 %v3052_v28, %v2092_v31  ;;  %v14250_v53 = vld [vmem:[#allocation542_spill] sm:$0xff]  ;;  %v14251_v28 = vld [vmem:[#allocation324_spill] sm:$0xff]  ;;  %v14254_v31 = vld [vmem:[#allocation83_spill] sm:$0xff] }
 0x59c   :  { %v5864_v37 = vadd.f32 %v5672_v8, %v10745_v42  ;;  %v5667_v49 = vadd.f32 %v5475_v0, %v4515_v22  ;;  %v5482_v27 = vmul.f32 %v4953_v24, %v10731_v58  ;;  %5208 = vperm.xlu0 %6197, %v14243_v36   ;;  %v4517_v38 = vadd.f32 %v4325_v29, %v3237_v43  ;;  %v14252_v22 = vld [vmem:[#allocation543_spill] sm:$0xff]  ;;  %v14255_v29 = vld [vmem:[#allocation86_spill] sm:$0xff] }
 0x59d   :  { %v4933_v15 = vpop.permute.xlu1 %4932  ;;  %v3054_v16 = vmul.f32 %v14245_v34, %v10686_v35  ;;  %v2089_v54 = vmul.f32 %v14246_v60, %v10635_v50  ;;  %v2094_v13 = vmul.f32 %v14247_v41, %v10679_v3  ;;  %v4327_v5 = vmul.f32 %v14248_v21, %v10711_v19  ;;  %v14260_v41 = vld [vmem:[#allocation317_spill] sm:$0xff] }
 0x59e   :  { %6056 = vst [vmem:[%s13032_s2 + $0x268] sm:$0x1f] %v5864_v37  ;;  %v5859_v59 = vadd.f32 %v5667_v49, %v10690_v7  ;;  %v5674_v25 = vadd.f32 %v5482_v27, %v4522_v9  ;;  %v5477_v2 = vmul.f32 %v4933_v15, %v10720_v63  ;;  %5188 = vperm.xlu1 %6198, %v6438_v40   ;;  %v14257_v9 = vld [vmem:[#allocation549_spill] sm:$0xff]  ;;  %v14258_v15 = vld [vmem:[#allocation327_spill] sm:$0xff] }
 0x59f   :  { %v4524_v61 = vadd.f32 %v4332_v26, %v3244_v4  ;;  %v4961_v52 = vpop.permute.xlu0 %4960  ;;  %v4334_v14 = vmul.f32 %v14249_v44, %v10698_v51  ;;  %v3241_v45 = vadd.f32 %v3049_v20, %v2089_v54  ;;  %v3051_v47 = vmul.f32 %v14251_v28, %v10686_v35  ;;  %v14256_v26 = vld [vmem:[#allocation318_spill] sm:$0xff] }
 0x5a0   :  { %6051 = vst [vmem:[%s13032_s2 + $0x240] sm:$0xff] %v5859_v59  ;;  %v5866_v57 = vadd.f32 %v5674_v25, %v10760_v10  ;;  %v5669_v43 = vadd.f32 %v5477_v2, %v4517_v38  ;;  %v5484_v48 = vmul.f32 %v4961_v52, %v10672_v55  ;;  %5216 = vperm.xlu0 %6197, %v14250_v53   ;;  %v6439_v20 = vld [vmem:[%s13030_s0 + $0x4a2] sm:$0xff]  ;;  %v14259_v25 = vld [vmem:[#allocation545_spill] sm:$0xff]  ;;  %v14263_v52 = vld [vmem:[#allocation320_spill] sm:$0xff] }
 0x5a1   :  { %v3056_v32 = vmul.f32 %v14252_v22, %v10675_v56  ;;  %v4941_v17 = vpop.permute.xlu1 %4940  ;;  %v4519_v8 = vadd.f32 %v4327_v5, %v3239_v11  ;;  %v3246_v0 = vadd.f32 %v3054_v16, %v2094_v13  ;;  %v2091_v23 = vmul.f32 %v14254_v31, %v10679_v3  ;;  %v14261_v13 = vld [vmem:[#allocation85_spill] sm:$0xff]  ;;  %v14262_v5 = vld [vmem:[#allocation88_spill] sm:$0xff] }
 0x5a2   :  { %6058 = vst [vmem:[%s13032_s2 + $0x278] sm:$0xff] %v5866_v57  ;;  %v5861_v1 = vadd.f32 %v5669_v43, %v10745_v42  ;;  %v5676_v33 = vadd.f32 %v5484_v48, %v4524_v61  ;;  %v5479_v62 = vmul.f32 %v4941_v17, %v10731_v58  ;;  %5196 = vperm.xlu1 %6198, %v14253_v12   ;;  %v14264_v43 = vld [vmem:[#allocation552_spill] sm:$0xff] }
 0x5a3   :  { %v2096_v46 = vmul.f32 %v14255_v29, %v10681_v18  ;;  %v4329_v24 = vmul.f32 %v14256_v26, %v10646_v6  ;;  %v4336_v37 = vmul.f32 %v14257_v9, %v10711_v19  ;;  %v4969_v49 = vpop.permute.xlu0 %4968  ;;  %v4526_v27 = vadd.f32 %v4334_v14, %v3246_v0  ;;  %v6440_v29 = vld [vmem:[%s13030_s0 + $0x48a] sm:$0xff] }
 0x5a4   :  { %6053 = vst [vmem:[%s13032_s2 + $0x250] sm:$0x1f] %v5861_v1  ;;  %v5868_v36 = vadd.f32 %v5676_v33, %v10690_v7  ;;  %v5671_v11 = vadd.f32 %v5479_v62, %v4519_v8  ;;  %v5486_v30 = vmul.f32 %v4969_v49, %v10720_v63  ;;  %5224 = vperm.xlu0 %6197, %v6439_v20   ;;  %v14267_v8 = vld [vmem:[#allocation548_spill] sm:$0xff] }
 0x5a5   :  { %v3243_v4 = vadd.f32 %v3051_v47, %v2091_v23  ;;  %v3053_v38 = vmul.f32 %v14258_v15, %v10675_v56  ;;  %v3248_v34 = vadd.f32 %v3056_v32, %v2096_v46  ;;  %v4949_v16 = vpop.permute.xlu1 %4948  ;;  %v4521_v59 = vadd.f32 %v4329_v24, %v3241_v45  ;;  %v14265_v47 = vld [vmem:[#allocation547_spill] sm:$0xff]  ;;  %v14266_v32 = vld [vmem:[#allocation329_spill] sm:$0xff]  ;;  %v14269_v24 = vld [vmem:[#allocation90_spill] sm:$0xff] }
 0x5a6   :  { %v3058_v2 = vmul.f32 %v14259_v25, %v10631_v39  ;;  %6060 = vst [vmem:[%s13032_s2 + $0x288] sm:$0xff] %v5868_v36  ;;  %v5863_v40 = vadd.f32 %v5671_v11, %v10760_v10  ;;  %v5678_v60 = vadd.f32 %v5486_v30, %v4526_v27  ;;  %v5481_v54 = vmul.f32 %v4949_v16, %v10672_v55  ;;  %v14268_v46 = vld [vmem:[#allocation87_spill] sm:$0xff]  ;;  %v14271_v27 = vld [vmem:[#allocation554_spill] sm:$0xff]  ;;  %v14273_v16 = vld [vmem:[#allocation332_spill] sm:$0xff] }
 0x5a7   :  { %5204 = vperm.xlu1 %6198, %v14260_v41   ;;  %v2093_v21 = vmul.f32 %v14261_v13, %v10681_v18  ;;  %v2098_v61 = vmul.f32 %v14262_v5, %v10635_v50  ;;  %v4331_v44 = vmul.f32 %v14263_v52, %v10698_v51  ;;  %v4528_v14 = vadd.f32 %v4336_v37, %v3248_v34  ;;  %v4977_v57 = vpop.permute.xlu0 %4976  ;;  %v14270_v37 = vld [vmem:[#allocation323_spill] sm:$0xff]  ;;  %v14275_v5 = vld [vmem:[#allocation322_spill] sm:$0xff] }
 0x5a8   :  { %v4338_v48 = vmul.f32 %v14264_v43, %v10646_v6  ;;  %6055 = vst [vmem:[%s13032_s2 + $0x260] sm:$0xff] %v5863_v40  ;;  %v5870_v53 = vadd.f32 %v5678_v60, %v10745_v42  ;;  %v5673_v45 = vadd.f32 %v5481_v54, %v4521_v59  ;;  %v5488_v28 = vmul.f32 %v4977_v57, %v10731_v58  ;;  %v14274_v60 = vld [vmem:[#allocation551_spill] sm:$0xff]  ;;  %v14278_v57 = vld [vmem:[#allocation326_spill] sm:$0xff] }
 0x5a9   :  { %5232 = vperm.xlu0 %6197, %v14265_v47   ;;  %v3245_v22 = vadd.f32 %v3053_v38, %v2093_v21  ;;  %v3055_v17 = vmul.f32 %v14266_v32, %v10631_v39  ;;  %v3060_v0 = vmul.f32 %v14267_v8, %v10686_v35  ;;  %v4957_v1 = vpop.permute.xlu1 %4956  ;;  %v4523_v33 = vadd.f32 %v4331_v44, %v3243_v4  ;;  %v14272_v38 = vld [vmem:[#allocation550_spill] sm:$0xff]  ;;  %v14277_v44 = vld [vmem:[#allocation92_spill] sm:$0xff] }
 0x5aa   :  { %v3250_v62 = vadd.f32 %v3058_v2, %v2098_v61  ;;  %6062 = vst [vmem:[%s13032_s2 + $0x298] sm:$0x1f] %v5870_v53  ;;  %v5865_v12 = vadd.f32 %v5673_v45, %v10690_v7  ;;  %v5680_v31 = vadd.f32 %v5488_v28, %v4528_v14  ;;  %v5483_v23 = vmul.f32 %v4957_v1, %v10720_v63  ;;  %v14276_v61 = vld [vmem:[#allocation89_spill] sm:$0xff] }
 0x5ab   :  { %5212 = vperm.xlu1 %6198, %v6440_v29   ;;  %v2095_v26 = vmul.f32 %v14268_v46, %v10635_v50  ;;  %v2100_v9 = vmul.f32 %v14269_v24, %v10679_v3  ;;  %v4333_v49 = vmul.f32 %v14270_v37, %v10711_v19  ;;  %v4340_v36 = vmul.f32 %v14271_v27, %v10698_v51  ;;  %v4985_v11 = vpop.permute.xlu0 %4984  ;;  %v14279_v45 = vld [vmem:[#allocation557_spill] sm:$0xff] }
 0x5ac   :  { %v4530_v30 = vadd.f32 %v4338_v48, %v3250_v62  ;;  %6057 = vst [vmem:[%s13032_s2 + $0x270] sm:$0xff] %v5865_v12  ;;  %v5872_v20 = vadd.f32 %v5680_v31, %v10760_v10  ;;  %v5675_v4 = vadd.f32 %v5483_v23, %v4523_v33  ;;  %v5490_v15 = vmul.f32 %v4985_v11, %v10672_v55  ;;  %v14281_v33 = vld [vmem:[#allocation553_spill] sm:$0xff] }
 0x5ad   :  { %5240 = vperm.xlu0 %6197, %v14272_v38   ;;  %v3247_v34 = vadd.f32 %v3055_v17, %v2095_v26  ;;  %v3057_v59 = vmul.f32 %v14273_v16, %v10686_v35  ;;  %v3252_v25 = vadd.f32 %v3060_v0, %v2100_v9  ;;  %v4965_v2 = vpop.permute.xlu1 %4964  ;;  %v4525_v40 = vadd.f32 %v4333_v49, %v3245_v22  ;;  %v6441_v17 = vld [vmem:[%s13030_s0 + $0x4d2] sm:$0xff]  ;;  %v14280_v0 = vld [vmem:[#allocation335_spill] sm:$0xff]  ;;  %v14284_v49 = vld [vmem:[#allocation94_spill] sm:$0xff] }
 0x5ae   :  { %v3062_v54 = vmul.f32 %v14274_v60, %v10675_v56  ;;  %6064 = vst [vmem:[%s13032_s2 + $0x2a8] sm:$0xff] %v5872_v20  ;;  %v5867_v41 = vadd.f32 %v5675_v4, %v10745_v42  ;;  %v5682_v13 = vadd.f32 %v5490_v15, %v4530_v30  ;;  %v5485_v21 = vmul.f32 %v4965_v2, %v10731_v58  ;;  %v14282_v24 = vld [vmem:[#allocation325_spill] sm:$0xff]  ;;  %v14283_v9 = vld [vmem:[#allocation91_spill] sm:$0xff]  ;;  %v14286_v30 = vld [vmem:[#allocation560_spill] sm:$0xff] }
 0x5af   :  { %5220 = vperm.xlu1 %6198, %v14275_v5   ;;  %v2097_v52 = vmul.f32 %v14276_v61, %v10679_v3  ;;  %v2102_v14 = vmul.f32 %v14277_v44, %v10681_v18  ;;  %v4335_v43 = vmul.f32 %v14278_v57, %v10646_v6  ;;  %v4532_v48 = vadd.f32 %v4340_v36, %v3252_v25  ;;  %v4993_v53 = vpop.permute.xlu0 %4992  ;;  %v14285_v36 = vld [vmem:[#allocation328_spill] sm:$0xff]  ;;  %v14288_v2 = vld [vmem:[#allocation338_spill] sm:$0xff] }
 0x5b0   :  { %v4342_v28 = vmul.f32 %v14279_v45, %v10711_v19  ;;  %6059 = vst [vmem:[%s13032_s2 + $0x280] sm:$0x1f] %v5867_v41  ;;  %v5874_v47 = vadd.f32 %v5682_v13, %v10690_v7  ;;  %v5677_v22 = vadd.f32 %v5485_v21, %v4525_v40  ;;  %v5492_v32 = vmul.f32 %v4993_v53, %v10720_v63  ;;  %v14289_v13 = vld [vmem:[#allocation556_spill] sm:$0xff]  ;;  %v6442_v44 = vld [vmem:[%s13030_s0 + $0x4ba] sm:$0xff]  ;;  %v14292_v53 = vld [vmem:[#allocation331_spill] sm:$0xff] }
 0x5b1   :  { %5248 = vperm.xlu0 %6197, %v6441_v17   ;;  %v3249_v8 = vadd.f32 %v3057_v59, %v2097_v52  ;;  %v3059_v1 = vmul.f32 %v14280_v0, %v10675_v56  ;;  %v3064_v62 = vmul.f32 %v14281_v33, %v10631_v39  ;;  %v4973_v12 = vpop.permute.xlu1 %4972  ;;  %v4527_v31 = vadd.f32 %v4335_v43, %v3247_v34  ;;  %v14287_v59 = vld [vmem:[#allocation555_spill] sm:$0xff]  ;;  %v14291_v43 = vld [vmem:[#allocation96_spill] sm:$0xff] }
 0x5b2   :  { %v3254_v23 = vadd.f32 %v3062_v54, %v2102_v14  ;;  %6066 = vst [vmem:[%s13032_s2 + $0x2b8] sm:$0xff] %v5874_v47  ;;  %v5869_v29 = vadd.f32 %v5677_v22, %v10760_v10  ;;  %v5684_v46 = vadd.f32 %v5492_v32, %v4532_v48  ;;  %v5487_v26 = vmul.f32 %v4973_v12, %v10672_v55  ;;  %v14290_v14 = vld [vmem:[#allocation93_spill] sm:$0xff]  ;;  %v14293_v22 = vld [vmem:[#allocation562_spill] sm:$0xff] }
 0x5b3   :  { %5228 = vperm.xlu1 %6198, %v14282_v24   ;;  %v2099_v37 = vmul.f32 %v14283_v9, %v10681_v18  ;;  %v2104_v27 = vmul.f32 %v14284_v49, %v10635_v50  ;;  %v4337_v11 = vmul.f32 %v14285_v36, %v10698_v51  ;;  %v4344_v20 = vmul.f32 %v14286_v30, %v10646_v6  ;;  %v5001_v4 = vpop.permute.xlu0 %5000  ;;  %v14297_v49 = vld [vmem:[#allocation330_spill] sm:$0xff] }
 0x5b4   :  { %v4534_v15 = vadd.f32 %v4342_v28, %v3254_v23  ;;  %6061 = vst [vmem:[%s13032_s2 + $0x290] sm:$0xff] %v5869_v29  ;;  %v5876_v38 = vadd.f32 %v5684_v46, %v10745_v42  ;;  %v5679_v34 = vadd.f32 %v5487_v26, %v4527_v31  ;;  %v5494_v16 = vmul.f32 %v5001_v4, %v10731_v58  ;;  %v14296_v31 = vld [vmem:[#allocation559_spill] sm:$0xff] }
 0x5b5   :  { %5256 = vperm.xlu0 %6197, %v14287_v59   ;;  %v3251_v25 = vadd.f32 %v3059_v1, %v2099_v37  ;;  %v3061_v40 = vmul.f32 %v14288_v2, %v10631_v39  ;;  %v3256_v60 = vadd.f32 %v3064_v62, %v2104_v27  ;;  %v4981_v54 = vpop.permute.xlu1 %4980  ;;  %v4529_v41 = vadd.f32 %v4337_v11, %v3249_v8  ;;  %v14294_v1 = vld [vmem:[#allocation558_spill] sm:$0xff]  ;;  %v14295_v62 = vld [vmem:[#allocation341_spill] sm:$0xff]  ;;  %v14298_v27 = vld [vmem:[#allocation95_spill] sm:$0xff] }
 0x5b6   :  { %v3066_v21 = vmul.f32 %v14289_v13, %v10686_v35  ;;  %6068 = vst [vmem:[%s13032_s2 + $0x2c8] sm:$0x1f] %v5876_v38  ;;  %v5871_v5 = vadd.f32 %v5679_v34, %v10690_v7  ;;  %v5686_v61 = vadd.f32 %v5494_v16, %v4534_v15  ;;  %v5489_v52 = vmul.f32 %v4981_v54, %v10720_v63  ;;  %v14299_v11 = vld [vmem:[#allocation98_spill] sm:$0xff]  ;;  %v14301_v15 = vld [vmem:[#allocation564_spill] sm:$0xff]  ;;  %v14302_v54 = vld [vmem:[#allocation345_spill] sm:$0xff] }
 0x5b7   :  { %5236 = vperm.xlu1 %6198, %v6442_v44   ;;  %v2101_v57 = vmul.f32 %v14290_v14, %v10635_v50  ;;  %v2106_v48 = vmul.f32 %v14291_v43, %v10679_v3  ;;  %v4339_v45 = vmul.f32 %v14292_v53, %v10711_v19  ;;  %v4536_v28 = vadd.f32 %v4344_v20, %v3256_v60  ;;  %v5009_v47 = vpop.permute.xlu0 %5008  ;;  %v14300_v20 = vld [vmem:[#allocation334_spill] sm:$0xff]  ;;  %v14304_v43 = vld [vmem:[#allocation333_spill] sm:$0xff] }
 0x5b8   :  { %v4346_v32 = vmul.f32 %v14293_v22, %v10698_v51  ;;  %6063 = vst [vmem:[%s13032_s2 + $0x2a0] sm:$0xff] %v5871_v5  ;;  %v5878_v17 = vadd.f32 %v5686_v61, %v10760_v10  ;;  %v5681_v8 = vadd.f32 %v5489_v52, %v4529_v41  ;;  %v5496_v0 = vmul.f32 %v5009_v47, %v10672_v55  ;;  %v14303_v61 = vld [vmem:[#allocation561_spill] sm:$0xff] }
 0x5b9   :  { %5264 = vperm.xlu0 %6197, %v14294_v1   ;;  %v3253_v33 = vadd.f32 %v3061_v40, %v2101_v57  ;;  %v3063_v12 = vmul.f32 %v14295_v62, %v10686_v35  ;;  %v3068_v23 = vmul.f32 %v14296_v31, %v10675_v56  ;;  %v4989_v29 = vpop.permute.xlu1 %4988  ;;  %v4531_v46 = vadd.f32 %v4339_v45, %v3251_v25  ;;  %v6443_v40 = vld [vmem:[%s13030_s0 + $0x502] sm:$0xff]  ;;  %v14306_v45 = vld [vmem:[#allocation100_spill] sm:$0xff]  ;;  %v14307_v47 = vld [vmem:[#allocation337_spill] sm:$0xff] }
 0x5ba   :  { %v3258_v26 = vadd.f32 %v3066_v21, %v2106_v48  ;;  %6070 = vst [vmem:[%s13032_s2 + $0x2d8] sm:$0xff] %v5878_v17  ;;  %v5873_v24 = vadd.f32 %v5681_v8, %v10745_v42  ;;  %v5688_v9 = vadd.f32 %v5496_v0, %v4536_v28  ;;  %v5491_v37 = vmul.f32 %v4989_v29, %v10731_v58  ;;  %v14305_v48 = vld [vmem:[#allocation97_spill] sm:$0xff]  ;;  %v14308_v8 = vld [vmem:[#allocation566_spill] sm:$0xff] }
 0x5bb   :  { %5244 = vperm.xlu1 %6198, %v14297_v49   ;;  %v2103_v36 = vmul.f32 %v14298_v27, %v10679_v3  ;;  %v2108_v30 = vmul.f32 %v14299_v11, %v10681_v18  ;;  %v4341_v4 = vmul.f32 %v14300_v20, %v10646_v6  ;;  %v4348_v38 = vmul.f32 %v14301_v15, %v10711_v19  ;;  %v5017_v34 = vpop.permute.xlu0 %5016  ;;  %v6444_v11 = vld [vmem:[%s13030_s0 + $0x4ea] sm:$0xff] }
 0x5bc   :  { %v4538_v16 = vadd.f32 %v4346_v32, %v3258_v26  ;;  %6065 = vst [vmem:[%s13032_s2 + $0x2b0] sm:$0x1f] %v5873_v24  ;;  %v5880_v59 = vadd.f32 %v5688_v9, %v10690_v7  ;;  %v5683_v25 = vadd.f32 %v5491_v37, %v4531_v46  ;;  %v5498_v2 = vmul.f32 %v5017_v34, %v10720_v63  ;;  %v14311_v46 = vld [vmem:[#allocation563_spill] sm:$0xff] }
 0x5bd   :  { %5272 = vperm.xlu0 %6197, %v6443_v40   ;;  %v3255_v60 = vadd.f32 %v3063_v12, %v2103_v36  ;;  %v3065_v41 = vmul.f32 %v14302_v54, %v10675_v56  ;;  %v3260_v13 = vadd.f32 %v3068_v23, %v2108_v30  ;;  %v4997_v21 = vpop.permute.xlu1 %4996  ;;  %v4533_v5 = vadd.f32 %v4341_v4, %v3253_v33  ;;  %v14309_v12 = vld [vmem:[#allocation336_spill] sm:$0xff]  ;;  %v14312_v30 = vld [vmem:[#allocation99_spill] sm:$0xff]  ;;  %v14313_v4 = vld [vmem:[#allocation102_spill] sm:$0xff] }
 0x5be   :  { %v3070_v52 = vmul.f32 %v14303_v61, %v10631_v39  ;;  %6072 = vst [vmem:[%s13032_s2 + $0x2e8] sm:$0xff] %v5880_v59  ;;  %v5875_v44 = vadd.f32 %v5683_v25, %v10760_v10  ;;  %v5690_v14 = vadd.f32 %v5498_v2, %v4538_v16  ;;  %v5493_v57 = vmul.f32 %v4997_v21, %v10672_v55  ;;  %v14310_v23 = vld [vmem:[#allocation348_spill] sm:$0xff]  ;;  %v14317_v21 = vld [vmem:[#allocation351_spill] sm:$0xff] }
 0x5bf   :  { %5252 = vperm.xlu1 %6198, %v14304_v43   ;;  %v2105_v53 = vmul.f32 %v14305_v48, %v10681_v18  ;;  %v2110_v28 = vmul.f32 %v14306_v45, %v10635_v50  ;;  %v4343_v22 = vmul.f32 %v14307_v47, %v10698_v51  ;;  %v4540_v32 = vadd.f32 %v4348_v38, %v3260_v13  ;;  %v5025_v17 = vpop.permute.xlu0 %5024  ;;  %v14314_v38 = vld [vmem:[#allocation340_spill] sm:$0xff]  ;;  %v14319_v45 = vld [vmem:[#allocation339_spill] sm:$0xff] }
 0x5c0   :  { %v4350_v0 = vmul.f32 %v14308_v8, %v10646_v6  ;;  %6067 = vst [vmem:[%s13032_s2 + $0x2c0] sm:$0xff] %v5875_v44  ;;  %v5882_v1 = vadd.f32 %v5690_v14, %v10745_v42  ;;  %v5685_v33 = vadd.f32 %v5493_v57, %v4533_v5  ;;  %v5500_v62 = vmul.f32 %v5025_v17, %v10731_v58  ;;  %v14315_v16 = vld [vmem:[#allocation568_spill] sm:$0xff]  ;;  %v14318_v14 = vld [vmem:[#allocation565_spill] sm:$0xff] }
 0x5c1   :  { %5280 = vperm.xlu0 %6197, %v14309_v12   ;;  %v3257_v31 = vadd.f32 %v3065_v41, %v2105_v53  ;;  %v3067_v29 = vmul.f32 %v14310_v23, %v10631_v39  ;;  %v3072_v26 = vmul.f32 %v14311_v46, %v10686_v35  ;;  %v5005_v24 = vpop.permute.xlu1 %5004  ;;  %v4535_v9 = vadd.f32 %v4343_v22, %v3255_v60  ;;  %v14316_v41 = vld [vmem:[#allocation343_spill] sm:$0xff]  ;;  %v14321_v22 = vld [vmem:[#allocation104_spill] sm:$0xff] }
 0x5c2   :  { %v3262_v37 = vadd.f32 %v3070_v52, %v2110_v28  ;;  %6074 = vst [vmem:[%s13032_s2 + $0x2f8] sm:$0x1f] %v5882_v1  ;;  %v5877_v49 = vadd.f32 %v5685_v33, %v10690_v7  ;;  %v5692_v27 = vadd.f32 %v5500_v62, %v4540_v32  ;;  %v5495_v36 = vmul.f32 %v5005_v24, %v10720_v63  ;;  %v14320_v28 = vld [vmem:[#allocation101_spill] sm:$0xff]  ;;  %v14322_v17 = vld [vmem:[#allocation344_spill] sm:$0xff]  ;;  %v14323_v33 = vld [vmem:[#allocation570_spill] sm:$0xff] }
 0x5c3   :  { %5260 = vperm.xlu1 %6198, %v6444_v11   ;;  %v2107_v20 = vmul.f32 %v14312_v30, %v10635_v50  ;;  %v2112_v15 = vmul.f32 %v14313_v4, %v10679_v3  ;;  %v4345_v34 = vmul.f32 %v14314_v38, %v10711_v19  ;;  %v4352_v59 = vmul.f32 %v14315_v16, %v10698_v51  ;;  %v5033_v25 = vpop.permute.xlu0 %5032  ;;  %v14326_v4 = vld [vmem:[#allocation342_spill] sm:$0xff] }
 0x5c4   :  { %v4542_v2 = vadd.f32 %v4350_v0, %v3262_v37  ;;  %6069 = vst [vmem:[%s13032_s2 + $0x2d0] sm:$0xff] %v5877_v49  ;;  %v5884_v40 = vadd.f32 %v5692_v27, %v10760_v10  ;;  %v5687_v60 = vadd.f32 %v5495_v36, %v4535_v9  ;;  %v5502_v54 = vmul.f32 %v5033_v25, %v10672_v55  ;;  %v14325_v9 = vld [vmem:[#allocation567_spill] sm:$0xff] }
 0x5c5   :  { %5288 = vperm.xlu0 %6197, %v14316_v41   ;;  %v3259_v13 = vadd.f32 %v3067_v29, %v2107_v20  ;;  %v3069_v5 = vmul.f32 %v14317_v21, %v10686_v35  ;;  %v3264_v61 = vadd.f32 %v3072_v26, %v2112_v15  ;;  %v5013_v52 = vpop.permute.xlu1 %5012  ;;  %v4537_v44 = vadd.f32 %v4345_v34, %v3257_v31  ;;  %v6445_v29 = vld [vmem:[%s13030_s0 + $0x532] sm:$0xff]  ;;  %v14324_v26 = vld [vmem:[#allocation355_spill] sm:$0xff]  ;;  %v14328_v34 = vld [vmem:[#allocation106_spill] sm:$0xff] }
 0x5c6   :  { %v3074_v57 = vmul.f32 %v14318_v14, %v10675_v56  ;;  %6076 = vst [vmem:[%s13032_s2 + $0x308] sm:$0xff] %v5884_v40  ;;  %v5879_v43 = vadd.f32 %v5687_v60, %v10745_v42  ;;  %v5694_v48 = vadd.f32 %v5502_v54, %v4542_v2  ;;  %v5497_v53 = vmul.f32 %v5013_v52, %v10731_v58  ;;  %v14327_v15 = vld [vmem:[#allocation103_spill] sm:$0xff]  ;;  %v14330_v2 = vld [vmem:[#allocation572_spill] sm:$0xff]  ;;  %v14332_v52 = vld [vmem:[#allocation358_spill] sm:$0xff] }
 0x5c7   :  { %5268 = vperm.xlu1 %6198, %v14319_v45   ;;  %v2109_v47 = vmul.f32 %v14320_v28, %v10679_v3  ;;  %v2114_v32 = vmul.f32 %v14321_v22, %v10681_v18  ;;  %v4347_v8 = vmul.f32 %v14322_v17, %v10646_v6  ;;  %v4544_v0 = vadd.f32 %v4352_v59, %v3264_v61  ;;  %v5041_v1 = vpop.permute.xlu0 %5040  ;;  %v14329_v59 = vld [vmem:[#allocation347_spill] sm:$0xff]  ;;  %v6446_v22 = vld [vmem:[%s13030_s0 + $0x51a] sm:$0xff] }
 0x5c8   :  { %v4354_v62 = vmul.f32 %v14323_v33, %v10711_v19  ;;  %6071 = vst [vmem:[%s13032_s2 + $0x2e0] sm:$0x1f] %v5879_v43  ;;  %v5886_v12 = vadd.f32 %v5694_v48, %v10690_v7  ;;  %v5689_v31 = vadd.f32 %v5497_v53, %v4537_v44  ;;  %v5504_v23 = vmul.f32 %v5041_v1, %v10720_v63  ;;  %v14333_v48 = vld [vmem:[#allocation569_spill] sm:$0xff]  ;;  %v14336_v1 = vld [vmem:[#allocation350_spill] sm:$0xff] }
 0x5c9   :  { %5296 = vperm.xlu0 %6197, %v6445_v29   ;;  %v3261_v46 = vadd.f32 %v3069_v5, %v2109_v47  ;;  %v3071_v24 = vmul.f32 %v14324_v26, %v10675_v56  ;;  %v3076_v37 = vmul.f32 %v14325_v9, %v10631_v39  ;;  %v5021_v49 = vpop.permute.xlu1 %5020  ;;  %v4539_v27 = vadd.f32 %v4347_v8, %v3259_v13  ;;  %v14331_v5 = vld [vmem:[#allocation346_spill] sm:$0xff]  ;;  %v14335_v8 = vld [vmem:[#allocation108_spill] sm:$0xff] }
 0x5ca   :  { %v3266_v36 = vadd.f32 %v3074_v57, %v2114_v32  ;;  %6078 = vst [vmem:[%s13032_s2 + $0x318] sm:$0xff] %v5886_v12  ;;  %v5881_v11 = vadd.f32 %v5689_v31, %v10760_v10  ;;  %v5696_v30 = vadd.f32 %v5504_v23, %v4544_v0  ;;  %v5499_v20 = vmul.f32 %v5021_v49, %v10672_v55  ;;  %v14334_v32 = vld [vmem:[#allocation105_spill] sm:$0xff]  ;;  %v14337_v31 = vld [vmem:[#allocation574_spill] sm:$0xff] }
 0x5cb   :  { %5276 = vperm.xlu1 %6198, %v14326_v4   ;;  %v2111_v38 = vmul.f32 %v14327_v15, %v10681_v18  ;;  %v2116_v16 = vmul.f32 %v14328_v34, %v10635_v50  ;;  %v4349_v25 = vmul.f32 %v14329_v59, %v10698_v51  ;;  %v4356_v40 = vmul.f32 %v14330_v2, %v10646_v6  ;;  %v5049_v60 = vpop.permute.xlu0 %5048  ;;  %v14341_v34 = vld [vmem:[#allocation349_spill] sm:$0xff] }
 0x5cc   :  { %v4546_v54 = vadd.f32 %v4354_v62, %v3266_v36  ;;  %6073 = vst [vmem:[%s13032_s2 + $0x2f0] sm:$0xff] %v5881_v11  ;;  %v5888_v41 = vadd.f32 %v5696_v30, %v10745_v42  ;;  %v5691_v13 = vadd.f32 %v5499_v20, %v4539_v27  ;;  %v5506_v21 = vmul.f32 %v5049_v60, %v10731_v58  ;;  %v14340_v27 = vld [vmem:[#allocation571_spill] sm:$0xff] }
 0x5cd   :  { %5304 = vperm.xlu0 %6197, %v14331_v5   ;;  %v3263_v61 = vadd.f32 %v3071_v24, %v2111_v38  ;;  %v3073_v44 = vmul.f32 %v14332_v52, %v10631_v39  ;;  %v3268_v14 = vadd.f32 %v3076_v37, %v2116_v16  ;;  %v5029_v57 = vpop.permute.xlu1 %5028  ;;  %v4541_v43 = vadd.f32 %v4349_v25, %v3261_v46  ;;  %v14338_v24 = vld [vmem:[#allocation353_spill] sm:$0xff]  ;;  %v14342_v16 = vld [vmem:[#allocation107_spill] sm:$0xff]  ;;  %v14343_v25 = vld [vmem:[#allocation110_spill] sm:$0xff] }
 0x5ce   :  { %v3078_v53 = vmul.f32 %v14333_v48, %v10686_v35  ;;  %6080 = vst [vmem:[%s13032_s2 + $0x328] sm:$0x1f] %v5888_v41  ;;  %v5883_v45 = vadd.f32 %v5691_v13, %v10690_v7  ;;  %v5698_v28 = vadd.f32 %v5506_v21, %v4546_v54  ;;  %v5501_v47 = vmul.f32 %v5029_v57, %v10720_v63  ;;  %v14339_v37 = vld [vmem:[#allocation361_spill] sm:$0xff]  ;;  %v14345_v54 = vld [vmem:[#allocation576_spill] sm:$0xff] }
 0x5cf   :  { %5284 = vperm.xlu1 %6198, %v6446_v22   ;;  %v2113_v17 = vmul.f32 %v14334_v32, %v10635_v50  ;;  %v2118_v0 = vmul.f32 %v14335_v8, %v10679_v3  ;;  %v4351_v33 = vmul.f32 %v14336_v1, %v10711_v19  ;;  %v4548_v62 = vadd.f32 %v4356_v40, %v3268_v14  ;;  %v5057_v12 = vpop.permute.xlu0 %5056  ;;  %v14344_v40 = vld [vmem:[#allocation354_spill] sm:$0xff]  ;;  %v14346_v57 = vld [vmem:[#allocation365_spill] sm:$0xff]  ;;  %v14348_v8 = vld [vmem:[#allocation352_spill] sm:$0xff] }
 0x5d0   :  { %v4358_v23 = vmul.f32 %v14337_v31, %v10698_v51  ;;  %6075 = vst [vmem:[%s13032_s2 + $0x300] sm:$0xff] %v5883_v45  ;;  %v5890_v29 = vadd.f32 %v5698_v28, %v10760_v10  ;;  %v5693_v46 = vadd.f32 %v5501_v47, %v4541_v43  ;;  %v5508_v26 = vmul.f32 %v5057_v12, %v10672_v55  ;;  %v14347_v28 = vld [vmem:[#allocation573_spill] sm:$0xff] }
 0x5d1   :  { %5312 = vperm.xlu0 %6197, %v14338_v24   ;;  %v3265_v9 = vadd.f32 %v3073_v44, %v2113_v17  ;;  %v3075_v49 = vmul.f32 %v14339_v37, %v10686_v35  ;;  %v3080_v36 = vmul.f32 %v14340_v27, %v10675_v56  ;;  %v5037_v11 = vpop.permute.xlu1 %5036  ;;  %v4543_v30 = vadd.f32 %v4351_v33, %v3263_v61  ;;  %v6447_v44 = vld [vmem:[%s13030_s0 + $0x562] sm:$0xff]  ;;  %v14350_v33 = vld [vmem:[#allocation112_spill] sm:$0xff]  ;;  %v14351_v12 = vld [vmem:[#allocation357_spill] sm:$0xff] }
 0x5d2   :  { %v3270_v20 = vadd.f32 %v3078_v53, %v2118_v0  ;;  %6082 = vst [vmem:[%s13032_s2 + $0x338] sm:$0xff] %v5890_v29  ;;  %v5885_v4 = vadd.f32 %v5693_v46, %v10745_v42  ;;  %v5700_v15 = vadd.f32 %v5508_v26, %v4548_v62  ;;  %v5503_v38 = vmul.f32 %v5037_v11, %v10731_v58  ;;  %v14349_v0 = vld [vmem:[#allocation109_spill] sm:$0xff]  ;;  %v14352_v46 = vld [vmem:[#allocation578_spill] sm:$0xff] }
 0x5d3   :  { %5292 = vperm.xlu1 %6198, %v14341_v34   ;;  %v2115_v59 = vmul.f32 %v14342_v16, %v10679_v3  ;;  %v2120_v2 = vmul.f32 %v14343_v25, %v10681_v18  ;;  %v4353_v60 = vmul.f32 %v14344_v40, %v10646_v6  ;;  %v4360_v41 = vmul.f32 %v14345_v54, %v10711_v19  ;;  %v5065_v13 = vpop.permute.xlu0 %5064  ;;  %v6448_v25 = vld [vmem:[%s13030_s0 + $0x54a] sm:$0xff] }
 0x5d4   :  { %v4550_v21 = vadd.f32 %v4358_v23, %v3270_v20  ;;  %6077 = vst [vmem:[%s13032_s2 + $0x310] sm:$0x1f] %v5885_v4  ;;  %v5892_v5 = vadd.f32 %v5700_v15, %v10690_v7  ;;  %v5695_v61 = vadd.f32 %v5503_v38, %v4543_v30  ;;  %v5510_v52 = vmul.f32 %v5065_v13, %v10720_v63  ;;  %v14355_v30 = vld [vmem:[#allocation575_spill] sm:$0xff] }
 0x5d5   :  { %5320 = vperm.xlu0 %6197, %v6447_v44   ;;  %v3267_v14 = vadd.f32 %v3075_v49, %v2115_v59  ;;  %v3077_v43 = vmul.f32 %v14346_v57, %v10675_v56  ;;  %v3272_v48 = vadd.f32 %v3080_v36, %v2120_v2  ;;  %v5045_v53 = vpop.permute.xlu1 %5044  ;;  %v4545_v45 = vadd.f32 %v4353_v60, %v3265_v9  ;;  %v14353_v49 = vld [vmem:[#allocation356_spill] sm:$0xff]  ;;  %v14356_v2 = vld [vmem:[#allocation111_spill] sm:$0xff]  ;;  %v14357_v60 = vld [vmem:[#allocation114_spill] sm:$0xff] }
 0x5d6   :  { %v3082_v47 = vmul.f32 %v14347_v28, %v10631_v39  ;;  %6084 = vst [vmem:[%s13032_s2 + $0x348] sm:$0xff] %v5892_v5  ;;  %v5887_v22 = vadd.f32 %v5695_v61, %v10760_v10  ;;  %v5702_v32 = vadd.f32 %v5510_v52, %v4550_v21  ;;  %v5505_v17 = vmul.f32 %v5045_v53, %v10672_v55  ;;  %v14354_v36 = vld [vmem:[#allocation368_spill] sm:$0xff]  ;;  %v14361_v53 = vld [vmem:[#allocation371_spill] sm:$0xff] }
 0x5d7   :  { %5300 = vperm.xlu1 %6198, %v14348_v8   ;;  %v2117_v1 = vmul.f32 %v14349_v0, %v10681_v18  ;;  %v2122_v62 = vmul.f32 %v14350_v33, %v10635_v50  ;;  %v4355_v31 = vmul.f32 %v14351_v12, %v10698_v51  ;;  %v4552_v23 = vadd.f32 %v4360_v41, %v3272_v48  ;;  %v5073_v29 = vpop.permute.xlu0 %5072  ;;  %v14358_v41 = vld [vmem:[#allocation360_spill] sm:$0xff]  ;;  %v14363_v33 = vld [vmem:[#allocation359_spill] sm:$0xff] }
 0x5d8   :  { %v4362_v26 = vmul.f32 %v14352_v46, %v10646_v6  ;;  %6079 = vst [vmem:[%s13032_s2 + $0x320] sm:$0xff] %v5887_v22  ;;  %v5894_v24 = vadd.f32 %v5702_v32, %v10745_v42  ;;  %v5697_v9 = vadd.f32 %v5505_v17, %v4545_v45  ;;  %v5512_v37 = vmul.f32 %v5073_v29, %v10731_v58  ;;  %v14359_v21 = vld [vmem:[#allocation580_spill] sm:$0xff]  ;;  %v14362_v32 = vld [vmem:[#allocation577_spill] sm:$0xff] }
 0x5d9   :  { %5328 = vperm.xlu0 %6197, %v14353_v49   ;;  %v3269_v27 = vadd.f32 %v3077_v43, %v2117_v1  ;;  %v3079_v11 = vmul.f32 %v14354_v36, %v10631_v39  ;;  %v3084_v20 = vmul.f32 %v14355_v30, %v10686_v35  ;;  %v5053_v4 = vpop.permute.xlu1 %5052  ;;  %v4547_v15 = vadd.f32 %v4355_v31, %v3267_v14  ;;  %v14360_v43 = vld [vmem:[#allocation363_spill] sm:$0xff]  ;;  %v14365_v31 = vld [vmem:[#allocation116_spill] sm:$0xff] }
 0x5da   :  { %v3274_v38 = vadd.f32 %v3082_v47, %v2122_v62  ;;  %6086 = vst [vmem:[%s13032_s2 + $0x358] sm:$0x1f] %v5894_v24  ;;  %v5889_v34 = vadd.f32 %v5697_v9, %v10690_v7  ;;  %v5704_v16 = vadd.f32 %v5512_v37, %v4552_v23  ;;  %v5507_v59 = vmul.f32 %v5053_v4, %v10720_v63  ;;  %v14364_v62 = vld [vmem:[#allocation113_spill] sm:$0xff]  ;;  %v14366_v29 = vld [vmem:[#allocation364_spill] sm:$0xff]  ;;  %v14367_v9 = vld [vmem:[#allocation582_spill] sm:$0xff] }
 0x5db   :  { %5308 = vperm.xlu1 %6198, %v6448_v25   ;;  %v2119_v40 = vmul.f32 %v14356_v2, %v10635_v50  ;;  %v2124_v54 = vmul.f32 %v14357_v60, %v10679_v3  ;;  %v4357_v13 = vmul.f32 %v14358_v41, %v10711_v19  ;;  %v4364_v5 = vmul.f32 %v14359_v21, %v10698_v51  ;;  %v5081_v61 = vpop.permute.xlu0 %5080  ;;  %v14370_v60 = vld [vmem:[#allocation362_spill] sm:$0xff] }
 0x5dc   :  { %v4554_v52 = vadd.f32 %v4362_v26, %v3274_v38  ;;  %6081 = vst [vmem:[%s13032_s2 + $0x330] sm:$0xff] %v5889_v34  ;;  %v5896_v44 = vadd.f32 %v5704_v16, %v10760_v10  ;;  %v5699_v14 = vadd.f32 %v5507_v59, %v4547_v15  ;;  %v5514_v57 = vmul.f32 %v5081_v61, %v10672_v55  ;;  %v14369_v15 = vld [vmem:[#allocation579_spill] sm:$0xff] }
 0x5dd   :  { %5336 = vperm.xlu0 %6197, %v14360_v43   ;;  %v3271_v48 = vadd.f32 %v3079_v11, %v2119_v40  ;;  %v3081_v45 = vmul.f32 %v14361_v53, %v10686_v35  ;;  %v3276_v28 = vadd.f32 %v3084_v20, %v2124_v54  ;;  %v5061_v47 = vpop.permute.xlu1 %5060  ;;  %v4549_v22 = vadd.f32 %v4357_v13, %v3269_v27  ;;  %v6449_v11 = vld [vmem:[%s13030_s0 + $0x592] sm:$0xff]  ;;  %v14368_v20 = vld [vmem:[#allocation375_spill] sm:$0xff]  ;;  %v14372_v13 = vld [vmem:[#allocation118_spill] sm:$0xff] }
 0x5de   :  { %v3086_v17 = vmul.f32 %v14362_v32, %v10675_v56  ;;  %6088 = vst [vmem:[%s13032_s2 + $0x368] sm:$0xff] %v5896_v44  ;;  %v5891_v8 = vadd.f32 %v5699_v14, %v10745_v42  ;;  %v5706_v0 = vadd.f32 %v5514_v57, %v4554_v52  ;;  %v5509_v1 = vmul.f32 %v5061_v47, %v10731_v58  ;;  %v14371_v54 = vld [vmem:[#allocation115_spill] sm:$0xff]  ;;  %v14374_v52 = vld [vmem:[#allocation584_spill] sm:$0xff]  ;;  %v14376_v47 = vld [vmem:[#allocation378_spill] sm:$0xff] }
 0x5df   :  { %5316 = vperm.xlu1 %6198, %v14363_v33   ;;  %v2121_v12 = vmul.f32 %v14364_v62, %v10679_v3  ;;  %v2126_v23 = vmul.f32 %v14365_v31, %v10681_v18  ;;  %v4359_v46 = vmul.f32 %v14366_v29, %v10646_v6  ;;  %v4556_v26 = vadd.f32 %v4364_v5, %v3276_v28  ;;  %v5089_v24 = vpop.permute.xlu0 %5088  ;;  %v14373_v5 = vld [vmem:[#allocation367_spill] sm:$0xff]  ;;  %v6450_v31 = vld [vmem:[%s13030_s0 + $0x57a] sm:$0xff] }
 0x5e0   :  { %v4366_v37 = vmul.f32 %v14367_v9, %v10711_v19  ;;  %6083 = vst [vmem:[%s13032_s2 + $0x340] sm:$0x1f] %v5891_v8  ;;  %v5898_v49 = vadd.f32 %v5706_v0, %v10690_v7  ;;  %v5701_v27 = vadd.f32 %v5509_v1, %v4549_v22  ;;  %v5516_v36 = vmul.f32 %v5089_v24, %v10720_v63  ;;  %v14377_v0 = vld [vmem:[#allocation581_spill] sm:$0xff]  ;;  %v14380_v24 = vld [vmem:[#allocation370_spill] sm:$0xff] }
 0x5e1   :  { %5344 = vperm.xlu0 %6197, %v6449_v11   ;;  %v3273_v30 = vadd.f32 %v3081_v45, %v2121_v12  ;;  %v3083_v4 = vmul.f32 %v14368_v20, %v10675_v56  ;;  %v3088_v38 = vmul.f32 %v14369_v15, %v10631_v39  ;;  %v5069_v34 = vpop.permute.xlu1 %5068  ;;  %v4551_v16 = vadd.f32 %v4359_v46, %v3271_v48  ;;  %v14375_v45 = vld [vmem:[#allocation366_spill] sm:$0xff]  ;;  %v14379_v46 = vld [vmem:[#allocation120_spill] sm:$0xff] }
 0x5e2   :  { %v3278_v59 = vadd.f32 %v3086_v17, %v2126_v23  ;;  %6090 = vst [vmem:[%s13032_s2 + $0x378] sm:$0xff] %v5898_v49  ;;  %v5893_v25 = vadd.f32 %v5701_v27, %v10760_v10  ;;  %v5708_v2 = vadd.f32 %v5516_v36, %v4556_v26  ;;  %v5511_v40 = vmul.f32 %v5069_v34, %v10672_v55  ;;  %v14378_v23 = vld [vmem:[#allocation117_spill] sm:$0xff]  ;;  %v14381_v27 = vld [vmem:[#allocation586_spill] sm:$0xff] }
 0x5e3   :  { %5324 = vperm.xlu1 %6198, %v14370_v60   ;;  %v2123_v41 = vmul.f32 %v14371_v54, %v10681_v18  ;;  %v2128_v21 = vmul.f32 %v14372_v13, %v10635_v50  ;;  %v4361_v61 = vmul.f32 %v14373_v5, %v10698_v51  ;;  %v4368_v44 = vmul.f32 %v14374_v52, %v10646_v6  ;;  %v5097_v14 = vpop.permute.xlu0 %5096  ;;  %v14385_v13 = vld [vmem:[#allocation369_spill] sm:$0xff] }
 0x5e4   :  { %v4558_v57 = vadd.f32 %v4366_v37, %v3278_v59  ;;  %6085 = vst [vmem:[%s13032_s2 + $0x350] sm:$0xff] %v5893_v25  ;;  %v5900_v43 = vadd.f32 %v5708_v2, %v10745_v42  ;;  %v5703_v48 = vadd.f32 %v5511_v40, %v4551_v16  ;;  %v5518_v53 = vmul.f32 %v5097_v14, %v10731_v58  ;;  %v14384_v16 = vld [vmem:[#allocation583_spill] sm:$0xff] }
 0x5e5   :  { %5352 = vperm.xlu0 %6197, %v14375_v45   ;;  %v3275_v28 = vadd.f32 %v3083_v4, %v2123_v41  ;;  %v3085_v22 = vmul.f32 %v14376_v47, %v10631_v39  ;;  %v3280_v32 = vadd.f32 %v3088_v38, %v2128_v21  ;;  %v5077_v17 = vpop.permute.xlu1 %5076  ;;  %v4553_v8 = vadd.f32 %v4361_v61, %v3273_v30  ;;  %v14382_v4 = vld [vmem:[#allocation373_spill] sm:$0xff]  ;;  %v14386_v21 = vld [vmem:[#allocation119_spill] sm:$0xff]  ;;  %v14387_v61 = vld [vmem:[#allocation122_spill] sm:$0xff] }
 0x5e6   :  { %v3090_v1 = vmul.f32 %v14377_v0, %v10686_v35  ;;  %6092 = vst [vmem:[%s13032_s2 + $0x388] sm:$0x1f] %v5900_v43  ;;  %v5895_v33 = vadd.f32 %v5703_v48, %v10690_v7  ;;  %v5710_v62 = vadd.f32 %v5518_v53, %v4558_v57  ;;  %v5513_v12 = vmul.f32 %v5077_v17, %v10720_v63  ;;  %v14383_v38 = vld [vmem:[#allocation381_spill] sm:$0xff]  ;;  %v14389_v57 = vld [vmem:[#allocation588_spill] sm:$0xff] }
 0x5e7   :  { %5332 = vperm.xlu1 %6198, %v6450_v31   ;;  %v2125_v29 = vmul.f32 %v14378_v23, %v10635_v50  ;;  %v2130_v26 = vmul.f32 %v14379_v46, %v10679_v3  ;;  %v4363_v9 = vmul.f32 %v14380_v24, %v10711_v19  ;;  %v4560_v37 = vadd.f32 %v4368_v44, %v3280_v32  ;;  %v5105_v49 = vpop.permute.xlu0 %5104  ;;  %v14388_v44 = vld [vmem:[#allocation374_spill] sm:$0xff]  ;;  %v14390_v17 = vld [vmem:[#allocation384_spill] sm:$0xff] }
 0x5e8   :  { %v4370_v36 = vmul.f32 %v14381_v27, %v10698_v51  ;;  %6087 = vst [vmem:[%s13032_s2 + $0x360] sm:$0xff] %v5895_v33  ;;  %v5902_v11 = vadd.f32 %v5710_v62, %v10760_v10  ;;  %v5705_v30 = vadd.f32 %v5513_v12, %v4553_v8  ;;  %v5520_v20 = vmul.f32 %v5105_v49, %v10672_v55  ;;  %v14391_v62 = vld [vmem:[#allocation585_spill] sm:$0xff]  ;;  %v14392_v46 = vld [vmem:[#allocation372_spill] sm:$0xff] }
 0x5e9   :  { %5360 = vperm.xlu0 %6197, %v14382_v4   ;;  %v3277_v15 = vadd.f32 %v3085_v22, %v2125_v29  ;;  %v3087_v34 = vmul.f32 %v14383_v38, %v10686_v35  ;;  %v3092_v59 = vmul.f32 %v14384_v16, %v10675_v56  ;;  %v5085_v25 = vpop.permute.xlu1 %5084  ;;  %v4555_v2 = vadd.f32 %v4363_v9, %v3275_v28  ;;  %v6451_v22 = vld [vmem:[%s13030_s0 + $0x5c2] sm:$0xff]  ;;  %v14394_v9 = vld [vmem:[#allocation124_spill] sm:$0xff]  ;;  %v14395_v49 = vld [vmem:[#allocation377_spill] sm:$0xff] }
 0x5ea   :  { %v3282_v40 = vadd.f32 %v3090_v1, %v2130_v26  ;;  %6094 = vst [vmem:[%s13032_s2 + $0x398] sm:$0xff] %v5902_v11  ;;  %v5897_v60 = vadd.f32 %v5705_v30, %v10745_v42  ;;  %v5712_v54 = vadd.f32 %v5520_v20, %v4560_v37  ;;  %v5515_v41 = vmul.f32 %v5085_v25, %v10731_v58  ;;  %v14393_v26 = vld [vmem:[#allocation121_spill] sm:$0xff]  ;;  %v14396_v30 = vld [vmem:[#allocation591_spill] sm:$0xff] }
 0x5eb   :  { %5340 = vperm.xlu1 %6198, %v14385_v13   ;;  %v2127_v5 = vmul.f32 %v14386_v21, %v10679_v3  ;;  %v2132_v52 = vmul.f32 %v14387_v61, %v10681_v18  ;;  %v4365_v14 = vmul.f32 %v14388_v44, %v10646_v6  ;;  %v4372_v43 = vmul.f32 %v14389_v57, %v10711_v19  ;;  %v5113_v48 = vpop.permute.xlu0 %5112  ;;  %v6452_v61 = vld [vmem:[%s13030_s0 + $0x5aa] sm:$0xff] }
 0x5ec   :  { %v4562_v53 = vadd.f32 %v4370_v36, %v3282_v40  ;;  %6089 = vst [vmem:[%s13032_s2 + $0x370] sm:$0x1f] %v5897_v60  ;;  %v5904_v45 = vadd.f32 %v5712_v54, %v10690_v7  ;;  %v5707_v28 = vadd.f32 %v5515_v41, %v4555_v2  ;;  %v5522_v47 = vmul.f32 %v5113_v48, %v10720_v63  ;;  %v14399_v2 = vld [vmem:[#allocation587_spill] sm:$0xff] }
 0x5ed   :  { %5368 = vperm.xlu0 %6197, %v6451_v22   ;;  %v3279_v32 = vadd.f32 %v3087_v34, %v2127_v5  ;;  %v3089_v8 = vmul.f32 %v14390_v17, %v10675_v56  ;;  %v3284_v0 = vadd.f32 %v3092_v59, %v2132_v52  ;;  %v5093_v1 = vpop.permute.xlu1 %5092  ;;  %v4557_v33 = vadd.f32 %v4365_v14, %v3277_v15  ;;  %v14397_v34 = vld [vmem:[#allocation376_spill] sm:$0xff]  ;;  %v14398_v59 = vld [vmem:[#allocation387_spill] sm:$0xff]  ;;  %v14401_v14 = vld [vmem:[#allocation126_spill] sm:$0xff] }
 0x5ee   :  { %v3094_v12 = vmul.f32 %v14391_v62, %v10631_v39  ;;  %6096 = vst [vmem:[%s13032_s2 + $0x3a8] sm:$0xff] %v5904_v45  ;;  %v5899_v31 = vadd.f32 %v5707_v28, %v10760_v10  ;;  %v5714_v23 = vadd.f32 %v5522_v47, %v4562_v53  ;;  %v5517_v29 = vmul.f32 %v5093_v1, %v10672_v55  ;;  %v14400_v52 = vld [vmem:[#allocation123_spill] sm:$0xff]  ;;  %v14403_v53 = vld [vmem:[#allocation593_spill] sm:$0xff]  ;;  %v14405_v1 = vld [vmem:[#allocation390_spill] sm:$0xff] }
 0x5ef   :  { %5348 = vperm.xlu1 %6198, %v14392_v46   ;;  %v2129_v24 = vmul.f32 %v14393_v26, %v10681_v18  ;;  %v2134_v37 = vmul.f32 %v14394_v9, %v10635_v50  ;;  %v4367_v27 = vmul.f32 %v14395_v49, %v10698_v51  ;;  %v4564_v36 = vadd.f32 %v4372_v43, %v3284_v0  ;;  %v5121_v11 = vpop.permute.xlu0 %5120  ;;  %v14402_v43 = vld [vmem:[#allocation380_spill] sm:$0xff]  ;;  %v14407_v9 = vld [vmem:[#allocation379_spill] sm:$0xff] }
 0x5f0   :  { %v4374_v20 = vmul.f32 %v14396_v30, %v10646_v6  ;;  %6091 = vst [vmem:[%s13032_s2 + $0x380] sm:$0xff] %v5899_v31  ;;  %v5906_v4 = vadd.f32 %v5714_v23, %v10745_v42  ;;  %v5709_v15 = vadd.f32 %v5517_v29, %v4557_v33  ;;  %v5524_v38 = vmul.f32 %v5121_v11, %v10731_v58  ;;  %v14406_v23 = vld [vmem:[#allocation590_spill] sm:$0xff]  ;;  %v14410_v11 = vld [vmem:[#allocation383_spill] sm:$0xff] }
 0x5f1   :  { %5376 = vperm.xlu0 %6197, %v14397_v34   ;;  %v3281_v16 = vadd.f32 %v3089_v8, %v2129_v24  ;;  %v3091_v25 = vmul.f32 %v14398_v59, %v10631_v39  ;;  %v3096_v40 = vmul.f32 %v14399_v2, %v10686_v35  ;;  %v5101_v60 = vpop.permute.xlu1 %5100  ;;  %v4559_v54 = vadd.f32 %v4367_v27, %v3279_v32  ;;  %v14404_v8 = vld [vmem:[#allocation589_spill] sm:$0xff]  ;;  %v14409_v27 = vld [vmem:[#allocation128_spill] sm:$0xff] }
 0x5f2   :  { %v3286_v41 = vadd.f32 %v3094_v12, %v2134_v37  ;;  %6098 = vst [vmem:[%s13032_s2 + $0x3b8] sm:$0x1f] %v5906_v4  ;;  %v5901_v13 = vadd.f32 %v5709_v15, %v10690_v7  ;;  %v5716_v21 = vadd.f32 %v5524_v38, %v4564_v36  ;;  %v5519_v5 = vmul.f32 %v5101_v60, %v10720_v63  ;;  %v14408_v37 = vld [vmem:[#allocation125_spill] sm:$0xff]  ;;  %v14411_v15 = vld [vmem:[#allocation595_spill] sm:$0xff] }
 0x5f3   :  { %5356 = vperm.xlu1 %6198, %v6452_v61   ;;  %v2131_v44 = vmul.f32 %v14400_v52, %v10635_v50  ;;  %v2136_v57 = vmul.f32 %v14401_v14, %v10679_v3  ;;  %v4369_v48 = vmul.f32 %v14402_v43, %v10711_v19  ;;  %v4376_v45 = vmul.f32 %v14403_v53, %v10698_v51  ;;  %v5129_v28 = vpop.permute.xlu0 %5128  ;;  %v14414_v14 = vld [vmem:[#allocation382_spill] sm:$0xff] }
 0x5f4   :  { %v4566_v47 = vadd.f32 %v4374_v20, %v3286_v41  ;;  %6093 = vst [vmem:[%s13032_s2 + $0x390] sm:$0xff] %v5901_v13  ;;  %v5908_v22 = vadd.f32 %v5716_v21, %v10760_v10  ;;  %v5711_v32 = vadd.f32 %v5519_v5, %v4559_v54  ;;  %v5526_v17 = vmul.f32 %v5129_v28, %v10672_v55  ;;  %v14413_v54 = vld [vmem:[#allocation592_spill] sm:$0xff] }
 0x5f5   :  { %5384 = vperm.xlu0 %6197, %v14404_v8   ;;  %v3283_v0 = vadd.f32 %v3091_v25, %v2131_v44  ;;  %v3093_v33 = vmul.f32 %v14405_v1, %v10686_v35  ;;  %v3288_v62 = vadd.f32 %v3096_v40, %v2136_v57  ;;  %v5109_v12 = vpop.permute.xlu1 %5108  ;;  %v4561_v31 = vadd.f32 %v4369_v48, %v3281_v16  ;;  %v6453_v25 = vld [vmem:[%s13030_s0 + $0x5f2] sm:$0xff]  ;;  %v14415_v57 = vld [vmem:[#allocation127_spill] sm:$0xff] }
 0x5f6   :  { %v3098_v29 = vmul.f32 %v14406_v23, %v10675_v56  ;;  %6100 = vst [vmem:[%s13032_s2 + $0x3c8] sm:$0xff] %v5908_v22  ;;  %v5903_v46 = vadd.f32 %v5711_v32, %v10745_v42  ;;  %v5718_v26 = vadd.f32 %v5526_v17, %v4566_v47  ;;  %v5521_v24 = vmul.f32 %v5109_v12, %v10731_v58  ;;  %v14412_v40 = vld [vmem:[#allocation393_spill] sm:$0xff]  ;;  %v14416_v48 = vld [vmem:[#allocation131_spill] sm:$0xff] }
 0x5f7   :  { %5364 = vperm.xlu1 %6198, %v14407_v9   ;;  %v2133_v49 = vmul.f32 %v14408_v37, %v10679_v3  ;;  %v2138_v36 = vmul.f32 %v14409_v27, %v10681_v18  ;;  %v4371_v30 = vmul.f32 %v14410_v11, %v10646_v6  ;;  %v4568_v20 = vadd.f32 %v4376_v45, %v3288_v62  ;;  %v5137_v4 = vpop.permute.xlu0 %5136  ;;  %v14417_v45 = vld [vmem:[#allocation386_spill] sm:$0xff]  ;;  %v14418_v47 = vld [vmem:[#allocation597_spill] sm:$0xff]  ;;  %v14420_v12 = vld [vmem:[#allocation395_spill] sm:$0xff] }
 0x5f8   :  { %v4378_v38 = vmul.f32 %v14411_v15, %v10711_v19  ;;  %6095 = vst [vmem:[%s13032_s2 + $0x3a0] sm:$0x1f] %v5903_v46  ;;  %v5910_v34 = vadd.f32 %v5718_v26, %v10690_v7  ;;  %v5713_v16 = vadd.f32 %v5521_v24, %v4561_v31  ;;  %v5528_v59 = vmul.f32 %v5137_v4, %v10720_v63  ;;  %v14421_v26 = vld [vmem:[#allocation594_spill] sm:$0xff]  ;;  %v14424_v4 = vld [vmem:[#allocation389_spill] sm:$0xff] }
 0x5f9   :  { %5392 = vperm.xlu0 %6197, %v6453_v25   ;;  %v3285_v2 = vadd.f32 %v3093_v33, %v2133_v49  ;;  %v3095_v60 = vmul.f32 %v14412_v40, %v10675_v56  ;;  %v3100_v41 = vmul.f32 %v14413_v54, %v10631_v39  ;;  %v5117_v13 = vpop.permute.xlu1 %5116  ;;  %v4563_v21 = vadd.f32 %v4371_v30, %v3283_v0  ;;  %v14419_v33 = vld [vmem:[#allocation385_spill] sm:$0xff]  ;;  %v14423_v30 = vld [vmem:[#allocation134_spill] sm:$0xff] }
 0x5fa   :  { %v3290_v5 = vadd.f32 %v3098_v29, %v2138_v36  ;;  %6102 = vst [vmem:[%s13032_s2 + $0x3d8] sm:$0xff] %v5910_v34  ;;  %v5905_v61 = vadd.f32 %v5713_v16, %v10760_v10  ;;  %v5720_v52 = vadd.f32 %v5528_v59, %v4568_v20  ;;  %v5523_v44 = vmul.f32 %v5117_v13, %v10672_v55  ;;  %v6454_v27 = vld [vmem:[%s13030_s0 + $0x5da] sm:$0xff]  ;;  %v14427_v13 = vld [vmem:[#allocation596_spill] sm:$0xff] }
 0x5fb   :  { %5372 = vperm.xlu1 %6198, %v14414_v14   ;;  %v2135_v43 = vmul.f32 %v14415_v57, %v10681_v18  ;;  %v2140_v53 = vmul.f32 %v14416_v48, %v10635_v50  ;;  %v4373_v28 = vmul.f32 %v14417_v45, %v10698_v51  ;;  %v4380_v22 = vmul.f32 %v14418_v47, %v10646_v6  ;;  %v5145_v32 = vpop.permute.xlu0 %5144  ;;  %v14422_v36 = vld [vmem:[#allocation129_spill] sm:$0xff]  ;;  %v14425_v16 = vld [vmem:[#allocation598_spill] sm:$0xff]  ;;  %v14429_v48 = vld [vmem:[#allocation132_spill] sm:$0xff] }
 0x5fc   :  { %v4570_v17 = vadd.f32 %v4378_v38, %v3290_v5  ;;  %6097 = vst [vmem:[%s13032_s2 + $0x3b0] sm:$0xff] %v5905_v61  ;;  %v5912_v8 = vadd.f32 %v5720_v52, %v10745_v42  ;;  %v5715_v0 = vadd.f32 %v5523_v44, %v4563_v21  ;;  %v5530_v1 = vmul.f32 %v5145_v32, %v10731_v58  ;;  %v14426_v54 = vld [vmem:[#allocation397_spill] sm:$0xff]  ;;  %v14430_v45 = vld [vmem:[#allocation136_spill] sm:$0xff] }
 0x5fd   :  { %5400 = vperm.xlu0 %6197, %v14419_v33   ;;  %v3287_v62 = vadd.f32 %v3095_v60, %v2135_v43  ;;  %v3097_v31 = vmul.f32 %v14420_v12, %v10631_v39  ;;  %v3292_v23 = vadd.f32 %v3100_v41, %v2140_v53  ;;  %v5125_v29 = vpop.permute.xlu1 %5124  ;;  %v4565_v46 = vadd.f32 %v4373_v28, %v3285_v2  ;;  %v14428_v43 = vld [vmem:[#allocation388_spill] sm:$0xff] }
 0x5fe   :  { %v3102_v24 = vmul.f32 %v14421_v26, %v10686_v35  ;;  %6104 = vst [vmem:[%s13032_s2 + $0x3e8] sm:$0x1f] %v5912_v8  ;;  %v5907_v9 = vadd.f32 %v5715_v0, %v10690_v7  ;;  %v5722_v37 = vadd.f32 %v5530_v1, %v4570_v17  ;;  %v5525_v49 = vmul.f32 %v5125_v29, %v10720_v63  ;;  %v14431_v47 = vld [vmem:[#allocation392_spill] sm:$0xff] }
 0x5ff   :  { %5380 = vperm.xlu1 %6198, %v6454_v27   ;;  %v2137_v11 = vmul.f32 %v14422_v36, %v10635_v50  ;;  %v2142_v20 = vmul.f32 %v14423_v30, %v10679_v3  ;;  %v4375_v15 = vmul.f32 %v14424_v4, %v10711_v19  ;;  %v4572_v38 = vadd.f32 %v4380_v22, %v3292_v23  ;;  %v5153_v34 = vpop.permute.xlu0 %5152  ;;  %v14432_v32 = vld [vmem:[#allocation600_spill] sm:$0xff]  ;;  %v14435_v36 = vld [vmem:[#allocation391_spill] sm:$0xff] }
 0x600   :  { %v4382_v59 = vmul.f32 %v14425_v16, %v10698_v51  ;;  %6099 = vst [vmem:[%s13032_s2 + $0x3c0] sm:$0xff] %v5907_v9  ;;  %v5914_v25 = vadd.f32 %v5722_v37, %v10760_v10  ;;  %v5717_v2 = vadd.f32 %v5525_v49, %v4565_v46  ;;  %v5532_v40 = vmul.f32 %v5153_v34, %v10672_v55 }
 0x601   :  { %v3289_v60 = vadd.f32 %v3097_v31, %v2137_v11  ;;  %v3099_v41 = vmul.f32 %v14426_v54, %v10686_v35  ;;  %v3104_v21 = vmul.f32 %v14427_v13, %v10675_v56  ;;  %v5133_v5 = vpop.permute.xlu1 %5132  ;;  %v4567_v61 = vadd.f32 %v4375_v15, %v3287_v62  ;;  %v14433_v31 = vld [vmem:[#allocation399_spill] sm:$0xff]  ;;  %v14438_v15 = vld [vmem:[#allocation394_spill] sm:$0xff] }
 0x602   :  { %v3294_v52 = vadd.f32 %v3102_v24, %v2142_v20  ;;  %6106 = vst [vmem:[%s13032_s2 + $0x3f8] sm:$0xff] %v5914_v25  ;;  %v5909_v44 = vadd.f32 %v5717_v2, %v10745_v42  ;;  %v5724_v14 = vadd.f32 %v5532_v40, %v4572_v38  ;;  %v5527_v57 = vmul.f32 %v5133_v5, %v10731_v58  ;;  %v14434_v24 = vld [vmem:[#allocation130_spill] sm:$0xff]  ;;  %v14436_v11 = vld [vmem:[#allocation135_spill] sm:$0xff] }
 0x603   :  { %5388 = vperm.xlu1 %6198, %v14428_v43   ;;  %v2139_v53 = vmul.f32 %v14429_v48, %v10679_v3  ;;  %v2144_v28 = vmul.f32 %v14430_v45, %v10681_v18  ;;  %v4377_v22 = vmul.f32 %v14431_v47, %v10646_v6  ;;  %v4384_v17 = vmul.f32 %v14432_v32, %v10711_v19  ;;  %v5161_v8 = vpop.permute.xlu0 %5160  ;;  %v14437_v20 = vld [vmem:[#allocation139_spill] sm:$0xff]  ;;  %v14442_v48 = vld [vmem:[#allocation137_spill] sm:$0xff]  ;;  %v14443_v45 = vld [vmem:[#allocation142_spill] sm:$0xff] }
 0x604   :  { %v4574_v0 = vadd.f32 %v4382_v59, %v3294_v52  ;;  %6101 = vst [vmem:[%s13032_s2 + $0x3d0] sm:$0x1f] %v5909_v44  ;;  %v5916_v1 = vadd.f32 %v5724_v14, %v10690_v7  ;;  %v5719_v33 = vadd.f32 %v5527_v57, %v4567_v61  ;;  %v5534_v62 = vmul.f32 %v5161_v8, %v10720_v63  ;;  %v14439_v59 = vld [vmem:[#allocation601_spill] sm:$0xff]  ;;  %v14444_v47 = vld [vmem:[#allocation396_spill] sm:$0xff]  ;;  %v14445_v32 = vld [vmem:[#allocation603_spill] sm:$0xff] }
 0x605   :  { %v3291_v12 = vadd.f32 %v3099_v41, %v2139_v53  ;;  %v3101_v23 = vmul.f32 %v14433_v31, %v10675_v56  ;;  %v3296_v29 = vadd.f32 %v3104_v21, %v2144_v28  ;;  %v5141_v46 = vpop.permute.xlu1 %5140  ;;  %v4569_v26 = vadd.f32 %v4377_v22, %v3289_v60  ;;  %v14440_v41 = vld [vmem:[#allocation401_spill] sm:$0xff]  ;;  %v14441_v21 = vld [vmem:[#allocation599_spill] sm:$0xff] }
 0x606   :  { %v3106_v9 = vmul.f32 %v14434_v24, %v10631_v39  ;;  %6108 = vst [vmem:[%s13032_s2 + $0x408] sm:$0xff] %v5916_v1  ;;  %v5911_v37 = vadd.f32 %v5719_v33, %v10760_v10  ;;  %v5726_v49 = vadd.f32 %v5534_v62, %v4574_v0  ;;  %v5529_v27 = vmul.f32 %v5141_v46, %v10672_v55  ;;  %v14446_v31 = vld [vmem:[#allocation403_spill] sm:$0xff]  ;;  %v14447_v24 = vld [vmem:[#allocation133_spill] sm:$0xff] }
 0x607   :  { %5396 = vperm.xlu1 %6198, %v14435_v36   ;;  %v2141_v30 = vmul.f32 %v14436_v11, %v10681_v18  ;;  %v2146_v4 = vmul.f32 %v14437_v20, %v10635_v50  ;;  %v4379_v38 = vmul.f32 %v14438_v15, %v10698_v51  ;;  %v4576_v34 = vadd.f32 %v4384_v17, %v3296_v29  ;;  %v5169_v16 = vpop.permute.xlu0 %5168  ;;  %v14448_v36 = vld [vmem:[#allocation140_spill] sm:$0xff] }
 0x608   :  { %v4386_v25 = vmul.f32 %v14439_v59, %v10646_v6  ;;  %6103 = vst [vmem:[%s13032_s2 + $0x3e0] sm:$0xff] %v5911_v37  ;;  %v5918_v2 = vadd.f32 %v5726_v49, %v10745_v42  ;;  %v5721_v40 = vadd.f32 %v5529_v27, %v4569_v26  ;;  %v5536_v60 = vmul.f32 %v5169_v16, %v10731_v58  ;;  %v14451_v16 = vld [vmem:[#allocation604_spill] sm:$0xff] }
 0x609   :  { %v3293_v54 = vadd.f32 %v3101_v23, %v2141_v30  ;;  %v3103_v13 = vmul.f32 %v14440_v41, %v10631_v39  ;;  %v3108_v5 = vmul.f32 %v14441_v21, %v10686_v35  ;;  %v5149_v61 = vpop.permute.xlu1 %5148  ;;  %v4571_v52 = vadd.f32 %v4379_v38, %v3291_v12  ;;  %v14449_v30 = vld [vmem:[#allocation144_spill] sm:$0xff] }
 0x60a   :  { %v3298_v44 = vadd.f32 %v3106_v9, %v2146_v4  ;;  %6110 = vst [vmem:[%s13032_s2 + $0x418] sm:$0x1f] %v5918_v2  ;;  %v5913_v14 = vadd.f32 %v5721_v40, %v10690_v7  ;;  %v5728_v57 = vadd.f32 %v5536_v60, %v4576_v34  ;;  %v5531_v43 = vmul.f32 %v5149_v61, %v10720_v63  ;;  %v14450_v4 = vld [vmem:[#allocation398_spill] sm:$0xff] }
 0x60b   :  { %v2143_v53 = vmul.f32 %v14442_v48, %v10635_v50  ;;  %v2148_v28 = vmul.f32 %v14443_v45, %v10679_v3  ;;  %v4381_v22 = vmul.f32 %v14444_v47, %v10711_v19  ;;  %v4388_v17 = vmul.f32 %v14445_v32, %v10698_v51  ;;  %v5177_v8 = vpop.permute.xlu0 %5176 }
 0x60c   :  { %v4578_v0 = vadd.f32 %v4386_v25, %v3298_v44  ;;  %6105 = vst [vmem:[%s13032_s2 + $0x3f0] sm:$0xff] %v5913_v14  ;;  %v5920_v1 = vadd.f32 %v5728_v57, %v10760_v10  ;;  %v5723_v33 = vadd.f32 %v5531_v43, %v4571_v52  ;;  %v5538_v62 = vmul.f32 %v5177_v8, %v10672_v55  ;;  %v14454_v43 = vld [vmem:[#allocation143_spill] sm:$0xff] }
 0x60d   :  { %v3295_v12 = vadd.f32 %v3103_v13, %v2143_v53  ;;  %v3105_v23 = vmul.f32 %v14446_v31, %v10686_v35  ;;  %v3300_v29 = vadd.f32 %v3108_v5, %v2148_v28  ;;  %v5157_v46 = vpop.permute.xlu1 %5156  ;;  %v4573_v26 = vadd.f32 %v4381_v22, %v3293_v54  ;;  %v14452_v54 = vld [vmem:[#allocation405_spill] sm:$0xff]  ;;  %v14453_v13 = vld [vmem:[#allocation602_spill] sm:$0xff]  ;;  %v14455_v53 = vld [vmem:[#allocation147_spill] sm:$0xff] }
 0x60e   :  { %v3110_v9 = vmul.f32 %v14447_v24, %v10675_v56  ;;  %6112 = vst [vmem:[%s13032_s2 + $0x428] sm:$0xff] %v5920_v1  ;;  %v5915_v37 = vadd.f32 %v5723_v33, %v10745_v42  ;;  %v5730_v49 = vadd.f32 %v5538_v62, %v4578_v0  ;;  %v5533_v27 = vmul.f32 %v5157_v46, %v10731_v58  ;;  %v14456_v28 = vld [vmem:[#allocation400_spill] sm:$0xff]  ;;  %v14457_v22 = vld [vmem:[#allocation605_spill] sm:$0xff] }
 0x60f   :  { %v2145_v11 = vmul.f32 %v14448_v36, %v10679_v3  ;;  %v2150_v20 = vmul.f32 %v14449_v30, %v10681_v18  ;;  %v4383_v15 = vmul.f32 %v14450_v4, %v10646_v6  ;;  %v4580_v38 = vadd.f32 %v4388_v17, %v3300_v29  ;;  %v5185_v34 = vpop.permute.xlu0 %5184 }
 0x610   :  { %v4390_v59 = vmul.f32 %v14451_v16, %v10711_v19  ;;  %6107 = vst [vmem:[%s13032_s2 + $0x400] sm:$0x1f] %v5915_v37  ;;  %v5922_v25 = vadd.f32 %v5730_v49, %v10690_v7  ;;  %v5725_v2 = vadd.f32 %v5533_v27, %v4573_v26  ;;  %v5540_v40 = vmul.f32 %v5185_v34, %v10720_v63  ;;  %v14459_v26 = vld [vmem:[#allocation138_spill] sm:$0xff]  ;;  %v14460_v27 = vld [vmem:[#allocation145_spill] sm:$0xff]  ;;  %v14463_v34 = vld [vmem:[#allocation607_spill] sm:$0xff] }
 0x611   :  { %v3297_v60 = vadd.f32 %v3105_v23, %v2145_v11  ;;  %v3107_v41 = vmul.f32 %v14452_v54, %v10675_v56  ;;  %v3112_v21 = vmul.f32 %v14453_v13, %v10631_v39  ;;  %v5165_v5 = vpop.permute.xlu1 %5164  ;;  %v4575_v61 = vadd.f32 %v4383_v15, %v3295_v12  ;;  %v14458_v12 = vld [vmem:[#allocation407_spill] sm:$0xff]  ;;  %v14461_v11 = vld [vmem:[#allocation150_spill] sm:$0xff] }
 0x612   :  { %v3302_v52 = vadd.f32 %v3110_v9, %v2150_v20  ;;  %6114 = vst [vmem:[%s13032_s2 + $0x438] sm:$0xff] %v5922_v25  ;;  %v5917_v44 = vadd.f32 %v5725_v2, %v10760_v10  ;;  %v5732_v14 = vadd.f32 %v5540_v40, %v4580_v38  ;;  %v5535_v57 = vmul.f32 %v5165_v5, %v10672_v55  ;;  %v14462_v20 = vld [vmem:[#allocation402_spill] sm:$0xff] }
 0x613   :  { %v2147_v48 = vmul.f32 %v14454_v43, %v10681_v18  ;;  %v2152_v45 = vmul.f32 %v14455_v53, %v10635_v50  ;;  %v4385_v47 = vmul.f32 %v14456_v28, %v10698_v51  ;;  %v4392_v32 = vmul.f32 %v14457_v22, %v10646_v6  ;;  %v5193_v17 = vpop.permute.xlu0 %5192 }
 0x614   :  { %v4582_v8 = vadd.f32 %v4390_v59, %v3302_v52  ;;  %6109 = vst [vmem:[%s13032_s2 + $0x410] sm:$0xff] %v5917_v44  ;;  %v5924_v0 = vadd.f32 %v5732_v14, %v10745_v42  ;;  %v5727_v1 = vadd.f32 %v5535_v57, %v4575_v61  ;;  %v5542_v33 = vmul.f32 %v5193_v17, %v10731_v58  ;;  %v14466_v57 = vld [vmem:[#allocation148_spill] sm:$0xff] }
 0x615   :  { %v3299_v62 = vadd.f32 %v3107_v41, %v2147_v48  ;;  %v3109_v31 = vmul.f32 %v14458_v12, %v10631_v39  ;;  %v3304_v23 = vadd.f32 %v3112_v21, %v2152_v45  ;;  %v5173_v29 = vpop.permute.xlu1 %5172  ;;  %v4577_v46 = vadd.f32 %v4385_v47, %v3297_v60  ;;  %v14464_v60 = vld [vmem:[#allocation409_spill] sm:$0xff]  ;;  %v14467_v48 = vld [vmem:[#allocation152_spill] sm:$0xff] }
 0x616   :  { %v3114_v24 = vmul.f32 %v14459_v26, %v10686_v35  ;;  %6116 = vst [vmem:[%s13032_s2 + $0x448] sm:$0x1f] %v5924_v0  ;;  %v5919_v9 = vadd.f32 %v5727_v1, %v10690_v7  ;;  %v5734_v37 = vadd.f32 %v5542_v33, %v4582_v8  ;;  %v5537_v49 = vmul.f32 %v5173_v29, %v10720_v63  ;;  %v14465_v41 = vld [vmem:[#allocation141_spill] sm:$0xff]  ;;  %v14468_v45 = vld [vmem:[#allocation404_spill] sm:$0xff] }
 0x617   :  { %v2149_v36 = vmul.f32 %v14460_v27, %v10635_v50  ;;  %v2154_v30 = vmul.f32 %v14461_v11, %v10679_v3  ;;  %v4387_v4 = vmul.f32 %v14462_v20, %v10711_v19  ;;  %v4584_v15 = vadd.f32 %v4392_v32, %v3304_v23  ;;  %v5201_v38 = vpop.permute.xlu0 %5200  ;;  %v14469_v47 = vld [vmem:[#allocation608_spill] sm:$0xff] }
 0x618   :  { %v4394_v16 = vmul.f32 %v14463_v34, %v10698_v51  ;;  %6111 = vst [vmem:[%s13032_s2 + $0x420] sm:$0xff] %v5919_v9  ;;  %v5926_v59 = vadd.f32 %v5734_v37, %v10760_v10  ;;  %v5729_v25 = vadd.f32 %v5537_v49, %v4577_v46  ;;  %v5544_v2 = vmul.f32 %v5201_v38, %v10672_v55  ;;  %v14471_v46 = vld [vmem:[#allocation606_spill] sm:$0xff]  ;;  %v14472_v49 = vld [vmem:[#allocation151_spill] sm:$0xff]  ;;  %v14475_v38 = vld [vmem:[#allocation609_spill] sm:$0xff] }
 0x619   :  { %v3301_v40 = vadd.f32 %v3109_v31, %v2149_v36  ;;  %v3111_v54 = vmul.f32 %v14464_v60, %v10686_v35  ;;  %v3116_v13 = vmul.f32 %v14465_v41, %v10675_v56  ;;  %v5181_v21 = vpop.permute.xlu1 %5180  ;;  %v4579_v5 = vadd.f32 %v4387_v4, %v3299_v62  ;;  %v14470_v62 = vld [vmem:[#allocation411_spill] sm:$0xff] }
 0x61a   :  { %v3306_v61 = vadd.f32 %v3114_v24, %v2154_v30  ;;  %6118 = vst [vmem:[%s13032_s2 + $0x458] sm:$0xff] %v5926_v59  ;;  %v5921_v52 = vadd.f32 %v5729_v25, %v10745_v42  ;;  %v5736_v44 = vadd.f32 %v5544_v2, %v4584_v15  ;;  %v5539_v14 = vmul.f32 %v5181_v21, %v10731_v58  ;;  %v14473_v36 = vld [vmem:[#allocation155_spill] sm:$0xff]  ;;  %v14474_v30 = vld [vmem:[#allocation406_spill] sm:$0xff] }
 0x61b   :  { %v2151_v43 = vmul.f32 %v14466_v57, %v10679_v3  ;;  %v2156_v53 = vmul.f32 %v14467_v48, %v10681_v18  ;;  %v4389_v28 = vmul.f32 %v14468_v45, %v10646_v6  ;;  %v4396_v22 = vmul.f32 %v14469_v47, %v10711_v19  ;;  %v5209_v32 = vpop.permute.xlu0 %5208 }
 0x61c   :  { %v4586_v17 = vadd.f32 %v4394_v16, %v3306_v61  ;;  %6113 = vst [vmem:[%s13032_s2 + $0x430] sm:$0x1f] %v5921_v52  ;;  %v5928_v8 = vadd.f32 %v5736_v44, %v10690_v7  ;;  %v5731_v0 = vadd.f32 %v5539_v14, %v4579_v5  ;;  %v5546_v1 = vmul.f32 %v5209_v32, %v10720_v63  ;;  %v14478_v14 = vld [vmem:[#allocation153_spill] sm:$0xff] }
 0x61d   :  { %v3303_v33 = vadd.f32 %v3111_v54, %v2151_v43  ;;  %v3113_v12 = vmul.f32 %v14470_v62, %v10675_v56  ;;  %v3308_v31 = vadd.f32 %v3116_v13, %v2156_v53  ;;  %v5189_v23 = vpop.permute.xlu1 %5188  ;;  %v4581_v29 = vadd.f32 %v4389_v28, %v3301_v40  ;;  %v14476_v40 = vld [vmem:[#allocation413_spill] sm:$0xff]  ;;  %v14477_v54 = vld [vmem:[#allocation146_spill] sm:$0xff]  ;;  %v14480_v53 = vld [vmem:[#allocation408_spill] sm:$0xff] }
 0x61e   :  { %v3118_v26 = vmul.f32 %v14471_v46, %v10631_v39  ;;  %6120 = vst [vmem:[%s13032_s2 + $0x468] sm:$0xff] %v5928_v8  ;;  %v5923_v24 = vadd.f32 %v5731_v0, %v10760_v10  ;;  %v5738_v9 = vadd.f32 %v5546_v1, %v4586_v17  ;;  %v5541_v37 = vmul.f32 %v5189_v23, %v10672_v55  ;;  %v14479_v43 = vld [vmem:[#allocation158_spill] sm:$0xff]  ;;  %v14481_v28 = vld [vmem:[#allocation611_spill] sm:$0xff] }
 0x61f   :  { %v2153_v27 = vmul.f32 %v14472_v49, %v10681_v18  ;;  %v2158_v11 = vmul.f32 %v14473_v36, %v10635_v50  ;;  %v4391_v20 = vmul.f32 %v14474_v30, %v10698_v51  ;;  %v4588_v4 = vadd.f32 %v4396_v22, %v3308_v31  ;;  %v5217_v15 = vpop.permute.xlu0 %5216 }
 0x620   :  { %v4398_v34 = vmul.f32 %v14475_v38, %v10646_v6  ;;  %6115 = vst [vmem:[%s13032_s2 + $0x440] sm:$0xff] %v5923_v24  ;;  %v5930_v16 = vadd.f32 %v5738_v9, %v10745_v42  ;;  %v5733_v59 = vadd.f32 %v5541_v37, %v4581_v29  ;;  %v5548_v25 = vmul.f32 %v5217_v15, %v10731_v58  ;;  %v14483_v29 = vld [vmem:[#allocation149_spill] sm:$0xff]  ;;  %v14484_v37 = vld [vmem:[#allocation156_spill] sm:$0xff] }
 0x621   :  { %v3305_v2 = vadd.f32 %v3113_v12, %v2153_v27  ;;  %v3115_v60 = vmul.f32 %v14476_v40, %v10631_v39  ;;  %v3120_v41 = vmul.f32 %v14477_v54, %v10686_v35  ;;  %v5197_v13 = vpop.permute.xlu1 %5196  ;;  %v4583_v21 = vadd.f32 %v4391_v20, %v3303_v33  ;;  %v14482_v33 = vld [vmem:[#allocation415_spill] sm:$0xff]  ;;  %v14485_v27 = vld [vmem:[#allocation160_spill] sm:$0xff] }
 0x622   :  { %v3310_v5 = vadd.f32 %v3118_v26, %v2158_v11  ;;  %6122 = vst [vmem:[%s13032_s2 + $0x478] sm:$0x1f] %v5930_v16  ;;  %v5925_v61 = vadd.f32 %v5733_v59, %v10690_v7  ;;  %v5740_v52 = vadd.f32 %v5548_v25, %v4588_v4  ;;  %v5543_v44 = vmul.f32 %v5197_v13, %v10720_v63  ;;  %v14486_v11 = vld [vmem:[#allocation410_spill] sm:$0xff]  ;;  %v14487_v15 = vld [vmem:[#allocation612_spill] sm:$0xff] }
 0x623   :  { %v2155_v57 = vmul.f32 %v14478_v14, %v10635_v50  ;;  %v2160_v48 = vmul.f32 %v14479_v43, %v10679_v3  ;;  %v4393_v45 = vmul.f32 %v14480_v53, %v10711_v19  ;;  %v4400_v47 = vmul.f32 %v14481_v28, %v10698_v51  ;;  %v5225_v22 = vpop.permute.xlu0 %5224 }
 0x624   :  { %v4590_v32 = vadd.f32 %v4398_v34, %v3310_v5  ;;  %6117 = vst [vmem:[%s13032_s2 + $0x450] sm:$0xff] %v5925_v61  ;;  %v5932_v17 = vadd.f32 %v5740_v52, %v10760_v10  ;;  %v5735_v8 = vadd.f32 %v5543_v44, %v4583_v21  ;;  %v5550_v0 = vmul.f32 %v5225_v22, %v10672_v55  ;;  %v14490_v44 = vld [vmem:[#allocation159_spill] sm:$0xff] }
 0x625   :  { %v3307_v1 = vadd.f32 %v3115_v60, %v2155_v57  ;;  %v3117_v62 = vmul.f32 %v14482_v33, %v10686_v35  ;;  %v3312_v12 = vadd.f32 %v3120_v41, %v2160_v48  ;;  %v4585_v23 = vadd.f32 %v4393_v45, %v3305_v2  ;;  %v14488_v2 = vld [vmem:[#allocation417_spill] sm:$0xff]  ;;  %v14489_v60 = vld [vmem:[#allocation610_spill] sm:$0xff]  ;;  %v14491_v57 = vld [vmem:[#allocation163_spill] sm:$0xff] }
 0x626   :  { %v5205_v31 = vpop.permute.xlu1 %5204  ;;  %v3122_v46 = vmul.f32 %v14483_v29, %v10675_v56  ;;  %6124 = vst [vmem:[%s13032_s2 + $0x488] sm:$0xff] %v5932_v17  ;;  %v5927_v26 = vadd.f32 %v5735_v8, %v10745_v42  ;;  %v5742_v24 = vadd.f32 %v5550_v0, %v4590_v32  ;;  %v2157_v49 = vmul.f32 %v14484_v37, %v10679_v3  ;;  %v14492_v48 = vld [vmem:[#allocation412_spill] sm:$0xff]  ;;  %v14493_v45 = vld [vmem:[#allocation613_spill] sm:$0xff] }
 0x627   :  { %v5545_v9 = vmul.f32 %v5205_v31, %v10731_v58  ;;  %v2162_v36 = vmul.f32 %v14485_v27, %v10681_v18  ;;  %v4395_v30 = vmul.f32 %v14486_v11, %v10646_v6  ;;  %v4592_v20 = vadd.f32 %v4400_v47, %v3312_v12 }
 0x628   :  { %v5233_v4 = vpop.permute.xlu0 %5232  ;;  %v4402_v38 = vmul.f32 %v14487_v15, %v10711_v19  ;;  %6119 = vst [vmem:[%s13032_s2 + $0x460] sm:$0x1f] %v5927_v26  ;;  %v5934_v34 = vadd.f32 %v5742_v24, %v10690_v7  ;;  %v3309_v25 = vadd.f32 %v3117_v62, %v2157_v49  ;;  %v3119_v40 = vmul.f32 %v14488_v2, %v10675_v56  ;;  %v14497_v49 = vld [vmem:[#allocation166_spill] sm:$0xff] }
 0x629   :  { %v5737_v16 = vadd.f32 %v5545_v9, %v4585_v23  ;;  %v5552_v59 = vmul.f32 %v5233_v4, %v10720_v63  ;;  %v3124_v54 = vmul.f32 %v14489_v60, %v10631_v39  ;;  %v4587_v13 = vadd.f32 %v4395_v30, %v3307_v1  ;;  %v14494_v1 = vld [vmem:[#allocation419_spill] sm:$0xff]  ;;  %v14495_v23 = vld [vmem:[#allocation154_spill] sm:$0xff]  ;;  %v14496_v9 = vld [vmem:[#allocation161_spill] sm:$0xff] }
 0x62a   :  { %v5213_v41 = vpop.permute.xlu1 %5212  ;;  %v3314_v21 = vadd.f32 %v3122_v46, %v2162_v36  ;;  %6126 = vst [vmem:[%s13032_s2 + $0x498] sm:$0xff] %v5934_v34  ;;  %v2159_v14 = vmul.f32 %v14490_v44, %v10681_v18  ;;  %v2164_v43 = vmul.f32 %v14491_v57, %v10635_v50  ;;  %v4397_v53 = vmul.f32 %v14492_v48, %v10698_v51  ;;  %v14498_v36 = vld [vmem:[#allocation414_spill] sm:$0xff]  ;;  %v14499_v4 = vld [vmem:[#allocation615_spill] sm:$0xff] }
 0x62b   :  { %v5929_v5 = vadd.f32 %v5737_v16, %v10760_v10  ;;  %v5744_v61 = vadd.f32 %v5552_v59, %v4592_v20  ;;  %v5547_v52 = vmul.f32 %v5213_v41, %v10672_v55  ;;  %v4404_v28 = vmul.f32 %v14493_v45, %v10646_v6 }
 0x62c   :  { %v5241_v47 = vpop.permute.xlu0 %5240  ;;  %v4594_v22 = vadd.f32 %v4402_v38, %v3314_v21  ;;  %v3311_v0 = vadd.f32 %v3119_v40, %v2159_v14  ;;  %v3121_v33 = vmul.f32 %v14494_v1, %v10631_v39  ;;  %v3316_v62 = vadd.f32 %v3124_v54, %v2164_v43  ;;  %v14501_v40 = vld [vmem:[#allocation157_spill] sm:$0xff]  ;;  %v14503_v14 = vld [vmem:[#allocation168_spill] sm:$0xff] }
 0x62d   :  { %6121 = vst [vmem:[%s13032_s2 + $0x470] sm:$0xff] %v5929_v5  ;;  %v5936_v32 = vadd.f32 %v5744_v61, %v10745_v42  ;;  %v5739_v17 = vadd.f32 %v5547_v52, %v4587_v13  ;;  %v5554_v8 = vmul.f32 %v5241_v47, %v10731_v58  ;;  %v4589_v31 = vadd.f32 %v4397_v53, %v3309_v25  ;;  %v14500_v25 = vld [vmem:[#allocation421_spill] sm:$0xff]  ;;  %v14502_v52 = vld [vmem:[#allocation164_spill] sm:$0xff] }
 0x62e   :  { %v5221_v12 = vpop.permute.xlu1 %5220  ;;  %v3126_v29 = vmul.f32 %v14495_v23, %v10686_v35  ;;  %v2161_v37 = vmul.f32 %v14496_v9, %v10635_v50  ;;  %v2166_v27 = vmul.f32 %v14497_v49, %v10679_v3  ;;  %v4399_v11 = vmul.f32 %v14498_v36, %v10711_v19  ;;  %v14504_v43 = vld [vmem:[#allocation416_spill] sm:$0xff] }
 0x62f   :  { %6128 = vst [vmem:[%s13032_s2 + $0x4a8] sm:$0x1f] %v5936_v32  ;;  %v5931_v46 = vadd.f32 %v5739_v17, %v10690_v7  ;;  %v5746_v26 = vadd.f32 %v5554_v8, %v4594_v22  ;;  %v5549_v24 = vmul.f32 %v5221_v12, %v10720_v63  ;;  %v4596_v30 = vadd.f32 %v4404_v28, %v3316_v62  ;;  %v14505_v53 = vld [vmem:[#allocation616_spill] sm:$0xff] }
 0x630   :  { %v5249_v20 = vpop.permute.xlu0 %5248  ;;  %v4406_v15 = vmul.f32 %v14499_v4, %v10698_v51  ;;  %v3313_v59 = vadd.f32 %v3121_v33, %v2161_v37  ;;  %v3123_v2 = vmul.f32 %v14500_v25, %v10686_v35  ;;  %v3128_v60 = vmul.f32 %v14501_v40, %v10675_v56  ;;  %v14509_v37 = vld [vmem:[#allocation171_spill] sm:$0xff] }
 0x631   :  { %6123 = vst [vmem:[%s13032_s2 + $0x480] sm:$0xff] %v5931_v46  ;;  %v5938_v38 = vadd.f32 %v5746_v26, %v10760_v10  ;;  %v5741_v34 = vadd.f32 %v5549_v24, %v4589_v31  ;;  %v5556_v16 = vmul.f32 %v5249_v20, %v10672_v55  ;;  %v4591_v41 = vadd.f32 %v4399_v11, %v3311_v0  ;;  %v14506_v0 = vld [vmem:[#allocation423_spill] sm:$0xff]  ;;  %v14507_v31 = vld [vmem:[#allocation614_spill] sm:$0xff]  ;;  %v14511_v20 = vld [vmem:[#allocation617_spill] sm:$0xff] }
 0x632   :  { %v5229_v54 = vpop.permute.xlu1 %5228  ;;  %v3318_v13 = vadd.f32 %v3126_v29, %v2166_v27  ;;  %v2163_v44 = vmul.f32 %v14502_v52, %v10679_v3  ;;  %v2168_v57 = vmul.f32 %v14503_v14, %v10681_v18  ;;  %v4401_v48 = vmul.f32 %v14504_v43, %v10646_v6  ;;  %v14508_v24 = vld [vmem:[#allocation167_spill] sm:$0xff]  ;;  %v14510_v27 = vld [vmem:[#allocation418_spill] sm:$0xff] }
 0x633   :  { %6130 = vst [vmem:[%s13032_s2 + $0x4b8] sm:$0xff] %v5938_v38  ;;  %v5933_v21 = vadd.f32 %v5741_v34, %v10745_v42  ;;  %v5748_v5 = vadd.f32 %v5556_v16, %v4596_v30  ;;  %v5551_v61 = vmul.f32 %v5229_v54, %v10731_v58  ;;  %v4408_v45 = vmul.f32 %v14505_v53, %v10711_v19 }
 0x634   :  { %v5257_v28 = vpop.permute.xlu0 %5256  ;;  %v4598_v47 = vadd.f32 %v4406_v15, %v3318_v13  ;;  %v3315_v8 = vadd.f32 %v3123_v2, %v2163_v44  ;;  %v3125_v1 = vmul.f32 %v14506_v0, %v10675_v56  ;;  %v3320_v33 = vadd.f32 %v3128_v60, %v2168_v57  ;;  %v14513_v2 = vld [vmem:[#allocation162_spill] sm:$0xff]  ;;  %v14516_v57 = vld [vmem:[#allocation420_spill] sm:$0xff] }
 0x635   :  { %6125 = vst [vmem:[%s13032_s2 + $0x490] sm:$0x1f] %v5933_v21  ;;  %v5940_v22 = vadd.f32 %v5748_v5, %v10690_v7  ;;  %v5743_v32 = vadd.f32 %v5551_v61, %v4591_v41  ;;  %v5558_v17 = vmul.f32 %v5257_v28, %v10720_v63  ;;  %v4593_v12 = vadd.f32 %v4401_v48, %v3313_v59  ;;  %v14512_v59 = vld [vmem:[#allocation425_spill] sm:$0xff]  ;;  %v14515_v44 = vld [vmem:[#allocation174_spill] sm:$0xff]  ;;  %v14517_v48 = vld [vmem:[#allocation619_spill] sm:$0xff] }
 0x636   :  { %v5237_v62 = vpop.permute.xlu1 %5236  ;;  %v3130_v23 = vmul.f32 %v14507_v31, %v10631_v39  ;;  %v2165_v9 = vmul.f32 %v14508_v24, %v10681_v18  ;;  %v2170_v49 = vmul.f32 %v14509_v37, %v10635_v50  ;;  %v4403_v36 = vmul.f32 %v14510_v27, %v10698_v51  ;;  %v14514_v61 = vld [vmem:[#allocation169_spill] sm:$0xff] }
 0x637   :  { %6132 = vst [vmem:[%s13032_s2 + $0x4c8] sm:$0xff] %v5940_v22  ;;  %v5935_v29 = vadd.f32 %v5743_v32, %v10760_v10  ;;  %v5750_v46 = vadd.f32 %v5558_v17, %v4598_v47  ;;  %v5553_v26 = vmul.f32 %v5237_v62, %v10672_v55  ;;  %v4600_v11 = vadd.f32 %v4408_v45, %v3320_v33 }
 0x638   :  { %v5265_v30 = vpop.permute.xlu0 %5264  ;;  %v4410_v4 = vmul.f32 %v14511_v20, %v10646_v6  ;;  %v3317_v16 = vadd.f32 %v3125_v1, %v2165_v9  ;;  %v3127_v25 = vmul.f32 %v14512_v59, %v10631_v39  ;;  %v3132_v40 = vmul.f32 %v14513_v2, %v10686_v35  ;;  %v14521_v9 = vld [vmem:[#allocation176_spill] sm:$0xff] }
 0x639   :  { %6127 = vst [vmem:[%s13032_s2 + $0x4a0] sm:$0xff] %v5935_v29  ;;  %v5942_v15 = vadd.f32 %v5750_v46, %v10745_v42  ;;  %v5745_v38 = vadd.f32 %v5553_v26, %v4593_v12  ;;  %v5560_v34 = vmul.f32 %v5265_v30, %v10731_v58  ;;  %v4595_v54 = vadd.f32 %v4403_v36, %v3315_v8  ;;  %v14518_v8 = vld [vmem:[#allocation427_spill] sm:$0xff]  ;;  %v14519_v12 = vld [vmem:[#allocation165_spill] sm:$0xff]  ;;  %v14520_v26 = vld [vmem:[#allocation172_spill] sm:$0xff] }
 0x63a   :  { %v5245_v60 = vpop.permute.xlu1 %5244  ;;  %v3322_v41 = vadd.f32 %v3130_v23, %v2170_v49  ;;  %v2167_v52 = vmul.f32 %v14514_v61, %v10635_v50  ;;  %v2172_v14 = vmul.f32 %v14515_v44, %v10679_v3  ;;  %v4405_v43 = vmul.f32 %v14516_v57, %v10711_v19  ;;  %v14522_v49 = vld [vmem:[#allocation422_spill] sm:$0xff]  ;;  %v14523_v30 = vld [vmem:[#allocation620_spill] sm:$0xff] }
 0x63b   :  { %6134 = vst [vmem:[%s13032_s2 + $0x4d8] sm:$0x1f] %v5942_v15  ;;  %v5937_v13 = vadd.f32 %v5745_v38, %v10690_v7  ;;  %v5752_v21 = vadd.f32 %v5560_v34, %v4600_v11  ;;  %v5555_v5 = vmul.f32 %v5245_v60, %v10720_v63  ;;  %v4412_v53 = vmul.f32 %v14517_v48, %v10698_v51 }
 0x63c   :  { %v5273_v45 = vpop.permute.xlu0 %5272  ;;  %v4602_v28 = vadd.f32 %v4410_v4, %v3322_v41  ;;  %v3319_v17 = vadd.f32 %v3127_v25, %v2167_v52  ;;  %v3129_v0 = vmul.f32 %v14518_v8, %v10686_v35  ;;  %v3324_v1 = vadd.f32 %v3132_v40, %v2172_v14  ;;  %v14525_v25 = vld [vmem:[#allocation618_spill] sm:$0xff]  ;;  %v14527_v52 = vld [vmem:[#allocation179_spill] sm:$0xff]  ;;  %v14528_v14 = vld [vmem:[#allocation424_spill] sm:$0xff] }
 0x63d   :  { %6129 = vst [vmem:[%s13032_s2 + $0x4b0] sm:$0xff] %v5937_v13  ;;  %v5944_v47 = vadd.f32 %v5752_v21, %v10760_v10  ;;  %v5747_v22 = vadd.f32 %v5555_v5, %v4595_v54  ;;  %v5562_v32 = vmul.f32 %v5273_v45, %v10672_v55  ;;  %v4597_v62 = vadd.f32 %v4405_v43, %v3317_v16  ;;  %v14524_v16 = vld [vmem:[#allocation429_spill] sm:$0xff]  ;;  %v14526_v5 = vld [vmem:[#allocation175_spill] sm:$0xff] }
 0x63e   :  { %v5253_v33 = vpop.permute.xlu1 %5252  ;;  %v3134_v31 = vmul.f32 %v14519_v12, %v10675_v56  ;;  %v2169_v24 = vmul.f32 %v14520_v26, %v10679_v3  ;;  %v2174_v37 = vmul.f32 %v14521_v9, %v10681_v18  ;;  %v4407_v27 = vmul.f32 %v14522_v49, %v10646_v6  ;;  %v14529_v43 = vld [vmem:[#allocation621_spill] sm:$0xff] }
 0x63f   :  { %6136 = vst [vmem:[%s13032_s2 + $0x4e8] sm:$0xff] %v5944_v47  ;;  %v5939_v23 = vadd.f32 %v5747_v22, %v10745_v42  ;;  %v5754_v29 = vadd.f32 %v5562_v32, %v4602_v28  ;;  %v5557_v46 = vmul.f32 %v5253_v33, %v10731_v58  ;;  %v4604_v36 = vadd.f32 %v4412_v53, %v3324_v1 }
 0x640   :  { %v5281_v11 = vpop.permute.xlu0 %5280  ;;  %v4414_v20 = vmul.f32 %v14523_v30, %v10711_v19  ;;  %v3321_v34 = vadd.f32 %v3129_v0, %v2169_v24  ;;  %v3131_v59 = vmul.f32 %v14524_v16, %v10675_v56  ;;  %v3136_v2 = vmul.f32 %v14525_v25, %v10631_v39  ;;  %v14533_v24 = vld [vmem:[#allocation182_spill] sm:$0xff] }
 0x641   :  { %6131 = vst [vmem:[%s13032_s2 + $0x4c0] sm:$0x1f] %v5939_v23  ;;  %v5946_v4 = vadd.f32 %v5754_v29, %v10690_v7  ;;  %v5749_v15 = vadd.f32 %v5557_v46, %v4597_v62  ;;  %v5564_v38 = vmul.f32 %v5281_v11, %v10720_v63  ;;  %v4599_v60 = vadd.f32 %v4407_v27, %v3319_v17  ;;  %v14530_v17 = vld [vmem:[#allocation431_spill] sm:$0xff]  ;;  %v14531_v62 = vld [vmem:[#allocation170_spill] sm:$0xff]  ;;  %v14532_v46 = vld [vmem:[#allocation177_spill] sm:$0xff] }
 0x642   :  { %v5261_v40 = vpop.permute.xlu1 %5260  ;;  %v3326_v54 = vadd.f32 %v3134_v31, %v2174_v37  ;;  %v2171_v61 = vmul.f32 %v14526_v5, %v10681_v18  ;;  %v2176_v44 = vmul.f32 %v14527_v52, %v10635_v50  ;;  %v4409_v57 = vmul.f32 %v14528_v14, %v10698_v51  ;;  %v14534_v37 = vld [vmem:[#allocation426_spill] sm:$0xff]  ;;  %v14535_v11 = vld [vmem:[#allocation623_spill] sm:$0xff] }
 0x643   :  { %6138 = vst [vmem:[%s13032_s2 + $0x4f8] sm:$0xff] %v5946_v4  ;;  %v5941_v41 = vadd.f32 %v5749_v15, %v10760_v10  ;;  %v5756_v13 = vadd.f32 %v5564_v38, %v4604_v36  ;;  %v5559_v21 = vmul.f32 %v5261_v40, %v10672_v55  ;;  %v4416_v48 = vmul.f32 %v14529_v43, %v10646_v6 }
 0x644   :  { %v5289_v53 = vpop.permute.xlu0 %5288  ;;  %v4606_v45 = vadd.f32 %v4414_v20, %v3326_v54  ;;  %v3323_v32 = vadd.f32 %v3131_v59, %v2171_v61  ;;  %v3133_v8 = vmul.f32 %v14530_v17, %v10631_v39  ;;  %v3328_v0 = vadd.f32 %v3136_v2, %v2176_v44  ;;  %v14537_v59 = vld [vmem:[#allocation173_spill] sm:$0xff]  ;;  %v14539_v61 = vld [vmem:[#allocation184_spill] sm:$0xff] }
 0x645   :  { %6133 = vst [vmem:[%s13032_s2 + $0x4d0] sm:$0xff] %v5941_v41  ;;  %v5948_v28 = vadd.f32 %v5756_v13, %v10745_v42  ;;  %v5751_v47 = vadd.f32 %v5559_v21, %v4599_v60  ;;  %v5566_v22 = vmul.f32 %v5289_v53, %v10731_v58  ;;  %v4601_v33 = vadd.f32 %v4409_v57, %v3321_v34  ;;  %v14536_v34 = vld [vmem:[#allocation433_spill] sm:$0xff]  ;;  %v14538_v21 = vld [vmem:[#allocation180_spill] sm:$0xff] }
 0x646   :  { %v5269_v1 = vpop.permute.xlu1 %5268  ;;  %v3138_v12 = vmul.f32 %v14531_v62, %v10686_v35  ;;  %v2173_v26 = vmul.f32 %v14532_v46, %v10635_v50  ;;  %v2178_v9 = vmul.f32 %v14533_v24, %v10679_v3  ;;  %v4411_v49 = vmul.f32 %v14534_v37, %v10711_v19  ;;  %v14540_v44 = vld [vmem:[#allocation428_spill] sm:$0xff] }
 0x647   :  { %6140 = vst [vmem:[%s13032_s2 + $0x508] sm:$0x1f] %v5948_v28  ;;  %v5943_v31 = vadd.f32 %v5751_v47, %v10690_v7  ;;  %v5758_v23 = vadd.f32 %v5566_v22, %v4606_v45  ;;  %v5561_v29 = vmul.f32 %v5269_v1, %v10720_v63  ;;  %v4608_v27 = vadd.f32 %v4416_v48, %v3328_v0  ;;  %v14541_v57 = vld [vmem:[#allocation624_spill] sm:$0xff] }
 0x648   :  { %v5297_v36 = vpop.permute.xlu0 %5296  ;;  %v4418_v30 = vmul.f32 %v14535_v11, %v10698_v51  ;;  %v3325_v38 = vadd.f32 %v3133_v8, %v2173_v26  ;;  %v3135_v16 = vmul.f32 %v14536_v34, %v10686_v35  ;;  %v3140_v25 = vmul.f32 %v14537_v59, %v10675_v56  ;;  %v14545_v26 = vld [vmem:[#allocation187_spill] sm:$0xff] }
 0x649   :  { %6135 = vst [vmem:[%s13032_s2 + $0x4e0] sm:$0xff] %v5943_v31  ;;  %v5950_v20 = vadd.f32 %v5758_v23, %v10760_v10  ;;  %v5753_v4 = vadd.f32 %v5561_v29, %v4601_v33  ;;  %v5568_v15 = vmul.f32 %v5297_v36, %v10672_v55  ;;  %v4603_v40 = vadd.f32 %v4411_v49, %v3323_v32  ;;  %v14542_v32 = vld [vmem:[#allocation435_spill] sm:$0xff]  ;;  %v14543_v33 = vld [vmem:[#allocation622_spill] sm:$0xff]  ;;  %v14547_v36 = vld [vmem:[#allocation625_spill] sm:$0xff] }
 0x64a   :  { %v5277_v2 = vpop.permute.xlu1 %5276  ;;  %v3330_v60 = vadd.f32 %v3138_v12, %v2178_v9  ;;  %v2175_v5 = vmul.f32 %v14538_v21, %v10679_v3  ;;  %v2180_v52 = vmul.f32 %v14539_v61, %v10681_v18  ;;  %v4413_v14 = vmul.f32 %v14540_v44, %v10646_v6  ;;  %v14544_v29 = vld [vmem:[#allocation183_spill] sm:$0xff]  ;;  %v14546_v9 = vld [vmem:[#allocation430_spill] sm:$0xff] }
 0x64b   :  { %6142 = vst [vmem:[%s13032_s2 + $0x518] sm:$0xff] %v5950_v20  ;;  %v5945_v54 = vadd.f32 %v5753_v4, %v10745_v42  ;;  %v5760_v41 = vadd.f32 %v5568_v15, %v4608_v27  ;;  %v5563_v13 = vmul.f32 %v5277_v2, %v10731_v58  ;;  %v4420_v43 = vmul.f32 %v14541_v57, %v10711_v19 }
 0x64c   :  { %v5305_v48 = vpop.permute.xlu0 %5304  ;;  %v4610_v53 = vadd.f32 %v4418_v30, %v3330_v60  ;;  %v3327_v22 = vadd.f32 %v3135_v16, %v2175_v5  ;;  %v3137_v17 = vmul.f32 %v14542_v32, %v10675_v56  ;;  %v3332_v8 = vadd.f32 %v3140_v25, %v2180_v52  ;;  %v14549_v16 = vld [vmem:[#allocation178_spill] sm:$0xff]  ;;  %v14552_v52 = vld [vmem:[#allocation432_spill] sm:$0xff] }
 0x64d   :  { %6137 = vst [vmem:[%s13032_s2 + $0x4f0] sm:$0x1f] %v5945_v54  ;;  %v5952_v45 = vadd.f32 %v5760_v41, %v10690_v7  ;;  %v5755_v28 = vadd.f32 %v5563_v13, %v4603_v40  ;;  %v5570_v47 = vmul.f32 %v5305_v48, %v10720_v63  ;;  %v4605_v1 = vadd.f32 %v4413_v14, %v3325_v38  ;;  %v14548_v38 = vld [vmem:[#allocation437_spill] sm:$0xff]  ;;  %v14551_v5 = vld [vmem:[#allocation190_spill] sm:$0xff]  ;;  %v14553_v14 = vld [vmem:[#allocation627_spill] sm:$0xff] }
 0x64e   :  { %v5285_v0 = vpop.permute.xlu1 %5284  ;;  %v3142_v62 = vmul.f32 %v14543_v33, %v10631_v39  ;;  %v2177_v46 = vmul.f32 %v14544_v29, %v10681_v18  ;;  %v2182_v24 = vmul.f32 %v14545_v26, %v10635_v50  ;;  %v4415_v37 = vmul.f32 %v14546_v9, %v10698_v51  ;;  %v14550_v13 = vld [vmem:[#allocation185_spill] sm:$0xff] }
 0x64f   :  { %6144 = vst [vmem:[%s13032_s2 + $0x528] sm:$0xff] %v5952_v45  ;;  %v5947_v12 = vadd.f32 %v5755_v28, %v10760_v10  ;;  %v5762_v31 = vadd.f32 %v5570_v47, %v4610_v53  ;;  %v5565_v23 = vmul.f32 %v5285_v0, %v10672_v55  ;;  %v4612_v49 = vadd.f32 %v4420_v43, %v3332_v8 }
 0x650   :  { %v5313_v27 = vpop.permute.xlu0 %5312  ;;  %v4422_v11 = vmul.f32 %v14547_v36, %v10646_v6  ;;  %v3329_v15 = vadd.f32 %v3137_v17, %v2177_v46  ;;  %v3139_v34 = vmul.f32 %v14548_v38, %v10631_v39  ;;  %v3144_v59 = vmul.f32 %v14549_v16, %v10686_v35  ;;  %v14557_v46 = vld [vmem:[#allocation192_spill] sm:$0xff] }
 0x651   :  { %6139 = vst [vmem:[%s13032_s2 + $0x500] sm:$0xff] %v5947_v12  ;;  %v5954_v30 = vadd.f32 %v5762_v31, %v10745_v42  ;;  %v5757_v20 = vadd.f32 %v5565_v23, %v4605_v1  ;;  %v5572_v4 = vmul.f32 %v5313_v27, %v10731_v58  ;;  %v4607_v2 = vadd.f32 %v4415_v37, %v3327_v22  ;;  %v14554_v22 = vld [vmem:[#allocation439_spill] sm:$0xff]  ;;  %v14555_v1 = vld [vmem:[#allocation181_spill] sm:$0xff]  ;;  %v14556_v23 = vld [vmem:[#allocation188_spill] sm:$0xff] }
 0x652   :  { %v5293_v25 = vpop.permute.xlu1 %5292  ;;  %v3334_v40 = vadd.f32 %v3142_v62, %v2182_v24  ;;  %v2179_v21 = vmul.f32 %v14550_v13, %v10635_v50  ;;  %v2184_v61 = vmul.f32 %v14551_v5, %v10679_v3  ;;  %v4417_v44 = vmul.f32 %v14552_v52, %v10711_v19  ;;  %v14558_v24 = vld [vmem:[#allocation434_spill] sm:$0xff]  ;;  %v14559_v27 = vld [vmem:[#allocation628_spill] sm:$0xff] }
 0x653   :  { %6146 = vst [vmem:[%s13032_s2 + $0x538] sm:$0x1f] %v5954_v30  ;;  %v5949_v60 = vadd.f32 %v5757_v20, %v10690_v7  ;;  %v5764_v54 = vadd.f32 %v5572_v4, %v4612_v49  ;;  %v5567_v41 = vmul.f32 %v5293_v25, %v10720_v63  ;;  %v4424_v57 = vmul.f32 %v14553_v14, %v10698_v51 }
 0x654   :  { %v5321_v43 = vpop.permute.xlu0 %5320  ;;  %v4614_v48 = vadd.f32 %v4422_v11, %v3334_v40  ;;  %v3331_v47 = vadd.f32 %v3139_v34, %v2179_v21  ;;  %v3141_v32 = vmul.f32 %v14554_v22, %v10686_v35  ;;  %v3336_v17 = vadd.f32 %v3144_v59, %v2184_v61  ;;  %v14561_v34 = vld [vmem:[#allocation626_spill] sm:$0xff]  ;;  %v14563_v21 = vld [vmem:[#allocation195_spill] sm:$0xff]  ;;  %v14564_v61 = vld [vmem:[#allocation436_spill] sm:$0xff] }
 0x655   :  { %6141 = vst [vmem:[%s13032_s2 + $0x510] sm:$0xff] %v5949_v60  ;;  %v5956_v53 = vadd.f32 %v5764_v54, %v10760_v10  ;;  %v5759_v45 = vadd.f32 %v5567_v41, %v4607_v2  ;;  %v5574_v28 = vmul.f32 %v5321_v43, %v10672_v55  ;;  %v4609_v0 = vadd.f32 %v4417_v44, %v3329_v15  ;;  %v14560_v15 = vld [vmem:[#allocation441_spill] sm:$0xff]  ;;  %v14562_v41 = vld [vmem:[#allocation191_spill] sm:$0xff] }
 0x656   :  { %v5301_v8 = vpop.permute.xlu1 %5300  ;;  %v3146_v33 = vmul.f32 %v14555_v1, %v10675_v56  ;;  %v2181_v29 = vmul.f32 %v14556_v23, %v10679_v3  ;;  %v2186_v26 = vmul.f32 %v14557_v46, %v10681_v18  ;;  %v4419_v9 = vmul.f32 %v14558_v24, %v10646_v6  ;;  %v14565_v44 = vld [vmem:[#allocation629_spill] sm:$0xff] }
 0x657   :  { %6148 = vst [vmem:[%s13032_s2 + $0x548] sm:$0xff] %v5956_v53  ;;  %v5951_v62 = vadd.f32 %v5759_v45, %v10745_v42  ;;  %v5766_v12 = vadd.f32 %v5574_v28, %v4614_v48  ;;  %v5569_v31 = vmul.f32 %v5301_v8, %v10731_v58  ;;  %v4616_v37 = vadd.f32 %v4424_v57, %v3336_v17 }
 0x658   :  { %v5329_v49 = vpop.permute.xlu0 %5328  ;;  %v4426_v36 = vmul.f32 %v14559_v27, %v10711_v19  ;;  %v3333_v4 = vadd.f32 %v3141_v32, %v2181_v29  ;;  %v3143_v38 = vmul.f32 %v14560_v15, %v10675_v56  ;;  %v3148_v16 = vmul.f32 %v14561_v34, %v10631_v39  ;;  %v14569_v29 = vld [vmem:[#allocation198_spill] sm:$0xff] }
 0x659   :  { %6143 = vst [vmem:[%s13032_s2 + $0x520] sm:$0x1f] %v5951_v62  ;;  %v5958_v11 = vadd.f32 %v5766_v12, %v10690_v7  ;;  %v5761_v30 = vadd.f32 %v5569_v31, %v4609_v0  ;;  %v5576_v20 = vmul.f32 %v5329_v49, %v10720_v63  ;;  %v4611_v25 = vadd.f32 %v4419_v9, %v3331_v47  ;;  %v14566_v47 = vld [vmem:[#allocation443_spill] sm:$0xff]  ;;  %v14567_v0 = vld [vmem:[#allocation186_spill] sm:$0xff]  ;;  %v14568_v31 = vld [vmem:[#allocation193_spill] sm:$0xff] }
 0x65a   :  { %v5309_v59 = vpop.permute.xlu1 %5308  ;;  %v3338_v2 = vadd.f32 %v3146_v33, %v2186_v26  ;;  %v2183_v13 = vmul.f32 %v14562_v41, %v10681_v18  ;;  %v2188_v5 = vmul.f32 %v14563_v21, %v10635_v50  ;;  %v4421_v52 = vmul.f32 %v14564_v61, %v10698_v51  ;;  %v14570_v26 = vld [vmem:[#allocation438_spill] sm:$0xff]  ;;  %v14571_v49 = vld [vmem:[#allocation631_spill] sm:$0xff] }
 0x65b   :  { %6150 = vst [vmem:[%s13032_s2 + $0x558] sm:$0xff] %v5958_v11  ;;  %v5953_v40 = vadd.f32 %v5761_v30, %v10760_v10  ;;  %v5768_v60 = vadd.f32 %v5576_v20, %v4616_v37  ;;  %v5571_v54 = vmul.f32 %v5309_v59, %v10672_v55  ;;  %v4428_v14 = vmul.f32 %v14565_v44, %v10646_v6 }
 0x65c   :  { %v5337_v57 = vpop.permute.xlu0 %5336  ;;  %v4618_v43 = vadd.f32 %v4426_v36, %v3338_v2  ;;  %v3335_v28 = vadd.f32 %v3143_v38, %v2183_v13  ;;  %v3145_v22 = vmul.f32 %v14566_v47, %v10631_v39  ;;  %v3340_v32 = vadd.f32 %v3148_v16, %v2188_v5  ;;  %v14573_v38 = vld [vmem:[#allocation189_spill] sm:$0xff]  ;;  %v14575_v13 = vld [vmem:[#allocation200_spill] sm:$0xff] }
 0x65d   :  { %6145 = vst [vmem:[%s13032_s2 + $0x530] sm:$0xff] %v5953_v40  ;;  %v5960_v48 = vadd.f32 %v5768_v60, %v10745_v42  ;;  %v5763_v53 = vadd.f32 %v5571_v54, %v4611_v25  ;;  %v5578_v45 = vmul.f32 %v5337_v57, %v10731_v58  ;;  %v4613_v8 = vadd.f32 %v4421_v52, %v3333_v4  ;;  %v14572_v4 = vld [vmem:[#allocation445_spill] sm:$0xff]  ;;  %v14574_v54 = vld [vmem:[#allocation196_spill] sm:$0xff] }
 0x65e   :  { %v5317_v17 = vpop.permute.xlu1 %5316  ;;  %v3150_v1 = vmul.f32 %v14567_v0, %v10686_v35  ;;  %v2185_v23 = vmul.f32 %v14568_v31, %v10635_v50  ;;  %v2190_v46 = vmul.f32 %v14569_v29, %v10679_v3  ;;  %v4423_v24 = vmul.f32 %v14570_v26, %v10711_v19  ;;  %v14576_v5 = vld [vmem:[#allocation440_spill] sm:$0xff] }
 0x65f   :  { %6152 = vst [vmem:[%s13032_s2 + $0x568] sm:$0x1f] %v5960_v48  ;;  %v5955_v33 = vadd.f32 %v5763_v53, %v10690_v7  ;;  %v5770_v62 = vadd.f32 %v5578_v45, %v4618_v43  ;;  %v5573_v12 = vmul.f32 %v5317_v17, %v10720_v63  ;;  %v4620_v9 = vadd.f32 %v4428_v14, %v3340_v32  ;;  %v14577_v52 = vld [vmem:[#allocation632_spill] sm:$0xff] }
 0x660   :  { %v5345_v37 = vpop.permute.xlu0 %5344  ;;  %v4430_v27 = vmul.f32 %v14571_v49, %v10698_v51  ;;  %v3337_v20 = vadd.f32 %v3145_v22, %v2185_v23  ;;  %v3147_v15 = vmul.f32 %v14572_v4, %v10686_v35  ;;  %v3152_v34 = vmul.f32 %v14573_v38, %v10675_v56  ;;  %v14581_v23 = vld [vmem:[#allocation203_spill] sm:$0xff] }
 0x661   :  { %6147 = vst [vmem:[%s13032_s2 + $0x540] sm:$0xff] %v5955_v33  ;;  %v5962_v36 = vadd.f32 %v5770_v62, %v10760_v10  ;;  %v5765_v11 = vadd.f32 %v5573_v12, %v4613_v8  ;;  %v5580_v30 = vmul.f32 %v5345_v37, %v10672_v55  ;;  %v4615_v59 = vadd.f32 %v4423_v24, %v3335_v28  ;;  %v14578_v28 = vld [vmem:[#allocation447_spill] sm:$0xff]  ;;  %v14579_v8 = vld [vmem:[#allocation630_spill] sm:$0xff]  ;;  %v14583_v37 = vld [vmem:[#allocation633_spill] sm:$0xff] }
 0x662   :  { %v5325_v16 = vpop.permute.xlu1 %5324  ;;  %v3342_v25 = vadd.f32 %v3150_v1, %v2190_v46  ;;  %v2187_v41 = vmul.f32 %v14574_v54, %v10679_v3  ;;  %v2192_v21 = vmul.f32 %v14575_v13, %v10681_v18  ;;  %v4425_v61 = vmul.f32 %v14576_v5, %v10646_v6  ;;  %v14580_v12 = vld [vmem:[#allocation199_spill] sm:$0xff]  ;;  %v14582_v46 = vld [vmem:[#allocation442_spill] sm:$0xff] }
 0x663   :  { %6154 = vst [vmem:[%s13032_s2 + $0x578] sm:$0xff] %v5962_v36  ;;  %v5957_v2 = vadd.f32 %v5765_v11, %v10745_v42  ;;  %v5772_v40 = vadd.f32 %v5580_v30, %v4620_v9  ;;  %v5575_v60 = vmul.f32 %v5325_v16, %v10731_v58  ;;  %v4432_v44 = vmul.f32 %v14577_v52, %v10711_v19 }
 0x664   :  { %v5353_v14 = vpop.permute.xlu0 %5352  ;;  %v4622_v57 = vadd.f32 %v4430_v27, %v3342_v25  ;;  %v3339_v45 = vadd.f32 %v3147_v15, %v2187_v41  ;;  %v3149_v47 = vmul.f32 %v14578_v28, %v10675_v56  ;;  %v3344_v22 = vadd.f32 %v3152_v34, %v2192_v21  ;;  %v14585_v15 = vld [vmem:[#allocation194_spill] sm:$0xff]  ;;  %v14588_v21 = vld [vmem:[#allocation444_spill] sm:$0xff] }
 0x665   :  { %6149 = vst [vmem:[%s13032_s2 + $0x550] sm:$0x1f] %v5957_v2  ;;  %v5964_v43 = vadd.f32 %v5772_v40, %v10690_v7  ;;  %v5767_v48 = vadd.f32 %v5575_v60, %v4615_v59  ;;  %v5582_v53 = vmul.f32 %v5353_v14, %v10720_v63  ;;  %v4617_v17 = vadd.f32 %v4425_v61, %v3337_v20  ;;  %v14584_v20 = vld [vmem:[#allocation449_spill] sm:$0xff]  ;;  %v14587_v41 = vld [vmem:[#allocation206_spill] sm:$0xff]  ;;  %v14589_v61 = vld [vmem:[#allocation635_spill] sm:$0xff] }
 0x666   :  { %v5333_v32 = vpop.permute.xlu1 %5332  ;;  %v3154_v0 = vmul.f32 %v14579_v8, %v10631_v39  ;;  %v2189_v31 = vmul.f32 %v14580_v12, %v10681_v18  ;;  %v2194_v29 = vmul.f32 %v14581_v23, %v10635_v50  ;;  %v4427_v26 = vmul.f32 %v14582_v46, %v10698_v51  ;;  %v14586_v60 = vld [vmem:[#allocation201_spill] sm:$0xff] }
 0x667   :  { %6156 = vst [vmem:[%s13032_s2 + $0x588] sm:$0xff] %v5964_v43  ;;  %v5959_v1 = vadd.f32 %v5767_v48, %v10760_v10  ;;  %v5774_v33 = vadd.f32 %v5582_v53, %v4622_v57  ;;  %v5577_v62 = vmul.f32 %v5333_v32, %v10672_v55  ;;  %v4624_v24 = vadd.f32 %v4432_v44, %v3344_v22 }
 0x668   :  { %v5361_v9 = vpop.permute.xlu0 %5360  ;;  %v4434_v49 = vmul.f32 %v14583_v37, %v10646_v6  ;;  %v3341_v30 = vadd.f32 %v3149_v47, %v2189_v31  ;;  %v3151_v4 = vmul.f32 %v14584_v20, %v10631_v39  ;;  %v3156_v38 = vmul.f32 %v14585_v15, %v10686_v35  ;;  %v14593_v31 = vld [vmem:[#allocation208_spill] sm:$0xff] }
 0x669   :  { %6151 = vst [vmem:[%s13032_s2 + $0x560] sm:$0xff] %v5959_v1  ;;  %v5966_v27 = vadd.f32 %v5774_v33, %v10745_v42  ;;  %v5769_v36 = vadd.f32 %v5577_v62, %v4617_v17  ;;  %v5584_v11 = vmul.f32 %v5361_v9, %v10731_v58  ;;  %v4619_v16 = vadd.f32 %v4427_v26, %v3339_v45  ;;  %v14590_v45 = vld [vmem:[#allocation451_spill] sm:$0xff]  ;;  %v14591_v17 = vld [vmem:[#allocation197_spill] sm:$0xff]  ;;  %v14592_v62 = vld [vmem:[#allocation204_spill] sm:$0xff] }
 0x66a   :  { %v5341_v34 = vpop.permute.xlu1 %5340  ;;  %v3346_v59 = vadd.f32 %v3154_v0, %v2194_v29  ;;  %v2191_v54 = vmul.f32 %v14586_v60, %v10635_v50  ;;  %v2196_v13 = vmul.f32 %v14587_v41, %v10679_v3  ;;  %v4429_v5 = vmul.f32 %v14588_v21, %v10711_v19  ;;  %v14594_v29 = vld [vmem:[#allocation446_spill] sm:$0xff]  ;;  %v14595_v9 = vld [vmem:[#allocation3_spill] sm:$0xff] }
 0x66b   :  { %6158 = vst [vmem:[%s13032_s2 + $0x598] sm:$0x1f] %v5966_v27  ;;  %v5961_v25 = vadd.f32 %v5769_v36, %v10690_v7  ;;  %v5776_v2 = vadd.f32 %v5584_v11, %v4624_v24  ;;  %v5579_v40 = vmul.f32 %v5341_v34, %v10720_v63  ;;  %v4436_v52 = vmul.f32 %v14589_v61, %v10698_v51 }
 0x66c   :  { %v5369_v44 = vpop.permute.xlu0 %5368  ;;  %v4626_v14 = vadd.f32 %v4434_v49, %v3346_v59  ;;  %v3343_v53 = vadd.f32 %v3151_v4, %v2191_v54  ;;  %v3153_v28 = vmul.f32 %v14590_v45, %v10686_v35  ;;  %v3348_v47 = vadd.f32 %v3156_v38, %v2196_v13  ;;  %v14597_v4 = vld [vmem:[#allocation634_spill] sm:$0xff]  ;;  %v14599_v54 = vld [vmem:[#allocation211_spill] sm:$0xff]  ;;  %v14600_v13 = vld [vmem:[#allocation448_spill] sm:$0xff] }
 0x66d   :  { %6153 = vst [vmem:[%s13032_s2 + $0x570] sm:$0xff] %v5961_v25  ;;  %v5968_v57 = vadd.f32 %v5776_v2, %v10760_v10  ;;  %v5771_v43 = vadd.f32 %v5579_v40, %v4619_v16  ;;  %v5586_v48 = vmul.f32 %v5369_v44, %v10672_v55  ;;  %v4621_v32 = vadd.f32 %v4429_v5, %v3341_v30  ;;  %v14596_v30 = vld [vmem:[#allocation453_spill] sm:$0xff]  ;;  %v14598_v40 = vld [vmem:[#allocation207_spill] sm:$0xff]  ;;  %v14601_v5 = vld [vmem:[#allocation460_spill] sm:$0xff] }
 0x66e   :  { %v5349_v22 = vpop.permute.xlu1 %5348  ;;  %v3158_v8 = vmul.f32 %v14591_v17, %v10675_v56  ;;  %v2193_v12 = vmul.f32 %v14592_v62, %v10679_v3  ;;  %v2198_v23 = vmul.f32 %v14593_v31, %v10681_v18  ;;  %v4431_v46 = vmul.f32 %v14594_v29, %v10646_v6  ;;  %v14606_v31 = vld [vmem:[#allocation450_spill] sm:$0xff] }
 0x66f   :  { %6160 = vst [vmem:[%s13032_s2 + $0x5a8] sm:$0xff] %v5968_v57  ;;  %v5963_v0 = vadd.f32 %v5771_v43, %v10745_v42  ;;  %v5778_v1 = vadd.f32 %v5586_v48, %v4626_v14  ;;  %v5581_v33 = vmul.f32 %v5349_v22, %v10731_v58  ;;  %v4628_v26 = vadd.f32 %v4436_v52, %v3348_v47 }
 0x670   :  { %v5377_v24 = vpop.permute.xlu0 %5376  ;;  %v4438_v37 = vmul.f32 %v14595_v9, %v10711_v19  ;;  %v3345_v11 = vadd.f32 %v3153_v28, %v2193_v12  ;;  %v3155_v20 = vmul.f32 %v14596_v30, %v10675_v56  ;;  %v3160_v15 = vmul.f32 %v14597_v4, %v10631_v39 }
 0x671   :  { %6155 = vst [vmem:[%s13032_s2 + $0x580] sm:$0x1f] %v5963_v0  ;;  %v5970_v49 = vadd.f32 %v5778_v1, %v10690_v7  ;;  %v5773_v27 = vadd.f32 %v5581_v33, %v4621_v32  ;;  %v5588_v36 = vmul.f32 %v5377_v24, %v10720_v63  ;;  %v4623_v34 = vadd.f32 %v4431_v46, %v3343_v53  ;;  %v14602_v53 = vld [vmem:[#allocation455_spill] sm:$0xff]  ;;  %v14603_v32 = vld [vmem:[#allocation202_spill] sm:$0xff]  ;;  %v14604_v33 = vld [vmem:[#allocation209_spill] sm:$0xff] }
 0x672   :  { %v5357_v38 = vpop.permute.xlu1 %5356  ;;  %v3350_v16 = vadd.f32 %v3158_v8, %v2198_v23  ;;  %v2195_v60 = vmul.f32 %v14598_v40, %v10681_v18  ;;  %v2200_v41 = vmul.f32 %v14599_v54, %v10635_v50  ;;  %v4433_v21 = vmul.f32 %v14600_v13, %v10698_v51 }
 0x673   :  { %6162 = vst [vmem:[%s13032_s2 + $0x5b8] sm:$0xff] %v5970_v49  ;;  %v5965_v59 = vadd.f32 %v5773_v27, %v10760_v10  ;;  %v5780_v25 = vadd.f32 %v5588_v36, %v4628_v26  ;;  %v5583_v2 = vmul.f32 %v5357_v38, %v10672_v55  ;;  %v4440_v61 = vmul.f32 %v14601_v5, %v10646_v6  ;;  %v14607_v26 = vld [vmem:[#allocation459_spill] sm:$0xff]  ;;  %v14608_v27 = vld [vmem:[#allocation457_spill] sm:$0xff]  ;;  %v14611_v5 = vld [vmem:[#allocation458_spill] sm:$0xff] }
 0x674   :  { %v5385_v52 = vpop.permute.xlu0 %5384  ;;  %v4630_v44 = vadd.f32 %v4438_v37, %v3350_v16  ;;  %v3347_v48 = vadd.f32 %v3155_v20, %v2195_v60  ;;  %v3157_v45 = vmul.f32 %v14602_v53, %v10631_v39  ;;  %v3352_v28 = vadd.f32 %v3160_v15, %v2200_v41  ;;  %v14605_v39 = vld [vmem:[#allocation214_spill] sm:$0xff] }
 0x675   :  { %6157 = vst [vmem:[%s13032_s2 + $0x590] sm:$0xff] %v5965_v59  ;;  %v5972_v14 = vadd.f32 %v5780_v25, %v10745_v42  ;;  %v5775_v57 = vadd.f32 %v5583_v2, %v4623_v34  ;;  %v5590_v43 = vmul.f32 %v5385_v52, %v10731_v58  ;;  %v4625_v22 = vadd.f32 %v4433_v21, %v3345_v11  ;;  %v14609_v34 = vld [vmem:[#allocation212_spill] sm:$0xff] }
 0x676   :  { %v5365_v47 = vpop.permute.xlu1 %5364  ;;  %v3162_v17 = vmul.f32 %v14603_v32, %v10686_v35  ;;  %v2197_v62 = vmul.f32 %v14604_v33, %v10635_v50  ;;  %v2202_v12 = vmul.f32 %v14605_v39, %v10679_v3  ;;  %v4435_v23 = vmul.f32 %v14606_v31, %v10711_v19  ;;  %v14610_v59 = vld [vmem:[#allocation452_spill] sm:$0xff] }
 0x677   :  { %6164 = vst [vmem:[%s13032_s2 + $0x5c8] sm:$0x1f] %v5972_v14  ;;  %v5967_v8 = vadd.f32 %v5775_v57, %v10690_v7  ;;  %v5782_v0 = vadd.f32 %v5590_v43, %v4630_v44  ;;  %v5585_v1 = vmul.f32 %v5365_v47, %v10720_v63  ;;  %v4632_v29 = vadd.f32 %v4440_v61, %v3352_v28  ;;  %v14612_v44 = vld [vmem:[#allocation215_spill] sm:$0xff]  ;;  %v14613_v57 = vld [vmem:[#allocation454_spill] sm:$0xff] }
 0x678   :  { %v5393_v46 = vpop.permute.xlu0 %5392  ;;  %v4442_v24 = vmul.f32 %v14607_v26, %v10698_v51  ;;  %v3349_v49 = vadd.f32 %v3157_v45, %v2197_v62  ;;  %v3159_v36 = vmul.f32 %v14608_v27, %v10686_v35  ;;  %v4627_v30 = vadd.f32 %v4435_v23, %v3347_v48 }
 0x679   :  { %6159 = vst [vmem:[%s13032_s2 + $0x5a0] sm:$0xff] %v5967_v8  ;;  %v5974_v9 = vadd.f32 %v5782_v0, %v10760_v10  ;;  %v5777_v37 = vadd.f32 %v5585_v1, %v4625_v22  ;;  %v5592_v50 = vmul.f32 %v5393_v46, %v10672_v55  ;;  %v3354_v20 = vadd.f32 %v3162_v17, %v2202_v12 }
 0x67a   :  { %v5373_v11 = vpop.permute.xlu1 %5372  ;;  %v2199_v16 = vmul.f32 %v14609_v34, %v10679_v3  ;;  %v4437_v25 = vmul.f32 %v14610_v59, %v10646_v6  ;;  %v3161_v3 = vmul.f32 %v14611_v5, %v10675_v56  ;;  %v2201_v14 = vmul.f32 %v14612_v44, %v10681_v18 }
 0x67b   :  { %6166 = vst [vmem:[%s13032_s2 + $0x5d8] sm:$0xff] %v5974_v9  ;;  %v5969_v4 = vadd.f32 %v5777_v37, %v10745_v42  ;;  %v5784_v15 = vadd.f32 %v5592_v50, %v4632_v29  ;;  %v5587_v38 = vmul.f32 %v5373_v11, %v10731_v58  ;;  %v4634_v35 = vadd.f32 %v4442_v24, %v3354_v20 }
 0x67c   :  { %v5401_v2 = vpop.permute.xlu0 %5400  ;;  %v3351_v41 = vadd.f32 %v3159_v36, %v2199_v16  ;;  %v4629_v21 = vadd.f32 %v4437_v25, %v3349_v49  ;;  %v4439_v43 = vmul.f32 %v14613_v57, %v10698_v51  ;;  %v3353_v45 = vadd.f32 %v3161_v3, %v2201_v14  ;;  %v14614_v51 = vld [vmem:[#allocation456_spill] sm:$0xff] }
 0x67d   :  { %6161 = vst [vmem:[%s13032_s2 + $0x5b0] sm:$0x1f] %v5969_v4  ;;  %v5976_v40 = vadd.f32 %v5784_v15, %v10690_v7  ;;  %v5779_v60 = vadd.f32 %v5587_v38, %v4627_v30  ;;  %v5594_v54 = vmul.f32 %v5401_v2, %v10720_v63  ;;  %v4441_v47 = vmul.f32 %v14614_v51, %v10711_v19 }
 0x67e   :  { %v5381_v13 = vpop.permute.xlu1 %5380  ;;  %v4631_v28 = vadd.f32 %v4439_v43, %v3351_v41 }
 0x67f   :  { %6168 = vst [vmem:[%s13032_s2 + $0x5e8] sm:$0xff] %v5976_v40  ;;  %v5971_v6 = vadd.f32 %v5779_v60, %v10760_v10  ;;  %v5786_v61 = vadd.f32 %v5594_v54, %v4634_v35  ;;  %v5589_v52 = vmul.f32 %v5381_v13, %v10672_v55  ;;  %v4633_v8 = vadd.f32 %v4441_v47, %v3353_v45 }
 0x681   :  { %6163 = vst [vmem:[%s13032_s2 + $0x5c0] sm:$0xff] %v5971_v6  ;;  %v5978_v56 = vadd.f32 %v5786_v61, %v10745_v42  ;;  %v5781_v48 = vadd.f32 %v5589_v52, %v4629_v21 }
 0x682   :  { %v5389_v53 = vpop.permute.xlu1 %5388 }
 0x683   :  { %6170 = vst [vmem:[%s13032_s2 + $0x5f8] sm:$0x1f] %v5978_v56  ;;  %v5973_v55 = vadd.f32 %v5781_v48, %v10690_v7  ;;  %v5591_v18 = vmul.f32 %v5389_v53, %v10720_v63 }
 0x685   :  { %6165 = vst [vmem:[%s13032_s2 + $0x5d0] sm:$0xff] %v5973_v55  ;;  %v5783_v22 = vadd.f32 %v5591_v18, %v4631_v28 }
 0x686   :  { %v5397_v32 = vpop.permute.xlu1 %5396 }
 0x687   :  { %v5975_v17 = vadd.f32 %v5783_v22, %v10745_v42  ;;  %v5593_v0 = vmul.f32 %v5397_v32, %v10731_v58 }
 0x689   :  { %6167 = vst [vmem:[%s13032_s2 + $0x5e0] sm:$0x1f] %v5975_v17  ;;  %v5785_v7 = vadd.f32 %v5593_v0, %v4633_v8 }
 0x68b   :  { %v5977_v63 = vadd.f32 %v5785_v7, %v10760_v10 }
 0x68d   :  { %6169 = vst [vmem:[%s13032_s2 + $0x5f0] sm:$0xff] %v5977_v63 }

</bundles_post_ra>
